<compile_context>
chip_gen: v5e
topology: v5e:2x2
jax: 0.10.0
libtpu: 0.0.40
codegen_flags: <defaults>
</compile_context>

<pallas_src>
import functools

import jax
import jax.numpy as jnp
import numpy as np
from jax.experimental import pallas as pl
from jax.experimental.pallas import tpu as pltpu


# ----------------------------- Pallas kernel --------------------------------
def hebbian_fwd_kernel(x_ref, w_ref, b_ref, p_ref, wx_ref, a_ref, slab_ref,
                       *, C, fh, fw, W, Hp, Wp, Pp, zero_fill):
    # x_ref   : [C, H*W]   one image, channel planes flattened row-major
    # w_ref   : [F, D]     1x1-conv weight
    # b_ref   : [F, 1]     bias
    # p_ref   : [D, Q]     centered+normalized patches (Q = Hp*Wp)
    # wx_ref  : [F, Q]
    # a_ref   : [F, Q]
    # slab_ref: [D, Pp]    scratch, Pp = (Hp-1)*W + Wp (full-W-stride positions)
    fhw = fh * fw

    # ---- in-kernel im2col: row k=(c,i,j) is one contiguous lane slice ----
    for c in range(C):
        for i in range(fh):
            for j in range(fw):
                k = c * fhw + i * fw + j
                slab_ref[k, :] = x_ref[c, pl.ds(i * W + j, Pp)]
    raw = slab_ref[...]                                              # [D, Pp]

    # ---- compact valid positions: lane r*W+col  ->  lane r*Wp+col ----
    pc = jnp.concatenate([raw[:, r * W:r * W + Wp] for r in range(Hp)],
                         axis=1)                                     # [D, Q]

    # ---- center: subtract mean over patch dimension (torch dim=1) ----
    mean = jnp.mean(pc, axis=0, keepdims=True)                       # [1, Q]
    cen = pc - mean

    # ---- normalize_patches: L2 over patch dim with zero-norm guard ----
    # reciprocal only on the [1, Q] row, then a single broadcast multiply
    # (avoids a full [D, Q] divide on the VALU).
    ss = jnp.sum(cen * cen, axis=0, keepdims=True)                   # [1, Q]
    norm = jnp.sqrt(ss)
    is_zero = (norm <= 1e-4).astype(jnp.float32)
    inv = 1.0 / (norm + is_zero)                                     # [1, Q]
    p = (cen + is_zero * zero_fill) * inv                            # [D, Q]
    p_ref[...] = p

    # ---- 1x1 conv == matmul over patch dimension (MXU) ----
    wx = jnp.dot(w_ref[...], p,
                 precision=jax.lax.Precision.HIGHEST,
                 preferred_element_type=jnp.float32)                 # [F, Q]
    wx_ref[...] = wx

    # ---- a = relu(Wx_ - bias) ----
    a_ref[...] = jnp.maximum(wx - b_ref[...], 0.0)


# ------------------------------ JAX wrapper ----------------------------------
def hebbian_forward(x, weight, bias, filter_size):
    """Returns (patches, Wx_, a), all NCHW, matching HebbianLayer.forward."""
    fh, fw = filter_size
    N, C, H, W = x.shape
    Hp, Wp = H - fh + 1, W - fw + 1
    Q = Hp * Wp                       # valid conv positions per image
    D = C * fh * fw                   # patch dimension
    F = weight.shape[0]               # number of filters
    Pp = (Hp - 1) * W + Wp            # full-image-stride position count

    # Free (contiguous) reshapes only -- no HBM transpose passes.
    x3 = x.reshape(N, C, H * W).astype(jnp.float32)
    w2 = weight.reshape(F, D).astype(jnp.float32)
    b2 = bias.reshape(F, 1).astype(jnp.float32)

    zero_fill = float(1.0 / np.sqrt(Q))   # 1/sqrt(prod(norm.size()[2:]))
    kernel = functools.partial(hebbian_fwd_kernel, C=C, fh=fh, fw=fw, W=W,
                               Hp=Hp, Wp=Wp, Pp=Pp, zero_fill=zero_fill)

    # VMEM budget sized from the actual (8,128)-padded buffers, capped well
    # under v7x's 64 MiB physical VMEM.
    def _pad(v, m):
        return ((v + m - 1) // m) * m

    def _blk(sub, lane):
        return 4 * _pad(sub, 8) * _pad(lane, 128)

    io_bytes = (_blk(C, H * W) + _blk(F, D) + _blk(F, 1)
                + _blk(D, Q) + 2 * _blk(F, Q))
    slab_bytes = _blk(D, Pp)
    vmem_limit = int(min(max(2 * io_bytes + 6 * slab_bytes + (8 << 20),
                             16 << 20),
                         48 << 20))

    grid_spec = pltpu.PrefetchScalarGridSpec(
        num_scalar_prefetch=0,
        grid=(N,),                                     # >= 2 -> both v7x TCs used
        in_specs=[
            pl.BlockSpec((None, C, H * W), lambda n: (n, 0, 0)),   # image n
            pl.BlockSpec((F, D), lambda n: (0, 0)),                # weight
            pl.BlockSpec((F, 1), lambda n: (0, 0)),                # bias
        ],
        out_specs=[
            pl.BlockSpec((None, D, Q), lambda n: (n, 0, 0)),
            pl.BlockSpec((None, F, Q), lambda n: (n, 0, 0)),
            pl.BlockSpec((None, F, Q), lambda n: (n, 0, 0)),
        ],
        scratch_shapes=[pltpu.VMEM((D, Pp), jnp.float32)],
    )

    patches_o, wx_o, a_o = pl.pallas_call(
        kernel,
        out_shape=(
            jax.ShapeDtypeStruct((N, D, Q), jnp.float32),
            jax.ShapeDtypeStruct((N, F, Q), jnp.float32),
            jax.ShapeDtypeStruct((N, F, Q), jnp.float32),
        ),
        grid_spec=grid_spec,
        compiler_params=pltpu.CompilerParams(
            dimension_semantics=("parallel",),
            vmem_limit_bytes=vmem_limit),
    )(x3, w2, b2)

    # Outputs are already channel-major -- reshapes below are metadata-only.
    return (patches_o.reshape(N, D, Hp, Wp),
            wx_o.reshape(N, F, Hp, Wp),
            a_o.reshape(N, F, Hp, Wp))


# ------------------------- pure-JAX reference check ---------------------------
def im2col_nchw(x, fh, fw):
    """proj_conv with eye(D).view(D, C, fh, fw) weights == patch extraction."""
    N, C, H, W = x.shape
    Hp, Wp = H - fh + 1, W - fw + 1
    cols = []
    for i in range(fh):
        for j in range(fw):
            cols.append(x[:, :, i:i + Hp, j:j + Wp])
    p = jnp.stack(cols, axis=2)               # [N, C, fh*fw, Hp, Wp]
    return p.reshape(N, C * fh * fw, Hp, Wp)  # [N, D, Hp, Wp]


def hebbian_forward_ref(x, weight, bias, filter_size):
    fh, fw = filter_size
    N, C, H, W = x.shape
    Hp, Wp = H - fh + 1, W - fw + 1
    patches = im2col_nchw(x, fh, fw)                               # [N, D, Hp, Wp]
    patches = patches - jnp.mean(patches, axis=1, keepdims=True)
    norm = jnp.sqrt(jnp.sum(patches ** 2, axis=1, keepdims=True))
    is_zero = (norm <= 1e-4).astype(jnp.float32)
    patches = patches + is_zero * (1.0 / np.sqrt(Hp * Wp))
    norm = norm + is_zero
    patches = patches / norm
    F, D = weight.shape[0], weight.reshape(weight.shape[0], -1).shape[1]
    wx = jnp.einsum('ndhw,fd->nfhw', patches, weight.reshape(F, D),
                    precision=jax.lax.Precision.HIGHEST)
    a = jnp.maximum(wx - bias.reshape(1, F, 1, 1), 0.0)
    return patches, wx, a


if __name__ == "__main__":
    # Small, module-consistent shapes.
    N, C, H, W = 2, 4, 16, 16
    filter_size = (7, 7)
    num_filters = 8                             # num_initial_filters
    D = C * filter_size[0] * filter_size[1]     # patch_dimension = 196

    key = jax.random.PRNGKey(0)
    kx, kw = jax.random.split(key)
    x = jax.random.normal(kx, (N, C, H, W), dtype=jnp.float32)

    # Deterministic parameter init, mirroring HebbianLayer.initialize():
    # conv weight ~ Uniform[0,1), then normalize_patches (L2 over dim=1); bias = 0.
    # (Init uses the conv-consistent shape [F, D, 1, 1]; the original code's
    #  prod(filter_size) shape is a latent bug we do not reproduce.)
    w = jax.random.uniform(kw, (num_filters, D), dtype=jnp.float32)
    w_norm = jnp.sqrt(jnp.sum(w ** 2, axis=1, keepdims=True))
    w = w / jnp.maximum(w_norm, 1e-4)
    weight = w.reshape(num_filters, D, 1, 1)
    bias = jnp.zeros((num_filters,), dtype=jnp.float32)

    # TODO(synk): training-side methods (add_neuron / prune / update_weights /
    # update_bias / AHL_update) mutate layer topology at runtime and are not
    # part of forward; whiten / conic_filters / spatial_locality branches are
    # dead under the default config.

    patches, wx, a = jax.block_until_ready(
        hebbian_forward(x, weight, bias, filter_size))

    p_ref, wx_ref, a_ref = hebbian_forward_ref(x, weight, bias, filter_size)
    assert patches.shape == p_ref.shape and wx.shape == wx_ref.shape and a.shape == a_ref.shape
    assert jnp.allclose(patches, p_ref, atol=1e-5, rtol=1e-5)
    assert jnp.allclose(wx, wx_ref, atol=1e-5, rtol=1e-5)
    assert jnp.allclose(a, a_ref, atol=1e-5, rtol=1e-5)

    print("KERNEL_OK")
</pallas_src>

<mosaic_0001>
module attributes {stable_mosaic.version = 11 : i64} {
  func.func @hebbian_fwd_kernel(%arg0: i32, %arg1: memref<1x4x256xf32, #tpu.memory_space<vmem>>, %arg2: memref<8x196xf32, #tpu.memory_space<vmem>>, %arg3: memref<8x1xf32, #tpu.memory_space<vmem>>, %arg4: memref<1x196x100xf32, #tpu.memory_space<vmem>>, %arg5: memref<1x8x100xf32, #tpu.memory_space<vmem>>, %arg6: memref<1x8x100xf32, #tpu.memory_space<vmem>>, %arg7: memref<196x154xf32, #tpu.memory_space<vmem>>) attributes {dimension_semantics = [#tpu.dimension_semantics<parallel>], iteration_bounds = array<i64: 2>, scalar_prefetch = 0 : i64, scratch_operands = 1 : i64, tpu.core_type = #tpu.core_type<tc>, window_params = [{transform_indices = @transform_0, window_bounds = array<i64: 1, 4, 256>}, {pipeline_mode = #tpu.pipeline_mode<synchronous>, transform_indices = @transform_1, window_bounds = array<i64: 8, 196>}, {pipeline_mode = #tpu.pipeline_mode<synchronous>, transform_indices = @transform_2, window_bounds = array<i64: 8, 1>}, {transform_indices = @transform_3, window_bounds = array<i64: 1, 196, 100>}, {transform_indices = @transform_4, window_bounds = array<i64: 1, 8, 100>}, {transform_indices = @transform_5, window_bounds = array<i64: 1, 8, 100>}]} {
    %c0 = arith.constant 0 : index
    %c0_0 = arith.constant 0 : index
    %c0_1 = arith.constant 0 : index
    %0 = vector.load %arg1[%c0, %c0_0, %c0_1] : memref<1x4x256xf32, #tpu.memory_space<vmem>>, vector<1x1x154xf32>
    %1 = vector.shape_cast %0 : vector<1x1x154xf32> to vector<154xf32>
    %c0_2 = arith.constant 0 : index
    %c0_3 = arith.constant 0 : index
    %2 = vector.load %arg7[%c0_2, %c0_3] : memref<196x154xf32, #tpu.memory_space<vmem>>, vector<1x154xf32>
    %3 = vector.shape_cast %2 : vector<1x154xf32> to vector<154xf32>
    %4 = vector.shape_cast %1 : vector<154xf32> to vector<1x154xf32>
    tpu.vector_store %arg7[%c0_2, %c0_3], %4 {strides = array<i32>} : memref<196x154xf32, #tpu.memory_space<vmem>>, vector<1x154xf32>,
    %c0_4 = arith.constant 0 : index
    %c0_5 = arith.constant 0 : index
    %c1 = arith.constant 1 : index
    %5 = vector.load %arg1[%c0_4, %c0_5, %c1] : memref<1x4x256xf32, #tpu.memory_space<vmem>>, vector<1x1x154xf32>
    %6 = vector.shape_cast %5 : vector<1x1x154xf32> to vector<154xf32>
    %c1_6 = arith.constant 1 : index
    %c0_7 = arith.constant 0 : index
    %7 = vector.load %arg7[%c1_6, %c0_7] : memref<196x154xf32, #tpu.memory_space<vmem>>, vector<1x154xf32>
    %8 = vector.shape_cast %7 : vector<1x154xf32> to vector<154xf32>
    %9 = vector.shape_cast %6 : vector<154xf32> to vector<1x154xf32>
    tpu.vector_store %arg7[%c1_6, %c0_7], %9 {strides = array<i32>} : memref<196x154xf32, #tpu.memory_space<vmem>>, vector<1x154xf32>,
    %c0_8 = arith.constant 0 : index
    %c0_9 = arith.constant 0 : index
    %c2 = arith.constant 2 : index
    %10 = vector.load %arg1[%c0_8, %c0_9, %c2] : memref<1x4x256xf32, #tpu.memory_space<vmem>>, vector<1x1x154xf32>
    %11 = vector.shape_cast %10 : vector<1x1x154xf32> to vector<154xf32>
    %c2_10 = arith.constant 2 : index
    %c0_11 = arith.constant 0 : index
    %12 = vector.load %arg7[%c2_10, %c0_11] : memref<196x154xf32, #tpu.memory_space<vmem>>, vector<1x154xf32>
    %13 = vector.shape_cast %12 : vector<1x154xf32> to vector<154xf32>
    %14 = vector.shape_cast %11 : vector<154xf32> to vector<1x154xf32>
    tpu.vector_store %arg7[%c2_10, %c0_11], %14 {strides = array<i32>} : memref<196x154xf32, #tpu.memory_space<vmem>>, vector<1x154xf32>,
    %c0_12 = arith.constant 0 : index
    %c0_13 = arith.constant 0 : index
    %c3 = arith.constant 3 : index
    %15 = vector.load %arg1[%c0_12, %c0_13, %c3] : memref<1x4x256xf32, #tpu.memory_space<vmem>>, vector<1x1x154xf32>
    %16 = vector.shape_cast %15 : vector<1x1x154xf32> to vector<154xf32>
    %c3_14 = arith.constant 3 : index
    %c0_15 = arith.constant 0 : index
    %17 = vector.load %arg7[%c3_14, %c0_15] : memref<196x154xf32, #tpu.memory_space<vmem>>, vector<1x154xf32>
    %18 = vector.shape_cast %17 : vector<1x154xf32> to vector<154xf32>
    %19 = vector.shape_cast %16 : vector<154xf32> to vector<1x154xf32>
    tpu.vector_store %arg7[%c3_14, %c0_15], %19 {strides = array<i32>} : memref<196x154xf32, #tpu.memory_space<vmem>>, vector<1x154xf32>,
    %c0_16 = arith.constant 0 : index
    %c0_17 = arith.constant 0 : index
    %c4 = arith.constant 4 : index
    %20 = vector.load %arg1[%c0_16, %c0_17, %c4] : memref<1x4x256xf32, #tpu.memory_space<vmem>>, vector<1x1x154xf32>
    %21 = vector.shape_cast %20 : vector<1x1x154xf32> to vector<154xf32>
    %c4_18 = arith.constant 4 : index
    %c0_19 = arith.constant 0 : index
    %22 = vector.load %arg7[%c4_18, %c0_19] : memref<196x154xf32, #tpu.memory_space<vmem>>, vector<1x154xf32>
    %23 = vector.shape_cast %22 : vector<1x154xf32> to vector<154xf32>
    %24 = vector.shape_cast %21 : vector<154xf32> to vector<1x154xf32>
    tpu.vector_store %arg7[%c4_18, %c0_19], %24 {strides = array<i32>} : memref<196x154xf32, #tpu.memory_space<vmem>>, vector<1x154xf32>,
    %c0_20 = arith.constant 0 : index
    %c0_21 = arith.constant 0 : index
    %c5 = arith.constant 5 : index
    %25 = vector.load %arg1[%c0_20, %c0_21, %c5] : memref<1x4x256xf32, #tpu.memory_space<vmem>>, vector<1x1x154xf32>
    %26 = vector.shape_cast %25 : vector<1x1x154xf32> to vector<154xf32>
    %c5_22 = arith.constant 5 : index
    %c0_23 = arith.constant 0 : index
    %27 = vector.load %arg7[%c5_22, %c0_23] : memref<196x154xf32, #tpu.memory_space<vmem>>, vector<1x154xf32>
    %28 = vector.shape_cast %27 : vector<1x154xf32> to vector<154xf32>
    %29 = vector.shape_cast %26 : vector<154xf32> to vector<1x154xf32>
    tpu.vector_store %arg7[%c5_22, %c0_23], %29 {strides = array<i32>} : memref<196x154xf32, #tpu.memory_space<vmem>>, vector<1x154xf32>,
    %c0_24 = arith.constant 0 : index
    %c0_25 = arith.constant 0 : index
    %c6 = arith.constant 6 : index
    %30 = vector.load %arg1[%c0_24, %c0_25, %c6] : memref<1x4x256xf32, #tpu.memory_space<vmem>>, vector<1x1x154xf32>
    %31 = vector.shape_cast %30 : vector<1x1x154xf32> to vector<154xf32>
    %c6_26 = arith.constant 6 : index
    %c0_27 = arith.constant 0 : index
    %32 = vector.load %arg7[%c6_26, %c0_27] : memref<196x154xf32, #tpu.memory_space<vmem>>, vector<1x154xf32>
    %33 = vector.shape_cast %32 : vector<1x154xf32> to vector<154xf32>
    %34 = vector.shape_cast %31 : vector<154xf32> to vector<1x154xf32>
    tpu.vector_store %arg7[%c6_26, %c0_27], %34 {strides = array<i32>} : memref<196x154xf32, #tpu.memory_space<vmem>>, vector<1x154xf32>,
    %c0_28 = arith.constant 0 : index
    %c0_29 = arith.constant 0 : index
    %c16 = arith.constant 16 : index
    %35 = vector.load %arg1[%c0_28, %c0_29, %c16] : memref<1x4x256xf32, #tpu.memory_space<vmem>>, vector<1x1x154xf32>
    %36 = vector.shape_cast %35 : vector<1x1x154xf32> to vector<154xf32>
    %c7 = arith.constant 7 : index
    %c0_30 = arith.constant 0 : index
    %37 = vector.load %arg7[%c7, %c0_30] : memref<196x154xf32, #tpu.memory_space<vmem>>, vector<1x154xf32>
    %38 = vector.shape_cast %37 : vector<1x154xf32> to vector<154xf32>
    %39 = vector.shape_cast %36 : vector<154xf32> to vector<1x154xf32>
    tpu.vector_store %arg7[%c7, %c0_30], %39 {strides = array<i32>} : memref<196x154xf32, #tpu.memory_space<vmem>>, vector<1x154xf32>,
    %c0_31 = arith.constant 0 : index
    %c0_32 = arith.constant 0 : index
    %c17 = arith.constant 17 : index
    %40 = vector.load %arg1[%c0_31, %c0_32, %c17] : memref<1x4x256xf32, #tpu.memory_space<vmem>>, vector<1x1x154xf32>
    %41 = vector.shape_cast %40 : vector<1x1x154xf32> to vector<154xf32>
    %c8 = arith.constant 8 : index
    %c0_33 = arith.constant 0 : index
    %42 = vector.load %arg7[%c8, %c0_33] : memref<196x154xf32, #tpu.memory_space<vmem>>, vector<1x154xf32>
    %43 = vector.shape_cast %42 : vector<1x154xf32> to vector<154xf32>
    %44 = vector.shape_cast %41 : vector<154xf32> to vector<1x154xf32>
    tpu.vector_store %arg7[%c8, %c0_33], %44 {strides = array<i32>} : memref<196x154xf32, #tpu.memory_space<vmem>>, vector<1x154xf32>,
    %c0_34 = arith.constant 0 : index
    %c0_35 = arith.constant 0 : index
    %c18 = arith.constant 18 : index
    %45 = vector.load %arg1[%c0_34, %c0_35, %c18] : memref<1x4x256xf32, #tpu.memory_space<vmem>>, vector<1x1x154xf32>
    %46 = vector.shape_cast %45 : vector<1x1x154xf32> to vector<154xf32>
    %c9 = arith.constant 9 : index
    %c0_36 = arith.constant 0 : index
    %47 = vector.load %arg7[%c9, %c0_36] : memref<196x154xf32, #tpu.memory_space<vmem>>, vector<1x154xf32>
    %48 = vector.shape_cast %47 : vector<1x154xf32> to vector<154xf32>
    %49 = vector.shape_cast %46 : vector<154xf32> to vector<1x154xf32>
    tpu.vector_store %arg7[%c9, %c0_36], %49 {strides = array<i32>} : memref<196x154xf32, #tpu.memory_space<vmem>>, vector<1x154xf32>,
    %c0_37 = arith.constant 0 : index
    %c0_38 = arith.constant 0 : index
    %c19 = arith.constant 19 : index
    %50 = vector.load %arg1[%c0_37, %c0_38, %c19] : memref<1x4x256xf32, #tpu.memory_space<vmem>>, vector<1x1x154xf32>
    %51 = vector.shape_cast %50 : vector<1x1x154xf32> to vector<154xf32>
    %c10 = arith.constant 10 : index
    %c0_39 = arith.constant 0 : index
    %52 = vector.load %arg7[%c10, %c0_39] : memref<196x154xf32, #tpu.memory_space<vmem>>, vector<1x154xf32>
    %53 = vector.shape_cast %52 : vector<1x154xf32> to vector<154xf32>
    %54 = vector.shape_cast %51 : vector<154xf32> to vector<1x154xf32>
    tpu.vector_store %arg7[%c10, %c0_39], %54 {strides = array<i32>} : memref<196x154xf32, #tpu.memory_space<vmem>>, vector<1x154xf32>,
    %c0_40 = arith.constant 0 : index
    %c0_41 = arith.constant 0 : index
    %c20 = arith.constant 20 : index
    %55 = vector.load %arg1[%c0_40, %c0_41, %c20] : memref<1x4x256xf32, #tpu.memory_space<vmem>>, vector<1x1x154xf32>
    %56 = vector.shape_cast %55 : vector<1x1x154xf32> to vector<154xf32>
    %c11 = arith.constant 11 : index
    %c0_42 = arith.constant 0 : index
    %57 = vector.load %arg7[%c11, %c0_42] : memref<196x154xf32, #tpu.memory_space<vmem>>, vector<1x154xf32>
    %58 = vector.shape_cast %57 : vector<1x154xf32> to vector<154xf32>
    %59 = vector.shape_cast %56 : vector<154xf32> to vector<1x154xf32>
    tpu.vector_store %arg7[%c11, %c0_42], %59 {strides = array<i32>} : memref<196x154xf32, #tpu.memory_space<vmem>>, vector<1x154xf32>,
    %c0_43 = arith.constant 0 : index
    %c0_44 = arith.constant 0 : index
    %c21 = arith.constant 21 : index
    %60 = vector.load %arg1[%c0_43, %c0_44, %c21] : memref<1x4x256xf32, #tpu.memory_space<vmem>>, vector<1x1x154xf32>
    %61 = vector.shape_cast %60 : vector<1x1x154xf32> to vector<154xf32>
    %c12 = arith.constant 12 : index
    %c0_45 = arith.constant 0 : index
    %62 = vector.load %arg7[%c12, %c0_45] : memref<196x154xf32, #tpu.memory_space<vmem>>, vector<1x154xf32>
    %63 = vector.shape_cast %62 : vector<1x154xf32> to vector<154xf32>
    %64 = vector.shape_cast %61 : vector<154xf32> to vector<1x154xf32>
    tpu.vector_store %arg7[%c12, %c0_45], %64 {strides = array<i32>} : memref<196x154xf32, #tpu.memory_space<vmem>>, vector<1x154xf32>,
    %c0_46 = arith.constant 0 : index
    %c0_47 = arith.constant 0 : index
    %c22 = arith.constant 22 : index
    %65 = vector.load %arg1[%c0_46, %c0_47, %c22] : memref<1x4x256xf32, #tpu.memory_space<vmem>>, vector<1x1x154xf32>
    %66 = vector.shape_cast %65 : vector<1x1x154xf32> to vector<154xf32>
    %c13 = arith.constant 13 : index
    %c0_48 = arith.constant 0 : index
    %67 = vector.load %arg7[%c13, %c0_48] : memref<196x154xf32, #tpu.memory_space<vmem>>, vector<1x154xf32>
    %68 = vector.shape_cast %67 : vector<1x154xf32> to vector<154xf32>
    %69 = vector.shape_cast %66 : vector<154xf32> to vector<1x154xf32>
    tpu.vector_store %arg7[%c13, %c0_48], %69 {strides = array<i32>} : memref<196x154xf32, #tpu.memory_space<vmem>>, vector<1x154xf32>,
    %c0_49 = arith.constant 0 : index
    %c0_50 = arith.constant 0 : index
    %c32 = arith.constant 32 : index
    %70 = vector.load %arg1[%c0_49, %c0_50, %c32] : memref<1x4x256xf32, #tpu.memory_space<vmem>>, vector<1x1x154xf32>
    %71 = vector.shape_cast %70 : vector<1x1x154xf32> to vector<154xf32>
    %c14 = arith.constant 14 : index
    %c0_51 = arith.constant 0 : index
    %72 = vector.load %arg7[%c14, %c0_51] : memref<196x154xf32, #tpu.memory_space<vmem>>, vector<1x154xf32>
    %73 = vector.shape_cast %72 : vector<1x154xf32> to vector<154xf32>
    %74 = vector.shape_cast %71 : vector<154xf32> to vector<1x154xf32>
    tpu.vector_store %arg7[%c14, %c0_51], %74 {strides = array<i32>} : memref<196x154xf32, #tpu.memory_space<vmem>>, vector<1x154xf32>,
    %c0_52 = arith.constant 0 : index
    %c0_53 = arith.constant 0 : index
    %c33 = arith.constant 33 : index
    %75 = vector.load %arg1[%c0_52, %c0_53, %c33] : memref<1x4x256xf32, #tpu.memory_space<vmem>>, vector<1x1x154xf32>
    %76 = vector.shape_cast %75 : vector<1x1x154xf32> to vector<154xf32>
    %c15 = arith.constant 15 : index
    %c0_54 = arith.constant 0 : index
    %77 = vector.load %arg7[%c15, %c0_54] : memref<196x154xf32, #tpu.memory_space<vmem>>, vector<1x154xf32>
    %78 = vector.shape_cast %77 : vector<1x154xf32> to vector<154xf32>
    %79 = vector.shape_cast %76 : vector<154xf32> to vector<1x154xf32>
    tpu.vector_store %arg7[%c15, %c0_54], %79 {strides = array<i32>} : memref<196x154xf32, #tpu.memory_space<vmem>>, vector<1x154xf32>,
    %c0_55 = arith.constant 0 : index
    %c0_56 = arith.constant 0 : index
    %c34 = arith.constant 34 : index
    %80 = vector.load %arg1[%c0_55, %c0_56, %c34] : memref<1x4x256xf32, #tpu.memory_space<vmem>>, vector<1x1x154xf32>
    %81 = vector.shape_cast %80 : vector<1x1x154xf32> to vector<154xf32>
    %c16_57 = arith.constant 16 : index
    %c0_58 = arith.constant 0 : index
    %82 = vector.load %arg7[%c16_57, %c0_58] : memref<196x154xf32, #tpu.memory_space<vmem>>, vector<1x154xf32>
    %83 = vector.shape_cast %82 : vector<1x154xf32> to vector<154xf32>
    %84 = vector.shape_cast %81 : vector<154xf32> to vector<1x154xf32>
    tpu.vector_store %arg7[%c16_57, %c0_58], %84 {strides = array<i32>} : memref<196x154xf32, #tpu.memory_space<vmem>>, vector<1x154xf32>,
    %c0_59 = arith.constant 0 : index
    %c0_60 = arith.constant 0 : index
    %c35 = arith.constant 35 : index
    %85 = vector.load %arg1[%c0_59, %c0_60, %c35] : memref<1x4x256xf32, #tpu.memory_space<vmem>>, vector<1x1x154xf32>
    %86 = vector.shape_cast %85 : vector<1x1x154xf32> to vector<154xf32>
    %c17_61 = arith.constant 17 : index
    %c0_62 = arith.constant 0 : index
    %87 = vector.load %arg7[%c17_61, %c0_62] : memref<196x154xf32, #tpu.memory_space<vmem>>, vector<1x154xf32>
    %88 = vector.shape_cast %87 : vector<1x154xf32> to vector<154xf32>
    %89 = vector.shape_cast %86 : vector<154xf32> to vector<1x154xf32>
    tpu.vector_store %arg7[%c17_61, %c0_62], %89 {strides = array<i32>} : memref<196x154xf32, #tpu.memory_space<vmem>>, vector<1x154xf32>,
    %c0_63 = arith.constant 0 : index
    %c0_64 = arith.constant 0 : index
    %c36 = arith.constant 36 : index
    %90 = vector.load %arg1[%c0_63, %c0_64, %c36] : memref<1x4x256xf32, #tpu.memory_space<vmem>>, vector<1x1x154xf32>
    %91 = vector.shape_cast %90 : vector<1x1x154xf32> to vector<154xf32>
    %c18_65 = arith.constant 18 : index
    %c0_66 = arith.constant 0 : index
    %92 = vector.load %arg7[%c18_65, %c0_66] : memref<196x154xf32, #tpu.memory_space<vmem>>, vector<1x154xf32>
    %93 = vector.shape_cast %92 : vector<1x154xf32> to vector<154xf32>
    %94 = vector.shape_cast %91 : vector<154xf32> to vector<1x154xf32>
    tpu.vector_store %arg7[%c18_65, %c0_66], %94 {strides = array<i32>} : memref<196x154xf32, #tpu.memory_space<vmem>>, vector<1x154xf32>,
    %c0_67 = arith.constant 0 : index
    %c0_68 = arith.constant 0 : index
    %c37 = arith.constant 37 : index
    %95 = vector.load %arg1[%c0_67, %c0_68, %c37] : memref<1x4x256xf32, #tpu.memory_space<vmem>>, vector<1x1x154xf32>
    %96 = vector.shape_cast %95 : vector<1x1x154xf32> to vector<154xf32>
    %c19_69 = arith.constant 19 : index
    %c0_70 = arith.constant 0 : index
    %97 = vector.load %arg7[%c19_69, %c0_70] : memref<196x154xf32, #tpu.memory_space<vmem>>, vector<1x154xf32>
    %98 = vector.shape_cast %97 : vector<1x154xf32> to vector<154xf32>
    %99 = vector.shape_cast %96 : vector<154xf32> to vector<1x154xf32>
    tpu.vector_store %arg7[%c19_69, %c0_70], %99 {strides = array<i32>} : memref<196x154xf32, #tpu.memory_space<vmem>>, vector<1x154xf32>,
    %c0_71 = arith.constant 0 : index
    %c0_72 = arith.constant 0 : index
    %c38 = arith.constant 38 : index
    %100 = vector.load %arg1[%c0_71, %c0_72, %c38] : memref<1x4x256xf32, #tpu.memory_space<vmem>>, vector<1x1x154xf32>
    %101 = vector.shape_cast %100 : vector<1x1x154xf32> to vector<154xf32>
    %c20_73 = arith.constant 20 : index
    %c0_74 = arith.constant 0 : index
    %102 = vector.load %arg7[%c20_73, %c0_74] : memref<196x154xf32, #tpu.memory_space<vmem>>, vector<1x154xf32>
    %103 = vector.shape_cast %102 : vector<1x154xf32> to vector<154xf32>
    %104 = vector.shape_cast %101 : vector<154xf32> to vector<1x154xf32>
    tpu.vector_store %arg7[%c20_73, %c0_74], %104 {strides = array<i32>} : memref<196x154xf32, #tpu.memory_space<vmem>>, vector<1x154xf32>,
    %c0_75 = arith.constant 0 : index
    %c0_76 = arith.constant 0 : index
    %c48 = arith.constant 48 : index
    %105 = vector.load %arg1[%c0_75, %c0_76, %c48] : memref<1x4x256xf32, #tpu.memory_space<vmem>>, vector<1x1x154xf32>
    %106 = vector.shape_cast %105 : vector<1x1x154xf32> to vector<154xf32>
    %c21_77 = arith.constant 21 : index
    %c0_78 = arith.constant 0 : index
    %107 = vector.load %arg7[%c21_77, %c0_78] : memref<196x154xf32, #tpu.memory_space<vmem>>, vector<1x154xf32>
    %108 = vector.shape_cast %107 : vector<1x154xf32> to vector<154xf32>
    %109 = vector.shape_cast %106 : vector<154xf32> to vector<1x154xf32>
    tpu.vector_store %arg7[%c21_77, %c0_78], %109 {strides = array<i32>} : memref<196x154xf32, #tpu.memory_space<vmem>>, vector<1x154xf32>,
    %c0_79 = arith.constant 0 : index
    %c0_80 = arith.constant 0 : index
    %c49 = arith.constant 49 : index
    %110 = vector.load %arg1[%c0_79, %c0_80, %c49] : memref<1x4x256xf32, #tpu.memory_space<vmem>>, vector<1x1x154xf32>
    %111 = vector.shape_cast %110 : vector<1x1x154xf32> to vector<154xf32>
    %c22_81 = arith.constant 22 : index
    %c0_82 = arith.constant 0 : index
    %112 = vector.load %arg7[%c22_81, %c0_82] : memref<196x154xf32, #tpu.memory_space<vmem>>, vector<1x154xf32>
    %113 = vector.shape_cast %112 : vector<1x154xf32> to vector<154xf32>
    %114 = vector.shape_cast %111 : vector<154xf32> to vector<1x154xf32>
    tpu.vector_store %arg7[%c22_81, %c0_82], %114 {strides = array<i32>} : memref<196x154xf32, #tpu.memory_space<vmem>>, vector<1x154xf32>,
    %c0_83 = arith.constant 0 : index
    %c0_84 = arith.constant 0 : index
    %c50 = arith.constant 50 : index
    %115 = vector.load %arg1[%c0_83, %c0_84, %c50] : memref<1x4x256xf32, #tpu.memory_space<vmem>>, vector<1x1x154xf32>
    %116 = vector.shape_cast %115 : vector<1x1x154xf32> to vector<154xf32>
    %c23 = arith.constant 23 : index
    %c0_85 = arith.constant 0 : index
    %117 = vector.load %arg7[%c23, %c0_85] : memref<196x154xf32, #tpu.memory_space<vmem>>, vector<1x154xf32>
    %118 = vector.shape_cast %117 : vector<1x154xf32> to vector<154xf32>
    %119 = vector.shape_cast %116 : vector<154xf32> to vector<1x154xf32>
    tpu.vector_store %arg7[%c23, %c0_85], %119 {strides = array<i32>} : memref<196x154xf32, #tpu.memory_space<vmem>>, vector<1x154xf32>,
    %c0_86 = arith.constant 0 : index
    %c0_87 = arith.constant 0 : index
    %c51 = arith.constant 51 : index
    %120 = vector.load %arg1[%c0_86, %c0_87, %c51] : memref<1x4x256xf32, #tpu.memory_space<vmem>>, vector<1x1x154xf32>
    %121 = vector.shape_cast %120 : vector<1x1x154xf32> to vector<154xf32>
    %c24 = arith.constant 24 : index
    %c0_88 = arith.constant 0 : index
    %122 = vector.load %arg7[%c24, %c0_88] : memref<196x154xf32, #tpu.memory_space<vmem>>, vector<1x154xf32>
    %123 = vector.shape_cast %122 : vector<1x154xf32> to vector<154xf32>
    %124 = vector.shape_cast %121 : vector<154xf32> to vector<1x154xf32>
    tpu.vector_store %arg7[%c24, %c0_88], %124 {strides = array<i32>} : memref<196x154xf32, #tpu.memory_space<vmem>>, vector<1x154xf32>,
    %c0_89 = arith.constant 0 : index
    %c0_90 = arith.constant 0 : index
    %c52 = arith.constant 52 : index
    %125 = vector.load %arg1[%c0_89, %c0_90, %c52] : memref<1x4x256xf32, #tpu.memory_space<vmem>>, vector<1x1x154xf32>
    %126 = vector.shape_cast %125 : vector<1x1x154xf32> to vector<154xf32>
    %c25 = arith.constant 25 : index
    %c0_91 = arith.constant 0 : index
    %127 = vector.load %arg7[%c25, %c0_91] : memref<196x154xf32, #tpu.memory_space<vmem>>, vector<1x154xf32>
    %128 = vector.shape_cast %127 : vector<1x154xf32> to vector<154xf32>
    %129 = vector.shape_cast %126 : vector<154xf32> to vector<1x154xf32>
    tpu.vector_store %arg7[%c25, %c0_91], %129 {strides = array<i32>} : memref<196x154xf32, #tpu.memory_space<vmem>>, vector<1x154xf32>,
    %c0_92 = arith.constant 0 : index
    %c0_93 = arith.constant 0 : index
    %c53 = arith.constant 53 : index
    %130 = vector.load %arg1[%c0_92, %c0_93, %c53] : memref<1x4x256xf32, #tpu.memory_space<vmem>>, vector<1x1x154xf32>
    %131 = vector.shape_cast %130 : vector<1x1x154xf32> to vector<154xf32>
    %c26 = arith.constant 26 : index
    %c0_94 = arith.constant 0 : index
    %132 = vector.load %arg7[%c26, %c0_94] : memref<196x154xf32, #tpu.memory_space<vmem>>, vector<1x154xf32>
    %133 = vector.shape_cast %132 : vector<1x154xf32> to vector<154xf32>
    %134 = vector.shape_cast %131 : vector<154xf32> to vector<1x154xf32>
    tpu.vector_store %arg7[%c26, %c0_94], %134 {strides = array<i32>} : memref<196x154xf32, #tpu.memory_space<vmem>>, vector<1x154xf32>,
    %c0_95 = arith.constant 0 : index
    %c0_96 = arith.constant 0 : index
    %c54 = arith.constant 54 : index
    %135 = vector.load %arg1[%c0_95, %c0_96, %c54] : memref<1x4x256xf32, #tpu.memory_space<vmem>>, vector<1x1x154xf32>
    %136 = vector.shape_cast %135 : vector<1x1x154xf32> to vector<154xf32>
    %c27 = arith.constant 27 : index
    %c0_97 = arith.constant 0 : index
    %137 = vector.load %arg7[%c27, %c0_97] : memref<196x154xf32, #tpu.memory_space<vmem>>, vector<1x154xf32>
    %138 = vector.shape_cast %137 : vector<1x154xf32> to vector<154xf32>
    %139 = vector.shape_cast %136 : vector<154xf32> to vector<1x154xf32>
    tpu.vector_store %arg7[%c27, %c0_97], %139 {strides = array<i32>} : memref<196x154xf32, #tpu.memory_space<vmem>>, vector<1x154xf32>,
    %c0_98 = arith.constant 0 : index
    %c0_99 = arith.constant 0 : index
    %c64 = arith.constant 64 : index
    %140 = vector.load %arg1[%c0_98, %c0_99, %c64] : memref<1x4x256xf32, #tpu.memory_space<vmem>>, vector<1x1x154xf32>
    %141 = vector.shape_cast %140 : vector<1x1x154xf32> to vector<154xf32>
    %c28 = arith.constant 28 : index
    %c0_100 = arith.constant 0 : index
    %142 = vector.load %arg7[%c28, %c0_100] : memref<196x154xf32, #tpu.memory_space<vmem>>, vector<1x154xf32>
    %143 = vector.shape_cast %142 : vector<1x154xf32> to vector<154xf32>
    %144 = vector.shape_cast %141 : vector<154xf32> to vector<1x154xf32>
    tpu.vector_store %arg7[%c28, %c0_100], %144 {strides = array<i32>} : memref<196x154xf32, #tpu.memory_space<vmem>>, vector<1x154xf32>,
    %c0_101 = arith.constant 0 : index
    %c0_102 = arith.constant 0 : index
    %c65 = arith.constant 65 : index
    %145 = vector.load %arg1[%c0_101, %c0_102, %c65] : memref<1x4x256xf32, #tpu.memory_space<vmem>>, vector<1x1x154xf32>
    %146 = vector.shape_cast %145 : vector<1x1x154xf32> to vector<154xf32>
    %c29 = arith.constant 29 : index
    %c0_103 = arith.constant 0 : index
    %147 = vector.load %arg7[%c29, %c0_103] : memref<196x154xf32, #tpu.memory_space<vmem>>, vector<1x154xf32>
    %148 = vector.shape_cast %147 : vector<1x154xf32> to vector<154xf32>
    %149 = vector.shape_cast %146 : vector<154xf32> to vector<1x154xf32>
    tpu.vector_store %arg7[%c29, %c0_103], %149 {strides = array<i32>} : memref<196x154xf32, #tpu.memory_space<vmem>>, vector<1x154xf32>,
    %c0_104 = arith.constant 0 : index
    %c0_105 = arith.constant 0 : index
    %c66 = arith.constant 66 : index
    %150 = vector.load %arg1[%c0_104, %c0_105, %c66] : memref<1x4x256xf32, #tpu.memory_space<vmem>>, vector<1x1x154xf32>
    %151 = vector.shape_cast %150 : vector<1x1x154xf32> to vector<154xf32>
    %c30 = arith.constant 30 : index
    %c0_106 = arith.constant 0 : index
    %152 = vector.load %arg7[%c30, %c0_106] : memref<196x154xf32, #tpu.memory_space<vmem>>, vector<1x154xf32>
    %153 = vector.shape_cast %152 : vector<1x154xf32> to vector<154xf32>
    %154 = vector.shape_cast %151 : vector<154xf32> to vector<1x154xf32>
    tpu.vector_store %arg7[%c30, %c0_106], %154 {strides = array<i32>} : memref<196x154xf32, #tpu.memory_space<vmem>>, vector<1x154xf32>,
    %c0_107 = arith.constant 0 : index
    %c0_108 = arith.constant 0 : index
    %c67 = arith.constant 67 : index
    %155 = vector.load %arg1[%c0_107, %c0_108, %c67] : memref<1x4x256xf32, #tpu.memory_space<vmem>>, vector<1x1x154xf32>
    %156 = vector.shape_cast %155 : vector<1x1x154xf32> to vector<154xf32>
    %c31 = arith.constant 31 : index
    %c0_109 = arith.constant 0 : index
    %157 = vector.load %arg7[%c31, %c0_109] : memref<196x154xf32, #tpu.memory_space<vmem>>, vector<1x154xf32>
    %158 = vector.shape_cast %157 : vector<1x154xf32> to vector<154xf32>
    %159 = vector.shape_cast %156 : vector<154xf32> to vector<1x154xf32>
    tpu.vector_store %arg7[%c31, %c0_109], %159 {strides = array<i32>} : memref<196x154xf32, #tpu.memory_space<vmem>>, vector<1x154xf32>,
    %c0_110 = arith.constant 0 : index
    %c0_111 = arith.constant 0 : index
    %c68 = arith.constant 68 : index
    %160 = vector.load %arg1[%c0_110, %c0_111, %c68] : memref<1x4x256xf32, #tpu.memory_space<vmem>>, vector<1x1x154xf32>
    %161 = vector.shape_cast %160 : vector<1x1x154xf32> to vector<154xf32>
    %c32_112 = arith.constant 32 : index
    %c0_113 = arith.constant 0 : index
    %162 = vector.load %arg7[%c32_112, %c0_113] : memref<196x154xf32, #tpu.memory_space<vmem>>, vector<1x154xf32>
    %163 = vector.shape_cast %162 : vector<1x154xf32> to vector<154xf32>
    %164 = vector.shape_cast %161 : vector<154xf32> to vector<1x154xf32>
    tpu.vector_store %arg7[%c32_112, %c0_113], %164 {strides = array<i32>} : memref<196x154xf32, #tpu.memory_space<vmem>>, vector<1x154xf32>,
    %c0_114 = arith.constant 0 : index
    %c0_115 = arith.constant 0 : index
    %c69 = arith.constant 69 : index
    %165 = vector.load %arg1[%c0_114, %c0_115, %c69] : memref<1x4x256xf32, #tpu.memory_space<vmem>>, vector<1x1x154xf32>
    %166 = vector.shape_cast %165 : vector<1x1x154xf32> to vector<154xf32>
    %c33_116 = arith.constant 33 : index
    %c0_117 = arith.constant 0 : index
    %167 = vector.load %arg7[%c33_116, %c0_117] : memref<196x154xf32, #tpu.memory_space<vmem>>, vector<1x154xf32>
    %168 = vector.shape_cast %167 : vector<1x154xf32> to vector<154xf32>
    %169 = vector.shape_cast %166 : vector<154xf32> to vector<1x154xf32>
    tpu.vector_store %arg7[%c33_116, %c0_117], %169 {strides = array<i32>} : memref<196x154xf32, #tpu.memory_space<vmem>>, vector<1x154xf32>,
    %c0_118 = arith.constant 0 : index
    %c0_119 = arith.constant 0 : index
    %c70 = arith.constant 70 : index
    %170 = vector.load %arg1[%c0_118, %c0_119, %c70] : memref<1x4x256xf32, #tpu.memory_space<vmem>>, vector<1x1x154xf32>
    %171 = vector.shape_cast %170 : vector<1x1x154xf32> to vector<154xf32>
    %c34_120 = arith.constant 34 : index
    %c0_121 = arith.constant 0 : index
    %172 = vector.load %arg7[%c34_120, %c0_121] : memref<196x154xf32, #tpu.memory_space<vmem>>, vector<1x154xf32>
    %173 = vector.shape_cast %172 : vector<1x154xf32> to vector<154xf32>
    %174 = vector.shape_cast %171 : vector<154xf32> to vector<1x154xf32>
    tpu.vector_store %arg7[%c34_120, %c0_121], %174 {strides = array<i32>} : memref<196x154xf32, #tpu.memory_space<vmem>>, vector<1x154xf32>,
    %c0_122 = arith.constant 0 : index
    %c0_123 = arith.constant 0 : index
    %c80 = arith.constant 80 : index
    %175 = vector.load %arg1[%c0_122, %c0_123, %c80] : memref<1x4x256xf32, #tpu.memory_space<vmem>>, vector<1x1x154xf32>
    %176 = vector.shape_cast %175 : vector<1x1x154xf32> to vector<154xf32>
    %c35_124 = arith.constant 35 : index
    %c0_125 = arith.constant 0 : index
    %177 = vector.load %arg7[%c35_124, %c0_125] : memref<196x154xf32, #tpu.memory_space<vmem>>, vector<1x154xf32>
    %178 = vector.shape_cast %177 : vector<1x154xf32> to vector<154xf32>
    %179 = vector.shape_cast %176 : vector<154xf32> to vector<1x154xf32>
    tpu.vector_store %arg7[%c35_124, %c0_125], %179 {strides = array<i32>} : memref<196x154xf32, #tpu.memory_space<vmem>>, vector<1x154xf32>,
    %c0_126 = arith.constant 0 : index
    %c0_127 = arith.constant 0 : index
    %c81 = arith.constant 81 : index
    %180 = vector.load %arg1[%c0_126, %c0_127, %c81] : memref<1x4x256xf32, #tpu.memory_space<vmem>>, vector<1x1x154xf32>
    %181 = vector.shape_cast %180 : vector<1x1x154xf32> to vector<154xf32>
    %c36_128 = arith.constant 36 : index
    %c0_129 = arith.constant 0 : index
    %182 = vector.load %arg7[%c36_128, %c0_129] : memref<196x154xf32, #tpu.memory_space<vmem>>, vector<1x154xf32>
    %183 = vector.shape_cast %182 : vector<1x154xf32> to vector<154xf32>
    %184 = vector.shape_cast %181 : vector<154xf32> to vector<1x154xf32>
    tpu.vector_store %arg7[%c36_128, %c0_129], %184 {strides = array<i32>} : memref<196x154xf32, #tpu.memory_space<vmem>>, vector<1x154xf32>,
    %c0_130 = arith.constant 0 : index
    %c0_131 = arith.constant 0 : index
    %c82 = arith.constant 82 : index
    %185 = vector.load %arg1[%c0_130, %c0_131, %c82] : memref<1x4x256xf32, #tpu.memory_space<vmem>>, vector<1x1x154xf32>
    %186 = vector.shape_cast %185 : vector<1x1x154xf32> to vector<154xf32>
    %c37_132 = arith.constant 37 : index
    %c0_133 = arith.constant 0 : index
    %187 = vector.load %arg7[%c37_132, %c0_133] : memref<196x154xf32, #tpu.memory_space<vmem>>, vector<1x154xf32>
    %188 = vector.shape_cast %187 : vector<1x154xf32> to vector<154xf32>
    %189 = vector.shape_cast %186 : vector<154xf32> to vector<1x154xf32>
    tpu.vector_store %arg7[%c37_132, %c0_133], %189 {strides = array<i32>} : memref<196x154xf32, #tpu.memory_space<vmem>>, vector<1x154xf32>,
    %c0_134 = arith.constant 0 : index
    %c0_135 = arith.constant 0 : index
    %c83 = arith.constant 83 : index
    %190 = vector.load %arg1[%c0_134, %c0_135, %c83] : memref<1x4x256xf32, #tpu.memory_space<vmem>>, vector<1x1x154xf32>
    %191 = vector.shape_cast %190 : vector<1x1x154xf32> to vector<154xf32>
    %c38_136 = arith.constant 38 : index
    %c0_137 = arith.constant 0 : index
    %192 = vector.load %arg7[%c38_136, %c0_137] : memref<196x154xf32, #tpu.memory_space<vmem>>, vector<1x154xf32>
    %193 = vector.shape_cast %192 : vector<1x154xf32> to vector<154xf32>
    %194 = vector.shape_cast %191 : vector<154xf32> to vector<1x154xf32>
    tpu.vector_store %arg7[%c38_136, %c0_137], %194 {strides = array<i32>} : memref<196x154xf32, #tpu.memory_space<vmem>>, vector<1x154xf32>,
    %c0_138 = arith.constant 0 : index
    %c0_139 = arith.constant 0 : index
    %c84 = arith.constant 84 : index
    %195 = vector.load %arg1[%c0_138, %c0_139, %c84] : memref<1x4x256xf32, #tpu.memory_space<vmem>>, vector<1x1x154xf32>
    %196 = vector.shape_cast %195 : vector<1x1x154xf32> to vector<154xf32>
    %c39 = arith.constant 39 : index
    %c0_140 = arith.constant 0 : index
    %197 = vector.load %arg7[%c39, %c0_140] : memref<196x154xf32, #tpu.memory_space<vmem>>, vector<1x154xf32>
    %198 = vector.shape_cast %197 : vector<1x154xf32> to vector<154xf32>
    %199 = vector.shape_cast %196 : vector<154xf32> to vector<1x154xf32>
    tpu.vector_store %arg7[%c39, %c0_140], %199 {strides = array<i32>} : memref<196x154xf32, #tpu.memory_space<vmem>>, vector<1x154xf32>,
    %c0_141 = arith.constant 0 : index
    %c0_142 = arith.constant 0 : index
    %c85 = arith.constant 85 : index
    %200 = vector.load %arg1[%c0_141, %c0_142, %c85] : memref<1x4x256xf32, #tpu.memory_space<vmem>>, vector<1x1x154xf32>
    %201 = vector.shape_cast %200 : vector<1x1x154xf32> to vector<154xf32>
    %c40 = arith.constant 40 : index
    %c0_143 = arith.constant 0 : index
    %202 = vector.load %arg7[%c40, %c0_143] : memref<196x154xf32, #tpu.memory_space<vmem>>, vector<1x154xf32>
    %203 = vector.shape_cast %202 : vector<1x154xf32> to vector<154xf32>
    %204 = vector.shape_cast %201 : vector<154xf32> to vector<1x154xf32>
    tpu.vector_store %arg7[%c40, %c0_143], %204 {strides = array<i32>} : memref<196x154xf32, #tpu.memory_space<vmem>>, vector<1x154xf32>,
    %c0_144 = arith.constant 0 : index
    %c0_145 = arith.constant 0 : index
    %c86 = arith.constant 86 : index
    %205 = vector.load %arg1[%c0_144, %c0_145, %c86] : memref<1x4x256xf32, #tpu.memory_space<vmem>>, vector<1x1x154xf32>
    %206 = vector.shape_cast %205 : vector<1x1x154xf32> to vector<154xf32>
    %c41 = arith.constant 41 : index
    %c0_146 = arith.constant 0 : index
    %207 = vector.load %arg7[%c41, %c0_146] : memref<196x154xf32, #tpu.memory_space<vmem>>, vector<1x154xf32>
    %208 = vector.shape_cast %207 : vector<1x154xf32> to vector<154xf32>
    %209 = vector.shape_cast %206 : vector<154xf32> to vector<1x154xf32>
    tpu.vector_store %arg7[%c41, %c0_146], %209 {strides = array<i32>} : memref<196x154xf32, #tpu.memory_space<vmem>>, vector<1x154xf32>,
    %c0_147 = arith.constant 0 : index
    %c0_148 = arith.constant 0 : index
    %c96 = arith.constant 96 : index
    %210 = vector.load %arg1[%c0_147, %c0_148, %c96] : memref<1x4x256xf32, #tpu.memory_space<vmem>>, vector<1x1x154xf32>
    %211 = vector.shape_cast %210 : vector<1x1x154xf32> to vector<154xf32>
    %c42 = arith.constant 42 : index
    %c0_149 = arith.constant 0 : index
    %212 = vector.load %arg7[%c42, %c0_149] : memref<196x154xf32, #tpu.memory_space<vmem>>, vector<1x154xf32>
    %213 = vector.shape_cast %212 : vector<1x154xf32> to vector<154xf32>
    %214 = vector.shape_cast %211 : vector<154xf32> to vector<1x154xf32>
    tpu.vector_store %arg7[%c42, %c0_149], %214 {strides = array<i32>} : memref<196x154xf32, #tpu.memory_space<vmem>>, vector<1x154xf32>,
    %c0_150 = arith.constant 0 : index
    %c0_151 = arith.constant 0 : index
    %c97 = arith.constant 97 : index
    %215 = vector.load %arg1[%c0_150, %c0_151, %c97] : memref<1x4x256xf32, #tpu.memory_space<vmem>>, vector<1x1x154xf32>
    %216 = vector.shape_cast %215 : vector<1x1x154xf32> to vector<154xf32>
    %c43 = arith.constant 43 : index
    %c0_152 = arith.constant 0 : index
    %217 = vector.load %arg7[%c43, %c0_152] : memref<196x154xf32, #tpu.memory_space<vmem>>, vector<1x154xf32>
    %218 = vector.shape_cast %217 : vector<1x154xf32> to vector<154xf32>
    %219 = vector.shape_cast %216 : vector<154xf32> to vector<1x154xf32>
    tpu.vector_store %arg7[%c43, %c0_152], %219 {strides = array<i32>} : memref<196x154xf32, #tpu.memory_space<vmem>>, vector<1x154xf32>,
    %c0_153 = arith.constant 0 : index
    %c0_154 = arith.constant 0 : index
    %c98 = arith.constant 98 : index
    %220 = vector.load %arg1[%c0_153, %c0_154, %c98] : memref<1x4x256xf32, #tpu.memory_space<vmem>>, vector<1x1x154xf32>
    %221 = vector.shape_cast %220 : vector<1x1x154xf32> to vector<154xf32>
    %c44 = arith.constant 44 : index
    %c0_155 = arith.constant 0 : index
    %222 = vector.load %arg7[%c44, %c0_155] : memref<196x154xf32, #tpu.memory_space<vmem>>, vector<1x154xf32>
    %223 = vector.shape_cast %222 : vector<1x154xf32> to vector<154xf32>
    %224 = vector.shape_cast %221 : vector<154xf32> to vector<1x154xf32>
    tpu.vector_store %arg7[%c44, %c0_155], %224 {strides = array<i32>} : memref<196x154xf32, #tpu.memory_space<vmem>>, vector<1x154xf32>,
    %c0_156 = arith.constant 0 : index
    %c0_157 = arith.constant 0 : index
    %c99 = arith.constant 99 : index
    %225 = vector.load %arg1[%c0_156, %c0_157, %c99] : memref<1x4x256xf32, #tpu.memory_space<vmem>>, vector<1x1x154xf32>
    %226 = vector.shape_cast %225 : vector<1x1x154xf32> to vector<154xf32>
    %c45 = arith.constant 45 : index
    %c0_158 = arith.constant 0 : index
    %227 = vector.load %arg7[%c45, %c0_158] : memref<196x154xf32, #tpu.memory_space<vmem>>, vector<1x154xf32>
    %228 = vector.shape_cast %227 : vector<1x154xf32> to vector<154xf32>
    %229 = vector.shape_cast %226 : vector<154xf32> to vector<1x154xf32>
    tpu.vector_store %arg7[%c45, %c0_158], %229 {strides = array<i32>} : memref<196x154xf32, #tpu.memory_space<vmem>>, vector<1x154xf32>,
    %c0_159 = arith.constant 0 : index
    %c0_160 = arith.constant 0 : index
    %c100 = arith.constant 100 : index
    %230 = vector.load %arg1[%c0_159, %c0_160, %c100] : memref<1x4x256xf32, #tpu.memory_space<vmem>>, vector<1x1x154xf32>
    %231 = vector.shape_cast %230 : vector<1x1x154xf32> to vector<154xf32>
    %c46 = arith.constant 46 : index
    %c0_161 = arith.constant 0 : index
    %232 = vector.load %arg7[%c46, %c0_161] : memref<196x154xf32, #tpu.memory_space<vmem>>, vector<1x154xf32>
    %233 = vector.shape_cast %232 : vector<1x154xf32> to vector<154xf32>
    %234 = vector.shape_cast %231 : vector<154xf32> to vector<1x154xf32>
    tpu.vector_store %arg7[%c46, %c0_161], %234 {strides = array<i32>} : memref<196x154xf32, #tpu.memory_space<vmem>>, vector<1x154xf32>,
    %c0_162 = arith.constant 0 : index
    %c0_163 = arith.constant 0 : index
    %c101 = arith.constant 101 : index
    %235 = vector.load %arg1[%c0_162, %c0_163, %c101] : memref<1x4x256xf32, #tpu.memory_space<vmem>>, vector<1x1x154xf32>
    %236 = vector.shape_cast %235 : vector<1x1x154xf32> to vector<154xf32>
    %c47 = arith.constant 47 : index
    %c0_164 = arith.constant 0 : index
    %237 = vector.load %arg7[%c47, %c0_164] : memref<196x154xf32, #tpu.memory_space<vmem>>, vector<1x154xf32>
    %238 = vector.shape_cast %237 : vector<1x154xf32> to vector<154xf32>
    %239 = vector.shape_cast %236 : vector<154xf32> to vector<1x154xf32>
    tpu.vector_store %arg7[%c47, %c0_164], %239 {strides = array<i32>} : memref<196x154xf32, #tpu.memory_space<vmem>>, vector<1x154xf32>,
    %c0_165 = arith.constant 0 : index
    %c0_166 = arith.constant 0 : index
    %c102 = arith.constant 102 : index
    %240 = vector.load %arg1[%c0_165, %c0_166, %c102] : memref<1x4x256xf32, #tpu.memory_space<vmem>>, vector<1x1x154xf32>
    %241 = vector.shape_cast %240 : vector<1x1x154xf32> to vector<154xf32>
    %c48_167 = arith.constant 48 : index
    %c0_168 = arith.constant 0 : index
    %242 = vector.load %arg7[%c48_167, %c0_168] : memref<196x154xf32, #tpu.memory_space<vmem>>, vector<1x154xf32>
    %243 = vector.shape_cast %242 : vector<1x154xf32> to vector<154xf32>
    %244 = vector.shape_cast %241 : vector<154xf32> to vector<1x154xf32>
    tpu.vector_store %arg7[%c48_167, %c0_168], %244 {strides = array<i32>} : memref<196x154xf32, #tpu.memory_space<vmem>>, vector<1x154xf32>,
    %c0_169 = arith.constant 0 : index
    %c1_170 = arith.constant 1 : index
    %c0_171 = arith.constant 0 : index
    %245 = vector.load %arg1[%c0_169, %c1_170, %c0_171] : memref<1x4x256xf32, #tpu.memory_space<vmem>>, vector<1x1x154xf32>
    %246 = vector.shape_cast %245 : vector<1x1x154xf32> to vector<154xf32>
    %c49_172 = arith.constant 49 : index
    %c0_173 = arith.constant 0 : index
    %247 = vector.load %arg7[%c49_172, %c0_173] : memref<196x154xf32, #tpu.memory_space<vmem>>, vector<1x154xf32>
    %248 = vector.shape_cast %247 : vector<1x154xf32> to vector<154xf32>
    %249 = vector.shape_cast %246 : vector<154xf32> to vector<1x154xf32>
    tpu.vector_store %arg7[%c49_172, %c0_173], %249 {strides = array<i32>} : memref<196x154xf32, #tpu.memory_space<vmem>>, vector<1x154xf32>,
    %c0_174 = arith.constant 0 : index
    %c1_175 = arith.constant 1 : index
    %c1_176 = arith.constant 1 : index
    %250 = vector.load %arg1[%c0_174, %c1_175, %c1_176] : memref<1x4x256xf32, #tpu.memory_space<vmem>>, vector<1x1x154xf32>
    %251 = vector.shape_cast %250 : vector<1x1x154xf32> to vector<154xf32>
    %c50_177 = arith.constant 50 : index
    %c0_178 = arith.constant 0 : index
    %252 = vector.load %arg7[%c50_177, %c0_178] : memref<196x154xf32, #tpu.memory_space<vmem>>, vector<1x154xf32>
    %253 = vector.shape_cast %252 : vector<1x154xf32> to vector<154xf32>
    %254 = vector.shape_cast %251 : vector<154xf32> to vector<1x154xf32>
    tpu.vector_store %arg7[%c50_177, %c0_178], %254 {strides = array<i32>} : memref<196x154xf32, #tpu.memory_space<vmem>>, vector<1x154xf32>,
    %c0_179 = arith.constant 0 : index
    %c1_180 = arith.constant 1 : index
    %c2_181 = arith.constant 2 : index
    %255 = vector.load %arg1[%c0_179, %c1_180, %c2_181] : memref<1x4x256xf32, #tpu.memory_space<vmem>>, vector<1x1x154xf32>
    %256 = vector.shape_cast %255 : vector<1x1x154xf32> to vector<154xf32>
    %c51_182 = arith.constant 51 : index
    %c0_183 = arith.constant 0 : index
    %257 = vector.load %arg7[%c51_182, %c0_183] : memref<196x154xf32, #tpu.memory_space<vmem>>, vector<1x154xf32>
    %258 = vector.shape_cast %257 : vector<1x154xf32> to vector<154xf32>
    %259 = vector.shape_cast %256 : vector<154xf32> to vector<1x154xf32>
    tpu.vector_store %arg7[%c51_182, %c0_183], %259 {strides = array<i32>} : memref<196x154xf32, #tpu.memory_space<vmem>>, vector<1x154xf32>,
    %c0_184 = arith.constant 0 : index
    %c1_185 = arith.constant 1 : index
    %c3_186 = arith.constant 3 : index
    %260 = vector.load %arg1[%c0_184, %c1_185, %c3_186] : memref<1x4x256xf32, #tpu.memory_space<vmem>>, vector<1x1x154xf32>
    %261 = vector.shape_cast %260 : vector<1x1x154xf32> to vector<154xf32>
    %c52_187 = arith.constant 52 : index
    %c0_188 = arith.constant 0 : index
    %262 = vector.load %arg7[%c52_187, %c0_188] : memref<196x154xf32, #tpu.memory_space<vmem>>, vector<1x154xf32>
    %263 = vector.shape_cast %262 : vector<1x154xf32> to vector<154xf32>
    %264 = vector.shape_cast %261 : vector<154xf32> to vector<1x154xf32>
    tpu.vector_store %arg7[%c52_187, %c0_188], %264 {strides = array<i32>} : memref<196x154xf32, #tpu.memory_space<vmem>>, vector<1x154xf32>,
    %c0_189 = arith.constant 0 : index
    %c1_190 = arith.constant 1 : index
    %c4_191 = arith.constant 4 : index
    %265 = vector.load %arg1[%c0_189, %c1_190, %c4_191] : memref<1x4x256xf32, #tpu.memory_space<vmem>>, vector<1x1x154xf32>
    %266 = vector.shape_cast %265 : vector<1x1x154xf32> to vector<154xf32>
    %c53_192 = arith.constant 53 : index
    %c0_193 = arith.constant 0 : index
    %267 = vector.load %arg7[%c53_192, %c0_193] : memref<196x154xf32, #tpu.memory_space<vmem>>, vector<1x154xf32>
    %268 = vector.shape_cast %267 : vector<1x154xf32> to vector<154xf32>
    %269 = vector.shape_cast %266 : vector<154xf32> to vector<1x154xf32>
    tpu.vector_store %arg7[%c53_192, %c0_193], %269 {strides = array<i32>} : memref<196x154xf32, #tpu.memory_space<vmem>>, vector<1x154xf32>,
    %c0_194 = arith.constant 0 : index
    %c1_195 = arith.constant 1 : index
    %c5_196 = arith.constant 5 : index
    %270 = vector.load %arg1[%c0_194, %c1_195, %c5_196] : memref<1x4x256xf32, #tpu.memory_space<vmem>>, vector<1x1x154xf32>
    %271 = vector.shape_cast %270 : vector<1x1x154xf32> to vector<154xf32>
    %c54_197 = arith.constant 54 : index
    %c0_198 = arith.constant 0 : index
    %272 = vector.load %arg7[%c54_197, %c0_198] : memref<196x154xf32, #tpu.memory_space<vmem>>, vector<1x154xf32>
    %273 = vector.shape_cast %272 : vector<1x154xf32> to vector<154xf32>
    %274 = vector.shape_cast %271 : vector<154xf32> to vector<1x154xf32>
    tpu.vector_store %arg7[%c54_197, %c0_198], %274 {strides = array<i32>} : memref<196x154xf32, #tpu.memory_space<vmem>>, vector<1x154xf32>,
    %c0_199 = arith.constant 0 : index
    %c1_200 = arith.constant 1 : index
    %c6_201 = arith.constant 6 : index
    %275 = vector.load %arg1[%c0_199, %c1_200, %c6_201] : memref<1x4x256xf32, #tpu.memory_space<vmem>>, vector<1x1x154xf32>
    %276 = vector.shape_cast %275 : vector<1x1x154xf32> to vector<154xf32>
    %c55 = arith.constant 55 : index
    %c0_202 = arith.constant 0 : index
    %277 = vector.load %arg7[%c55, %c0_202] : memref<196x154xf32, #tpu.memory_space<vmem>>, vector<1x154xf32>
    %278 = vector.shape_cast %277 : vector<1x154xf32> to vector<154xf32>
    %279 = vector.shape_cast %276 : vector<154xf32> to vector<1x154xf32>
    tpu.vector_store %arg7[%c55, %c0_202], %279 {strides = array<i32>} : memref<196x154xf32, #tpu.memory_space<vmem>>, vector<1x154xf32>,
    %c0_203 = arith.constant 0 : index
    %c1_204 = arith.constant 1 : index
    %c16_205 = arith.constant 16 : index
    %280 = vector.load %arg1[%c0_203, %c1_204, %c16_205] : memref<1x4x256xf32, #tpu.memory_space<vmem>>, vector<1x1x154xf32>
    %281 = vector.shape_cast %280 : vector<1x1x154xf32> to vector<154xf32>
    %c56 = arith.constant 56 : index
    %c0_206 = arith.constant 0 : index
    %282 = vector.load %arg7[%c56, %c0_206] : memref<196x154xf32, #tpu.memory_space<vmem>>, vector<1x154xf32>
    %283 = vector.shape_cast %282 : vector<1x154xf32> to vector<154xf32>
    %284 = vector.shape_cast %281 : vector<154xf32> to vector<1x154xf32>
    tpu.vector_store %arg7[%c56, %c0_206], %284 {strides = array<i32>} : memref<196x154xf32, #tpu.memory_space<vmem>>, vector<1x154xf32>,
    %c0_207 = arith.constant 0 : index
    %c1_208 = arith.constant 1 : index
    %c17_209 = arith.constant 17 : index
    %285 = vector.load %arg1[%c0_207, %c1_208, %c17_209] : memref<1x4x256xf32, #tpu.memory_space<vmem>>, vector<1x1x154xf32>
    %286 = vector.shape_cast %285 : vector<1x1x154xf32> to vector<154xf32>
    %c57 = arith.constant 57 : index
    %c0_210 = arith.constant 0 : index
    %287 = vector.load %arg7[%c57, %c0_210] : memref<196x154xf32, #tpu.memory_space<vmem>>, vector<1x154xf32>
    %288 = vector.shape_cast %287 : vector<1x154xf32> to vector<154xf32>
    %289 = vector.shape_cast %286 : vector<154xf32> to vector<1x154xf32>
    tpu.vector_store %arg7[%c57, %c0_210], %289 {strides = array<i32>} : memref<196x154xf32, #tpu.memory_space<vmem>>, vector<1x154xf32>,
    %c0_211 = arith.constant 0 : index
    %c1_212 = arith.constant 1 : index
    %c18_213 = arith.constant 18 : index
    %290 = vector.load %arg1[%c0_211, %c1_212, %c18_213] : memref<1x4x256xf32, #tpu.memory_space<vmem>>, vector<1x1x154xf32>
    %291 = vector.shape_cast %290 : vector<1x1x154xf32> to vector<154xf32>
    %c58 = arith.constant 58 : index
    %c0_214 = arith.constant 0 : index
    %292 = vector.load %arg7[%c58, %c0_214] : memref<196x154xf32, #tpu.memory_space<vmem>>, vector<1x154xf32>
    %293 = vector.shape_cast %292 : vector<1x154xf32> to vector<154xf32>
    %294 = vector.shape_cast %291 : vector<154xf32> to vector<1x154xf32>
    tpu.vector_store %arg7[%c58, %c0_214], %294 {strides = array<i32>} : memref<196x154xf32, #tpu.memory_space<vmem>>, vector<1x154xf32>,
    %c0_215 = arith.constant 0 : index
    %c1_216 = arith.constant 1 : index
    %c19_217 = arith.constant 19 : index
    %295 = vector.load %arg1[%c0_215, %c1_216, %c19_217] : memref<1x4x256xf32, #tpu.memory_space<vmem>>, vector<1x1x154xf32>
    %296 = vector.shape_cast %295 : vector<1x1x154xf32> to vector<154xf32>
    %c59 = arith.constant 59 : index
    %c0_218 = arith.constant 0 : index
    %297 = vector.load %arg7[%c59, %c0_218] : memref<196x154xf32, #tpu.memory_space<vmem>>, vector<1x154xf32>
    %298 = vector.shape_cast %297 : vector<1x154xf32> to vector<154xf32>
    %299 = vector.shape_cast %296 : vector<154xf32> to vector<1x154xf32>
    tpu.vector_store %arg7[%c59, %c0_218], %299 {strides = array<i32>} : memref<196x154xf32, #tpu.memory_space<vmem>>, vector<1x154xf32>,
    %c0_219 = arith.constant 0 : index
    %c1_220 = arith.constant 1 : index
    %c20_221 = arith.constant 20 : index
    %300 = vector.load %arg1[%c0_219, %c1_220, %c20_221] : memref<1x4x256xf32, #tpu.memory_space<vmem>>, vector<1x1x154xf32>
    %301 = vector.shape_cast %300 : vector<1x1x154xf32> to vector<154xf32>
    %c60 = arith.constant 60 : index
    %c0_222 = arith.constant 0 : index
    %302 = vector.load %arg7[%c60, %c0_222] : memref<196x154xf32, #tpu.memory_space<vmem>>, vector<1x154xf32>
    %303 = vector.shape_cast %302 : vector<1x154xf32> to vector<154xf32>
    %304 = vector.shape_cast %301 : vector<154xf32> to vector<1x154xf32>
    tpu.vector_store %arg7[%c60, %c0_222], %304 {strides = array<i32>} : memref<196x154xf32, #tpu.memory_space<vmem>>, vector<1x154xf32>,
    %c0_223 = arith.constant 0 : index
    %c1_224 = arith.constant 1 : index
    %c21_225 = arith.constant 21 : index
    %305 = vector.load %arg1[%c0_223, %c1_224, %c21_225] : memref<1x4x256xf32, #tpu.memory_space<vmem>>, vector<1x1x154xf32>
    %306 = vector.shape_cast %305 : vector<1x1x154xf32> to vector<154xf32>
    %c61 = arith.constant 61 : index
    %c0_226 = arith.constant 0 : index
    %307 = vector.load %arg7[%c61, %c0_226] : memref<196x154xf32, #tpu.memory_space<vmem>>, vector<1x154xf32>
    %308 = vector.shape_cast %307 : vector<1x154xf32> to vector<154xf32>
    %309 = vector.shape_cast %306 : vector<154xf32> to vector<1x154xf32>
    tpu.vector_store %arg7[%c61, %c0_226], %309 {strides = array<i32>} : memref<196x154xf32, #tpu.memory_space<vmem>>, vector<1x154xf32>,
    %c0_227 = arith.constant 0 : index
    %c1_228 = arith.constant 1 : index
    %c22_229 = arith.constant 22 : index
    %310 = vector.load %arg1[%c0_227, %c1_228, %c22_229] : memref<1x4x256xf32, #tpu.memory_space<vmem>>, vector<1x1x154xf32>
    %311 = vector.shape_cast %310 : vector<1x1x154xf32> to vector<154xf32>
    %c62 = arith.constant 62 : index
    %c0_230 = arith.constant 0 : index
    %312 = vector.load %arg7[%c62, %c0_230] : memref<196x154xf32, #tpu.memory_space<vmem>>, vector<1x154xf32>
    %313 = vector.shape_cast %312 : vector<1x154xf32> to vector<154xf32>
    %314 = vector.shape_cast %311 : vector<154xf32> to vector<1x154xf32>
    tpu.vector_store %arg7[%c62, %c0_230], %314 {strides = array<i32>} : memref<196x154xf32, #tpu.memory_space<vmem>>, vector<1x154xf32>,
    %c0_231 = arith.constant 0 : index
    %c1_232 = arith.constant 1 : index
    %c32_233 = arith.constant 32 : index
    %315 = vector.load %arg1[%c0_231, %c1_232, %c32_233] : memref<1x4x256xf32, #tpu.memory_space<vmem>>, vector<1x1x154xf32>
    %316 = vector.shape_cast %315 : vector<1x1x154xf32> to vector<154xf32>
    %c63 = arith.constant 63 : index
    %c0_234 = arith.constant 0 : index
    %317 = vector.load %arg7[%c63, %c0_234] : memref<196x154xf32, #tpu.memory_space<vmem>>, vector<1x154xf32>
    %318 = vector.shape_cast %317 : vector<1x154xf32> to vector<154xf32>
    %319 = vector.shape_cast %316 : vector<154xf32> to vector<1x154xf32>
    tpu.vector_store %arg7[%c63, %c0_234], %319 {strides = array<i32>} : memref<196x154xf32, #tpu.memory_space<vmem>>, vector<1x154xf32>,
    %c0_235 = arith.constant 0 : index
    %c1_236 = arith.constant 1 : index
    %c33_237 = arith.constant 33 : index
    %320 = vector.load %arg1[%c0_235, %c1_236, %c33_237] : memref<1x4x256xf32, #tpu.memory_space<vmem>>, vector<1x1x154xf32>
    %321 = vector.shape_cast %320 : vector<1x1x154xf32> to vector<154xf32>
    %c64_238 = arith.constant 64 : index
    %c0_239 = arith.constant 0 : index
    %322 = vector.load %arg7[%c64_238, %c0_239] : memref<196x154xf32, #tpu.memory_space<vmem>>, vector<1x154xf32>
    %323 = vector.shape_cast %322 : vector<1x154xf32> to vector<154xf32>
    %324 = vector.shape_cast %321 : vector<154xf32> to vector<1x154xf32>
    tpu.vector_store %arg7[%c64_238, %c0_239], %324 {strides = array<i32>} : memref<196x154xf32, #tpu.memory_space<vmem>>, vector<1x154xf32>,
    %c0_240 = arith.constant 0 : index
    %c1_241 = arith.constant 1 : index
    %c34_242 = arith.constant 34 : index
    %325 = vector.load %arg1[%c0_240, %c1_241, %c34_242] : memref<1x4x256xf32, #tpu.memory_space<vmem>>, vector<1x1x154xf32>
    %326 = vector.shape_cast %325 : vector<1x1x154xf32> to vector<154xf32>
    %c65_243 = arith.constant 65 : index
    %c0_244 = arith.constant 0 : index
    %327 = vector.load %arg7[%c65_243, %c0_244] : memref<196x154xf32, #tpu.memory_space<vmem>>, vector<1x154xf32>
    %328 = vector.shape_cast %327 : vector<1x154xf32> to vector<154xf32>
    %329 = vector.shape_cast %326 : vector<154xf32> to vector<1x154xf32>
    tpu.vector_store %arg7[%c65_243, %c0_244], %329 {strides = array<i32>} : memref<196x154xf32, #tpu.memory_space<vmem>>, vector<1x154xf32>,
    %c0_245 = arith.constant 0 : index
    %c1_246 = arith.constant 1 : index
    %c35_247 = arith.constant 35 : index
    %330 = vector.load %arg1[%c0_245, %c1_246, %c35_247] : memref<1x4x256xf32, #tpu.memory_space<vmem>>, vector<1x1x154xf32>
    %331 = vector.shape_cast %330 : vector<1x1x154xf32> to vector<154xf32>
    %c66_248 = arith.constant 66 : index
    %c0_249 = arith.constant 0 : index
    %332 = vector.load %arg7[%c66_248, %c0_249] : memref<196x154xf32, #tpu.memory_space<vmem>>, vector<1x154xf32>
    %333 = vector.shape_cast %332 : vector<1x154xf32> to vector<154xf32>
    %334 = vector.shape_cast %331 : vector<154xf32> to vector<1x154xf32>
    tpu.vector_store %arg7[%c66_248, %c0_249], %334 {strides = array<i32>} : memref<196x154xf32, #tpu.memory_space<vmem>>, vector<1x154xf32>,
    %c0_250 = arith.constant 0 : index
    %c1_251 = arith.constant 1 : index
    %c36_252 = arith.constant 36 : index
    %335 = vector.load %arg1[%c0_250, %c1_251, %c36_252] : memref<1x4x256xf32, #tpu.memory_space<vmem>>, vector<1x1x154xf32>
    %336 = vector.shape_cast %335 : vector<1x1x154xf32> to vector<154xf32>
    %c67_253 = arith.constant 67 : index
    %c0_254 = arith.constant 0 : index
    %337 = vector.load %arg7[%c67_253, %c0_254] : memref<196x154xf32, #tpu.memory_space<vmem>>, vector<1x154xf32>
    %338 = vector.shape_cast %337 : vector<1x154xf32> to vector<154xf32>
    %339 = vector.shape_cast %336 : vector<154xf32> to vector<1x154xf32>
    tpu.vector_store %arg7[%c67_253, %c0_254], %339 {strides = array<i32>} : memref<196x154xf32, #tpu.memory_space<vmem>>, vector<1x154xf32>,
    %c0_255 = arith.constant 0 : index
    %c1_256 = arith.constant 1 : index
    %c37_257 = arith.constant 37 : index
    %340 = vector.load %arg1[%c0_255, %c1_256, %c37_257] : memref<1x4x256xf32, #tpu.memory_space<vmem>>, vector<1x1x154xf32>
    %341 = vector.shape_cast %340 : vector<1x1x154xf32> to vector<154xf32>
    %c68_258 = arith.constant 68 : index
    %c0_259 = arith.constant 0 : index
    %342 = vector.load %arg7[%c68_258, %c0_259] : memref<196x154xf32, #tpu.memory_space<vmem>>, vector<1x154xf32>
    %343 = vector.shape_cast %342 : vector<1x154xf32> to vector<154xf32>
    %344 = vector.shape_cast %341 : vector<154xf32> to vector<1x154xf32>
    tpu.vector_store %arg7[%c68_258, %c0_259], %344 {strides = array<i32>} : memref<196x154xf32, #tpu.memory_space<vmem>>, vector<1x154xf32>,
    %c0_260 = arith.constant 0 : index
    %c1_261 = arith.constant 1 : index
    %c38_262 = arith.constant 38 : index
    %345 = vector.load %arg1[%c0_260, %c1_261, %c38_262] : memref<1x4x256xf32, #tpu.memory_space<vmem>>, vector<1x1x154xf32>
    %346 = vector.shape_cast %345 : vector<1x1x154xf32> to vector<154xf32>
    %c69_263 = arith.constant 69 : index
    %c0_264 = arith.constant 0 : index
    %347 = vector.load %arg7[%c69_263, %c0_264] : memref<196x154xf32, #tpu.memory_space<vmem>>, vector<1x154xf32>
    %348 = vector.shape_cast %347 : vector<1x154xf32> to vector<154xf32>
    %349 = vector.shape_cast %346 : vector<154xf32> to vector<1x154xf32>
    tpu.vector_store %arg7[%c69_263, %c0_264], %349 {strides = array<i32>} : memref<196x154xf32, #tpu.memory_space<vmem>>, vector<1x154xf32>,
    %c0_265 = arith.constant 0 : index
    %c1_266 = arith.constant 1 : index
    %c48_267 = arith.constant 48 : index
    %350 = vector.load %arg1[%c0_265, %c1_266, %c48_267] : memref<1x4x256xf32, #tpu.memory_space<vmem>>, vector<1x1x154xf32>
    %351 = vector.shape_cast %350 : vector<1x1x154xf32> to vector<154xf32>
    %c70_268 = arith.constant 70 : index
    %c0_269 = arith.constant 0 : index
    %352 = vector.load %arg7[%c70_268, %c0_269] : memref<196x154xf32, #tpu.memory_space<vmem>>, vector<1x154xf32>
    %353 = vector.shape_cast %352 : vector<1x154xf32> to vector<154xf32>
    %354 = vector.shape_cast %351 : vector<154xf32> to vector<1x154xf32>
    tpu.vector_store %arg7[%c70_268, %c0_269], %354 {strides = array<i32>} : memref<196x154xf32, #tpu.memory_space<vmem>>, vector<1x154xf32>,
    %c0_270 = arith.constant 0 : index
    %c1_271 = arith.constant 1 : index
    %c49_272 = arith.constant 49 : index
    %355 = vector.load %arg1[%c0_270, %c1_271, %c49_272] : memref<1x4x256xf32, #tpu.memory_space<vmem>>, vector<1x1x154xf32>
    %356 = vector.shape_cast %355 : vector<1x1x154xf32> to vector<154xf32>
    %c71 = arith.constant 71 : index
    %c0_273 = arith.constant 0 : index
    %357 = vector.load %arg7[%c71, %c0_273] : memref<196x154xf32, #tpu.memory_space<vmem>>, vector<1x154xf32>
    %358 = vector.shape_cast %357 : vector<1x154xf32> to vector<154xf32>
    %359 = vector.shape_cast %356 : vector<154xf32> to vector<1x154xf32>
    tpu.vector_store %arg7[%c71, %c0_273], %359 {strides = array<i32>} : memref<196x154xf32, #tpu.memory_space<vmem>>, vector<1x154xf32>,
    %c0_274 = arith.constant 0 : index
    %c1_275 = arith.constant 1 : index
    %c50_276 = arith.constant 50 : index
    %360 = vector.load %arg1[%c0_274, %c1_275, %c50_276] : memref<1x4x256xf32, #tpu.memory_space<vmem>>, vector<1x1x154xf32>
    %361 = vector.shape_cast %360 : vector<1x1x154xf32> to vector<154xf32>
    %c72 = arith.constant 72 : index
    %c0_277 = arith.constant 0 : index
    %362 = vector.load %arg7[%c72, %c0_277] : memref<196x154xf32, #tpu.memory_space<vmem>>, vector<1x154xf32>
    %363 = vector.shape_cast %362 : vector<1x154xf32> to vector<154xf32>
    %364 = vector.shape_cast %361 : vector<154xf32> to vector<1x154xf32>
    tpu.vector_store %arg7[%c72, %c0_277], %364 {strides = array<i32>} : memref<196x154xf32, #tpu.memory_space<vmem>>, vector<1x154xf32>,
    %c0_278 = arith.constant 0 : index
    %c1_279 = arith.constant 1 : index
    %c51_280 = arith.constant 51 : index
    %365 = vector.load %arg1[%c0_278, %c1_279, %c51_280] : memref<1x4x256xf32, #tpu.memory_space<vmem>>, vector<1x1x154xf32>
    %366 = vector.shape_cast %365 : vector<1x1x154xf32> to vector<154xf32>
    %c73 = arith.constant 73 : index
    %c0_281 = arith.constant 0 : index
    %367 = vector.load %arg7[%c73, %c0_281] : memref<196x154xf32, #tpu.memory_space<vmem>>, vector<1x154xf32>
    %368 = vector.shape_cast %367 : vector<1x154xf32> to vector<154xf32>
    %369 = vector.shape_cast %366 : vector<154xf32> to vector<1x154xf32>
    tpu.vector_store %arg7[%c73, %c0_281], %369 {strides = array<i32>} : memref<196x154xf32, #tpu.memory_space<vmem>>, vector<1x154xf32>,
    %c0_282 = arith.constant 0 : index
    %c1_283 = arith.constant 1 : index
    %c52_284 = arith.constant 52 : index
    %370 = vector.load %arg1[%c0_282, %c1_283, %c52_284] : memref<1x4x256xf32, #tpu.memory_space<vmem>>, vector<1x1x154xf32>
    %371 = vector.shape_cast %370 : vector<1x1x154xf32> to vector<154xf32>
    %c74 = arith.constant 74 : index
    %c0_285 = arith.constant 0 : index
    %372 = vector.load %arg7[%c74, %c0_285] : memref<196x154xf32, #tpu.memory_space<vmem>>, vector<1x154xf32>
    %373 = vector.shape_cast %372 : vector<1x154xf32> to vector<154xf32>
    %374 = vector.shape_cast %371 : vector<154xf32> to vector<1x154xf32>
    tpu.vector_store %arg7[%c74, %c0_285], %374 {strides = array<i32>} : memref<196x154xf32, #tpu.memory_space<vmem>>, vector<1x154xf32>,
    %c0_286 = arith.constant 0 : index
    %c1_287 = arith.constant 1 : index
    %c53_288 = arith.constant 53 : index
    %375 = vector.load %arg1[%c0_286, %c1_287, %c53_288] : memref<1x4x256xf32, #tpu.memory_space<vmem>>, vector<1x1x154xf32>
    %376 = vector.shape_cast %375 : vector<1x1x154xf32> to vector<154xf32>
    %c75 = arith.constant 75 : index
    %c0_289 = arith.constant 0 : index
    %377 = vector.load %arg7[%c75, %c0_289] : memref<196x154xf32, #tpu.memory_space<vmem>>, vector<1x154xf32>
    %378 = vector.shape_cast %377 : vector<1x154xf32> to vector<154xf32>
    %379 = vector.shape_cast %376 : vector<154xf32> to vector<1x154xf32>
    tpu.vector_store %arg7[%c75, %c0_289], %379 {strides = array<i32>} : memref<196x154xf32, #tpu.memory_space<vmem>>, vector<1x154xf32>,
    %c0_290 = arith.constant 0 : index
    %c1_291 = arith.constant 1 : index
    %c54_292 = arith.constant 54 : index
    %380 = vector.load %arg1[%c0_290, %c1_291, %c54_292] : memref<1x4x256xf32, #tpu.memory_space<vmem>>, vector<1x1x154xf32>
    %381 = vector.shape_cast %380 : vector<1x1x154xf32> to vector<154xf32>
    %c76 = arith.constant 76 : index
    %c0_293 = arith.constant 0 : index
    %382 = vector.load %arg7[%c76, %c0_293] : memref<196x154xf32, #tpu.memory_space<vmem>>, vector<1x154xf32>
    %383 = vector.shape_cast %382 : vector<1x154xf32> to vector<154xf32>
    %384 = vector.shape_cast %381 : vector<154xf32> to vector<1x154xf32>
    tpu.vector_store %arg7[%c76, %c0_293], %384 {strides = array<i32>} : memref<196x154xf32, #tpu.memory_space<vmem>>, vector<1x154xf32>,
    %c0_294 = arith.constant 0 : index
    %c1_295 = arith.constant 1 : index
    %c64_296 = arith.constant 64 : index
    %385 = vector.load %arg1[%c0_294, %c1_295, %c64_296] : memref<1x4x256xf32, #tpu.memory_space<vmem>>, vector<1x1x154xf32>
    %386 = vector.shape_cast %385 : vector<1x1x154xf32> to vector<154xf32>
    %c77 = arith.constant 77 : index
    %c0_297 = arith.constant 0 : index
    %387 = vector.load %arg7[%c77, %c0_297] : memref<196x154xf32, #tpu.memory_space<vmem>>, vector<1x154xf32>
    %388 = vector.shape_cast %387 : vector<1x154xf32> to vector<154xf32>
    %389 = vector.shape_cast %386 : vector<154xf32> to vector<1x154xf32>
    tpu.vector_store %arg7[%c77, %c0_297], %389 {strides = array<i32>} : memref<196x154xf32, #tpu.memory_space<vmem>>, vector<1x154xf32>,
    %c0_298 = arith.constant 0 : index
    %c1_299 = arith.constant 1 : index
    %c65_300 = arith.constant 65 : index
    %390 = vector.load %arg1[%c0_298, %c1_299, %c65_300] : memref<1x4x256xf32, #tpu.memory_space<vmem>>, vector<1x1x154xf32>
    %391 = vector.shape_cast %390 : vector<1x1x154xf32> to vector<154xf32>
    %c78 = arith.constant 78 : index
    %c0_301 = arith.constant 0 : index
    %392 = vector.load %arg7[%c78, %c0_301] : memref<196x154xf32, #tpu.memory_space<vmem>>, vector<1x154xf32>
    %393 = vector.shape_cast %392 : vector<1x154xf32> to vector<154xf32>
    %394 = vector.shape_cast %391 : vector<154xf32> to vector<1x154xf32>
    tpu.vector_store %arg7[%c78, %c0_301], %394 {strides = array<i32>} : memref<196x154xf32, #tpu.memory_space<vmem>>, vector<1x154xf32>,
    %c0_302 = arith.constant 0 : index
    %c1_303 = arith.constant 1 : index
    %c66_304 = arith.constant 66 : index
    %395 = vector.load %arg1[%c0_302, %c1_303, %c66_304] : memref<1x4x256xf32, #tpu.memory_space<vmem>>, vector<1x1x154xf32>
    %396 = vector.shape_cast %395 : vector<1x1x154xf32> to vector<154xf32>
    %c79 = arith.constant 79 : index
    %c0_305 = arith.constant 0 : index
    %397 = vector.load %arg7[%c79, %c0_305] : memref<196x154xf32, #tpu.memory_space<vmem>>, vector<1x154xf32>
    %398 = vector.shape_cast %397 : vector<1x154xf32> to vector<154xf32>
    %399 = vector.shape_cast %396 : vector<154xf32> to vector<1x154xf32>
    tpu.vector_store %arg7[%c79, %c0_305], %399 {strides = array<i32>} : memref<196x154xf32, #tpu.memory_space<vmem>>, vector<1x154xf32>,
    %c0_306 = arith.constant 0 : index
    %c1_307 = arith.constant 1 : index
    %c67_308 = arith.constant 67 : index
    %400 = vector.load %arg1[%c0_306, %c1_307, %c67_308] : memref<1x4x256xf32, #tpu.memory_space<vmem>>, vector<1x1x154xf32>
    %401 = vector.shape_cast %400 : vector<1x1x154xf32> to vector<154xf32>
    %c80_309 = arith.constant 80 : index
    %c0_310 = arith.constant 0 : index
    %402 = vector.load %arg7[%c80_309, %c0_310] : memref<196x154xf32, #tpu.memory_space<vmem>>, vector<1x154xf32>
    %403 = vector.shape_cast %402 : vector<1x154xf32> to vector<154xf32>
    %404 = vector.shape_cast %401 : vector<154xf32> to vector<1x154xf32>
    tpu.vector_store %arg7[%c80_309, %c0_310], %404 {strides = array<i32>} : memref<196x154xf32, #tpu.memory_space<vmem>>, vector<1x154xf32>,
    %c0_311 = arith.constant 0 : index
    %c1_312 = arith.constant 1 : index
    %c68_313 = arith.constant 68 : index
    %405 = vector.load %arg1[%c0_311, %c1_312, %c68_313] : memref<1x4x256xf32, #tpu.memory_space<vmem>>, vector<1x1x154xf32>
    %406 = vector.shape_cast %405 : vector<1x1x154xf32> to vector<154xf32>
    %c81_314 = arith.constant 81 : index
    %c0_315 = arith.constant 0 : index
    %407 = vector.load %arg7[%c81_314, %c0_315] : memref<196x154xf32, #tpu.memory_space<vmem>>, vector<1x154xf32>
    %408 = vector.shape_cast %407 : vector<1x154xf32> to vector<154xf32>
    %409 = vector.shape_cast %406 : vector<154xf32> to vector<1x154xf32>
    tpu.vector_store %arg7[%c81_314, %c0_315], %409 {strides = array<i32>} : memref<196x154xf32, #tpu.memory_space<vmem>>, vector<1x154xf32>,
    %c0_316 = arith.constant 0 : index
    %c1_317 = arith.constant 1 : index
    %c69_318 = arith.constant 69 : index
    %410 = vector.load %arg1[%c0_316, %c1_317, %c69_318] : memref<1x4x256xf32, #tpu.memory_space<vmem>>, vector<1x1x154xf32>
    %411 = vector.shape_cast %410 : vector<1x1x154xf32> to vector<154xf32>
    %c82_319 = arith.constant 82 : index
    %c0_320 = arith.constant 0 : index
    %412 = vector.load %arg7[%c82_319, %c0_320] : memref<196x154xf32, #tpu.memory_space<vmem>>, vector<1x154xf32>
    %413 = vector.shape_cast %412 : vector<1x154xf32> to vector<154xf32>
    %414 = vector.shape_cast %411 : vector<154xf32> to vector<1x154xf32>
    tpu.vector_store %arg7[%c82_319, %c0_320], %414 {strides = array<i32>} : memref<196x154xf32, #tpu.memory_space<vmem>>, vector<1x154xf32>,
    %c0_321 = arith.constant 0 : index
    %c1_322 = arith.constant 1 : index
    %c70_323 = arith.constant 70 : index
    %415 = vector.load %arg1[%c0_321, %c1_322, %c70_323] : memref<1x4x256xf32, #tpu.memory_space<vmem>>, vector<1x1x154xf32>
    %416 = vector.shape_cast %415 : vector<1x1x154xf32> to vector<154xf32>
    %c83_324 = arith.constant 83 : index
    %c0_325 = arith.constant 0 : index
    %417 = vector.load %arg7[%c83_324, %c0_325] : memref<196x154xf32, #tpu.memory_space<vmem>>, vector<1x154xf32>
    %418 = vector.shape_cast %417 : vector<1x154xf32> to vector<154xf32>
    %419 = vector.shape_cast %416 : vector<154xf32> to vector<1x154xf32>
    tpu.vector_store %arg7[%c83_324, %c0_325], %419 {strides = array<i32>} : memref<196x154xf32, #tpu.memory_space<vmem>>, vector<1x154xf32>,
    %c0_326 = arith.constant 0 : index
    %c1_327 = arith.constant 1 : index
    %c80_328 = arith.constant 80 : index
    %420 = vector.load %arg1[%c0_326, %c1_327, %c80_328] : memref<1x4x256xf32, #tpu.memory_space<vmem>>, vector<1x1x154xf32>
    %421 = vector.shape_cast %420 : vector<1x1x154xf32> to vector<154xf32>
    %c84_329 = arith.constant 84 : index
    %c0_330 = arith.constant 0 : index
    %422 = vector.load %arg7[%c84_329, %c0_330] : memref<196x154xf32, #tpu.memory_space<vmem>>, vector<1x154xf32>
    %423 = vector.shape_cast %422 : vector<1x154xf32> to vector<154xf32>
    %424 = vector.shape_cast %421 : vector<154xf32> to vector<1x154xf32>
    tpu.vector_store %arg7[%c84_329, %c0_330], %424 {strides = array<i32>} : memref<196x154xf32, #tpu.memory_space<vmem>>, vector<1x154xf32>,
    %c0_331 = arith.constant 0 : index
    %c1_332 = arith.constant 1 : index
    %c81_333 = arith.constant 81 : index
    %425 = vector.load %arg1[%c0_331, %c1_332, %c81_333] : memref<1x4x256xf32, #tpu.memory_space<vmem>>, vector<1x1x154xf32>
    %426 = vector.shape_cast %425 : vector<1x1x154xf32> to vector<154xf32>
    %c85_334 = arith.constant 85 : index
    %c0_335 = arith.constant 0 : index
    %427 = vector.load %arg7[%c85_334, %c0_335] : memref<196x154xf32, #tpu.memory_space<vmem>>, vector<1x154xf32>
    %428 = vector.shape_cast %427 : vector<1x154xf32> to vector<154xf32>
    %429 = vector.shape_cast %426 : vector<154xf32> to vector<1x154xf32>
    tpu.vector_store %arg7[%c85_334, %c0_335], %429 {strides = array<i32>} : memref<196x154xf32, #tpu.memory_space<vmem>>, vector<1x154xf32>,
    %c0_336 = arith.constant 0 : index
    %c1_337 = arith.constant 1 : index
    %c82_338 = arith.constant 82 : index
    %430 = vector.load %arg1[%c0_336, %c1_337, %c82_338] : memref<1x4x256xf32, #tpu.memory_space<vmem>>, vector<1x1x154xf32>
    %431 = vector.shape_cast %430 : vector<1x1x154xf32> to vector<154xf32>
    %c86_339 = arith.constant 86 : index
    %c0_340 = arith.constant 0 : index
    %432 = vector.load %arg7[%c86_339, %c0_340] : memref<196x154xf32, #tpu.memory_space<vmem>>, vector<1x154xf32>
    %433 = vector.shape_cast %432 : vector<1x154xf32> to vector<154xf32>
    %434 = vector.shape_cast %431 : vector<154xf32> to vector<1x154xf32>
    tpu.vector_store %arg7[%c86_339, %c0_340], %434 {strides = array<i32>} : memref<196x154xf32, #tpu.memory_space<vmem>>, vector<1x154xf32>,
    %c0_341 = arith.constant 0 : index
    %c1_342 = arith.constant 1 : index
    %c83_343 = arith.constant 83 : index
    %435 = vector.load %arg1[%c0_341, %c1_342, %c83_343] : memref<1x4x256xf32, #tpu.memory_space<vmem>>, vector<1x1x154xf32>
    %436 = vector.shape_cast %435 : vector<1x1x154xf32> to vector<154xf32>
    %c87 = arith.constant 87 : index
    %c0_344 = arith.constant 0 : index
    %437 = vector.load %arg7[%c87, %c0_344] : memref<196x154xf32, #tpu.memory_space<vmem>>, vector<1x154xf32>
    %438 = vector.shape_cast %437 : vector<1x154xf32> to vector<154xf32>
    %439 = vector.shape_cast %436 : vector<154xf32> to vector<1x154xf32>
    tpu.vector_store %arg7[%c87, %c0_344], %439 {strides = array<i32>} : memref<196x154xf32, #tpu.memory_space<vmem>>, vector<1x154xf32>,
    %c0_345 = arith.constant 0 : index
    %c1_346 = arith.constant 1 : index
    %c84_347 = arith.constant 84 : index
    %440 = vector.load %arg1[%c0_345, %c1_346, %c84_347] : memref<1x4x256xf32, #tpu.memory_space<vmem>>, vector<1x1x154xf32>
    %441 = vector.shape_cast %440 : vector<1x1x154xf32> to vector<154xf32>
    %c88 = arith.constant 88 : index
    %c0_348 = arith.constant 0 : index
    %442 = vector.load %arg7[%c88, %c0_348] : memref<196x154xf32, #tpu.memory_space<vmem>>, vector<1x154xf32>
    %443 = vector.shape_cast %442 : vector<1x154xf32> to vector<154xf32>
    %444 = vector.shape_cast %441 : vector<154xf32> to vector<1x154xf32>
    tpu.vector_store %arg7[%c88, %c0_348], %444 {strides = array<i32>} : memref<196x154xf32, #tpu.memory_space<vmem>>, vector<1x154xf32>,
    %c0_349 = arith.constant 0 : index
    %c1_350 = arith.constant 1 : index
    %c85_351 = arith.constant 85 : index
    %445 = vector.load %arg1[%c0_349, %c1_350, %c85_351] : memref<1x4x256xf32, #tpu.memory_space<vmem>>, vector<1x1x154xf32>
    %446 = vector.shape_cast %445 : vector<1x1x154xf32> to vector<154xf32>
    %c89 = arith.constant 89 : index
    %c0_352 = arith.constant 0 : index
    %447 = vector.load %arg7[%c89, %c0_352] : memref<196x154xf32, #tpu.memory_space<vmem>>, vector<1x154xf32>
    %448 = vector.shape_cast %447 : vector<1x154xf32> to vector<154xf32>
    %449 = vector.shape_cast %446 : vector<154xf32> to vector<1x154xf32>
    tpu.vector_store %arg7[%c89, %c0_352], %449 {strides = array<i32>} : memref<196x154xf32, #tpu.memory_space<vmem>>, vector<1x154xf32>,
    %c0_353 = arith.constant 0 : index
    %c1_354 = arith.constant 1 : index
    %c86_355 = arith.constant 86 : index
    %450 = vector.load %arg1[%c0_353, %c1_354, %c86_355] : memref<1x4x256xf32, #tpu.memory_space<vmem>>, vector<1x1x154xf32>
    %451 = vector.shape_cast %450 : vector<1x1x154xf32> to vector<154xf32>
    %c90 = arith.constant 90 : index
    %c0_356 = arith.constant 0 : index
    %452 = vector.load %arg7[%c90, %c0_356] : memref<196x154xf32, #tpu.memory_space<vmem>>, vector<1x154xf32>
    %453 = vector.shape_cast %452 : vector<1x154xf32> to vector<154xf32>
    %454 = vector.shape_cast %451 : vector<154xf32> to vector<1x154xf32>
    tpu.vector_store %arg7[%c90, %c0_356], %454 {strides = array<i32>} : memref<196x154xf32, #tpu.memory_space<vmem>>, vector<1x154xf32>,
    %c0_357 = arith.constant 0 : index
    %c1_358 = arith.constant 1 : index
    %c96_359 = arith.constant 96 : index
    %455 = vector.load %arg1[%c0_357, %c1_358, %c96_359] : memref<1x4x256xf32, #tpu.memory_space<vmem>>, vector<1x1x154xf32>
    %456 = vector.shape_cast %455 : vector<1x1x154xf32> to vector<154xf32>
    %c91 = arith.constant 91 : index
    %c0_360 = arith.constant 0 : index
    %457 = vector.load %arg7[%c91, %c0_360] : memref<196x154xf32, #tpu.memory_space<vmem>>, vector<1x154xf32>
    %458 = vector.shape_cast %457 : vector<1x154xf32> to vector<154xf32>
    %459 = vector.shape_cast %456 : vector<154xf32> to vector<1x154xf32>
    tpu.vector_store %arg7[%c91, %c0_360], %459 {strides = array<i32>} : memref<196x154xf32, #tpu.memory_space<vmem>>, vector<1x154xf32>,
    %c0_361 = arith.constant 0 : index
    %c1_362 = arith.constant 1 : index
    %c97_363 = arith.constant 97 : index
    %460 = vector.load %arg1[%c0_361, %c1_362, %c97_363] : memref<1x4x256xf32, #tpu.memory_space<vmem>>, vector<1x1x154xf32>
    %461 = vector.shape_cast %460 : vector<1x1x154xf32> to vector<154xf32>
    %c92 = arith.constant 92 : index
    %c0_364 = arith.constant 0 : index
    %462 = vector.load %arg7[%c92, %c0_364] : memref<196x154xf32, #tpu.memory_space<vmem>>, vector<1x154xf32>
    %463 = vector.shape_cast %462 : vector<1x154xf32> to vector<154xf32>
    %464 = vector.shape_cast %461 : vector<154xf32> to vector<1x154xf32>
    tpu.vector_store %arg7[%c92, %c0_364], %464 {strides = array<i32>} : memref<196x154xf32, #tpu.memory_space<vmem>>, vector<1x154xf32>,
    %c0_365 = arith.constant 0 : index
    %c1_366 = arith.constant 1 : index
    %c98_367 = arith.constant 98 : index
    %465 = vector.load %arg1[%c0_365, %c1_366, %c98_367] : memref<1x4x256xf32, #tpu.memory_space<vmem>>, vector<1x1x154xf32>
    %466 = vector.shape_cast %465 : vector<1x1x154xf32> to vector<154xf32>
    %c93 = arith.constant 93 : index
    %c0_368 = arith.constant 0 : index
    %467 = vector.load %arg7[%c93, %c0_368] : memref<196x154xf32, #tpu.memory_space<vmem>>, vector<1x154xf32>
    %468 = vector.shape_cast %467 : vector<1x154xf32> to vector<154xf32>
    %469 = vector.shape_cast %466 : vector<154xf32> to vector<1x154xf32>
    tpu.vector_store %arg7[%c93, %c0_368], %469 {strides = array<i32>} : memref<196x154xf32, #tpu.memory_space<vmem>>, vector<1x154xf32>,
    %c0_369 = arith.constant 0 : index
    %c1_370 = arith.constant 1 : index
    %c99_371 = arith.constant 99 : index
    %470 = vector.load %arg1[%c0_369, %c1_370, %c99_371] : memref<1x4x256xf32, #tpu.memory_space<vmem>>, vector<1x1x154xf32>
    %471 = vector.shape_cast %470 : vector<1x1x154xf32> to vector<154xf32>
    %c94 = arith.constant 94 : index
    %c0_372 = arith.constant 0 : index
    %472 = vector.load %arg7[%c94, %c0_372] : memref<196x154xf32, #tpu.memory_space<vmem>>, vector<1x154xf32>
    %473 = vector.shape_cast %472 : vector<1x154xf32> to vector<154xf32>
    %474 = vector.shape_cast %471 : vector<154xf32> to vector<1x154xf32>
    tpu.vector_store %arg7[%c94, %c0_372], %474 {strides = array<i32>} : memref<196x154xf32, #tpu.memory_space<vmem>>, vector<1x154xf32>,
    %c0_373 = arith.constant 0 : index
    %c1_374 = arith.constant 1 : index
    %c100_375 = arith.constant 100 : index
    %475 = vector.load %arg1[%c0_373, %c1_374, %c100_375] : memref<1x4x256xf32, #tpu.memory_space<vmem>>, vector<1x1x154xf32>
    %476 = vector.shape_cast %475 : vector<1x1x154xf32> to vector<154xf32>
    %c95 = arith.constant 95 : index
    %c0_376 = arith.constant 0 : index
    %477 = vector.load %arg7[%c95, %c0_376] : memref<196x154xf32, #tpu.memory_space<vmem>>, vector<1x154xf32>
    %478 = vector.shape_cast %477 : vector<1x154xf32> to vector<154xf32>
    %479 = vector.shape_cast %476 : vector<154xf32> to vector<1x154xf32>
    tpu.vector_store %arg7[%c95, %c0_376], %479 {strides = array<i32>} : memref<196x154xf32, #tpu.memory_space<vmem>>, vector<1x154xf32>,
    %c0_377 = arith.constant 0 : index
    %c1_378 = arith.constant 1 : index
    %c101_379 = arith.constant 101 : index
    %480 = vector.load %arg1[%c0_377, %c1_378, %c101_379] : memref<1x4x256xf32, #tpu.memory_space<vmem>>, vector<1x1x154xf32>
    %481 = vector.shape_cast %480 : vector<1x1x154xf32> to vector<154xf32>
    %c96_380 = arith.constant 96 : index
    %c0_381 = arith.constant 0 : index
    %482 = vector.load %arg7[%c96_380, %c0_381] : memref<196x154xf32, #tpu.memory_space<vmem>>, vector<1x154xf32>
    %483 = vector.shape_cast %482 : vector<1x154xf32> to vector<154xf32>
    %484 = vector.shape_cast %481 : vector<154xf32> to vector<1x154xf32>
    tpu.vector_store %arg7[%c96_380, %c0_381], %484 {strides = array<i32>} : memref<196x154xf32, #tpu.memory_space<vmem>>, vector<1x154xf32>,
    %c0_382 = arith.constant 0 : index
    %c1_383 = arith.constant 1 : index
    %c102_384 = arith.constant 102 : index
    %485 = vector.load %arg1[%c0_382, %c1_383, %c102_384] : memref<1x4x256xf32, #tpu.memory_space<vmem>>, vector<1x1x154xf32>
    %486 = vector.shape_cast %485 : vector<1x1x154xf32> to vector<154xf32>
    %c97_385 = arith.constant 97 : index
    %c0_386 = arith.constant 0 : index
    %487 = vector.load %arg7[%c97_385, %c0_386] : memref<196x154xf32, #tpu.memory_space<vmem>>, vector<1x154xf32>
    %488 = vector.shape_cast %487 : vector<1x154xf32> to vector<154xf32>
    %489 = vector.shape_cast %486 : vector<154xf32> to vector<1x154xf32>
    tpu.vector_store %arg7[%c97_385, %c0_386], %489 {strides = array<i32>} : memref<196x154xf32, #tpu.memory_space<vmem>>, vector<1x154xf32>,
    %c0_387 = arith.constant 0 : index
    %c2_388 = arith.constant 2 : index
    %c0_389 = arith.constant 0 : index
    %490 = vector.load %arg1[%c0_387, %c2_388, %c0_389] : memref<1x4x256xf32, #tpu.memory_space<vmem>>, vector<1x1x154xf32>
    %491 = vector.shape_cast %490 : vector<1x1x154xf32> to vector<154xf32>
    %c98_390 = arith.constant 98 : index
    %c0_391 = arith.constant 0 : index
    %492 = vector.load %arg7[%c98_390, %c0_391] : memref<196x154xf32, #tpu.memory_space<vmem>>, vector<1x154xf32>
    %493 = vector.shape_cast %492 : vector<1x154xf32> to vector<154xf32>
    %494 = vector.shape_cast %491 : vector<154xf32> to vector<1x154xf32>
    tpu.vector_store %arg7[%c98_390, %c0_391], %494 {strides = array<i32>} : memref<196x154xf32, #tpu.memory_space<vmem>>, vector<1x154xf32>,
    %c0_392 = arith.constant 0 : index
    %c2_393 = arith.constant 2 : index
    %c1_394 = arith.constant 1 : index
    %495 = vector.load %arg1[%c0_392, %c2_393, %c1_394] : memref<1x4x256xf32, #tpu.memory_space<vmem>>, vector<1x1x154xf32>
    %496 = vector.shape_cast %495 : vector<1x1x154xf32> to vector<154xf32>
    %c99_395 = arith.constant 99 : index
    %c0_396 = arith.constant 0 : index
    %497 = vector.load %arg7[%c99_395, %c0_396] : memref<196x154xf32, #tpu.memory_space<vmem>>, vector<1x154xf32>
    %498 = vector.shape_cast %497 : vector<1x154xf32> to vector<154xf32>
    %499 = vector.shape_cast %496 : vector<154xf32> to vector<1x154xf32>
    tpu.vector_store %arg7[%c99_395, %c0_396], %499 {strides = array<i32>} : memref<196x154xf32, #tpu.memory_space<vmem>>, vector<1x154xf32>,
    %c0_397 = arith.constant 0 : index
    %c2_398 = arith.constant 2 : index
    %c2_399 = arith.constant 2 : index
    %500 = vector.load %arg1[%c0_397, %c2_398, %c2_399] : memref<1x4x256xf32, #tpu.memory_space<vmem>>, vector<1x1x154xf32>
    %501 = vector.shape_cast %500 : vector<1x1x154xf32> to vector<154xf32>
    %c100_400 = arith.constant 100 : index
    %c0_401 = arith.constant 0 : index
    %502 = vector.load %arg7[%c100_400, %c0_401] : memref<196x154xf32, #tpu.memory_space<vmem>>, vector<1x154xf32>
    %503 = vector.shape_cast %502 : vector<1x154xf32> to vector<154xf32>
    %504 = vector.shape_cast %501 : vector<154xf32> to vector<1x154xf32>
    tpu.vector_store %arg7[%c100_400, %c0_401], %504 {strides = array<i32>} : memref<196x154xf32, #tpu.memory_space<vmem>>, vector<1x154xf32>,
    %c0_402 = arith.constant 0 : index
    %c2_403 = arith.constant 2 : index
    %c3_404 = arith.constant 3 : index
    %505 = vector.load %arg1[%c0_402, %c2_403, %c3_404] : memref<1x4x256xf32, #tpu.memory_space<vmem>>, vector<1x1x154xf32>
    %506 = vector.shape_cast %505 : vector<1x1x154xf32> to vector<154xf32>
    %c101_405 = arith.constant 101 : index
    %c0_406 = arith.constant 0 : index
    %507 = vector.load %arg7[%c101_405, %c0_406] : memref<196x154xf32, #tpu.memory_space<vmem>>, vector<1x154xf32>
    %508 = vector.shape_cast %507 : vector<1x154xf32> to vector<154xf32>
    %509 = vector.shape_cast %506 : vector<154xf32> to vector<1x154xf32>
    tpu.vector_store %arg7[%c101_405, %c0_406], %509 {strides = array<i32>} : memref<196x154xf32, #tpu.memory_space<vmem>>, vector<1x154xf32>,
    %c0_407 = arith.constant 0 : index
    %c2_408 = arith.constant 2 : index
    %c4_409 = arith.constant 4 : index
    %510 = vector.load %arg1[%c0_407, %c2_408, %c4_409] : memref<1x4x256xf32, #tpu.memory_space<vmem>>, vector<1x1x154xf32>
    %511 = vector.shape_cast %510 : vector<1x1x154xf32> to vector<154xf32>
    %c102_410 = arith.constant 102 : index
    %c0_411 = arith.constant 0 : index
    %512 = vector.load %arg7[%c102_410, %c0_411] : memref<196x154xf32, #tpu.memory_space<vmem>>, vector<1x154xf32>
    %513 = vector.shape_cast %512 : vector<1x154xf32> to vector<154xf32>
    %514 = vector.shape_cast %511 : vector<154xf32> to vector<1x154xf32>
    tpu.vector_store %arg7[%c102_410, %c0_411], %514 {strides = array<i32>} : memref<196x154xf32, #tpu.memory_space<vmem>>, vector<1x154xf32>,
    %c0_412 = arith.constant 0 : index
    %c2_413 = arith.constant 2 : index
    %c5_414 = arith.constant 5 : index
    %515 = vector.load %arg1[%c0_412, %c2_413, %c5_414] : memref<1x4x256xf32, #tpu.memory_space<vmem>>, vector<1x1x154xf32>
    %516 = vector.shape_cast %515 : vector<1x1x154xf32> to vector<154xf32>
    %c103 = arith.constant 103 : index
    %c0_415 = arith.constant 0 : index
    %517 = vector.load %arg7[%c103, %c0_415] : memref<196x154xf32, #tpu.memory_space<vmem>>, vector<1x154xf32>
    %518 = vector.shape_cast %517 : vector<1x154xf32> to vector<154xf32>
    %519 = vector.shape_cast %516 : vector<154xf32> to vector<1x154xf32>
    tpu.vector_store %arg7[%c103, %c0_415], %519 {strides = array<i32>} : memref<196x154xf32, #tpu.memory_space<vmem>>, vector<1x154xf32>,
    %c0_416 = arith.constant 0 : index
    %c2_417 = arith.constant 2 : index
    %c6_418 = arith.constant 6 : index
    %520 = vector.load %arg1[%c0_416, %c2_417, %c6_418] : memref<1x4x256xf32, #tpu.memory_space<vmem>>, vector<1x1x154xf32>
    %521 = vector.shape_cast %520 : vector<1x1x154xf32> to vector<154xf32>
    %c104 = arith.constant 104 : index
    %c0_419 = arith.constant 0 : index
    %522 = vector.load %arg7[%c104, %c0_419] : memref<196x154xf32, #tpu.memory_space<vmem>>, vector<1x154xf32>
    %523 = vector.shape_cast %522 : vector<1x154xf32> to vector<154xf32>
    %524 = vector.shape_cast %521 : vector<154xf32> to vector<1x154xf32>
    tpu.vector_store %arg7[%c104, %c0_419], %524 {strides = array<i32>} : memref<196x154xf32, #tpu.memory_space<vmem>>, vector<1x154xf32>,
    %c0_420 = arith.constant 0 : index
    %c2_421 = arith.constant 2 : index
    %c16_422 = arith.constant 16 : index
    %525 = vector.load %arg1[%c0_420, %c2_421, %c16_422] : memref<1x4x256xf32, #tpu.memory_space<vmem>>, vector<1x1x154xf32>
    %526 = vector.shape_cast %525 : vector<1x1x154xf32> to vector<154xf32>
    %c105 = arith.constant 105 : index
    %c0_423 = arith.constant 0 : index
    %527 = vector.load %arg7[%c105, %c0_423] : memref<196x154xf32, #tpu.memory_space<vmem>>, vector<1x154xf32>
    %528 = vector.shape_cast %527 : vector<1x154xf32> to vector<154xf32>
    %529 = vector.shape_cast %526 : vector<154xf32> to vector<1x154xf32>
    tpu.vector_store %arg7[%c105, %c0_423], %529 {strides = array<i32>} : memref<196x154xf32, #tpu.memory_space<vmem>>, vector<1x154xf32>,
    %c0_424 = arith.constant 0 : index
    %c2_425 = arith.constant 2 : index
    %c17_426 = arith.constant 17 : index
    %530 = vector.load %arg1[%c0_424, %c2_425, %c17_426] : memref<1x4x256xf32, #tpu.memory_space<vmem>>, vector<1x1x154xf32>
    %531 = vector.shape_cast %530 : vector<1x1x154xf32> to vector<154xf32>
    %c106 = arith.constant 106 : index
    %c0_427 = arith.constant 0 : index
    %532 = vector.load %arg7[%c106, %c0_427] : memref<196x154xf32, #tpu.memory_space<vmem>>, vector<1x154xf32>
    %533 = vector.shape_cast %532 : vector<1x154xf32> to vector<154xf32>
    %534 = vector.shape_cast %531 : vector<154xf32> to vector<1x154xf32>
    tpu.vector_store %arg7[%c106, %c0_427], %534 {strides = array<i32>} : memref<196x154xf32, #tpu.memory_space<vmem>>, vector<1x154xf32>,
    %c0_428 = arith.constant 0 : index
    %c2_429 = arith.constant 2 : index
    %c18_430 = arith.constant 18 : index
    %535 = vector.load %arg1[%c0_428, %c2_429, %c18_430] : memref<1x4x256xf32, #tpu.memory_space<vmem>>, vector<1x1x154xf32>
    %536 = vector.shape_cast %535 : vector<1x1x154xf32> to vector<154xf32>
    %c107 = arith.constant 107 : index
    %c0_431 = arith.constant 0 : index
    %537 = vector.load %arg7[%c107, %c0_431] : memref<196x154xf32, #tpu.memory_space<vmem>>, vector<1x154xf32>
    %538 = vector.shape_cast %537 : vector<1x154xf32> to vector<154xf32>
    %539 = vector.shape_cast %536 : vector<154xf32> to vector<1x154xf32>
    tpu.vector_store %arg7[%c107, %c0_431], %539 {strides = array<i32>} : memref<196x154xf32, #tpu.memory_space<vmem>>, vector<1x154xf32>,
    %c0_432 = arith.constant 0 : index
    %c2_433 = arith.constant 2 : index
    %c19_434 = arith.constant 19 : index
    %540 = vector.load %arg1[%c0_432, %c2_433, %c19_434] : memref<1x4x256xf32, #tpu.memory_space<vmem>>, vector<1x1x154xf32>
    %541 = vector.shape_cast %540 : vector<1x1x154xf32> to vector<154xf32>
    %c108 = arith.constant 108 : index
    %c0_435 = arith.constant 0 : index
    %542 = vector.load %arg7[%c108, %c0_435] : memref<196x154xf32, #tpu.memory_space<vmem>>, vector<1x154xf32>
    %543 = vector.shape_cast %542 : vector<1x154xf32> to vector<154xf32>
    %544 = vector.shape_cast %541 : vector<154xf32> to vector<1x154xf32>
    tpu.vector_store %arg7[%c108, %c0_435], %544 {strides = array<i32>} : memref<196x154xf32, #tpu.memory_space<vmem>>, vector<1x154xf32>,
    %c0_436 = arith.constant 0 : index
    %c2_437 = arith.constant 2 : index
    %c20_438 = arith.constant 20 : index
    %545 = vector.load %arg1[%c0_436, %c2_437, %c20_438] : memref<1x4x256xf32, #tpu.memory_space<vmem>>, vector<1x1x154xf32>
    %546 = vector.shape_cast %545 : vector<1x1x154xf32> to vector<154xf32>
    %c109 = arith.constant 109 : index
    %c0_439 = arith.constant 0 : index
    %547 = vector.load %arg7[%c109, %c0_439] : memref<196x154xf32, #tpu.memory_space<vmem>>, vector<1x154xf32>
    %548 = vector.shape_cast %547 : vector<1x154xf32> to vector<154xf32>
    %549 = vector.shape_cast %546 : vector<154xf32> to vector<1x154xf32>
    tpu.vector_store %arg7[%c109, %c0_439], %549 {strides = array<i32>} : memref<196x154xf32, #tpu.memory_space<vmem>>, vector<1x154xf32>,
    %c0_440 = arith.constant 0 : index
    %c2_441 = arith.constant 2 : index
    %c21_442 = arith.constant 21 : index
    %550 = vector.load %arg1[%c0_440, %c2_441, %c21_442] : memref<1x4x256xf32, #tpu.memory_space<vmem>>, vector<1x1x154xf32>
    %551 = vector.shape_cast %550 : vector<1x1x154xf32> to vector<154xf32>
    %c110 = arith.constant 110 : index
    %c0_443 = arith.constant 0 : index
    %552 = vector.load %arg7[%c110, %c0_443] : memref<196x154xf32, #tpu.memory_space<vmem>>, vector<1x154xf32>
    %553 = vector.shape_cast %552 : vector<1x154xf32> to vector<154xf32>
    %554 = vector.shape_cast %551 : vector<154xf32> to vector<1x154xf32>
    tpu.vector_store %arg7[%c110, %c0_443], %554 {strides = array<i32>} : memref<196x154xf32, #tpu.memory_space<vmem>>, vector<1x154xf32>,
    %c0_444 = arith.constant 0 : index
    %c2_445 = arith.constant 2 : index
    %c22_446 = arith.constant 22 : index
    %555 = vector.load %arg1[%c0_444, %c2_445, %c22_446] : memref<1x4x256xf32, #tpu.memory_space<vmem>>, vector<1x1x154xf32>
    %556 = vector.shape_cast %555 : vector<1x1x154xf32> to vector<154xf32>
    %c111 = arith.constant 111 : index
    %c0_447 = arith.constant 0 : index
    %557 = vector.load %arg7[%c111, %c0_447] : memref<196x154xf32, #tpu.memory_space<vmem>>, vector<1x154xf32>
    %558 = vector.shape_cast %557 : vector<1x154xf32> to vector<154xf32>
    %559 = vector.shape_cast %556 : vector<154xf32> to vector<1x154xf32>
    tpu.vector_store %arg7[%c111, %c0_447], %559 {strides = array<i32>} : memref<196x154xf32, #tpu.memory_space<vmem>>, vector<1x154xf32>,
    %c0_448 = arith.constant 0 : index
    %c2_449 = arith.constant 2 : index
    %c32_450 = arith.constant 32 : index
    %560 = vector.load %arg1[%c0_448, %c2_449, %c32_450] : memref<1x4x256xf32, #tpu.memory_space<vmem>>, vector<1x1x154xf32>
    %561 = vector.shape_cast %560 : vector<1x1x154xf32> to vector<154xf32>
    %c112 = arith.constant 112 : index
    %c0_451 = arith.constant 0 : index
    %562 = vector.load %arg7[%c112, %c0_451] : memref<196x154xf32, #tpu.memory_space<vmem>>, vector<1x154xf32>
    %563 = vector.shape_cast %562 : vector<1x154xf32> to vector<154xf32>
    %564 = vector.shape_cast %561 : vector<154xf32> to vector<1x154xf32>
    tpu.vector_store %arg7[%c112, %c0_451], %564 {strides = array<i32>} : memref<196x154xf32, #tpu.memory_space<vmem>>, vector<1x154xf32>,
    %c0_452 = arith.constant 0 : index
    %c2_453 = arith.constant 2 : index
    %c33_454 = arith.constant 33 : index
    %565 = vector.load %arg1[%c0_452, %c2_453, %c33_454] : memref<1x4x256xf32, #tpu.memory_space<vmem>>, vector<1x1x154xf32>
    %566 = vector.shape_cast %565 : vector<1x1x154xf32> to vector<154xf32>
    %c113 = arith.constant 113 : index
    %c0_455 = arith.constant 0 : index
    %567 = vector.load %arg7[%c113, %c0_455] : memref<196x154xf32, #tpu.memory_space<vmem>>, vector<1x154xf32>
    %568 = vector.shape_cast %567 : vector<1x154xf32> to vector<154xf32>
    %569 = vector.shape_cast %566 : vector<154xf32> to vector<1x154xf32>
    tpu.vector_store %arg7[%c113, %c0_455], %569 {strides = array<i32>} : memref<196x154xf32, #tpu.memory_space<vmem>>, vector<1x154xf32>,
    %c0_456 = arith.constant 0 : index
    %c2_457 = arith.constant 2 : index
    %c34_458 = arith.constant 34 : index
    %570 = vector.load %arg1[%c0_456, %c2_457, %c34_458] : memref<1x4x256xf32, #tpu.memory_space<vmem>>, vector<1x1x154xf32>
    %571 = vector.shape_cast %570 : vector<1x1x154xf32> to vector<154xf32>
    %c114 = arith.constant 114 : index
    %c0_459 = arith.constant 0 : index
    %572 = vector.load %arg7[%c114, %c0_459] : memref<196x154xf32, #tpu.memory_space<vmem>>, vector<1x154xf32>
    %573 = vector.shape_cast %572 : vector<1x154xf32> to vector<154xf32>
    %574 = vector.shape_cast %571 : vector<154xf32> to vector<1x154xf32>
    tpu.vector_store %arg7[%c114, %c0_459], %574 {strides = array<i32>} : memref<196x154xf32, #tpu.memory_space<vmem>>, vector<1x154xf32>,
    %c0_460 = arith.constant 0 : index
    %c2_461 = arith.constant 2 : index
    %c35_462 = arith.constant 35 : index
    %575 = vector.load %arg1[%c0_460, %c2_461, %c35_462] : memref<1x4x256xf32, #tpu.memory_space<vmem>>, vector<1x1x154xf32>
    %576 = vector.shape_cast %575 : vector<1x1x154xf32> to vector<154xf32>
    %c115 = arith.constant 115 : index
    %c0_463 = arith.constant 0 : index
    %577 = vector.load %arg7[%c115, %c0_463] : memref<196x154xf32, #tpu.memory_space<vmem>>, vector<1x154xf32>
    %578 = vector.shape_cast %577 : vector<1x154xf32> to vector<154xf32>
    %579 = vector.shape_cast %576 : vector<154xf32> to vector<1x154xf32>
    tpu.vector_store %arg7[%c115, %c0_463], %579 {strides = array<i32>} : memref<196x154xf32, #tpu.memory_space<vmem>>, vector<1x154xf32>,
    %c0_464 = arith.constant 0 : index
    %c2_465 = arith.constant 2 : index
    %c36_466 = arith.constant 36 : index
    %580 = vector.load %arg1[%c0_464, %c2_465, %c36_466] : memref<1x4x256xf32, #tpu.memory_space<vmem>>, vector<1x1x154xf32>
    %581 = vector.shape_cast %580 : vector<1x1x154xf32> to vector<154xf32>
    %c116 = arith.constant 116 : index
    %c0_467 = arith.constant 0 : index
    %582 = vector.load %arg7[%c116, %c0_467] : memref<196x154xf32, #tpu.memory_space<vmem>>, vector<1x154xf32>
    %583 = vector.shape_cast %582 : vector<1x154xf32> to vector<154xf32>
    %584 = vector.shape_cast %581 : vector<154xf32> to vector<1x154xf32>
    tpu.vector_store %arg7[%c116, %c0_467], %584 {strides = array<i32>} : memref<196x154xf32, #tpu.memory_space<vmem>>, vector<1x154xf32>,
    %c0_468 = arith.constant 0 : index
    %c2_469 = arith.constant 2 : index
    %c37_470 = arith.constant 37 : index
    %585 = vector.load %arg1[%c0_468, %c2_469, %c37_470] : memref<1x4x256xf32, #tpu.memory_space<vmem>>, vector<1x1x154xf32>
    %586 = vector.shape_cast %585 : vector<1x1x154xf32> to vector<154xf32>
    %c117 = arith.constant 117 : index
    %c0_471 = arith.constant 0 : index
    %587 = vector.load %arg7[%c117, %c0_471] : memref<196x154xf32, #tpu.memory_space<vmem>>, vector<1x154xf32>
    %588 = vector.shape_cast %587 : vector<1x154xf32> to vector<154xf32>
    %589 = vector.shape_cast %586 : vector<154xf32> to vector<1x154xf32>
    tpu.vector_store %arg7[%c117, %c0_471], %589 {strides = array<i32>} : memref<196x154xf32, #tpu.memory_space<vmem>>, vector<1x154xf32>,
    %c0_472 = arith.constant 0 : index
    %c2_473 = arith.constant 2 : index
    %c38_474 = arith.constant 38 : index
    %590 = vector.load %arg1[%c0_472, %c2_473, %c38_474] : memref<1x4x256xf32, #tpu.memory_space<vmem>>, vector<1x1x154xf32>
    %591 = vector.shape_cast %590 : vector<1x1x154xf32> to vector<154xf32>
    %c118 = arith.constant 118 : index
    %c0_475 = arith.constant 0 : index
    %592 = vector.load %arg7[%c118, %c0_475] : memref<196x154xf32, #tpu.memory_space<vmem>>, vector<1x154xf32>
    %593 = vector.shape_cast %592 : vector<1x154xf32> to vector<154xf32>
    %594 = vector.shape_cast %591 : vector<154xf32> to vector<1x154xf32>
    tpu.vector_store %arg7[%c118, %c0_475], %594 {strides = array<i32>} : memref<196x154xf32, #tpu.memory_space<vmem>>, vector<1x154xf32>,
    %c0_476 = arith.constant 0 : index
    %c2_477 = arith.constant 2 : index
    %c48_478 = arith.constant 48 : index
    %595 = vector.load %arg1[%c0_476, %c2_477, %c48_478] : memref<1x4x256xf32, #tpu.memory_space<vmem>>, vector<1x1x154xf32>
    %596 = vector.shape_cast %595 : vector<1x1x154xf32> to vector<154xf32>
    %c119 = arith.constant 119 : index
    %c0_479 = arith.constant 0 : index
    %597 = vector.load %arg7[%c119, %c0_479] : memref<196x154xf32, #tpu.memory_space<vmem>>, vector<1x154xf32>
    %598 = vector.shape_cast %597 : vector<1x154xf32> to vector<154xf32>
    %599 = vector.shape_cast %596 : vector<154xf32> to vector<1x154xf32>
    tpu.vector_store %arg7[%c119, %c0_479], %599 {strides = array<i32>} : memref<196x154xf32, #tpu.memory_space<vmem>>, vector<1x154xf32>,
    %c0_480 = arith.constant 0 : index
    %c2_481 = arith.constant 2 : index
    %c49_482 = arith.constant 49 : index
    %600 = vector.load %arg1[%c0_480, %c2_481, %c49_482] : memref<1x4x256xf32, #tpu.memory_space<vmem>>, vector<1x1x154xf32>
    %601 = vector.shape_cast %600 : vector<1x1x154xf32> to vector<154xf32>
    %c120 = arith.constant 120 : index
    %c0_483 = arith.constant 0 : index
    %602 = vector.load %arg7[%c120, %c0_483] : memref<196x154xf32, #tpu.memory_space<vmem>>, vector<1x154xf32>
    %603 = vector.shape_cast %602 : vector<1x154xf32> to vector<154xf32>
    %604 = vector.shape_cast %601 : vector<154xf32> to vector<1x154xf32>
    tpu.vector_store %arg7[%c120, %c0_483], %604 {strides = array<i32>} : memref<196x154xf32, #tpu.memory_space<vmem>>, vector<1x154xf32>,
    %c0_484 = arith.constant 0 : index
    %c2_485 = arith.constant 2 : index
    %c50_486 = arith.constant 50 : index
    %605 = vector.load %arg1[%c0_484, %c2_485, %c50_486] : memref<1x4x256xf32, #tpu.memory_space<vmem>>, vector<1x1x154xf32>
    %606 = vector.shape_cast %605 : vector<1x1x154xf32> to vector<154xf32>
    %c121 = arith.constant 121 : index
    %c0_487 = arith.constant 0 : index
    %607 = vector.load %arg7[%c121, %c0_487] : memref<196x154xf32, #tpu.memory_space<vmem>>, vector<1x154xf32>
    %608 = vector.shape_cast %607 : vector<1x154xf32> to vector<154xf32>
    %609 = vector.shape_cast %606 : vector<154xf32> to vector<1x154xf32>
    tpu.vector_store %arg7[%c121, %c0_487], %609 {strides = array<i32>} : memref<196x154xf32, #tpu.memory_space<vmem>>, vector<1x154xf32>,
    %c0_488 = arith.constant 0 : index
    %c2_489 = arith.constant 2 : index
    %c51_490 = arith.constant 51 : index
    %610 = vector.load %arg1[%c0_488, %c2_489, %c51_490] : memref<1x4x256xf32, #tpu.memory_space<vmem>>, vector<1x1x154xf32>
    %611 = vector.shape_cast %610 : vector<1x1x154xf32> to vector<154xf32>
    %c122 = arith.constant 122 : index
    %c0_491 = arith.constant 0 : index
    %612 = vector.load %arg7[%c122, %c0_491] : memref<196x154xf32, #tpu.memory_space<vmem>>, vector<1x154xf32>
    %613 = vector.shape_cast %612 : vector<1x154xf32> to vector<154xf32>
    %614 = vector.shape_cast %611 : vector<154xf32> to vector<1x154xf32>
    tpu.vector_store %arg7[%c122, %c0_491], %614 {strides = array<i32>} : memref<196x154xf32, #tpu.memory_space<vmem>>, vector<1x154xf32>,
    %c0_492 = arith.constant 0 : index
    %c2_493 = arith.constant 2 : index
    %c52_494 = arith.constant 52 : index
    %615 = vector.load %arg1[%c0_492, %c2_493, %c52_494] : memref<1x4x256xf32, #tpu.memory_space<vmem>>, vector<1x1x154xf32>
    %616 = vector.shape_cast %615 : vector<1x1x154xf32> to vector<154xf32>
    %c123 = arith.constant 123 : index
    %c0_495 = arith.constant 0 : index
    %617 = vector.load %arg7[%c123, %c0_495] : memref<196x154xf32, #tpu.memory_space<vmem>>, vector<1x154xf32>
    %618 = vector.shape_cast %617 : vector<1x154xf32> to vector<154xf32>
    %619 = vector.shape_cast %616 : vector<154xf32> to vector<1x154xf32>
    tpu.vector_store %arg7[%c123, %c0_495], %619 {strides = array<i32>} : memref<196x154xf32, #tpu.memory_space<vmem>>, vector<1x154xf32>,
    %c0_496 = arith.constant 0 : index
    %c2_497 = arith.constant 2 : index
    %c53_498 = arith.constant 53 : index
    %620 = vector.load %arg1[%c0_496, %c2_497, %c53_498] : memref<1x4x256xf32, #tpu.memory_space<vmem>>, vector<1x1x154xf32>
    %621 = vector.shape_cast %620 : vector<1x1x154xf32> to vector<154xf32>
    %c124 = arith.constant 124 : index
    %c0_499 = arith.constant 0 : index
    %622 = vector.load %arg7[%c124, %c0_499] : memref<196x154xf32, #tpu.memory_space<vmem>>, vector<1x154xf32>
    %623 = vector.shape_cast %622 : vector<1x154xf32> to vector<154xf32>
    %624 = vector.shape_cast %621 : vector<154xf32> to vector<1x154xf32>
    tpu.vector_store %arg7[%c124, %c0_499], %624 {strides = array<i32>} : memref<196x154xf32, #tpu.memory_space<vmem>>, vector<1x154xf32>,
    %c0_500 = arith.constant 0 : index
    %c2_501 = arith.constant 2 : index
    %c54_502 = arith.constant 54 : index
    %625 = vector.load %arg1[%c0_500, %c2_501, %c54_502] : memref<1x4x256xf32, #tpu.memory_space<vmem>>, vector<1x1x154xf32>
    %626 = vector.shape_cast %625 : vector<1x1x154xf32> to vector<154xf32>
    %c125 = arith.constant 125 : index
    %c0_503 = arith.constant 0 : index
    %627 = vector.load %arg7[%c125, %c0_503] : memref<196x154xf32, #tpu.memory_space<vmem>>, vector<1x154xf32>
    %628 = vector.shape_cast %627 : vector<1x154xf32> to vector<154xf32>
    %629 = vector.shape_cast %626 : vector<154xf32> to vector<1x154xf32>
    tpu.vector_store %arg7[%c125, %c0_503], %629 {strides = array<i32>} : memref<196x154xf32, #tpu.memory_space<vmem>>, vector<1x154xf32>,
    %c0_504 = arith.constant 0 : index
    %c2_505 = arith.constant 2 : index
    %c64_506 = arith.constant 64 : index
    %630 = vector.load %arg1[%c0_504, %c2_505, %c64_506] : memref<1x4x256xf32, #tpu.memory_space<vmem>>, vector<1x1x154xf32>
    %631 = vector.shape_cast %630 : vector<1x1x154xf32> to vector<154xf32>
    %c126 = arith.constant 126 : index
    %c0_507 = arith.constant 0 : index
    %632 = vector.load %arg7[%c126, %c0_507] : memref<196x154xf32, #tpu.memory_space<vmem>>, vector<1x154xf32>
    %633 = vector.shape_cast %632 : vector<1x154xf32> to vector<154xf32>
    %634 = vector.shape_cast %631 : vector<154xf32> to vector<1x154xf32>
    tpu.vector_store %arg7[%c126, %c0_507], %634 {strides = array<i32>} : memref<196x154xf32, #tpu.memory_space<vmem>>, vector<1x154xf32>,
    %c0_508 = arith.constant 0 : index
    %c2_509 = arith.constant 2 : index
    %c65_510 = arith.constant 65 : index
    %635 = vector.load %arg1[%c0_508, %c2_509, %c65_510] : memref<1x4x256xf32, #tpu.memory_space<vmem>>, vector<1x1x154xf32>
    %636 = vector.shape_cast %635 : vector<1x1x154xf32> to vector<154xf32>
    %c127 = arith.constant 127 : index
    %c0_511 = arith.constant 0 : index
    %637 = vector.load %arg7[%c127, %c0_511] : memref<196x154xf32, #tpu.memory_space<vmem>>, vector<1x154xf32>
    %638 = vector.shape_cast %637 : vector<1x154xf32> to vector<154xf32>
    %639 = vector.shape_cast %636 : vector<154xf32> to vector<1x154xf32>
    tpu.vector_store %arg7[%c127, %c0_511], %639 {strides = array<i32>} : memref<196x154xf32, #tpu.memory_space<vmem>>, vector<1x154xf32>,
    %c0_512 = arith.constant 0 : index
    %c2_513 = arith.constant 2 : index
    %c66_514 = arith.constant 66 : index
    %640 = vector.load %arg1[%c0_512, %c2_513, %c66_514] : memref<1x4x256xf32, #tpu.memory_space<vmem>>, vector<1x1x154xf32>
    %641 = vector.shape_cast %640 : vector<1x1x154xf32> to vector<154xf32>
    %c128 = arith.constant 128 : index
    %c0_515 = arith.constant 0 : index
    %642 = vector.load %arg7[%c128, %c0_515] : memref<196x154xf32, #tpu.memory_space<vmem>>, vector<1x154xf32>
    %643 = vector.shape_cast %642 : vector<1x154xf32> to vector<154xf32>
    %644 = vector.shape_cast %641 : vector<154xf32> to vector<1x154xf32>
    tpu.vector_store %arg7[%c128, %c0_515], %644 {strides = array<i32>} : memref<196x154xf32, #tpu.memory_space<vmem>>, vector<1x154xf32>,
    %c0_516 = arith.constant 0 : index
    %c2_517 = arith.constant 2 : index
    %c67_518 = arith.constant 67 : index
    %645 = vector.load %arg1[%c0_516, %c2_517, %c67_518] : memref<1x4x256xf32, #tpu.memory_space<vmem>>, vector<1x1x154xf32>
    %646 = vector.shape_cast %645 : vector<1x1x154xf32> to vector<154xf32>
    %c129 = arith.constant 129 : index
    %c0_519 = arith.constant 0 : index
    %647 = vector.load %arg7[%c129, %c0_519] : memref<196x154xf32, #tpu.memory_space<vmem>>, vector<1x154xf32>
    %648 = vector.shape_cast %647 : vector<1x154xf32> to vector<154xf32>
    %649 = vector.shape_cast %646 : vector<154xf32> to vector<1x154xf32>
    tpu.vector_store %arg7[%c129, %c0_519], %649 {strides = array<i32>} : memref<196x154xf32, #tpu.memory_space<vmem>>, vector<1x154xf32>,
    %c0_520 = arith.constant 0 : index
    %c2_521 = arith.constant 2 : index
    %c68_522 = arith.constant 68 : index
    %650 = vector.load %arg1[%c0_520, %c2_521, %c68_522] : memref<1x4x256xf32, #tpu.memory_space<vmem>>, vector<1x1x154xf32>
    %651 = vector.shape_cast %650 : vector<1x1x154xf32> to vector<154xf32>
    %c130 = arith.constant 130 : index
    %c0_523 = arith.constant 0 : index
    %652 = vector.load %arg7[%c130, %c0_523] : memref<196x154xf32, #tpu.memory_space<vmem>>, vector<1x154xf32>
    %653 = vector.shape_cast %652 : vector<1x154xf32> to vector<154xf32>
    %654 = vector.shape_cast %651 : vector<154xf32> to vector<1x154xf32>
    tpu.vector_store %arg7[%c130, %c0_523], %654 {strides = array<i32>} : memref<196x154xf32, #tpu.memory_space<vmem>>, vector<1x154xf32>,
    %c0_524 = arith.constant 0 : index
    %c2_525 = arith.constant 2 : index
    %c69_526 = arith.constant 69 : index
    %655 = vector.load %arg1[%c0_524, %c2_525, %c69_526] : memref<1x4x256xf32, #tpu.memory_space<vmem>>, vector<1x1x154xf32>
    %656 = vector.shape_cast %655 : vector<1x1x154xf32> to vector<154xf32>
    %c131 = arith.constant 131 : index
    %c0_527 = arith.constant 0 : index
    %657 = vector.load %arg7[%c131, %c0_527] : memref<196x154xf32, #tpu.memory_space<vmem>>, vector<1x154xf32>
    %658 = vector.shape_cast %657 : vector<1x154xf32> to vector<154xf32>
    %659 = vector.shape_cast %656 : vector<154xf32> to vector<1x154xf32>
    tpu.vector_store %arg7[%c131, %c0_527], %659 {strides = array<i32>} : memref<196x154xf32, #tpu.memory_space<vmem>>, vector<1x154xf32>,
    %c0_528 = arith.constant 0 : index
    %c2_529 = arith.constant 2 : index
    %c70_530 = arith.constant 70 : index
    %660 = vector.load %arg1[%c0_528, %c2_529, %c70_530] : memref<1x4x256xf32, #tpu.memory_space<vmem>>, vector<1x1x154xf32>
    %661 = vector.shape_cast %660 : vector<1x1x154xf32> to vector<154xf32>
    %c132 = arith.constant 132 : index
    %c0_531 = arith.constant 0 : index
    %662 = vector.load %arg7[%c132, %c0_531] : memref<196x154xf32, #tpu.memory_space<vmem>>, vector<1x154xf32>
    %663 = vector.shape_cast %662 : vector<1x154xf32> to vector<154xf32>
    %664 = vector.shape_cast %661 : vector<154xf32> to vector<1x154xf32>
    tpu.vector_store %arg7[%c132, %c0_531], %664 {strides = array<i32>} : memref<196x154xf32, #tpu.memory_space<vmem>>, vector<1x154xf32>,
    %c0_532 = arith.constant 0 : index
    %c2_533 = arith.constant 2 : index
    %c80_534 = arith.constant 80 : index
    %665 = vector.load %arg1[%c0_532, %c2_533, %c80_534] : memref<1x4x256xf32, #tpu.memory_space<vmem>>, vector<1x1x154xf32>
    %666 = vector.shape_cast %665 : vector<1x1x154xf32> to vector<154xf32>
    %c133 = arith.constant 133 : index
    %c0_535 = arith.constant 0 : index
    %667 = vector.load %arg7[%c133, %c0_535] : memref<196x154xf32, #tpu.memory_space<vmem>>, vector<1x154xf32>
    %668 = vector.shape_cast %667 : vector<1x154xf32> to vector<154xf32>
    %669 = vector.shape_cast %666 : vector<154xf32> to vector<1x154xf32>
    tpu.vector_store %arg7[%c133, %c0_535], %669 {strides = array<i32>} : memref<196x154xf32, #tpu.memory_space<vmem>>, vector<1x154xf32>,
    %c0_536 = arith.constant 0 : index
    %c2_537 = arith.constant 2 : index
    %c81_538 = arith.constant 81 : index
    %670 = vector.load %arg1[%c0_536, %c2_537, %c81_538] : memref<1x4x256xf32, #tpu.memory_space<vmem>>, vector<1x1x154xf32>
    %671 = vector.shape_cast %670 : vector<1x1x154xf32> to vector<154xf32>
    %c134 = arith.constant 134 : index
    %c0_539 = arith.constant 0 : index
    %672 = vector.load %arg7[%c134, %c0_539] : memref<196x154xf32, #tpu.memory_space<vmem>>, vector<1x154xf32>
    %673 = vector.shape_cast %672 : vector<1x154xf32> to vector<154xf32>
    %674 = vector.shape_cast %671 : vector<154xf32> to vector<1x154xf32>
    tpu.vector_store %arg7[%c134, %c0_539], %674 {strides = array<i32>} : memref<196x154xf32, #tpu.memory_space<vmem>>, vector<1x154xf32>,
    %c0_540 = arith.constant 0 : index
    %c2_541 = arith.constant 2 : index
    %c82_542 = arith.constant 82 : index
    %675 = vector.load %arg1[%c0_540, %c2_541, %c82_542] : memref<1x4x256xf32, #tpu.memory_space<vmem>>, vector<1x1x154xf32>
    %676 = vector.shape_cast %675 : vector<1x1x154xf32> to vector<154xf32>
    %c135 = arith.constant 135 : index
    %c0_543 = arith.constant 0 : index
    %677 = vector.load %arg7[%c135, %c0_543] : memref<196x154xf32, #tpu.memory_space<vmem>>, vector<1x154xf32>
    %678 = vector.shape_cast %677 : vector<1x154xf32> to vector<154xf32>
    %679 = vector.shape_cast %676 : vector<154xf32> to vector<1x154xf32>
    tpu.vector_store %arg7[%c135, %c0_543], %679 {strides = array<i32>} : memref<196x154xf32, #tpu.memory_space<vmem>>, vector<1x154xf32>,
    %c0_544 = arith.constant 0 : index
    %c2_545 = arith.constant 2 : index
    %c83_546 = arith.constant 83 : index
    %680 = vector.load %arg1[%c0_544, %c2_545, %c83_546] : memref<1x4x256xf32, #tpu.memory_space<vmem>>, vector<1x1x154xf32>
    %681 = vector.shape_cast %680 : vector<1x1x154xf32> to vector<154xf32>
    %c136 = arith.constant 136 : index
    %c0_547 = arith.constant 0 : index
    %682 = vector.load %arg7[%c136, %c0_547] : memref<196x154xf32, #tpu.memory_space<vmem>>, vector<1x154xf32>
    %683 = vector.shape_cast %682 : vector<1x154xf32> to vector<154xf32>
    %684 = vector.shape_cast %681 : vector<154xf32> to vector<1x154xf32>
    tpu.vector_store %arg7[%c136, %c0_547], %684 {strides = array<i32>} : memref<196x154xf32, #tpu.memory_space<vmem>>, vector<1x154xf32>,
    %c0_548 = arith.constant 0 : index
    %c2_549 = arith.constant 2 : index
    %c84_550 = arith.constant 84 : index
    %685 = vector.load %arg1[%c0_548, %c2_549, %c84_550] : memref<1x4x256xf32, #tpu.memory_space<vmem>>, vector<1x1x154xf32>
    %686 = vector.shape_cast %685 : vector<1x1x154xf32> to vector<154xf32>
    %c137 = arith.constant 137 : index
    %c0_551 = arith.constant 0 : index
    %687 = vector.load %arg7[%c137, %c0_551] : memref<196x154xf32, #tpu.memory_space<vmem>>, vector<1x154xf32>
    %688 = vector.shape_cast %687 : vector<1x154xf32> to vector<154xf32>
    %689 = vector.shape_cast %686 : vector<154xf32> to vector<1x154xf32>
    tpu.vector_store %arg7[%c137, %c0_551], %689 {strides = array<i32>} : memref<196x154xf32, #tpu.memory_space<vmem>>, vector<1x154xf32>,
    %c0_552 = arith.constant 0 : index
    %c2_553 = arith.constant 2 : index
    %c85_554 = arith.constant 85 : index
    %690 = vector.load %arg1[%c0_552, %c2_553, %c85_554] : memref<1x4x256xf32, #tpu.memory_space<vmem>>, vector<1x1x154xf32>
    %691 = vector.shape_cast %690 : vector<1x1x154xf32> to vector<154xf32>
    %c138 = arith.constant 138 : index
    %c0_555 = arith.constant 0 : index
    %692 = vector.load %arg7[%c138, %c0_555] : memref<196x154xf32, #tpu.memory_space<vmem>>, vector<1x154xf32>
    %693 = vector.shape_cast %692 : vector<1x154xf32> to vector<154xf32>
    %694 = vector.shape_cast %691 : vector<154xf32> to vector<1x154xf32>
    tpu.vector_store %arg7[%c138, %c0_555], %694 {strides = array<i32>} : memref<196x154xf32, #tpu.memory_space<vmem>>, vector<1x154xf32>,
    %c0_556 = arith.constant 0 : index
    %c2_557 = arith.constant 2 : index
    %c86_558 = arith.constant 86 : index
    %695 = vector.load %arg1[%c0_556, %c2_557, %c86_558] : memref<1x4x256xf32, #tpu.memory_space<vmem>>, vector<1x1x154xf32>
    %696 = vector.shape_cast %695 : vector<1x1x154xf32> to vector<154xf32>
    %c139 = arith.constant 139 : index
    %c0_559 = arith.constant 0 : index
    %697 = vector.load %arg7[%c139, %c0_559] : memref<196x154xf32, #tpu.memory_space<vmem>>, vector<1x154xf32>
    %698 = vector.shape_cast %697 : vector<1x154xf32> to vector<154xf32>
    %699 = vector.shape_cast %696 : vector<154xf32> to vector<1x154xf32>
    tpu.vector_store %arg7[%c139, %c0_559], %699 {strides = array<i32>} : memref<196x154xf32, #tpu.memory_space<vmem>>, vector<1x154xf32>,
    %c0_560 = arith.constant 0 : index
    %c2_561 = arith.constant 2 : index
    %c96_562 = arith.constant 96 : index
    %700 = vector.load %arg1[%c0_560, %c2_561, %c96_562] : memref<1x4x256xf32, #tpu.memory_space<vmem>>, vector<1x1x154xf32>
    %701 = vector.shape_cast %700 : vector<1x1x154xf32> to vector<154xf32>
    %c140 = arith.constant 140 : index
    %c0_563 = arith.constant 0 : index
    %702 = vector.load %arg7[%c140, %c0_563] : memref<196x154xf32, #tpu.memory_space<vmem>>, vector<1x154xf32>
    %703 = vector.shape_cast %702 : vector<1x154xf32> to vector<154xf32>
    %704 = vector.shape_cast %701 : vector<154xf32> to vector<1x154xf32>
    tpu.vector_store %arg7[%c140, %c0_563], %704 {strides = array<i32>} : memref<196x154xf32, #tpu.memory_space<vmem>>, vector<1x154xf32>,
    %c0_564 = arith.constant 0 : index
    %c2_565 = arith.constant 2 : index
    %c97_566 = arith.constant 97 : index
    %705 = vector.load %arg1[%c0_564, %c2_565, %c97_566] : memref<1x4x256xf32, #tpu.memory_space<vmem>>, vector<1x1x154xf32>
    %706 = vector.shape_cast %705 : vector<1x1x154xf32> to vector<154xf32>
    %c141 = arith.constant 141 : index
    %c0_567 = arith.constant 0 : index
    %707 = vector.load %arg7[%c141, %c0_567] : memref<196x154xf32, #tpu.memory_space<vmem>>, vector<1x154xf32>
    %708 = vector.shape_cast %707 : vector<1x154xf32> to vector<154xf32>
    %709 = vector.shape_cast %706 : vector<154xf32> to vector<1x154xf32>
    tpu.vector_store %arg7[%c141, %c0_567], %709 {strides = array<i32>} : memref<196x154xf32, #tpu.memory_space<vmem>>, vector<1x154xf32>,
    %c0_568 = arith.constant 0 : index
    %c2_569 = arith.constant 2 : index
    %c98_570 = arith.constant 98 : index
    %710 = vector.load %arg1[%c0_568, %c2_569, %c98_570] : memref<1x4x256xf32, #tpu.memory_space<vmem>>, vector<1x1x154xf32>
    %711 = vector.shape_cast %710 : vector<1x1x154xf32> to vector<154xf32>
    %c142 = arith.constant 142 : index
    %c0_571 = arith.constant 0 : index
    %712 = vector.load %arg7[%c142, %c0_571] : memref<196x154xf32, #tpu.memory_space<vmem>>, vector<1x154xf32>
    %713 = vector.shape_cast %712 : vector<1x154xf32> to vector<154xf32>
    %714 = vector.shape_cast %711 : vector<154xf32> to vector<1x154xf32>
    tpu.vector_store %arg7[%c142, %c0_571], %714 {strides = array<i32>} : memref<196x154xf32, #tpu.memory_space<vmem>>, vector<1x154xf32>,
    %c0_572 = arith.constant 0 : index
    %c2_573 = arith.constant 2 : index
    %c99_574 = arith.constant 99 : index
    %715 = vector.load %arg1[%c0_572, %c2_573, %c99_574] : memref<1x4x256xf32, #tpu.memory_space<vmem>>, vector<1x1x154xf32>
    %716 = vector.shape_cast %715 : vector<1x1x154xf32> to vector<154xf32>
    %c143 = arith.constant 143 : index
    %c0_575 = arith.constant 0 : index
    %717 = vector.load %arg7[%c143, %c0_575] : memref<196x154xf32, #tpu.memory_space<vmem>>, vector<1x154xf32>
    %718 = vector.shape_cast %717 : vector<1x154xf32> to vector<154xf32>
    %719 = vector.shape_cast %716 : vector<154xf32> to vector<1x154xf32>
    tpu.vector_store %arg7[%c143, %c0_575], %719 {strides = array<i32>} : memref<196x154xf32, #tpu.memory_space<vmem>>, vector<1x154xf32>,
    %c0_576 = arith.constant 0 : index
    %c2_577 = arith.constant 2 : index
    %c100_578 = arith.constant 100 : index
    %720 = vector.load %arg1[%c0_576, %c2_577, %c100_578] : memref<1x4x256xf32, #tpu.memory_space<vmem>>, vector<1x1x154xf32>
    %721 = vector.shape_cast %720 : vector<1x1x154xf32> to vector<154xf32>
    %c144 = arith.constant 144 : index
    %c0_579 = arith.constant 0 : index
    %722 = vector.load %arg7[%c144, %c0_579] : memref<196x154xf32, #tpu.memory_space<vmem>>, vector<1x154xf32>
    %723 = vector.shape_cast %722 : vector<1x154xf32> to vector<154xf32>
    %724 = vector.shape_cast %721 : vector<154xf32> to vector<1x154xf32>
    tpu.vector_store %arg7[%c144, %c0_579], %724 {strides = array<i32>} : memref<196x154xf32, #tpu.memory_space<vmem>>, vector<1x154xf32>,
    %c0_580 = arith.constant 0 : index
    %c2_581 = arith.constant 2 : index
    %c101_582 = arith.constant 101 : index
    %725 = vector.load %arg1[%c0_580, %c2_581, %c101_582] : memref<1x4x256xf32, #tpu.memory_space<vmem>>, vector<1x1x154xf32>
    %726 = vector.shape_cast %725 : vector<1x1x154xf32> to vector<154xf32>
    %c145 = arith.constant 145 : index
    %c0_583 = arith.constant 0 : index
    %727 = vector.load %arg7[%c145, %c0_583] : memref<196x154xf32, #tpu.memory_space<vmem>>, vector<1x154xf32>
    %728 = vector.shape_cast %727 : vector<1x154xf32> to vector<154xf32>
    %729 = vector.shape_cast %726 : vector<154xf32> to vector<1x154xf32>
    tpu.vector_store %arg7[%c145, %c0_583], %729 {strides = array<i32>} : memref<196x154xf32, #tpu.memory_space<vmem>>, vector<1x154xf32>,
    %c0_584 = arith.constant 0 : index
    %c2_585 = arith.constant 2 : index
    %c102_586 = arith.constant 102 : index
    %730 = vector.load %arg1[%c0_584, %c2_585, %c102_586] : memref<1x4x256xf32, #tpu.memory_space<vmem>>, vector<1x1x154xf32>
    %731 = vector.shape_cast %730 : vector<1x1x154xf32> to vector<154xf32>
    %c146 = arith.constant 146 : index
    %c0_587 = arith.constant 0 : index
    %732 = vector.load %arg7[%c146, %c0_587] : memref<196x154xf32, #tpu.memory_space<vmem>>, vector<1x154xf32>
    %733 = vector.shape_cast %732 : vector<1x154xf32> to vector<154xf32>
    %734 = vector.shape_cast %731 : vector<154xf32> to vector<1x154xf32>
    tpu.vector_store %arg7[%c146, %c0_587], %734 {strides = array<i32>} : memref<196x154xf32, #tpu.memory_space<vmem>>, vector<1x154xf32>,
    %c0_588 = arith.constant 0 : index
    %c3_589 = arith.constant 3 : index
    %c0_590 = arith.constant 0 : index
    %735 = vector.load %arg1[%c0_588, %c3_589, %c0_590] : memref<1x4x256xf32, #tpu.memory_space<vmem>>, vector<1x1x154xf32>
    %736 = vector.shape_cast %735 : vector<1x1x154xf32> to vector<154xf32>
    %c147 = arith.constant 147 : index
    %c0_591 = arith.constant 0 : index
    %737 = vector.load %arg7[%c147, %c0_591] : memref<196x154xf32, #tpu.memory_space<vmem>>, vector<1x154xf32>
    %738 = vector.shape_cast %737 : vector<1x154xf32> to vector<154xf32>
    %739 = vector.shape_cast %736 : vector<154xf32> to vector<1x154xf32>
    tpu.vector_store %arg7[%c147, %c0_591], %739 {strides = array<i32>} : memref<196x154xf32, #tpu.memory_space<vmem>>, vector<1x154xf32>,
    %c0_592 = arith.constant 0 : index
    %c3_593 = arith.constant 3 : index
    %c1_594 = arith.constant 1 : index
    %740 = vector.load %arg1[%c0_592, %c3_593, %c1_594] : memref<1x4x256xf32, #tpu.memory_space<vmem>>, vector<1x1x154xf32>
    %741 = vector.shape_cast %740 : vector<1x1x154xf32> to vector<154xf32>
    %c148 = arith.constant 148 : index
    %c0_595 = arith.constant 0 : index
    %742 = vector.load %arg7[%c148, %c0_595] : memref<196x154xf32, #tpu.memory_space<vmem>>, vector<1x154xf32>
    %743 = vector.shape_cast %742 : vector<1x154xf32> to vector<154xf32>
    %744 = vector.shape_cast %741 : vector<154xf32> to vector<1x154xf32>
    tpu.vector_store %arg7[%c148, %c0_595], %744 {strides = array<i32>} : memref<196x154xf32, #tpu.memory_space<vmem>>, vector<1x154xf32>,
    %c0_596 = arith.constant 0 : index
    %c3_597 = arith.constant 3 : index
    %c2_598 = arith.constant 2 : index
    %745 = vector.load %arg1[%c0_596, %c3_597, %c2_598] : memref<1x4x256xf32, #tpu.memory_space<vmem>>, vector<1x1x154xf32>
    %746 = vector.shape_cast %745 : vector<1x1x154xf32> to vector<154xf32>
    %c149 = arith.constant 149 : index
    %c0_599 = arith.constant 0 : index
    %747 = vector.load %arg7[%c149, %c0_599] : memref<196x154xf32, #tpu.memory_space<vmem>>, vector<1x154xf32>
    %748 = vector.shape_cast %747 : vector<1x154xf32> to vector<154xf32>
    %749 = vector.shape_cast %746 : vector<154xf32> to vector<1x154xf32>
    tpu.vector_store %arg7[%c149, %c0_599], %749 {strides = array<i32>} : memref<196x154xf32, #tpu.memory_space<vmem>>, vector<1x154xf32>,
    %c0_600 = arith.constant 0 : index
    %c3_601 = arith.constant 3 : index
    %c3_602 = arith.constant 3 : index
    %750 = vector.load %arg1[%c0_600, %c3_601, %c3_602] : memref<1x4x256xf32, #tpu.memory_space<vmem>>, vector<1x1x154xf32>
    %751 = vector.shape_cast %750 : vector<1x1x154xf32> to vector<154xf32>
    %c150 = arith.constant 150 : index
    %c0_603 = arith.constant 0 : index
    %752 = vector.load %arg7[%c150, %c0_603] : memref<196x154xf32, #tpu.memory_space<vmem>>, vector<1x154xf32>
    %753 = vector.shape_cast %752 : vector<1x154xf32> to vector<154xf32>
    %754 = vector.shape_cast %751 : vector<154xf32> to vector<1x154xf32>
    tpu.vector_store %arg7[%c150, %c0_603], %754 {strides = array<i32>} : memref<196x154xf32, #tpu.memory_space<vmem>>, vector<1x154xf32>,
    %c0_604 = arith.constant 0 : index
    %c3_605 = arith.constant 3 : index
    %c4_606 = arith.constant 4 : index
    %755 = vector.load %arg1[%c0_604, %c3_605, %c4_606] : memref<1x4x256xf32, #tpu.memory_space<vmem>>, vector<1x1x154xf32>
    %756 = vector.shape_cast %755 : vector<1x1x154xf32> to vector<154xf32>
    %c151 = arith.constant 151 : index
    %c0_607 = arith.constant 0 : index
    %757 = vector.load %arg7[%c151, %c0_607] : memref<196x154xf32, #tpu.memory_space<vmem>>, vector<1x154xf32>
    %758 = vector.shape_cast %757 : vector<1x154xf32> to vector<154xf32>
    %759 = vector.shape_cast %756 : vector<154xf32> to vector<1x154xf32>
    tpu.vector_store %arg7[%c151, %c0_607], %759 {strides = array<i32>} : memref<196x154xf32, #tpu.memory_space<vmem>>, vector<1x154xf32>,
    %c0_608 = arith.constant 0 : index
    %c3_609 = arith.constant 3 : index
    %c5_610 = arith.constant 5 : index
    %760 = vector.load %arg1[%c0_608, %c3_609, %c5_610] : memref<1x4x256xf32, #tpu.memory_space<vmem>>, vector<1x1x154xf32>
    %761 = vector.shape_cast %760 : vector<1x1x154xf32> to vector<154xf32>
    %c152 = arith.constant 152 : index
    %c0_611 = arith.constant 0 : index
    %762 = vector.load %arg7[%c152, %c0_611] : memref<196x154xf32, #tpu.memory_space<vmem>>, vector<1x154xf32>
    %763 = vector.shape_cast %762 : vector<1x154xf32> to vector<154xf32>
    %764 = vector.shape_cast %761 : vector<154xf32> to vector<1x154xf32>
    tpu.vector_store %arg7[%c152, %c0_611], %764 {strides = array<i32>} : memref<196x154xf32, #tpu.memory_space<vmem>>, vector<1x154xf32>,
    %c0_612 = arith.constant 0 : index
    %c3_613 = arith.constant 3 : index
    %c6_614 = arith.constant 6 : index
    %765 = vector.load %arg1[%c0_612, %c3_613, %c6_614] : memref<1x4x256xf32, #tpu.memory_space<vmem>>, vector<1x1x154xf32>
    %766 = vector.shape_cast %765 : vector<1x1x154xf32> to vector<154xf32>
    %c153 = arith.constant 153 : index
    %c0_615 = arith.constant 0 : index
    %767 = vector.load %arg7[%c153, %c0_615] : memref<196x154xf32, #tpu.memory_space<vmem>>, vector<1x154xf32>
    %768 = vector.shape_cast %767 : vector<1x154xf32> to vector<154xf32>
    %769 = vector.shape_cast %766 : vector<154xf32> to vector<1x154xf32>
    tpu.vector_store %arg7[%c153, %c0_615], %769 {strides = array<i32>} : memref<196x154xf32, #tpu.memory_space<vmem>>, vector<1x154xf32>,
    %c0_616 = arith.constant 0 : index
    %c3_617 = arith.constant 3 : index
    %c16_618 = arith.constant 16 : index
    %770 = vector.load %arg1[%c0_616, %c3_617, %c16_618] : memref<1x4x256xf32, #tpu.memory_space<vmem>>, vector<1x1x154xf32>
    %771 = vector.shape_cast %770 : vector<1x1x154xf32> to vector<154xf32>
    %c154 = arith.constant 154 : index
    %c0_619 = arith.constant 0 : index
    %772 = vector.load %arg7[%c154, %c0_619] : memref<196x154xf32, #tpu.memory_space<vmem>>, vector<1x154xf32>
    %773 = vector.shape_cast %772 : vector<1x154xf32> to vector<154xf32>
    %774 = vector.shape_cast %771 : vector<154xf32> to vector<1x154xf32>
    tpu.vector_store %arg7[%c154, %c0_619], %774 {strides = array<i32>} : memref<196x154xf32, #tpu.memory_space<vmem>>, vector<1x154xf32>,
    %c0_620 = arith.constant 0 : index
    %c3_621 = arith.constant 3 : index
    %c17_622 = arith.constant 17 : index
    %775 = vector.load %arg1[%c0_620, %c3_621, %c17_622] : memref<1x4x256xf32, #tpu.memory_space<vmem>>, vector<1x1x154xf32>
    %776 = vector.shape_cast %775 : vector<1x1x154xf32> to vector<154xf32>
    %c155 = arith.constant 155 : index
    %c0_623 = arith.constant 0 : index
    %777 = vector.load %arg7[%c155, %c0_623] : memref<196x154xf32, #tpu.memory_space<vmem>>, vector<1x154xf32>
    %778 = vector.shape_cast %777 : vector<1x154xf32> to vector<154xf32>
    %779 = vector.shape_cast %776 : vector<154xf32> to vector<1x154xf32>
    tpu.vector_store %arg7[%c155, %c0_623], %779 {strides = array<i32>} : memref<196x154xf32, #tpu.memory_space<vmem>>, vector<1x154xf32>,
    %c0_624 = arith.constant 0 : index
    %c3_625 = arith.constant 3 : index
    %c18_626 = arith.constant 18 : index
    %780 = vector.load %arg1[%c0_624, %c3_625, %c18_626] : memref<1x4x256xf32, #tpu.memory_space<vmem>>, vector<1x1x154xf32>
    %781 = vector.shape_cast %780 : vector<1x1x154xf32> to vector<154xf32>
    %c156 = arith.constant 156 : index
    %c0_627 = arith.constant 0 : index
    %782 = vector.load %arg7[%c156, %c0_627] : memref<196x154xf32, #tpu.memory_space<vmem>>, vector<1x154xf32>
    %783 = vector.shape_cast %782 : vector<1x154xf32> to vector<154xf32>
    %784 = vector.shape_cast %781 : vector<154xf32> to vector<1x154xf32>
    tpu.vector_store %arg7[%c156, %c0_627], %784 {strides = array<i32>} : memref<196x154xf32, #tpu.memory_space<vmem>>, vector<1x154xf32>,
    %c0_628 = arith.constant 0 : index
    %c3_629 = arith.constant 3 : index
    %c19_630 = arith.constant 19 : index
    %785 = vector.load %arg1[%c0_628, %c3_629, %c19_630] : memref<1x4x256xf32, #tpu.memory_space<vmem>>, vector<1x1x154xf32>
    %786 = vector.shape_cast %785 : vector<1x1x154xf32> to vector<154xf32>
    %c157 = arith.constant 157 : index
    %c0_631 = arith.constant 0 : index
    %787 = vector.load %arg7[%c157, %c0_631] : memref<196x154xf32, #tpu.memory_space<vmem>>, vector<1x154xf32>
    %788 = vector.shape_cast %787 : vector<1x154xf32> to vector<154xf32>
    %789 = vector.shape_cast %786 : vector<154xf32> to vector<1x154xf32>
    tpu.vector_store %arg7[%c157, %c0_631], %789 {strides = array<i32>} : memref<196x154xf32, #tpu.memory_space<vmem>>, vector<1x154xf32>,
    %c0_632 = arith.constant 0 : index
    %c3_633 = arith.constant 3 : index
    %c20_634 = arith.constant 20 : index
    %790 = vector.load %arg1[%c0_632, %c3_633, %c20_634] : memref<1x4x256xf32, #tpu.memory_space<vmem>>, vector<1x1x154xf32>
    %791 = vector.shape_cast %790 : vector<1x1x154xf32> to vector<154xf32>
    %c158 = arith.constant 158 : index
    %c0_635 = arith.constant 0 : index
    %792 = vector.load %arg7[%c158, %c0_635] : memref<196x154xf32, #tpu.memory_space<vmem>>, vector<1x154xf32>
    %793 = vector.shape_cast %792 : vector<1x154xf32> to vector<154xf32>
    %794 = vector.shape_cast %791 : vector<154xf32> to vector<1x154xf32>
    tpu.vector_store %arg7[%c158, %c0_635], %794 {strides = array<i32>} : memref<196x154xf32, #tpu.memory_space<vmem>>, vector<1x154xf32>,
    %c0_636 = arith.constant 0 : index
    %c3_637 = arith.constant 3 : index
    %c21_638 = arith.constant 21 : index
    %795 = vector.load %arg1[%c0_636, %c3_637, %c21_638] : memref<1x4x256xf32, #tpu.memory_space<vmem>>, vector<1x1x154xf32>
    %796 = vector.shape_cast %795 : vector<1x1x154xf32> to vector<154xf32>
    %c159 = arith.constant 159 : index
    %c0_639 = arith.constant 0 : index
    %797 = vector.load %arg7[%c159, %c0_639] : memref<196x154xf32, #tpu.memory_space<vmem>>, vector<1x154xf32>
    %798 = vector.shape_cast %797 : vector<1x154xf32> to vector<154xf32>
    %799 = vector.shape_cast %796 : vector<154xf32> to vector<1x154xf32>
    tpu.vector_store %arg7[%c159, %c0_639], %799 {strides = array<i32>} : memref<196x154xf32, #tpu.memory_space<vmem>>, vector<1x154xf32>,
    %c0_640 = arith.constant 0 : index
    %c3_641 = arith.constant 3 : index
    %c22_642 = arith.constant 22 : index
    %800 = vector.load %arg1[%c0_640, %c3_641, %c22_642] : memref<1x4x256xf32, #tpu.memory_space<vmem>>, vector<1x1x154xf32>
    %801 = vector.shape_cast %800 : vector<1x1x154xf32> to vector<154xf32>
    %c160 = arith.constant 160 : index
    %c0_643 = arith.constant 0 : index
    %802 = vector.load %arg7[%c160, %c0_643] : memref<196x154xf32, #tpu.memory_space<vmem>>, vector<1x154xf32>
    %803 = vector.shape_cast %802 : vector<1x154xf32> to vector<154xf32>
    %804 = vector.shape_cast %801 : vector<154xf32> to vector<1x154xf32>
    tpu.vector_store %arg7[%c160, %c0_643], %804 {strides = array<i32>} : memref<196x154xf32, #tpu.memory_space<vmem>>, vector<1x154xf32>,
    %c0_644 = arith.constant 0 : index
    %c3_645 = arith.constant 3 : index
    %c32_646 = arith.constant 32 : index
    %805 = vector.load %arg1[%c0_644, %c3_645, %c32_646] : memref<1x4x256xf32, #tpu.memory_space<vmem>>, vector<1x1x154xf32>
    %806 = vector.shape_cast %805 : vector<1x1x154xf32> to vector<154xf32>
    %c161 = arith.constant 161 : index
    %c0_647 = arith.constant 0 : index
    %807 = vector.load %arg7[%c161, %c0_647] : memref<196x154xf32, #tpu.memory_space<vmem>>, vector<1x154xf32>
    %808 = vector.shape_cast %807 : vector<1x154xf32> to vector<154xf32>
    %809 = vector.shape_cast %806 : vector<154xf32> to vector<1x154xf32>
    tpu.vector_store %arg7[%c161, %c0_647], %809 {strides = array<i32>} : memref<196x154xf32, #tpu.memory_space<vmem>>, vector<1x154xf32>,
    %c0_648 = arith.constant 0 : index
    %c3_649 = arith.constant 3 : index
    %c33_650 = arith.constant 33 : index
    %810 = vector.load %arg1[%c0_648, %c3_649, %c33_650] : memref<1x4x256xf32, #tpu.memory_space<vmem>>, vector<1x1x154xf32>
    %811 = vector.shape_cast %810 : vector<1x1x154xf32> to vector<154xf32>
    %c162 = arith.constant 162 : index
    %c0_651 = arith.constant 0 : index
    %812 = vector.load %arg7[%c162, %c0_651] : memref<196x154xf32, #tpu.memory_space<vmem>>, vector<1x154xf32>
    %813 = vector.shape_cast %812 : vector<1x154xf32> to vector<154xf32>
    %814 = vector.shape_cast %811 : vector<154xf32> to vector<1x154xf32>
    tpu.vector_store %arg7[%c162, %c0_651], %814 {strides = array<i32>} : memref<196x154xf32, #tpu.memory_space<vmem>>, vector<1x154xf32>,
    %c0_652 = arith.constant 0 : index
    %c3_653 = arith.constant 3 : index
    %c34_654 = arith.constant 34 : index
    %815 = vector.load %arg1[%c0_652, %c3_653, %c34_654] : memref<1x4x256xf32, #tpu.memory_space<vmem>>, vector<1x1x154xf32>
    %816 = vector.shape_cast %815 : vector<1x1x154xf32> to vector<154xf32>
    %c163 = arith.constant 163 : index
    %c0_655 = arith.constant 0 : index
    %817 = vector.load %arg7[%c163, %c0_655] : memref<196x154xf32, #tpu.memory_space<vmem>>, vector<1x154xf32>
    %818 = vector.shape_cast %817 : vector<1x154xf32> to vector<154xf32>
    %819 = vector.shape_cast %816 : vector<154xf32> to vector<1x154xf32>
    tpu.vector_store %arg7[%c163, %c0_655], %819 {strides = array<i32>} : memref<196x154xf32, #tpu.memory_space<vmem>>, vector<1x154xf32>,
    %c0_656 = arith.constant 0 : index
    %c3_657 = arith.constant 3 : index
    %c35_658 = arith.constant 35 : index
    %820 = vector.load %arg1[%c0_656, %c3_657, %c35_658] : memref<1x4x256xf32, #tpu.memory_space<vmem>>, vector<1x1x154xf32>
    %821 = vector.shape_cast %820 : vector<1x1x154xf32> to vector<154xf32>
    %c164 = arith.constant 164 : index
    %c0_659 = arith.constant 0 : index
    %822 = vector.load %arg7[%c164, %c0_659] : memref<196x154xf32, #tpu.memory_space<vmem>>, vector<1x154xf32>
    %823 = vector.shape_cast %822 : vector<1x154xf32> to vector<154xf32>
    %824 = vector.shape_cast %821 : vector<154xf32> to vector<1x154xf32>
    tpu.vector_store %arg7[%c164, %c0_659], %824 {strides = array<i32>} : memref<196x154xf32, #tpu.memory_space<vmem>>, vector<1x154xf32>,
    %c0_660 = arith.constant 0 : index
    %c3_661 = arith.constant 3 : index
    %c36_662 = arith.constant 36 : index
    %825 = vector.load %arg1[%c0_660, %c3_661, %c36_662] : memref<1x4x256xf32, #tpu.memory_space<vmem>>, vector<1x1x154xf32>
    %826 = vector.shape_cast %825 : vector<1x1x154xf32> to vector<154xf32>
    %c165 = arith.constant 165 : index
    %c0_663 = arith.constant 0 : index
    %827 = vector.load %arg7[%c165, %c0_663] : memref<196x154xf32, #tpu.memory_space<vmem>>, vector<1x154xf32>
    %828 = vector.shape_cast %827 : vector<1x154xf32> to vector<154xf32>
    %829 = vector.shape_cast %826 : vector<154xf32> to vector<1x154xf32>
    tpu.vector_store %arg7[%c165, %c0_663], %829 {strides = array<i32>} : memref<196x154xf32, #tpu.memory_space<vmem>>, vector<1x154xf32>,
    %c0_664 = arith.constant 0 : index
    %c3_665 = arith.constant 3 : index
    %c37_666 = arith.constant 37 : index
    %830 = vector.load %arg1[%c0_664, %c3_665, %c37_666] : memref<1x4x256xf32, #tpu.memory_space<vmem>>, vector<1x1x154xf32>
    %831 = vector.shape_cast %830 : vector<1x1x154xf32> to vector<154xf32>
    %c166 = arith.constant 166 : index
    %c0_667 = arith.constant 0 : index
    %832 = vector.load %arg7[%c166, %c0_667] : memref<196x154xf32, #tpu.memory_space<vmem>>, vector<1x154xf32>
    %833 = vector.shape_cast %832 : vector<1x154xf32> to vector<154xf32>
    %834 = vector.shape_cast %831 : vector<154xf32> to vector<1x154xf32>
    tpu.vector_store %arg7[%c166, %c0_667], %834 {strides = array<i32>} : memref<196x154xf32, #tpu.memory_space<vmem>>, vector<1x154xf32>,
    %c0_668 = arith.constant 0 : index
    %c3_669 = arith.constant 3 : index
    %c38_670 = arith.constant 38 : index
    %835 = vector.load %arg1[%c0_668, %c3_669, %c38_670] : memref<1x4x256xf32, #tpu.memory_space<vmem>>, vector<1x1x154xf32>
    %836 = vector.shape_cast %835 : vector<1x1x154xf32> to vector<154xf32>
    %c167 = arith.constant 167 : index
    %c0_671 = arith.constant 0 : index
    %837 = vector.load %arg7[%c167, %c0_671] : memref<196x154xf32, #tpu.memory_space<vmem>>, vector<1x154xf32>
    %838 = vector.shape_cast %837 : vector<1x154xf32> to vector<154xf32>
    %839 = vector.shape_cast %836 : vector<154xf32> to vector<1x154xf32>
    tpu.vector_store %arg7[%c167, %c0_671], %839 {strides = array<i32>} : memref<196x154xf32, #tpu.memory_space<vmem>>, vector<1x154xf32>,
    %c0_672 = arith.constant 0 : index
    %c3_673 = arith.constant 3 : index
    %c48_674 = arith.constant 48 : index
    %840 = vector.load %arg1[%c0_672, %c3_673, %c48_674] : memref<1x4x256xf32, #tpu.memory_space<vmem>>, vector<1x1x154xf32>
    %841 = vector.shape_cast %840 : vector<1x1x154xf32> to vector<154xf32>
    %c168 = arith.constant 168 : index
    %c0_675 = arith.constant 0 : index
    %842 = vector.load %arg7[%c168, %c0_675] : memref<196x154xf32, #tpu.memory_space<vmem>>, vector<1x154xf32>
    %843 = vector.shape_cast %842 : vector<1x154xf32> to vector<154xf32>
    %844 = vector.shape_cast %841 : vector<154xf32> to vector<1x154xf32>
    tpu.vector_store %arg7[%c168, %c0_675], %844 {strides = array<i32>} : memref<196x154xf32, #tpu.memory_space<vmem>>, vector<1x154xf32>,
    %c0_676 = arith.constant 0 : index
    %c3_677 = arith.constant 3 : index
    %c49_678 = arith.constant 49 : index
    %845 = vector.load %arg1[%c0_676, %c3_677, %c49_678] : memref<1x4x256xf32, #tpu.memory_space<vmem>>, vector<1x1x154xf32>
    %846 = vector.shape_cast %845 : vector<1x1x154xf32> to vector<154xf32>
    %c169 = arith.constant 169 : index
    %c0_679 = arith.constant 0 : index
    %847 = vector.load %arg7[%c169, %c0_679] : memref<196x154xf32, #tpu.memory_space<vmem>>, vector<1x154xf32>
    %848 = vector.shape_cast %847 : vector<1x154xf32> to vector<154xf32>
    %849 = vector.shape_cast %846 : vector<154xf32> to vector<1x154xf32>
    tpu.vector_store %arg7[%c169, %c0_679], %849 {strides = array<i32>} : memref<196x154xf32, #tpu.memory_space<vmem>>, vector<1x154xf32>,
    %c0_680 = arith.constant 0 : index
    %c3_681 = arith.constant 3 : index
    %c50_682 = arith.constant 50 : index
    %850 = vector.load %arg1[%c0_680, %c3_681, %c50_682] : memref<1x4x256xf32, #tpu.memory_space<vmem>>, vector<1x1x154xf32>
    %851 = vector.shape_cast %850 : vector<1x1x154xf32> to vector<154xf32>
    %c170 = arith.constant 170 : index
    %c0_683 = arith.constant 0 : index
    %852 = vector.load %arg7[%c170, %c0_683] : memref<196x154xf32, #tpu.memory_space<vmem>>, vector<1x154xf32>
    %853 = vector.shape_cast %852 : vector<1x154xf32> to vector<154xf32>
    %854 = vector.shape_cast %851 : vector<154xf32> to vector<1x154xf32>
    tpu.vector_store %arg7[%c170, %c0_683], %854 {strides = array<i32>} : memref<196x154xf32, #tpu.memory_space<vmem>>, vector<1x154xf32>,
    %c0_684 = arith.constant 0 : index
    %c3_685 = arith.constant 3 : index
    %c51_686 = arith.constant 51 : index
    %855 = vector.load %arg1[%c0_684, %c3_685, %c51_686] : memref<1x4x256xf32, #tpu.memory_space<vmem>>, vector<1x1x154xf32>
    %856 = vector.shape_cast %855 : vector<1x1x154xf32> to vector<154xf32>
    %c171 = arith.constant 171 : index
    %c0_687 = arith.constant 0 : index
    %857 = vector.load %arg7[%c171, %c0_687] : memref<196x154xf32, #tpu.memory_space<vmem>>, vector<1x154xf32>
    %858 = vector.shape_cast %857 : vector<1x154xf32> to vector<154xf32>
    %859 = vector.shape_cast %856 : vector<154xf32> to vector<1x154xf32>
    tpu.vector_store %arg7[%c171, %c0_687], %859 {strides = array<i32>} : memref<196x154xf32, #tpu.memory_space<vmem>>, vector<1x154xf32>,
    %c0_688 = arith.constant 0 : index
    %c3_689 = arith.constant 3 : index
    %c52_690 = arith.constant 52 : index
    %860 = vector.load %arg1[%c0_688, %c3_689, %c52_690] : memref<1x4x256xf32, #tpu.memory_space<vmem>>, vector<1x1x154xf32>
    %861 = vector.shape_cast %860 : vector<1x1x154xf32> to vector<154xf32>
    %c172 = arith.constant 172 : index
    %c0_691 = arith.constant 0 : index
    %862 = vector.load %arg7[%c172, %c0_691] : memref<196x154xf32, #tpu.memory_space<vmem>>, vector<1x154xf32>
    %863 = vector.shape_cast %862 : vector<1x154xf32> to vector<154xf32>
    %864 = vector.shape_cast %861 : vector<154xf32> to vector<1x154xf32>
    tpu.vector_store %arg7[%c172, %c0_691], %864 {strides = array<i32>} : memref<196x154xf32, #tpu.memory_space<vmem>>, vector<1x154xf32>,
    %c0_692 = arith.constant 0 : index
    %c3_693 = arith.constant 3 : index
    %c53_694 = arith.constant 53 : index
    %865 = vector.load %arg1[%c0_692, %c3_693, %c53_694] : memref<1x4x256xf32, #tpu.memory_space<vmem>>, vector<1x1x154xf32>
    %866 = vector.shape_cast %865 : vector<1x1x154xf32> to vector<154xf32>
    %c173 = arith.constant 173 : index
    %c0_695 = arith.constant 0 : index
    %867 = vector.load %arg7[%c173, %c0_695] : memref<196x154xf32, #tpu.memory_space<vmem>>, vector<1x154xf32>
    %868 = vector.shape_cast %867 : vector<1x154xf32> to vector<154xf32>
    %869 = vector.shape_cast %866 : vector<154xf32> to vector<1x154xf32>
    tpu.vector_store %arg7[%c173, %c0_695], %869 {strides = array<i32>} : memref<196x154xf32, #tpu.memory_space<vmem>>, vector<1x154xf32>,
    %c0_696 = arith.constant 0 : index
    %c3_697 = arith.constant 3 : index
    %c54_698 = arith.constant 54 : index
    %870 = vector.load %arg1[%c0_696, %c3_697, %c54_698] : memref<1x4x256xf32, #tpu.memory_space<vmem>>, vector<1x1x154xf32>
    %871 = vector.shape_cast %870 : vector<1x1x154xf32> to vector<154xf32>
    %c174 = arith.constant 174 : index
    %c0_699 = arith.constant 0 : index
    %872 = vector.load %arg7[%c174, %c0_699] : memref<196x154xf32, #tpu.memory_space<vmem>>, vector<1x154xf32>
    %873 = vector.shape_cast %872 : vector<1x154xf32> to vector<154xf32>
    %874 = vector.shape_cast %871 : vector<154xf32> to vector<1x154xf32>
    tpu.vector_store %arg7[%c174, %c0_699], %874 {strides = array<i32>} : memref<196x154xf32, #tpu.memory_space<vmem>>, vector<1x154xf32>,
    %c0_700 = arith.constant 0 : index
    %c3_701 = arith.constant 3 : index
    %c64_702 = arith.constant 64 : index
    %875 = vector.load %arg1[%c0_700, %c3_701, %c64_702] : memref<1x4x256xf32, #tpu.memory_space<vmem>>, vector<1x1x154xf32>
    %876 = vector.shape_cast %875 : vector<1x1x154xf32> to vector<154xf32>
    %c175 = arith.constant 175 : index
    %c0_703 = arith.constant 0 : index
    %877 = vector.load %arg7[%c175, %c0_703] : memref<196x154xf32, #tpu.memory_space<vmem>>, vector<1x154xf32>
    %878 = vector.shape_cast %877 : vector<1x154xf32> to vector<154xf32>
    %879 = vector.shape_cast %876 : vector<154xf32> to vector<1x154xf32>
    tpu.vector_store %arg7[%c175, %c0_703], %879 {strides = array<i32>} : memref<196x154xf32, #tpu.memory_space<vmem>>, vector<1x154xf32>,
    %c0_704 = arith.constant 0 : index
    %c3_705 = arith.constant 3 : index
    %c65_706 = arith.constant 65 : index
    %880 = vector.load %arg1[%c0_704, %c3_705, %c65_706] : memref<1x4x256xf32, #tpu.memory_space<vmem>>, vector<1x1x154xf32>
    %881 = vector.shape_cast %880 : vector<1x1x154xf32> to vector<154xf32>
    %c176 = arith.constant 176 : index
    %c0_707 = arith.constant 0 : index
    %882 = vector.load %arg7[%c176, %c0_707] : memref<196x154xf32, #tpu.memory_space<vmem>>, vector<1x154xf32>
    %883 = vector.shape_cast %882 : vector<1x154xf32> to vector<154xf32>
    %884 = vector.shape_cast %881 : vector<154xf32> to vector<1x154xf32>
    tpu.vector_store %arg7[%c176, %c0_707], %884 {strides = array<i32>} : memref<196x154xf32, #tpu.memory_space<vmem>>, vector<1x154xf32>,
    %c0_708 = arith.constant 0 : index
    %c3_709 = arith.constant 3 : index
    %c66_710 = arith.constant 66 : index
    %885 = vector.load %arg1[%c0_708, %c3_709, %c66_710] : memref<1x4x256xf32, #tpu.memory_space<vmem>>, vector<1x1x154xf32>
    %886 = vector.shape_cast %885 : vector<1x1x154xf32> to vector<154xf32>
    %c177 = arith.constant 177 : index
    %c0_711 = arith.constant 0 : index
    %887 = vector.load %arg7[%c177, %c0_711] : memref<196x154xf32, #tpu.memory_space<vmem>>, vector<1x154xf32>
    %888 = vector.shape_cast %887 : vector<1x154xf32> to vector<154xf32>
    %889 = vector.shape_cast %886 : vector<154xf32> to vector<1x154xf32>
    tpu.vector_store %arg7[%c177, %c0_711], %889 {strides = array<i32>} : memref<196x154xf32, #tpu.memory_space<vmem>>, vector<1x154xf32>,
    %c0_712 = arith.constant 0 : index
    %c3_713 = arith.constant 3 : index
    %c67_714 = arith.constant 67 : index
    %890 = vector.load %arg1[%c0_712, %c3_713, %c67_714] : memref<1x4x256xf32, #tpu.memory_space<vmem>>, vector<1x1x154xf32>
    %891 = vector.shape_cast %890 : vector<1x1x154xf32> to vector<154xf32>
    %c178 = arith.constant 178 : index
    %c0_715 = arith.constant 0 : index
    %892 = vector.load %arg7[%c178, %c0_715] : memref<196x154xf32, #tpu.memory_space<vmem>>, vector<1x154xf32>
    %893 = vector.shape_cast %892 : vector<1x154xf32> to vector<154xf32>
    %894 = vector.shape_cast %891 : vector<154xf32> to vector<1x154xf32>
    tpu.vector_store %arg7[%c178, %c0_715], %894 {strides = array<i32>} : memref<196x154xf32, #tpu.memory_space<vmem>>, vector<1x154xf32>,
    %c0_716 = arith.constant 0 : index
    %c3_717 = arith.constant 3 : index
    %c68_718 = arith.constant 68 : index
    %895 = vector.load %arg1[%c0_716, %c3_717, %c68_718] : memref<1x4x256xf32, #tpu.memory_space<vmem>>, vector<1x1x154xf32>
    %896 = vector.shape_cast %895 : vector<1x1x154xf32> to vector<154xf32>
    %c179 = arith.constant 179 : index
    %c0_719 = arith.constant 0 : index
    %897 = vector.load %arg7[%c179, %c0_719] : memref<196x154xf32, #tpu.memory_space<vmem>>, vector<1x154xf32>
    %898 = vector.shape_cast %897 : vector<1x154xf32> to vector<154xf32>
    %899 = vector.shape_cast %896 : vector<154xf32> to vector<1x154xf32>
    tpu.vector_store %arg7[%c179, %c0_719], %899 {strides = array<i32>} : memref<196x154xf32, #tpu.memory_space<vmem>>, vector<1x154xf32>,
    %c0_720 = arith.constant 0 : index
    %c3_721 = arith.constant 3 : index
    %c69_722 = arith.constant 69 : index
    %900 = vector.load %arg1[%c0_720, %c3_721, %c69_722] : memref<1x4x256xf32, #tpu.memory_space<vmem>>, vector<1x1x154xf32>
    %901 = vector.shape_cast %900 : vector<1x1x154xf32> to vector<154xf32>
    %c180 = arith.constant 180 : index
    %c0_723 = arith.constant 0 : index
    %902 = vector.load %arg7[%c180, %c0_723] : memref<196x154xf32, #tpu.memory_space<vmem>>, vector<1x154xf32>
    %903 = vector.shape_cast %902 : vector<1x154xf32> to vector<154xf32>
    %904 = vector.shape_cast %901 : vector<154xf32> to vector<1x154xf32>
    tpu.vector_store %arg7[%c180, %c0_723], %904 {strides = array<i32>} : memref<196x154xf32, #tpu.memory_space<vmem>>, vector<1x154xf32>,
    %c0_724 = arith.constant 0 : index
    %c3_725 = arith.constant 3 : index
    %c70_726 = arith.constant 70 : index
    %905 = vector.load %arg1[%c0_724, %c3_725, %c70_726] : memref<1x4x256xf32, #tpu.memory_space<vmem>>, vector<1x1x154xf32>
    %906 = vector.shape_cast %905 : vector<1x1x154xf32> to vector<154xf32>
    %c181 = arith.constant 181 : index
    %c0_727 = arith.constant 0 : index
    %907 = vector.load %arg7[%c181, %c0_727] : memref<196x154xf32, #tpu.memory_space<vmem>>, vector<1x154xf32>
    %908 = vector.shape_cast %907 : vector<1x154xf32> to vector<154xf32>
    %909 = vector.shape_cast %906 : vector<154xf32> to vector<1x154xf32>
    tpu.vector_store %arg7[%c181, %c0_727], %909 {strides = array<i32>} : memref<196x154xf32, #tpu.memory_space<vmem>>, vector<1x154xf32>,
    %c0_728 = arith.constant 0 : index
    %c3_729 = arith.constant 3 : index
    %c80_730 = arith.constant 80 : index
    %910 = vector.load %arg1[%c0_728, %c3_729, %c80_730] : memref<1x4x256xf32, #tpu.memory_space<vmem>>, vector<1x1x154xf32>
    %911 = vector.shape_cast %910 : vector<1x1x154xf32> to vector<154xf32>
    %c182 = arith.constant 182 : index
    %c0_731 = arith.constant 0 : index
    %912 = vector.load %arg7[%c182, %c0_731] : memref<196x154xf32, #tpu.memory_space<vmem>>, vector<1x154xf32>
    %913 = vector.shape_cast %912 : vector<1x154xf32> to vector<154xf32>
    %914 = vector.shape_cast %911 : vector<154xf32> to vector<1x154xf32>
    tpu.vector_store %arg7[%c182, %c0_731], %914 {strides = array<i32>} : memref<196x154xf32, #tpu.memory_space<vmem>>, vector<1x154xf32>,
    %c0_732 = arith.constant 0 : index
    %c3_733 = arith.constant 3 : index
    %c81_734 = arith.constant 81 : index
    %915 = vector.load %arg1[%c0_732, %c3_733, %c81_734] : memref<1x4x256xf32, #tpu.memory_space<vmem>>, vector<1x1x154xf32>
    %916 = vector.shape_cast %915 : vector<1x1x154xf32> to vector<154xf32>
    %c183 = arith.constant 183 : index
    %c0_735 = arith.constant 0 : index
    %917 = vector.load %arg7[%c183, %c0_735] : memref<196x154xf32, #tpu.memory_space<vmem>>, vector<1x154xf32>
    %918 = vector.shape_cast %917 : vector<1x154xf32> to vector<154xf32>
    %919 = vector.shape_cast %916 : vector<154xf32> to vector<1x154xf32>
    tpu.vector_store %arg7[%c183, %c0_735], %919 {strides = array<i32>} : memref<196x154xf32, #tpu.memory_space<vmem>>, vector<1x154xf32>,
    %c0_736 = arith.constant 0 : index
    %c3_737 = arith.constant 3 : index
    %c82_738 = arith.constant 82 : index
    %920 = vector.load %arg1[%c0_736, %c3_737, %c82_738] : memref<1x4x256xf32, #tpu.memory_space<vmem>>, vector<1x1x154xf32>
    %921 = vector.shape_cast %920 : vector<1x1x154xf32> to vector<154xf32>
    %c184 = arith.constant 184 : index
    %c0_739 = arith.constant 0 : index
    %922 = vector.load %arg7[%c184, %c0_739] : memref<196x154xf32, #tpu.memory_space<vmem>>, vector<1x154xf32>
    %923 = vector.shape_cast %922 : vector<1x154xf32> to vector<154xf32>
    %924 = vector.shape_cast %921 : vector<154xf32> to vector<1x154xf32>
    tpu.vector_store %arg7[%c184, %c0_739], %924 {strides = array<i32>} : memref<196x154xf32, #tpu.memory_space<vmem>>, vector<1x154xf32>,
    %c0_740 = arith.constant 0 : index
    %c3_741 = arith.constant 3 : index
    %c83_742 = arith.constant 83 : index
    %925 = vector.load %arg1[%c0_740, %c3_741, %c83_742] : memref<1x4x256xf32, #tpu.memory_space<vmem>>, vector<1x1x154xf32>
    %926 = vector.shape_cast %925 : vector<1x1x154xf32> to vector<154xf32>
    %c185 = arith.constant 185 : index
    %c0_743 = arith.constant 0 : index
    %927 = vector.load %arg7[%c185, %c0_743] : memref<196x154xf32, #tpu.memory_space<vmem>>, vector<1x154xf32>
    %928 = vector.shape_cast %927 : vector<1x154xf32> to vector<154xf32>
    %929 = vector.shape_cast %926 : vector<154xf32> to vector<1x154xf32>
    tpu.vector_store %arg7[%c185, %c0_743], %929 {strides = array<i32>} : memref<196x154xf32, #tpu.memory_space<vmem>>, vector<1x154xf32>,
    %c0_744 = arith.constant 0 : index
    %c3_745 = arith.constant 3 : index
    %c84_746 = arith.constant 84 : index
    %930 = vector.load %arg1[%c0_744, %c3_745, %c84_746] : memref<1x4x256xf32, #tpu.memory_space<vmem>>, vector<1x1x154xf32>
    %931 = vector.shape_cast %930 : vector<1x1x154xf32> to vector<154xf32>
    %c186 = arith.constant 186 : index
    %c0_747 = arith.constant 0 : index
    %932 = vector.load %arg7[%c186, %c0_747] : memref<196x154xf32, #tpu.memory_space<vmem>>, vector<1x154xf32>
    %933 = vector.shape_cast %932 : vector<1x154xf32> to vector<154xf32>
    %934 = vector.shape_cast %931 : vector<154xf32> to vector<1x154xf32>
    tpu.vector_store %arg7[%c186, %c0_747], %934 {strides = array<i32>} : memref<196x154xf32, #tpu.memory_space<vmem>>, vector<1x154xf32>,
    %c0_748 = arith.constant 0 : index
    %c3_749 = arith.constant 3 : index
    %c85_750 = arith.constant 85 : index
    %935 = vector.load %arg1[%c0_748, %c3_749, %c85_750] : memref<1x4x256xf32, #tpu.memory_space<vmem>>, vector<1x1x154xf32>
    %936 = vector.shape_cast %935 : vector<1x1x154xf32> to vector<154xf32>
    %c187 = arith.constant 187 : index
    %c0_751 = arith.constant 0 : index
    %937 = vector.load %arg7[%c187, %c0_751] : memref<196x154xf32, #tpu.memory_space<vmem>>, vector<1x154xf32>
    %938 = vector.shape_cast %937 : vector<1x154xf32> to vector<154xf32>
    %939 = vector.shape_cast %936 : vector<154xf32> to vector<1x154xf32>
    tpu.vector_store %arg7[%c187, %c0_751], %939 {strides = array<i32>} : memref<196x154xf32, #tpu.memory_space<vmem>>, vector<1x154xf32>,
    %c0_752 = arith.constant 0 : index
    %c3_753 = arith.constant 3 : index
    %c86_754 = arith.constant 86 : index
    %940 = vector.load %arg1[%c0_752, %c3_753, %c86_754] : memref<1x4x256xf32, #tpu.memory_space<vmem>>, vector<1x1x154xf32>
    %941 = vector.shape_cast %940 : vector<1x1x154xf32> to vector<154xf32>
    %c188 = arith.constant 188 : index
    %c0_755 = arith.constant 0 : index
    %942 = vector.load %arg7[%c188, %c0_755] : memref<196x154xf32, #tpu.memory_space<vmem>>, vector<1x154xf32>
    %943 = vector.shape_cast %942 : vector<1x154xf32> to vector<154xf32>
    %944 = vector.shape_cast %941 : vector<154xf32> to vector<1x154xf32>
    tpu.vector_store %arg7[%c188, %c0_755], %944 {strides = array<i32>} : memref<196x154xf32, #tpu.memory_space<vmem>>, vector<1x154xf32>,
    %c0_756 = arith.constant 0 : index
    %c3_757 = arith.constant 3 : index
    %c96_758 = arith.constant 96 : index
    %945 = vector.load %arg1[%c0_756, %c3_757, %c96_758] : memref<1x4x256xf32, #tpu.memory_space<vmem>>, vector<1x1x154xf32>
    %946 = vector.shape_cast %945 : vector<1x1x154xf32> to vector<154xf32>
    %c189 = arith.constant 189 : index
    %c0_759 = arith.constant 0 : index
    %947 = vector.load %arg7[%c189, %c0_759] : memref<196x154xf32, #tpu.memory_space<vmem>>, vector<1x154xf32>
    %948 = vector.shape_cast %947 : vector<1x154xf32> to vector<154xf32>
    %949 = vector.shape_cast %946 : vector<154xf32> to vector<1x154xf32>
    tpu.vector_store %arg7[%c189, %c0_759], %949 {strides = array<i32>} : memref<196x154xf32, #tpu.memory_space<vmem>>, vector<1x154xf32>,
    %c0_760 = arith.constant 0 : index
    %c3_761 = arith.constant 3 : index
    %c97_762 = arith.constant 97 : index
    %950 = vector.load %arg1[%c0_760, %c3_761, %c97_762] : memref<1x4x256xf32, #tpu.memory_space<vmem>>, vector<1x1x154xf32>
    %951 = vector.shape_cast %950 : vector<1x1x154xf32> to vector<154xf32>
    %c190 = arith.constant 190 : index
    %c0_763 = arith.constant 0 : index
    %952 = vector.load %arg7[%c190, %c0_763] : memref<196x154xf32, #tpu.memory_space<vmem>>, vector<1x154xf32>
    %953 = vector.shape_cast %952 : vector<1x154xf32> to vector<154xf32>
    %954 = vector.shape_cast %951 : vector<154xf32> to vector<1x154xf32>
    tpu.vector_store %arg7[%c190, %c0_763], %954 {strides = array<i32>} : memref<196x154xf32, #tpu.memory_space<vmem>>, vector<1x154xf32>,
    %c0_764 = arith.constant 0 : index
    %c3_765 = arith.constant 3 : index
    %c98_766 = arith.constant 98 : index
    %955 = vector.load %arg1[%c0_764, %c3_765, %c98_766] : memref<1x4x256xf32, #tpu.memory_space<vmem>>, vector<1x1x154xf32>
    %956 = vector.shape_cast %955 : vector<1x1x154xf32> to vector<154xf32>
    %c191 = arith.constant 191 : index
    %c0_767 = arith.constant 0 : index
    %957 = vector.load %arg7[%c191, %c0_767] : memref<196x154xf32, #tpu.memory_space<vmem>>, vector<1x154xf32>
    %958 = vector.shape_cast %957 : vector<1x154xf32> to vector<154xf32>
    %959 = vector.shape_cast %956 : vector<154xf32> to vector<1x154xf32>
    tpu.vector_store %arg7[%c191, %c0_767], %959 {strides = array<i32>} : memref<196x154xf32, #tpu.memory_space<vmem>>, vector<1x154xf32>,
    %c0_768 = arith.constant 0 : index
    %c3_769 = arith.constant 3 : index
    %c99_770 = arith.constant 99 : index
    %960 = vector.load %arg1[%c0_768, %c3_769, %c99_770] : memref<1x4x256xf32, #tpu.memory_space<vmem>>, vector<1x1x154xf32>
    %961 = vector.shape_cast %960 : vector<1x1x154xf32> to vector<154xf32>
    %c192 = arith.constant 192 : index
    %c0_771 = arith.constant 0 : index
    %962 = vector.load %arg7[%c192, %c0_771] : memref<196x154xf32, #tpu.memory_space<vmem>>, vector<1x154xf32>
    %963 = vector.shape_cast %962 : vector<1x154xf32> to vector<154xf32>
    %964 = vector.shape_cast %961 : vector<154xf32> to vector<1x154xf32>
    tpu.vector_store %arg7[%c192, %c0_771], %964 {strides = array<i32>} : memref<196x154xf32, #tpu.memory_space<vmem>>, vector<1x154xf32>,
    %c0_772 = arith.constant 0 : index
    %c3_773 = arith.constant 3 : index
    %c100_774 = arith.constant 100 : index
    %965 = vector.load %arg1[%c0_772, %c3_773, %c100_774] : memref<1x4x256xf32, #tpu.memory_space<vmem>>, vector<1x1x154xf32>
    %966 = vector.shape_cast %965 : vector<1x1x154xf32> to vector<154xf32>
    %c193 = arith.constant 193 : index
    %c0_775 = arith.constant 0 : index
    %967 = vector.load %arg7[%c193, %c0_775] : memref<196x154xf32, #tpu.memory_space<vmem>>, vector<1x154xf32>
    %968 = vector.shape_cast %967 : vector<1x154xf32> to vector<154xf32>
    %969 = vector.shape_cast %966 : vector<154xf32> to vector<1x154xf32>
    tpu.vector_store %arg7[%c193, %c0_775], %969 {strides = array<i32>} : memref<196x154xf32, #tpu.memory_space<vmem>>, vector<1x154xf32>,
    %c0_776 = arith.constant 0 : index
    %c3_777 = arith.constant 3 : index
    %c101_778 = arith.constant 101 : index
    %970 = vector.load %arg1[%c0_776, %c3_777, %c101_778] : memref<1x4x256xf32, #tpu.memory_space<vmem>>, vector<1x1x154xf32>
    %971 = vector.shape_cast %970 : vector<1x1x154xf32> to vector<154xf32>
    %c194 = arith.constant 194 : index
    %c0_779 = arith.constant 0 : index
    %972 = vector.load %arg7[%c194, %c0_779] : memref<196x154xf32, #tpu.memory_space<vmem>>, vector<1x154xf32>
    %973 = vector.shape_cast %972 : vector<1x154xf32> to vector<154xf32>
    %974 = vector.shape_cast %971 : vector<154xf32> to vector<1x154xf32>
    tpu.vector_store %arg7[%c194, %c0_779], %974 {strides = array<i32>} : memref<196x154xf32, #tpu.memory_space<vmem>>, vector<1x154xf32>,
    %c0_780 = arith.constant 0 : index
    %c3_781 = arith.constant 3 : index
    %c102_782 = arith.constant 102 : index
    %975 = vector.load %arg1[%c0_780, %c3_781, %c102_782] : memref<1x4x256xf32, #tpu.memory_space<vmem>>, vector<1x1x154xf32>
    %976 = vector.shape_cast %975 : vector<1x1x154xf32> to vector<154xf32>
    %c195 = arith.constant 195 : index
    %c0_783 = arith.constant 0 : index
    %977 = vector.load %arg7[%c195, %c0_783] : memref<196x154xf32, #tpu.memory_space<vmem>>, vector<1x154xf32>
    %978 = vector.shape_cast %977 : vector<1x154xf32> to vector<154xf32>
    %979 = vector.shape_cast %976 : vector<154xf32> to vector<1x154xf32>
    tpu.vector_store %arg7[%c195, %c0_783], %979 {strides = array<i32>} : memref<196x154xf32, #tpu.memory_space<vmem>>, vector<1x154xf32>,
    %c0_784 = arith.constant 0 : index
    %c0_785 = arith.constant 0 : index
    %980 = vector.load %arg7[%c0_784, %c0_785] : memref<196x154xf32, #tpu.memory_space<vmem>>, vector<196x154xf32>
    %981 = vector.extract_strided_slice %980 {offsets = [0, 0], sizes = [196, 10], strides = [1, 1]} : vector<196x154xf32> to vector<196x10xf32>
    %982 = vector.extract_strided_slice %980 {offsets = [0, 16], sizes = [196, 10], strides = [1, 1]} : vector<196x154xf32> to vector<196x10xf32>
    %983 = vector.extract_strided_slice %980 {offsets = [0, 32], sizes = [196, 10], strides = [1, 1]} : vector<196x154xf32> to vector<196x10xf32>
    %984 = vector.extract_strided_slice %980 {offsets = [0, 48], sizes = [196, 10], strides = [1, 1]} : vector<196x154xf32> to vector<196x10xf32>
    %985 = vector.extract_strided_slice %980 {offsets = [0, 64], sizes = [196, 10], strides = [1, 1]} : vector<196x154xf32> to vector<196x10xf32>
    %986 = vector.extract_strided_slice %980 {offsets = [0, 80], sizes = [196, 10], strides = [1, 1]} : vector<196x154xf32> to vector<196x10xf32>
    %987 = vector.extract_strided_slice %980 {offsets = [0, 96], sizes = [196, 10], strides = [1, 1]} : vector<196x154xf32> to vector<196x10xf32>
    %988 = vector.extract_strided_slice %980 {offsets = [0, 112], sizes = [196, 10], strides = [1, 1]} : vector<196x154xf32> to vector<196x10xf32>
    %989 = vector.extract_strided_slice %980 {offsets = [0, 128], sizes = [196, 10], strides = [1, 1]} : vector<196x154xf32> to vector<196x10xf32>
    %990 = vector.extract_strided_slice %980 {offsets = [0, 144], sizes = [196, 10], strides = [1, 1]} : vector<196x154xf32> to vector<196x10xf32>
    %991 = tpu.concatenate %981, %982, %983, %984, %985, %986, %987, %988, %989, %990 in 1 : vector<196x10xf32>, vector<196x10xf32>, vector<196x10xf32>, vector<196x10xf32>, vector<196x10xf32>, vector<196x10xf32>, vector<196x10xf32>, vector<196x10xf32>, vector<196x10xf32>, vector<196x10xf32> -> vector<196x100xf32>
    %cst = arith.constant dense<0.000000e+00> : vector<100xf32>
    %992 = vector.multi_reduction <add>, %991, %cst [0] : vector<196x100xf32> to vector<100xf32>
    %993 = vector.shape_cast %992 : vector<100xf32> to vector<1x100xf32>
    %cst_786 = arith.constant 1.960000e+02 : f32
    %994 = vector.broadcast %cst_786 : f32 to vector<1x100xf32>
    %995 = arith.divf %993, %994 : vector<1x100xf32>
    %996 = vector.broadcast %995 : vector<1x100xf32> to vector<196x100xf32>
    %997 = arith.subf %991, %996 : vector<196x100xf32>
    %998 = arith.mulf %997, %997 : vector<196x100xf32>
    %cst_787 = arith.constant dense<0.000000e+00> : vector<100xf32>
    %999 = vector.multi_reduction <add>, %998, %cst_787 [0] : vector<196x100xf32> to vector<100xf32>
    %1000 = vector.shape_cast %999 : vector<100xf32> to vector<1x100xf32>
    %1001 = math.sqrt %1000 : vector<1x100xf32>
    %cst_788 = arith.constant 9.99999974E-5 : f32
    %1002 = vector.broadcast %cst_788 : f32 to vector<1x100xf32>
    %1003 = arith.cmpf ole, %1001, %1002 : vector<1x100xf32>
    %1004 = arith.extui %1003 : vector<1x100xi1> to vector<1x100xi32>
    %1005 = arith.sitofp %1004 : vector<1x100xi32> to vector<1x100xf32>
    %1006 = arith.addf %1001, %1005 : vector<1x100xf32>
    %cst_789 = arith.constant 1.000000e+00 : f32
    %1007 = vector.broadcast %cst_789 : f32 to vector<1x100xf32>
    %1008 = arith.divf %1007, %1006 : vector<1x100xf32>
    %cst_790 = arith.constant 1.000000e-01 : f32
    %1009 = vector.broadcast %cst_790 : f32 to vector<1x100xf32>
    %1010 = arith.mulf %1005, %1009 : vector<1x100xf32>
    %1011 = vector.broadcast %1010 : vector<1x100xf32> to vector<196x100xf32>
    %1012 = arith.addf %997, %1011 : vector<196x100xf32>
    %1013 = vector.broadcast %1008 : vector<1x100xf32> to vector<196x100xf32>
    %1014 = arith.mulf %1012, %1013 : vector<196x100xf32>
    %c0_791 = arith.constant 0 : index
    %c0_792 = arith.constant 0 : index
    %c0_793 = arith.constant 0 : index
    %1015 = vector.load %arg4[%c0_791, %c0_792, %c0_793] : memref<1x196x100xf32, #tpu.memory_space<vmem>>, vector<1x196x100xf32>
    %1016 = vector.shape_cast %1015 : vector<1x196x100xf32> to vector<196x100xf32>
    %1017 = vector.shape_cast %1014 : vector<196x100xf32> to vector<1x196x100xf32>
    tpu.vector_store %arg4[%c0_791, %c0_792, %c0_793], %1017 {strides = array<i32>} : memref<1x196x100xf32, #tpu.memory_space<vmem>>, vector<1x196x100xf32>,
    %c0_794 = arith.constant 0 : index
    %c0_795 = arith.constant 0 : index
    %1018 = vector.load %arg2[%c0_794, %c0_795] : memref<8x196xf32, #tpu.memory_space<vmem>>, vector<8x196xf32>
    %cst_796 = arith.constant dense<0.000000e+00> : vector<8x100xf32>
    %1019 = tpu.matmul %1018, %1014, %cst_796 {dimension_numbers = #tpu.dot_dimension_numbers<[1], [0], [0], [1], [0, 0, 1, 1], [], []>, precision = #tpu.contract_precision<fp32>} : vector<8x196xf32>, vector<196x100xf32>, vector<8x100xf32> -> vector<8x100xf32>
    %c0_797 = arith.constant 0 : index
    %c0_798 = arith.constant 0 : index
    %c0_799 = arith.constant 0 : index
    %1020 = vector.load %arg5[%c0_797, %c0_798, %c0_799] : memref<1x8x100xf32, #tpu.memory_space<vmem>>, vector<1x8x100xf32>
    %1021 = vector.shape_cast %1020 : vector<1x8x100xf32> to vector<8x100xf32>
    %1022 = vector.shape_cast %1019 : vector<8x100xf32> to vector<1x8x100xf32>
    tpu.vector_store %arg5[%c0_797, %c0_798, %c0_799], %1022 {strides = array<i32>} : memref<1x8x100xf32, #tpu.memory_space<vmem>>, vector<1x8x100xf32>,
    %c0_800 = arith.constant 0 : index
    %c0_801 = arith.constant 0 : index
    %1023 = vector.load %arg3[%c0_800, %c0_801] : memref<8x1xf32, #tpu.memory_space<vmem>>, vector<8x1xf32>
    %1024 = vector.broadcast %1023 : vector<8x1xf32> to vector<8x100xf32>
    %1025 = arith.subf %1019, %1024 : vector<8x100xf32>
    %cst_802 = arith.constant 0.000000e+00 : f32
    %1026 = vector.broadcast %cst_802 : f32 to vector<8x100xf32>
    %1027 = arith.maximumf %1025, %1026 : vector<8x100xf32>
    %c0_803 = arith.constant 0 : index
    %c0_804 = arith.constant 0 : index
    %c0_805 = arith.constant 0 : index
    %1028 = vector.load %arg6[%c0_803, %c0_804, %c0_805] : memref<1x8x100xf32, #tpu.memory_space<vmem>>, vector<1x8x100xf32>
    %1029 = vector.shape_cast %1028 : vector<1x8x100xf32> to vector<8x100xf32>
    %1030 = vector.shape_cast %1027 : vector<8x100xf32> to vector<1x8x100xf32>
    tpu.vector_store %arg6[%c0_803, %c0_804, %c0_805], %1030 {strides = array<i32>} : memref<1x8x100xf32, #tpu.memory_space<vmem>>, vector<1x8x100xf32>,
    return
  }
  func.func @transform_0(%arg0: i32) -> (i32, i32, i32) {
    %c0_i32 = arith.constant 0 : i32
    %c0_i32_0 = arith.constant 0 : i32
    %c0_i32_1 = arith.constant 0 : i32
    return %arg0, %c0_i32, %c0_i32_0 : i32, i32, i32
  }
  func.func @transform_1(%arg0: i32) -> (i32, i32) {
    %c0_i32 = arith.constant 0 : i32
    %c0_i32_0 = arith.constant 0 : i32
    %c0_i32_1 = arith.constant 0 : i32
    return %c0_i32, %c0_i32_0 : i32, i32
  }
  func.func @transform_2(%arg0: i32) -> (i32, i32) {
    %c0_i32 = arith.constant 0 : i32
    %c0_i32_0 = arith.constant 0 : i32
    %c0_i32_1 = arith.constant 0 : i32
    return %c0_i32, %c0_i32_0 : i32, i32
  }
  func.func @transform_3(%arg0: i32) -> (i32, i32, i32) {
    %c0_i32 = arith.constant 0 : i32
    %c0_i32_0 = arith.constant 0 : i32
    %c0_i32_1 = arith.constant 0 : i32
    return %arg0, %c0_i32, %c0_i32_0 : i32, i32, i32
  }
  func.func @transform_4(%arg0: i32) -> (i32, i32, i32) {
    %c0_i32 = arith.constant 0 : i32
    %c0_i32_0 = arith.constant 0 : i32
    %c0_i32_1 = arith.constant 0 : i32
    return %arg0, %c0_i32, %c0_i32_0 : i32, i32, i32
  }
  func.func @transform_5(%arg0: i32) -> (i32, i32, i32) {
    %c0_i32 = arith.constant 0 : i32
    %c0_i32_0 = arith.constant 0 : i32
    %c0_i32_1 = arith.constant 0 : i32
    return %arg0, %c0_i32, %c0_i32_0 : i32, i32, i32
  }
}

</mosaic_0001>

<bundles_post_ra>
// kernel: tpu_custom_call.1
= control target key start
LH: loop header
LB: loop body
LE: loop exit
PB: predicated region body
PF: predicated region fallthrough
CT: control target
= control target key end

     0   :  { %s7856_s0 = inlined_call_operand.hbm [shape: f32[2,4,256], index: 0, kind: input, shape index: {}]   ;;  %s7857_s1 = inlined_call_operand.hbm [shape: f32[8,196], index: 1, kind: input, shape index: {}]   ;;  %s7858_s2 = inlined_call_operand.vmem [shape: f32[8,1], index: 2, kind: input, shape index: {}]   ;;  %s7859_s3 = inlined_call_operand.vmem [shape: f32[2,196,100], index: 3, kind: output, shape index: {0}]   ;;  %s7860_s4 = inlined_call_operand.hbm [shape: f32[2,8,100], index: 4, kind: output, shape index: {1}]   ;;  %s7861_s5 = inlined_call_operand.hbm [shape: f32[2,8,100], index: 5, kind: output, shape index: {2}]  }
   0x1   :  { %8034 = sst [smem:[#allocation74_spill]] %s7856_s0 }
   0x2   :  { %8035 = sst [smem:[#allocation75_spill]] %s7857_s1 }
   0x3   :  { %8036 = sst [smem:[#allocation76_spill]] %s7858_s2 }
   0x4   :  { %8037 = sst [smem:[#allocation77_spill]] %s7859_s3 }
   0x5   :  { %8038 = sst [smem:[#allocation78_spill]] %s7860_s4 }
   0x6   :  { %8039 = sst [smem:[#allocation79_spill]] %s7861_s5 }
   0x7   :  { %11 = vsyncpa [#allocation4], 0 }
   0x8   :  { %13 = vsyncpa [#allocation4 + $0x1], 0 }
   0x9   :  { %14 = vsyncpa [#allocation7], 0 }
   0xa   :  { %15 = vsyncpa [#allocation5], 0 }
   0xb   :  { %17 = vsyncpa [#allocation5 + $0x1], 0 }
   0xc   :  { %18 = vsyncpa [#allocation10], 0 }
   0xd   :  { %20 = vsyncpa [#allocation10 + $0x1], 0  ;;  %s4906_s18 = smov 0   ;;  %s4908_s19 = smov 0  }
   0xe   :  { %s4910_s20 = smov 0   ;;  %s4912_s21 = smov 0  }
   0xf LB: > { %8040 = sst [smem:[#allocation15_spill]] %s4806_s18  ;;  %s4927_s22 = sadd.s32 4294967295, %s4818_s21   ;;  %s4818_s21 = sphi %s4912_s21, %s8475_s21   ;;  %s4814_s20 = sphi %s4910_s20, %s8478_s20   ;;  %s4810_s19 = sphi %s4908_s19, %s8477_s19   ;;  %s4806_s18 = sphi %s4906_s18, %s8476_s18  }
  0x10   : > { %8041 = sst [smem:[#allocation16_spill]] %s4810_s19  ;;  %s4345_s23 = sadd.s32 4294967294, %s4818_s21  }
  0x11   : > { %8042 = sst [smem:[#allocation17_spill]] %s4814_s20  ;;  %p46_p0 = scmp.ne.s32.totalorder %s4810_s19, %s4806_s18 }
  0x12   : > { %8043 = sst [smem:[#allocation18_spill]] %s4818_s21  ;;  %p47_p1 = scmp.eq.s32.totalorder %s4927_s22, 0 }
  0x13   : > { %8044 = sst [smem:[#allocation19_spill]] %s4927_s22  ;;  %p138_p2 = scmp.eq.s32.totalorder %s4927_s22, 1 }
  0x14   : > { %p144_p3 = scmp.eq.s32.totalorder %s4345_s23, 1  ;;  %p4936_p4 = por %p47_p1, %p46_p0 }
  0x15   : > { %p4346_p5 = scmp.ge.s32.totalorder %s4818_s21, 1  ;;  %p177_p7 = scmp.lt.s32.totalorder %s4818_s21, 3 }
  0x16   : > { %p4941_p6 = por %p144_p3, %p46_p0  ;;  %s8048_s1 = sld [smem:[#allocation75_spill]] }
  0x17   : > { %p4949_p8 = pnand %p4346_p5, %p177_p7  ;;  %s4820_s30 = smov [#allocation6]  }
  0x18   : > { %s8046_s25 = scalar_select %p4941_p6, 1, 0 }
  0x19   : > { %p4524_p10 = pneg %p4949_p8  ;;  %s191_s6 = sshll.u32 %s4820_s30, 4  ;;  %s192_s6 = int_to_ptr.vmem [resolvable:$true] %s191_s6 }
  0x1a   : > { %8047 = sst [smem:[#allocation20_spill]] %s8046_s25  ;;  %s4959_s7 = sadd.s32 1, %s4818_s21  }
  0x1b   : > { %p4525_p11 = pnand %p4524_p10, %p47_p1  ;;  %8050 = sst [smem:[#allocation21_spill]] %s4959_s7 }
  0x1c   : > { %s189_s28 = sshll.u32 %s8048_s1, 4  ;;  %s33_s8 = sadd.s32 1, %s4814_s20  ;;  %s190_s28 = int_to_ptr.hbm [resolvable:$true] %s189_s28 }
  0x1d   : > { %s30_s9 = ssub.s32 %s4818_s21, %s4959_s7  ;;  %p40_p13 = scmp.ne.s32.totalorder %s4814_s20, %s4810_s19 }
  0x1e   : > { %4527 = dma.hbm_to_vmem [thread:$0]  (!%p4525_p11), %s190_s28, 256, %s192_s6, [#allocation7]  }
  0x1f   : > { %p31_p12 = scmp.eq.s32.totalorder %s30_s9, 0  ;;  %p41_p0 = scmp.eq.s32.totalorder %s4818_s21, 0 }
  0x20   : > { %p4972_p3 = por %p138_p2, %p40_p13  ;;  %p4540_p5 = scmp.lt.s32.totalorder %s4818_s21, 2 }
  0x21   : > { %s4968_s10 = scalar_select %p31_p12, %s4814_s20, %s33_s8  }
  0x22   : > { %s8052_s11 = scalar_select %p4972_p3, 1, 0 }
  0x23   : > { %8051 = sst [smem:[#allocation22_spill]] %s4968_s10  ;;  %s205_s12 = sand.u32 1, %s4814_s20  }
  0x24   : > { %8053 = sst [smem:[#allocation23_spill]] %s8052_s11  ;;  %s4512_s13 = sshll.u32 %s4818_s21, 3 }
  0x25   : > { %p42_p7 = por %p41_p0, %p40_p13  ;;  %s4349_s14 = sshll.u32 %s205_s12, 3 }
  0x26   : > { %s8054_s0 = sld [smem:[#allocation74_spill]]  ;;  %s209_s26 = scalar_lea.vmem [#allocation3], %s4349_s14 }
  0x27   : > { %s218_s27 = sshll.u32 %s209_s26, 4  ;;  %p4982_p10 = pnand %p4540_p5, %p42_p7  ;;  %s219_s27 = int_to_ptr.vmem [resolvable:$true] %s218_s27 }
  0x28   : > { %s206_s30 = scalar_lea.sflag [#allocation4], %s205_s12 }
  0x29   : > { %p4690_p11 = pneg %p4982_p10 }
  0x2c   : > { %s214_s17 = scalar_lea.hbm %s8054_s0, %s4512_s13  ;;  %s4693_s14 = scalar_lea.hbm %s8054_s0, 16 }
  0x2d   : > { %s216_s23 = sshll.u32 %s214_s17, 4  ;;  %s217_s23 = int_to_ptr.hbm [resolvable:$true] %s216_s23 }
  0x2e   : > { %s4686_s6 = sshra.s32 %s217_s23, 4  ;;  %s4687_s6 = int_to_ptr.hbm [resolvable:$true] %s4686_s6 }
  0x2f   : > { %s4688_s8 = scalar_lea.hbm %s4687_s6, 8  ;;  %p4694_p0 = scmp.lt.s32.totalorder %s4687_s6, %s8054_s0 }
  0x30   : > { %p4689_p2 = scmp.ne.s32.totalorder %s4687_s6, %s4688_s8  ;;  %p4695_p5 = scmp.lt.s32.totalorder %s4693_s14, %s4688_s8 }
  0x32   : > { %p4691_p12 = pnand %p4690_p11, %p4689_p2  ;;  %p4696_p7 = por %p4695_p5, %p4694_p0 }
  0x34   : > { %p4692_p13 = pneg %p4691_p12 }
  0x36   : > { %p4697_p9 = pnand %p4696_p7, %p4692_p13 }
  0x38   : > { %4700 = shalt.err (!%p4697_p9)
}
  0x39   : > { %4531 = dma.hbm_to_vmem [thread:$0]  (!%p4982_p10), %s217_s23, 128, %s219_s27, %s206_s30  }
  0x3a   : > { %227 = sbr.rel (%p4949_p8) target bundleno = 1716 (0x6b4), region = 32 }
  0x3f   : > { %s4999_s12 = sand.u32 1, %s4810_s19  }
  0x40   : > { %8056 = sst [smem:[#allocation24_spill]] %s4999_s12  ;;  %s5002_s17 = sshll.u32 %s4999_s12, 3 }
  0x41   : > { %8057 = sst [smem:[#allocation25_spill]] %s5002_s17  ;;  %s230_s26 = scalar_lea.sflag [#allocation4], %s4999_s12 }
  0x42   : > { %s5006_s6 = scalar_lea.vmem [#allocation3], %s5002_s17 }
  0x43   : > { %4789 = dma.done.wait (%p4936_p4), %s230_s26, 128  }
  0x44   : > { %4791 = vsyncadd (%p4936_p4), %s230_s26, 4294967168 }
  0x45   : > { %4793 = dma.done.wait (%p47_p1), [#allocation7], 256  }
  0x46   : > { %4795 = vsyncadd (%p47_p1), [#allocation7], 4294967040  ;;  %v332_v0 = vld [vmem:[%s5006_s6] ss:$4 sm:$0x3]  ;;  %s7934_s29 = smov 123   ;;  %v282_v36 = vlaneseq }
  0x47   : > { %v310_v1 = vld [vmem:[%s5006_s6] ss:$4 sm:$0x3]  ;;  %334 = vrot.lane.b32.xlu2 %v332_v0, %s7934_s29  ;;  %s7950_s24 = smov 125   ;;  %s7943_s23 = smov 127   ;;  %vm337_vm0 = vcmask 1006592  }
  0x48   : > { %312 = vrot.lane.b32.xlu1 %v310_v1, %s7950_s24  ;;  %v288_v2 = vld [vmem:[%s5006_s6] ss:$4 sm:$0x3]  ;;  %s7941_s27 = smov 122   ;;  %s7932_s28 = smov 124   ;;  %vm5088_vm1 = vcmp.lt.s32.totalorder %v282_v36, 154 }
  0x49   : > { %290 = vrot.lane.b32.xlu0 %v288_v2, %s7943_s23  ;;  %v343_v3 = vld [vmem:[%s5006_s6] ss:$4 sm:$0x3]  ;;  %s7948_s30 = smov 126   ;;  %s7939_s8 = smov 110   ;;  %vm348_vm2 = vcmask 998400  }
  0x4a   : > { %v321_v4 = vld [vmem:[%s5006_s6] ss:$4 sm:$0x3]  ;;  %s7900_s9 = smov 111   ;;  %s7862_s13 = smov 112   ;;  %vm381_vm3 = vcmask 900096  }
  0x4b   : > { %v299_v5 = vld [vmem:[%s5006_s6] ss:$4 sm:$0x3]  ;;  %s7864_s14 = smov 107   ;;  %s7868_s15 = smov 108   ;;  %vm414_vm4 = vcmask 875520  }
  0x4c   : > { %v376_v6 = vld [vmem:[%s5006_s6] ss:$4 sm:$0x3]  ;;  %s7866_s16 = smov 109   ;;  %s7870_s26 = smov 95   ;;  %vm315_vm5 = vcmask 1022976  }
  0x4d   : > { %v365_v7 = vld [vmem:[%s5006_s6] ss:$4 sm:$0x3]  ;;  %vm293_vm6 = vcmask 1039360   ;;  %vm447_vm7 = vcmask 777216   ;;  %vm326_vm8 = vcmask 1014784  }
  0x4e   : > { %v354_v8 = vld [vmem:[%s5006_s6] ss:$4 sm:$0x3]  ;;  %vm304_vm9 = vcmask 1031168   ;;  %vm8010_vm10 = vcmask 752640   ;;  %vm8009_vm11 = vcmask 908288  }
  0x4f   : > { %345 = vrot.lane.b32.xlu2 %v343_v3, %s7941_s27  ;;  %v409_v9 = vld [vmem:[%s5006_s6] ss:$4 sm:$0x3]  ;;  %vm8008_vm12 = vcmask 916480   ;;  %vm7937_vm13 = vcmask 654336   ;;  %vm7936_vm14 = vcmask 883712  }
  0x50   : > { %323 = vrot.lane.b32.xlu1 %v321_v4, %s7932_s28  ;;  %v398_v10 = vld [vmem:[%s5006_s6] ss:$4 sm:$0x3]  ;;  %vm7938_vm15 = vcmask 891904   ;;  %s8073_s0 = smov 91   ;;  %s8074_s1 = smov 77  }
  0x51   : > { %301 = vrot.lane.b32.xlu0 %v299_v5, %s7948_s30  ;;  %v387_v11 = vld [vmem:[%s5006_s6] ss:$4 sm:$0x3]  ;;  %s8075_s10 = smov 78   ;;  %s8076_s20 = smov 79  }
  0x52   : > { %v442_v12 = vld [vmem:[%s5006_s6] ss:$4 sm:$0x3]  ;;  %s8077_s19 = smov 74   ;;  %s8078_s7 = smov 75  }
  0x53   : > { %v431_v13 = vld [vmem:[%s5006_s6] ss:$4 sm:$0x3]  ;;  %s8079_s21 = smov 76   ;;  %s8080_s25 = smov 62  }
  0x54   : > { %v420_v14 = vld [vmem:[%s5006_s6] ss:$4 sm:$0x3]  ;;  %s8081_s18 = smov 63   ;;  %s8082_s11 = smov 64  }
  0x55   : > { %v475_v15 = vld [vmem:[%s5006_s6] ss:$4 sm:$0x3]  ;;  %s8083_s5 = smov 59   ;;  %s8084_s12 = smov 60  }
  0x56   : > { %v464_v16 = vld [vmem:[%s5006_s6] ss:$4 sm:$0x3]  ;;  %s8085_s4 = smov 61   ;;  %s8086_s17 = smov 47  }
  0x57   : > { %378 = vrot.lane.b32.xlu2 %v376_v6, %s7939_s8  ;;  %v453_v17 = vld [vmem:[%s5006_s6] ss:$4 sm:$0x3]  ;;  %s8087_s2 = smov 48   ;;  %s8088_s3 = smov 58  }
  0x58   : > { %367 = vrot.lane.b32.xlu1 %v365_v7, %s7900_s9  ;;  %v508_v18 = vld [vmem:[%s5006_s6] ss:$4 sm:$0x3]  ;;  %s7961_s9 = smov 61   ;;  %s8089_s22 = smov 44  }
  0x59   : > { %356 = vrot.lane.b32.xlu0 %v354_v8, %s7862_s13  ;;  %s7874_s13 = smov 96   ;;  %v497_v19 = vld [vmem:[%s5006_s6] ss:$4 sm:$0x3] }
  0x5a   : > { %v486_v20 = vld [vmem:[%s5006_s6] ss:$4 sm:$0x3] }
  0x5b   : > { %v541_v21 = vld [vmem:[%s5006_s6] ss:$4 sm:$0x3] }
  0x5c   : > { %v530_v22 = vld [vmem:[%s5006_s6] ss:$4 sm:$0x3] }
  0x5d   : > { %v519_v23 = vld [vmem:[%s5006_s6] ss:$4 sm:$0x3] }
  0x5e   : > { %v574_v24 = vld [vmem:[%s5006_s6] ss:$4 sm:$0x3] }
  0x5f   : > { %411 = vrot.lane.b32.xlu2 %v409_v9, %s7864_s14  ;;  %s7872_s14 = smov 106   ;;  %v563_v25 = vld [vmem:[%s5006_s6] ss:$4 sm:$0x3] }
  0x60   : > { %400 = vrot.lane.b32.xlu1 %v398_v10, %s7868_s15  ;;  %s7880_s15 = smov 93   ;;  %v552_v26 = vld [vmem:[%s5006_s6] ss:$4 sm:$0x3] }
  0x61   : > { %389 = vrot.lane.b32.xlu0 %v387_v11, %s7866_s16  ;;  %s7876_s16 = smov 92   ;;  %v607_v27 = vld [vmem:[%s5006_s6] ss:$4 sm:$0x3] }
  0x62   : > { %v596_v28 = vld [vmem:[%s5006_s6] ss:$4 sm:$0x3] }
  0x63   : > { %v585_v29 = vld [vmem:[%s5006_s6] ss:$4 sm:$0x3] }
  0x64   : > { %v640_v30 = vld [vmem:[%s5006_s6] ss:$4 sm:$0x3] }
  0x65   : > { %v629_v31 = vld [vmem:[%s5006_s6] ss:$4 sm:$0x3] }
  0x66   : > { %v618_v32 = vld [vmem:[%s5006_s6] ss:$4 sm:$0x3] }
  0x67   : > { %444 = vrot.lane.b32.xlu2 %v442_v12, %s7870_s26  ;;  %s7878_s26 = smov 94   ;;  %v673_v33 = vld [vmem:[%s5006_s6] ss:$4 sm:$0x3] }
  0x68   : > { %433 = vrot.lane.b32.xlu1 %v431_v13, %s7874_s13  ;;  %s7886_s13 = smov 90   ;;  %v662_v34 = vld [vmem:[%s5006_s6] ss:$4 sm:$0x3] }
  0x69   : > { %422 = vrot.lane.b32.xlu0 %v420_v14, %s7872_s14  ;;  %s7882_s14 = smov 80   ;;  %v651_v35 = vld [vmem:[%s5006_s6] ss:$4 sm:$0x3] }
  0x6a   : > { %v706_v41 = vld [vmem:[%s5006_s6] ss:$4 sm:$0x3]  ;;  %v4361_v13 = vld [vmem:[%s5006_s6 + $0x1] ss:$4 sm:$0x3] }
  0x6b   : > { %v695_v42 = vld [vmem:[%s5006_s6] ss:$4 sm:$0x3]  ;;  %v4360_v14 = vld [vmem:[%s5006_s6 + $0x1] ss:$4 sm:$0x3] }
  0x6c   : > { %v684_v43 = vld [vmem:[%s5006_s6] ss:$4 sm:$0x3] }
  0x6d   : > { %v739_v47 = vld [vmem:[%s5006_s6] ss:$4 sm:$0x3] }
  0x6e   : > { %v728_v48 = vld [vmem:[%s5006_s6] ss:$4 sm:$0x3] }
  0x6f   : > { %477 = vrot.lane.b32.xlu2 %v475_v15, %s7876_s16  ;;  %s7884_s16 = smov 91   ;;  %v717_v49 = vld [vmem:[%s5006_s6] ss:$4 sm:$0x3] }
  0x70   : > { %466 = vrot.lane.b32.xlu1 %v464_v16, %s7880_s15  ;;  %s7892_s15 = smov 78   ;;  %v281_v50 = vld [vmem:[%s5006_s6] ss:$4 sm:$0x3] }
  0x71   : > { %455 = vrot.lane.b32.xlu0 %v453_v17, %s7878_s26  ;;  %s7888_s26 = smov 77   ;;  %286 = vst.msk [vmem:[#allocation2] ss:$8 sm:$0x3] %vm5088_vm1, %v281_v50 }
  0x72   : > { %v772_v54 = vld [vmem:[%s5006_s6] ss:$4 sm:$0x3]  ;;  %v4359_v16 = vld [vmem:[%s5006_s6 + $0x1] ss:$4 sm:$0x3] }
  0x73   : > { %v761_v55 = vld [vmem:[%s5006_s6] ss:$4 sm:$0x3]  ;;  %v4370_v50 = vld [vmem:[%s5006_s6 + $0x1] ss:$4 sm:$0x3] }
  0x74   : > { %v750_v56 = vld [vmem:[%s5006_s6] ss:$4 sm:$0x3] }
  0x75   : > { %v805_v1 = vld [vmem:[%s5006_s6] ss:$4 sm:$0x3] }
  0x76   : > { %v794_v2 = vld [vmem:[%s5006_s6] ss:$4 sm:$0x3] }
  0x77   : > { %510 = vrot.lane.b32.xlu2 %v508_v18, %s7882_s14  ;;  %s7890_s14 = smov 79   ;;  %v783_v4 = vld [vmem:[%s5006_s6] ss:$4 sm:$0x3] }
  0x78   : > { %499 = vrot.lane.b32.xlu1 %v497_v19, %s7886_s13  ;;  %s7896_s13 = smov 75  }
  0x79   : > { %488 = vrot.lane.b32.xlu0 %v486_v20, %s7884_s16  ;;  %s7894_s16 = smov 74  }
  0x7f   : > { %543 = vrot.lane.b32.xlu2 %v541_v21, %s7888_s26  ;;  %s7898_s26 = smov 76  }
  0x80   : > { %532 = vrot.lane.b32.xlu1 %v530_v22, %s7892_s15  ;;  %s7904_s15 = smov 63  }
  0x81   : > { %521 = vrot.lane.b32.xlu0 %v519_v23, %s7890_s14  ;;  %s7968_s14 = smov 62  }
  0x87   : > { %576 = vrot.lane.b32.xlu2 %v574_v24, %s7894_s16  ;;  %s7902_s16 = smov 64  }
  0x88   : > { %565 = vrot.lane.b32.xlu1 %v563_v25, %s7896_s13  ;;  %s7906_s13 = smov 59   ;;  %v4364_v25 = vld [vmem:[%s5006_s6 + $0x1] ss:$4 sm:$0x3] }
  0x89   : > { %554 = vrot.lane.b32.xlu0 %v552_v26, %s7898_s26  ;;  %s7966_s26 = smov 60   ;;  %v4363_v26 = vld [vmem:[%s5006_s6 + $0x1] ss:$4 sm:$0x3] }
  0x8f   : > { %609 = vrot.lane.b32.xlu2 %v607_v27, %s7968_s14  ;;  %s8072_s14 = smov 90  }
  0x90   : > { %598 = vrot.lane.b32.xlu1 %v596_v28, %s7904_s15  ;;  %s7910_s15 = smov 48   ;;  %v4362_v28 = vld [vmem:[%s5006_s6 + $0x1] ss:$4 sm:$0x3] }
  0x91   : > { %587 = vrot.lane.b32.xlu0 %v585_v29, %s7902_s16  ;;  %s7912_s16 = smov 47  }
  0x97   : > { %642 = vrot.lane.b32.xlu2 %v640_v30, %s7906_s13  ;;  %s7908_s13 = smov 58  }
  0x98   : > { %631 = vrot.lane.b32.xlu1 %v629_v31, %s7966_s26  ;;  %s8071_s26 = smov 80  }
  0x99   : > { %620 = vrot.lane.b32.xlu0 %v618_v32, %s7961_s9  ;;  %s8070_s9 = smov 94  }
  0x9f   : > { %675 = vrot.lane.b32.xlu2 %v673_v33, %s7912_s16  ;;  %s7918_s16 = smov 46  }
  0xa0   : > { %664 = vrot.lane.b32.xlu1 %v662_v34, %s7910_s15  ;;  %s7916_s15 = smov 45  }
  0xa1   : > { %653 = vrot.lane.b32.xlu0 %v651_v35, %s7908_s13  ;;  %v335_v37 = vpop.permute.xlu2 %334  ;;  %s7914_s13 = smov 44  }
  0xa2   : > { %v336_v39 = vrot.slane %v335_v37, 1 }
  0xa4   : > { %v338_v40 = vsel %vm337_vm0, %v335_v37, %v336_v39  ;;  %v4367_v37 = vld [vmem:[%s5006_s6 + $0x1] ss:$4 sm:$0x3] }
  0xa5   : > { %341 = vst.msk [vmem:[#allocation2 + $0x5] ss:$8 sm:$0x3] %vm5088_vm1, %v338_v40  ;;  %v4366_v39 = vld [vmem:[%s5006_s6 + $0x1] ss:$4 sm:$0x3] }
  0xa7   : > { %708 = vrot.lane.b32.xlu2 %v706_v41, %s7914_s13  ;;  %s7920_s13 = smov 32   ;;  %v4365_v41 = vld [vmem:[%s5006_s6 + $0x1] ss:$4 sm:$0x3] }
  0xa8   : > { %697 = vrot.lane.b32.xlu1 %v695_v42, %s7916_s15  ;;  %s7922_s15 = smov 42  }
  0xa9   : > { %686 = vrot.lane.b32.xlu0 %v684_v43, %s7918_s16  ;;  %v346_v44 = vpop.permute.xlu2 %345  ;;  %s7924_s16 = smov 43  }
  0xaa   : > { %v347_v45 = vrot.slane %v346_v44, 1 }
  0xac   : > { %v349_v46 = vsel %vm348_vm2, %v346_v44, %v347_v45 }
  0xad   : > { %352 = vst.msk [vmem:[#allocation2 + $0x6] ss:$8 sm:$0x3] %vm5088_vm1, %v349_v46 }
  0xaf   : > { %741 = vrot.lane.b32.xlu2 %v739_v47, %s7920_s13  ;;  %s7930_s13 = smov 29  }
  0xb0   : > { %730 = vrot.lane.b32.xlu1 %v728_v48, %s7922_s15  ;;  %s7928_s15 = smov 30  }
  0xb1   : > { %719 = vrot.lane.b32.xlu0 %v717_v49, %s7924_s16  ;;  %v379_v51 = vpop.permute.xlu2 %378  ;;  %s7926_s16 = smov 31  }
  0xb2   : > { %v380_v52 = vrot.slane %v379_v51, 1 }
  0xb4   : > { %v382_v53 = vsel %vm381_vm3, %v379_v51, %v380_v52  ;;  %v4369_v51 = vld [vmem:[%s5006_s6 + $0x1] ss:$4 sm:$0x3] }
  0xb5   : > { %385 = vst.msk [vmem:[#allocation2 + $0x11] ss:$8 sm:$0x3] %vm5088_vm1, %v382_v53  ;;  %v4368_v53 = vld [vmem:[%s5006_s6 + $0x1] ss:$4 sm:$0x3] }
  0xb7   : > { %774 = vrot.lane.b32.xlu2 %v772_v54, %s7930_s13  ;;  %s7952_s13 = smov 28  }
  0xb8   : > { %763 = vrot.lane.b32.xlu1 %v761_v55, %s7928_s15  ;;  %s7957_s15 = smov 27  }
  0xb9   : > { %752 = vrot.lane.b32.xlu0 %v750_v56, %s7926_s16  ;;  %v412_v57 = vpop.permute.xlu2 %411  ;;  %s7959_s16 = smov 26  }
  0xba   : > { %v313_v58 = vpop.permute.xlu1 %312  ;;  %v413_v59 = vrot.slane %v412_v57, 1 }
  0xbb   : > { %v314_v60 = vrot.slane %v313_v58, 1  ;;  %v291_v61 = vpop.permute.xlu0 %290 }
  0xbc   : > { %v292_v62 = vrot.slane %v291_v61, 1  ;;  %v415_v63 = vsel %vm414_vm4, %v412_v57, %v413_v59 }
  0xbd   : > { %v316_v0 = vsel %vm315_vm5, %v313_v58, %v314_v60  ;;  %418 = vst.msk [vmem:[#allocation2 + $0x14] ss:$8 sm:$0x3] %vm5088_vm1, %v415_v63  ;;  %v4372_v63 = vld [vmem:[%s5006_s6 + $0x1] ss:$4 sm:$0x3] }
  0xbe   : > { %v294_v3 = vsel %vm293_vm6, %v291_v61, %v292_v62  ;;  %319 = vst.msk [vmem:[#allocation2 + $0x3] ss:$8 sm:$0x3] %vm5088_vm1, %v316_v0  ;;  %v4373_v62 = vld [vmem:[%s5006_s6 + $0x1] ss:$4 sm:$0x3] }
  0xbf   : > { %297 = vst.msk [vmem:[#allocation2 + $0x1] ss:$8 sm:$0x3] %vm5088_vm1, %v294_v3  ;;  %807 = vrot.lane.b32.xlu2 %v805_v1, %s7959_s16  ;;  %v4371_v1 = vld [vmem:[%s5006_s6 + $0x1] ss:$4 sm:$0x3] }
  0xc0   : > { %796 = vrot.lane.b32.xlu1 %v794_v2, %s7957_s15  ;;  %s8068_s15 = smov 92   ;;  %s8069_s16 = smov 93  }
  0xc1   : > { %785 = vrot.lane.b32.xlu0 %v783_v4, %s7952_s13  ;;  %v445_v5 = vpop.permute.xlu2 %444  ;;  %s8067_s13 = smov 106  }
  0xc2   : > { %v324_v6 = vpop.permute.xlu1 %323  ;;  %v446_v7 = vrot.slane %v445_v5, 1 }
  0xc3   : > { %v325_v8 = vrot.slane %v324_v6, 1  ;;  %v302_v9 = vpop.permute.xlu0 %301 }
  0xc4   : > { %v303_v10 = vrot.slane %v302_v9, 1  ;;  %v448_v11 = vsel %vm447_vm7, %v445_v5, %v446_v7 }
  0xc5   : > { %v327_v12 = vsel %vm326_vm8, %v324_v6, %v325_v8  ;;  %451 = vst.msk [vmem:[#allocation2 + $0x17] ss:$8 sm:$0x3] %vm5088_vm1, %v448_v11  ;;  %v4375_v11 = vld [vmem:[%s5006_s6 + $0x1] ss:$4 sm:$0x3] }
  0xc6   : > { %v305_v15 = vsel %vm304_vm9, %v302_v9, %v303_v10  ;;  %330 = vst.msk [vmem:[#allocation2 + $0x4] ss:$8 sm:$0x3] %vm5088_vm1, %v327_v12  ;;  %v4376_v10 = vld [vmem:[%s5006_s6 + $0x1] ss:$4 sm:$0x3] }
  0xc7   : > { %308 = vst.msk [vmem:[#allocation2 + $0x2] ss:$8 sm:$0x3] %vm5088_vm1, %v305_v15  ;;  %843 = vrot.lane.b32.xlu2 %v4361_v13, %s7950_s24  ;;  %s8066_s24 = smov 96  }
  0xc8   : > { %833 = vrot.lane.b32.xlu1 %v4360_v14, %s7948_s30  ;;  %s8065_s30 = smov 95   ;;  %v4374_v13 = vld [vmem:[%s5006_s6 + $0x1] ss:$4 sm:$0x3] }
  0xc9   : > { %823 = vrot.lane.b32.xlu0 %v4359_v16, %s7943_s23  ;;  %v478_v17 = vpop.permute.xlu2 %477  ;;  %s8064_s23 = smov 109  }
  0xca   : > { %v368_v18 = vpop.permute.xlu1 %367  ;;  %v479_v19 = vrot.slane %v478_v17, 1 }
  0xcb   : > { %v369_v20 = vrot.slane %v368_v18, 1  ;;  %v357_v21 = vpop.permute.xlu0 %356 }
  0xcc   : > { %v358_v22 = vrot.slane %v357_v21, 1  ;;  %v481_v23 = vsel %vm8010_vm10, %v478_v17, %v479_v19 }
  0xcd   : > { %v371_v24 = vsel %vm8009_vm11, %v368_v18, %v369_v20  ;;  %484 = vst.msk [vmem:[#allocation2 + $0x22] ss:$8 sm:$0x3] %vm5088_vm1, %v481_v23  ;;  %v4378_v23 = vld [vmem:[%s5006_s6 + $0x1] ss:$4 sm:$0x3] }
  0xce   : > { %v360_v27 = vsel %vm8008_vm12, %v357_v21, %v358_v22  ;;  %374 = vst.msk [vmem:[#allocation2 + $0x10] ss:$8 sm:$0x3] %vm5088_vm1, %v371_v24  ;;  %v4379_v22 = vld [vmem:[%s5006_s6 + $0x1] ss:$4 sm:$0x3] }
  0xcf   : > { %363 = vst.msk [vmem:[#allocation2 + $0x7] ss:$8 sm:$0x3] %vm5088_vm1, %v360_v27  ;;  %873 = vrot.lane.b32.xlu2 %v4364_v25, %s7941_s27  ;;  %s8063_s27 = smov 108  }
  0xd0   : > { %863 = vrot.lane.b32.xlu1 %v4363_v26, %s7934_s29  ;;  %s8061_s29 = smov 112   ;;  %v4377_v25 = vld [vmem:[%s5006_s6 + $0x1] ss:$4 sm:$0x3] }
  0xd1   : > { %853 = vrot.lane.b32.xlu0 %v4362_v28, %s7932_s28  ;;  %v511_v29 = vpop.permute.xlu2 %510  ;;  %s8060_s28 = smov 111  }
  0xd2   : > { %v401_v30 = vpop.permute.xlu1 %400  ;;  %v512_v31 = vrot.slane %v511_v29, 1 }
  0xd3   : > { %v402_v32 = vrot.slane %v401_v30, 1  ;;  %v390_v33 = vpop.permute.xlu0 %389 }
  0xd4   : > { %v391_v34 = vrot.slane %v390_v33, 1  ;;  %v514_v35 = vsel %vm7937_vm13, %v511_v29, %v512_v31  ;;  %vm7945_vm13 = vcmask 785408  }
  0xd5   : > { %v404_v36 = vsel %vm7936_vm14, %v401_v30, %v402_v32  ;;  %517 = vst.msk [vmem:[#allocation2 + $0x25] ss:$8 sm:$0x3] %vm5088_vm1, %v514_v35  ;;  %vm7946_vm14 = vcmask 629760  }
  0xd6   : > { %v393_v40 = vsel %vm7938_vm15, %v390_v33, %v391_v34  ;;  %407 = vst.msk [vmem:[#allocation2 + $0x13] ss:$8 sm:$0x3] %vm5088_vm1, %v404_v36  ;;  %vm7947_vm15 = vcmask 867328  }
  0xd7   : > { %396 = vst.msk [vmem:[#allocation2 + $0x12] ss:$8 sm:$0x3] %vm5088_vm1, %v393_v40  ;;  %903 = vrot.lane.b32.xlu2 %v4367_v37, %s7939_s8  ;;  %s8062_s8 = smov 107  }
  0xd8   : > { %893 = vrot.lane.b32.xlu1 %v4366_v39, %s8060_s28  ;;  %v4382_v34 = vld [vmem:[%s5006_s6 + $0x1] ss:$4 sm:$0x3] }
  0xd9   : > { %883 = vrot.lane.b32.xlu0 %v4365_v41, %s8061_s29  ;;  %v544_v42 = vpop.permute.xlu2 %543  ;;  %v4381_v35 = vld [vmem:[%s5006_s6 + $0x1] ss:$4 sm:$0x3] }
  0xda   : > { %v434_v43 = vpop.permute.xlu1 %433  ;;  %v545_v44 = vrot.slane %v544_v42, 1  ;;  %v4380_v37 = vld [vmem:[%s5006_s6 + $0x1] ss:$4 sm:$0x3] }
  0xdb   : > { %v435_v45 = vrot.slane %v434_v43, 1  ;;  %v423_v46 = vpop.permute.xlu0 %422 }
  0xdc   : > { %v424_v47 = vrot.slane %v423_v46, 1  ;;  %v547_v48 = vsel %vm7946_vm14, %v544_v42, %v545_v44  ;;  %vm7954_vm14 = vcmask 760832  }
  0xdd   : > { %v437_v49 = vsel %vm7945_vm13, %v434_v43, %v435_v45  ;;  %550 = vst.msk [vmem:[#allocation2 + $0x30] ss:$8 sm:$0x3] %vm5088_vm1, %v547_v48  ;;  %vm7955_vm13 = vcmask 605184  }
  0xde   : > { %v426_v52 = vsel %vm7947_vm15, %v423_v46, %v424_v47  ;;  %440 = vst.msk [vmem:[#allocation2 + $0x16] ss:$8 sm:$0x3] %vm5088_vm1, %v437_v49  ;;  %vm7956_vm15 = vcmask 769024  }
  0xdf   : > { %429 = vst.msk [vmem:[#allocation2 + $0x15] ss:$8 sm:$0x3] %vm5088_vm1, %v426_v52  ;;  %933 = vrot.lane.b32.xlu2 %v4370_v50, %s8062_s8  ;;  %v4385_v47 = vld [vmem:[%s5006_s6 + $0x1] ss:$4 sm:$0x3] }
  0xe0   : > { %923 = vrot.lane.b32.xlu1 %v4369_v51, %s8063_s27  ;;  %v4384_v48 = vld [vmem:[%s5006_s6 + $0x1] ss:$4 sm:$0x3] }
  0xe1   : > { %913 = vrot.lane.b32.xlu0 %v4368_v53, %s8064_s23  ;;  %v577_v54 = vpop.permute.xlu2 %576  ;;  %v4383_v50 = vld [vmem:[%s5006_s6 + $0x1] ss:$4 sm:$0x3] }
  0xe2   : > { %v467_v55 = vpop.permute.xlu1 %466  ;;  %v578_v56 = vrot.slane %v577_v54, 1 }
  0xe3   : > { %v468_v57 = vrot.slane %v467_v55, 1  ;;  %v456_v58 = vpop.permute.xlu0 %455 }
  0xe4   : > { %v457_v59 = vrot.slane %v456_v58, 1  ;;  %v580_v60 = vsel %vm7955_vm13, %v577_v54, %v578_v56  ;;  %vm7963_vm13 = vcmask 736256  }
  0xe5   : > { %v470_v61 = vsel %vm7954_vm14, %v467_v55, %v468_v57  ;;  %583 = vst.msk [vmem:[#allocation2 + $0x33] ss:$8 sm:$0x3] %vm5088_vm1, %v580_v60  ;;  %vm7964_vm14 = vcmask 506880  }
  0xe6   : > { %v459_v0 = vsel %vm7956_vm15, %v456_v58, %v457_v59  ;;  %473 = vst.msk [vmem:[#allocation2 + $0x21] ss:$8 sm:$0x3] %vm5088_vm1, %v470_v61  ;;  %vm7965_vm15 = vcmask 744448  }
  0xe7   : > { %462 = vst.msk [vmem:[#allocation2 + $0x20] ss:$8 sm:$0x3] %vm5088_vm1, %v459_v0  ;;  %963 = vrot.lane.b32.xlu2 %v4373_v62, %s8065_s30  ;;  %v4388_v59 = vld [vmem:[%s5006_s6 + $0x1] ss:$4 sm:$0x3] }
  0xe8   : > { %953 = vrot.lane.b32.xlu1 %v4372_v63, %s8066_s24  ;;  %v4387_v60 = vld [vmem:[%s5006_s6 + $0x1] ss:$4 sm:$0x3] }
  0xe9   : > { %943 = vrot.lane.b32.xlu0 %v4371_v1, %s8067_s13  ;;  %v610_v2 = vpop.permute.xlu2 %609  ;;  %v4386_v62 = vld [vmem:[%s5006_s6 + $0x1] ss:$4 sm:$0x3] }
  0xea   : > { %v500_v3 = vpop.permute.xlu1 %499  ;;  %v611_v4 = vrot.slane %v610_v2, 1 }
  0xeb   : > { %v501_v5 = vrot.slane %v500_v3, 1  ;;  %v489_v6 = vpop.permute.xlu0 %488 }
  0xec   : > { %v490_v7 = vrot.slane %v489_v6, 1  ;;  %v613_v8 = vsel %vm7964_vm14, %v610_v2, %v611_v4  ;;  %vm7970_vm14 = vcmask 637952  }
  0xed   : > { %v503_v9 = vsel %vm7963_vm13, %v500_v3, %v501_v5  ;;  %616 = vst.msk [vmem:[#allocation2 + $0x36] ss:$8 sm:$0x3] %vm5088_vm1, %v613_v8  ;;  %vm7971_vm13 = vcmask 482304  }
  0xee   : > { %v492_v12 = vsel %vm7965_vm15, %v489_v6, %v490_v7  ;;  %506 = vst.msk [vmem:[#allocation2 + $0x24] ss:$8 sm:$0x3] %vm5088_vm1, %v503_v9  ;;  %vm7972_vm15 = vcmask 646144  }
  0xef   : > { %495 = vst.msk [vmem:[#allocation2 + $0x23] ss:$8 sm:$0x3] %vm5088_vm1, %v492_v12  ;;  %993 = vrot.lane.b32.xlu2 %v4376_v10, %s8068_s15  ;;  %v4391_v7 = vld [vmem:[%s5006_s6 + $0x1] ss:$4 sm:$0x3] }
  0xf0   : > { %983 = vrot.lane.b32.xlu1 %v4375_v11, %s8069_s16  ;;  %v4390_v8 = vld [vmem:[%s5006_s6 + $0x1] ss:$4 sm:$0x3] }
  0xf1   : > { %973 = vrot.lane.b32.xlu0 %v4374_v13, %s8070_s9  ;;  %v643_v14 = vpop.permute.xlu2 %642  ;;  %v4389_v10 = vld [vmem:[%s5006_s6 + $0x1] ss:$4 sm:$0x3] }
  0xf2   : > { %v533_v15 = vpop.permute.xlu1 %532  ;;  %v644_v16 = vrot.slane %v643_v14, 1 }
  0xf3   : > { %v534_v17 = vrot.slane %v533_v15, 1  ;;  %v522_v18 = vpop.permute.xlu0 %521 }
  0xf4   : > { %v523_v19 = vrot.slane %v522_v18, 1  ;;  %v646_v20 = vsel %vm7971_vm13, %v643_v14, %v644_v16  ;;  %vm7974_vm13 = vcmask 613376  }
  0xf5   : > { %v536_v21 = vsel %vm7970_vm14, %v533_v15, %v534_v17  ;;  %649 = vst.msk [vmem:[#allocation2 + $0x41] ss:$8 sm:$0x3] %vm5088_vm1, %v646_v20  ;;  %vm7975_vm14 = vcmask 384000  }
  0xf6   : > { %v525_v24 = vsel %vm7972_vm15, %v522_v18, %v523_v19  ;;  %539 = vst.msk [vmem:[#allocation2 + $0x27] ss:$8 sm:$0x3] %vm5088_vm1, %v536_v21  ;;  %vm7976_vm15 = vcmask 621568  }
  0xf7   : > { %528 = vst.msk [vmem:[#allocation2 + $0x26] ss:$8 sm:$0x3] %vm5088_vm1, %v525_v24  ;;  %1023 = vrot.lane.b32.xlu2 %v4379_v22, %s8071_s26  ;;  %v4394_v19 = vld [vmem:[%s5006_s6 + $0x1] ss:$4 sm:$0x3] }
  0xf8   : > { %1013 = vrot.lane.b32.xlu1 %v4378_v23, %s8072_s14  ;;  %v4393_v20 = vld [vmem:[%s5006_s6 + $0x1] ss:$4 sm:$0x3] }
  0xf9   : > { %1003 = vrot.lane.b32.xlu0 %v4377_v25, %s8073_s0  ;;  %v676_v26 = vpop.permute.xlu2 %675  ;;  %v4392_v22 = vld [vmem:[%s5006_s6 + $0x1] ss:$4 sm:$0x3] }
  0xfa   : > { %v566_v27 = vpop.permute.xlu1 %565  ;;  %v677_v28 = vrot.slane %v676_v26, 1 }
  0xfb   : > { %v567_v29 = vrot.slane %v566_v27, 1  ;;  %v555_v30 = vpop.permute.xlu0 %554 }
  0xfc   : > { %v556_v31 = vrot.slane %v555_v30, 1  ;;  %v679_v32 = vsel %vm7975_vm14, %v676_v26, %v677_v28  ;;  %vm7981_vm14 = vcmask 515072  }
  0xfd   : > { %v569_v33 = vsel %vm7974_vm13, %v566_v27, %v567_v29  ;;  %682 = vst.msk [vmem:[#allocation2 + $0x44] ss:$8 sm:$0x3] %vm5088_vm1, %v679_v32  ;;  %vm7982_vm13 = vcmask 359424  }
  0xfe   : > { %v558_v36 = vsel %vm7976_vm15, %v555_v30, %v556_v31  ;;  %572 = vst.msk [vmem:[#allocation2 + $0x32] ss:$8 sm:$0x3] %vm5088_vm1, %v569_v33  ;;  %vm7983_vm15 = vcmask 523264  }
  0xff   : > { %561 = vst.msk [vmem:[#allocation2 + $0x31] ss:$8 sm:$0x3] %vm5088_vm1, %v558_v36  ;;  %1053 = vrot.lane.b32.xlu2 %v4382_v34, %s8074_s1  ;;  %v4397_v31 = vld [vmem:[%s5006_s6 + $0x1] ss:$4 sm:$0x3] }
 0x100   : > { %1043 = vrot.lane.b32.xlu1 %v4381_v35, %s8075_s10  ;;  %v4396_v32 = vld [vmem:[%s5006_s6 + $0x1] ss:$4 sm:$0x3] }
 0x101   : > { %1033 = vrot.lane.b32.xlu0 %v4380_v37, %s8076_s20  ;;  %v709_v39 = vpop.permute.xlu2 %708  ;;  %v4395_v34 = vld [vmem:[%s5006_s6 + $0x1] ss:$4 sm:$0x3] }
 0x102   : > { %v599_v40 = vpop.permute.xlu1 %598  ;;  %v710_v41 = vrot.slane %v709_v39, 1  ;;  %v4358_v37 = vld [vmem:[%s5006_s6 + $0x1] ss:$4 sm:$0x3] }
 0x103   : > { %v600_v42 = vrot.slane %v599_v40, 1  ;;  %v588_v43 = vpop.permute.xlu0 %587  ;;  %819 = vst.msk [vmem:[#allocation2 + $0x61] ss:$8 sm:$0x3] %vm5088_vm1, %v4358_v37 }
 0x104   : > { %v589_v44 = vrot.slane %v588_v43, 1  ;;  %v712_v45 = vsel %vm7982_vm13, %v709_v39, %v710_v41  ;;  %vm7988_vm13 = vcmask 490496  }
 0x105   : > { %v602_v46 = vsel %vm7981_vm14, %v599_v40, %v600_v42  ;;  %715 = vst.msk [vmem:[#allocation2 + $0x47] ss:$8 sm:$0x3] %vm5088_vm1, %v712_v45  ;;  %vm7989_vm14 = vcmask 261120  }
 0x106   : > { %v591_v49 = vsel %vm7983_vm15, %v588_v43, %v589_v44  ;;  %605 = vst.msk [vmem:[#allocation2 + $0x35] ss:$8 sm:$0x3] %vm5088_vm1, %v602_v46  ;;  %vm7990_vm15 = vcmask 498688  }
 0x107   : > { %594 = vst.msk [vmem:[#allocation2 + $0x34] ss:$8 sm:$0x3] %vm5088_vm1, %v591_v49  ;;  %1083 = vrot.lane.b32.xlu2 %v4385_v47, %s8077_s19  ;;  %v4400_v45 = vld [vmem:[%s5006_s6 + $0x1] ss:$4 sm:$0x3] }
 0x108   : > { %1073 = vrot.lane.b32.xlu1 %v4384_v48, %s8078_s7  ;;  %v4399_v46 = vld [vmem:[%s5006_s6 + $0x1] ss:$4 sm:$0x3] }
 0x109   : > { %1063 = vrot.lane.b32.xlu0 %v4383_v50, %s8079_s21  ;;  %v742_v51 = vpop.permute.xlu2 %741  ;;  %v4398_v48 = vld [vmem:[%s5006_s6 + $0x1] ss:$4 sm:$0x3] }
 0x10a   : > { %v632_v52 = vpop.permute.xlu1 %631  ;;  %v743_v53 = vrot.slane %v742_v51, 1 }
 0x10b   : > { %v633_v54 = vrot.slane %v632_v52, 1  ;;  %v621_v55 = vpop.permute.xlu0 %620 }
 0x10c   : > { %v622_v56 = vrot.slane %v621_v55, 1  ;;  %v745_v57 = vsel %vm7989_vm14, %v742_v51, %v743_v53  ;;  %vm7995_vm14 = vcmask 392192  }
 0x10d   : > { %v635_v58 = vsel %vm7988_vm13, %v632_v52, %v633_v54  ;;  %748 = vst.msk [vmem:[#allocation2 + $0x52] ss:$8 sm:$0x3] %vm5088_vm1, %v745_v57  ;;  %vm7996_vm13 = vcmask 236544  }
 0x10e   : > { %v624_v61 = vsel %vm7990_vm15, %v621_v55, %v622_v56  ;;  %638 = vst.msk [vmem:[#allocation2 + $0x40] ss:$8 sm:$0x3] %vm5088_vm1, %v635_v58  ;;  %vm7997_vm15 = vcmask 474112  }
 0x10f   : > { %627 = vst.msk [vmem:[#allocation2 + $0x37] ss:$8 sm:$0x3] %vm5088_vm1, %v624_v61  ;;  %1113 = vrot.lane.b32.xlu2 %v4388_v59, %s8080_s25  ;;  %v4403_v57 = vld [vmem:[%s5006_s6 + $0x1] ss:$4 sm:$0x3] }
 0x110   : > { %1103 = vrot.lane.b32.xlu1 %v4387_v60, %s8081_s18  ;;  %v4402_v58 = vld [vmem:[%s5006_s6 + $0x1] ss:$4 sm:$0x3] }
 0x111   : > { %1093 = vrot.lane.b32.xlu0 %v4386_v62, %s8082_s11  ;;  %v775_v63 = vpop.permute.xlu2 %774  ;;  %v4401_v60 = vld [vmem:[%s5006_s6 + $0x1] ss:$4 sm:$0x3] }
 0x112   : > { %v665_v0 = vpop.permute.xlu1 %664  ;;  %v776_v1 = vrot.slane %v775_v63, 1 }
 0x113   : > { %v666_v2 = vrot.slane %v665_v0, 1  ;;  %v654_v3 = vpop.permute.xlu0 %653 }
 0x114   : > { %v655_v4 = vrot.slane %v654_v3, 1  ;;  %v778_v5 = vsel %vm7996_vm13, %v775_v63, %v776_v1  ;;  %vm8000_vm13 = vcmask 367616  }
 0x115   : > { %v668_v6 = vsel %vm7995_vm14, %v665_v0, %v666_v2  ;;  %781 = vst.msk [vmem:[#allocation2 + $0x55] ss:$8 sm:$0x3] %vm5088_vm1, %v778_v5  ;;  %vm810_vm14 = vcmask 211968  }
 0x116   : > { %v657_v9 = vsel %vm7997_vm15, %v654_v3, %v655_v4  ;;  %671 = vst.msk [vmem:[#allocation2 + $0x43] ss:$8 sm:$0x3] %vm5088_vm1, %v668_v6  ;;  %vm8001_vm15 = vcmask 375808  }
 0x117   : > { %660 = vst.msk [vmem:[#allocation2 + $0x42] ss:$8 sm:$0x3] %vm5088_vm1, %v657_v9  ;;  %1143 = vrot.lane.b32.xlu2 %v4391_v7, %s8083_s5  ;;  %v4406_v5 = vld [vmem:[%s5006_s6 + $0x1] ss:$4 sm:$0x3] }
 0x118   : > { %1133 = vrot.lane.b32.xlu1 %v4390_v8, %s8084_s12  ;;  %v4405_v6 = vld [vmem:[%s5006_s6 + $0x1] ss:$4 sm:$0x3] }
 0x119   : > { %1123 = vrot.lane.b32.xlu0 %v4389_v10, %s8085_s4  ;;  %v808_v11 = vpop.permute.xlu2 %807  ;;  %v4404_v8 = vld [vmem:[%s5006_s6 + $0x1] ss:$4 sm:$0x3] }
 0x11a   : > { %v698_v12 = vpop.permute.xlu1 %697  ;;  %v809_v13 = vrot.slane %v808_v11, 1 }
 0x11b   : > { %v699_v14 = vrot.slane %v698_v12, 1  ;;  %v687_v15 = vpop.permute.xlu0 %686 }
 0x11c   : > { %v688_v16 = vrot.slane %v687_v15, 1  ;;  %v811_v17 = vsel %vm810_vm14, %v808_v11, %v809_v13 }
 0x11d   : > { %v701_v18 = vsel %vm8000_vm13, %v698_v12, %v699_v14  ;;  %814 = vst.msk [vmem:[#allocation2 + $0x60] ss:$8 sm:$0x3] %vm5088_vm1, %v811_v17  ;;  %vm8004_vm13 = vcmask 343040  }
 0x11e   : > { %v690_v21 = vsel %vm8001_vm15, %v687_v15, %v688_v16  ;;  %704 = vst.msk [vmem:[#allocation2 + $0x46] ss:$8 sm:$0x3] %vm5088_vm1, %v701_v18  ;;  %vm8005_vm15 = vcmask 351232  }
 0x11f   : > { %693 = vst.msk [vmem:[#allocation2 + $0x45] ss:$8 sm:$0x3] %vm5088_vm1, %v690_v21  ;;  %1173 = vrot.lane.b32.xlu2 %v4394_v19, %s8086_s17  ;;  %v4410_v17 = vld [vmem:[%s5006_s6 + $0x2] ss:$4 sm:$0x3] }
 0x120   : > { %1163 = vrot.lane.b32.xlu1 %v4393_v20, %s8087_s2  ;;  %s8091_s2 = smov 46   ;;  %v4409_v18 = vld [vmem:[%s5006_s6 + $0x2] ss:$4 sm:$0x3] }
 0x121   : > { %1153 = vrot.lane.b32.xlu0 %v4392_v22, %s8088_s3  ;;  %v844_v23 = vpop.permute.xlu2 %843  ;;  %s8090_s3 = smov 45   ;;  %v4408_v20 = vld [vmem:[%s5006_s6 + $0x2] ss:$4 sm:$0x3] }
 0x122   : > { %v731_v24 = vpop.permute.xlu1 %730  ;;  %v845_v25 = vrot.slane %v844_v23, 1 }
 0x123   : > { %v732_v26 = vrot.slane %v731_v24, 1  ;;  %v720_v27 = vpop.permute.xlu0 %719 }
 0x124   : > { %v721_v28 = vrot.slane %v720_v27, 1  ;;  %v846_v29 = vsel %vm315_vm5, %v844_v23, %v845_v25 }
 0x125   : > { %v734_v30 = vsel %vm8004_vm13, %v731_v24, %v732_v26  ;;  %849 = vst.msk [vmem:[#allocation2 + $0x64] ss:$8 sm:$0x3] %vm5088_vm1, %v846_v29  ;;  %vm8006_vm13 = vcmask 244736  }
 0x126   : > { %v723_v33 = vsel %vm8005_vm15, %v720_v27, %v721_v28  ;;  %737 = vst.msk [vmem:[#allocation2 + $0x51] ss:$8 sm:$0x3] %vm5088_vm1, %v734_v30  ;;  %vm8007_vm15 = vcmask 252928  }
 0x127   : > { %726 = vst.msk [vmem:[#allocation2 + $0x50] ss:$8 sm:$0x3] %vm5088_vm1, %v723_v33  ;;  %1203 = vrot.lane.b32.xlu2 %v4397_v31, %s8089_s22  ;;  %s8094_s22 = smov 43  }
 0x128   : > { %1193 = vrot.lane.b32.xlu1 %v4396_v32, %s8090_s3  ;;  %s8093_s3 = smov 42   ;;  %v4413_v29 = vld [vmem:[%s5006_s6 + $0x2] ss:$4 sm:$0x3] }
 0x129   : > { %1183 = vrot.lane.b32.xlu0 %v4395_v34, %s8091_s2  ;;  %v874_v35 = vpop.permute.xlu2 %873  ;;  %s8092_s2 = smov 32   ;;  %v4412_v30 = vld [vmem:[%s5006_s6 + $0x2] ss:$4 sm:$0x3] }
 0x12a   : > { %v764_v36 = vpop.permute.xlu1 %763  ;;  %v875_v39 = vrot.slane %v874_v35, 1  ;;  %v4411_v32 = vld [vmem:[%s5006_s6 + $0x2] ss:$4 sm:$0x3] }
 0x12b   : > { %v765_v40 = vrot.slane %v764_v36, 1  ;;  %v753_v41 = vpop.permute.xlu0 %752 }
 0x12c   : > { %v754_v42 = vrot.slane %v753_v41, 1  ;;  %v876_v43 = vsel %vm348_vm2, %v874_v35, %v875_v39 }
 0x12d   : > { %v767_v44 = vsel %vm8006_vm13, %v764_v36, %v765_v40  ;;  %879 = vst.msk [vmem:[#allocation2 + $0x67] ss:$8 sm:$0x3] %vm5088_vm1, %v876_v43  ;;  %vm799_vm13 = vcmask 220160  }
 0x12e   : > { %v756_v47 = vsel %vm8007_vm15, %v753_v41, %v754_v42  ;;  %770 = vst.msk [vmem:[#allocation2 + $0x54] ss:$8 sm:$0x3] %vm5088_vm1, %v767_v44  ;;  %vm788_vm15 = vcmask 228352  }
 0x12f   : > { %759 = vst.msk [vmem:[#allocation2 + $0x53] ss:$8 sm:$0x3] %vm5088_vm1, %v756_v47  ;;  %1233 = vrot.lane.b32.xlu2 %v4400_v45, %s8092_s2  ;;  %s8097_s2 = smov 31  }
 0x130   : > { %1223 = vrot.lane.b32.xlu1 %v4399_v46, %s8093_s3  ;;  %s8096_s3 = smov 30   ;;  %v4416_v42 = vld [vmem:[%s5006_s6 + $0x2] ss:$4 sm:$0x3] }
 0x131   : > { %1213 = vrot.lane.b32.xlu0 %v4398_v48, %s8094_s22  ;;  %v904_v49 = vpop.permute.xlu2 %903  ;;  %s8095_s22 = smov 29   ;;  %v4415_v43 = vld [vmem:[%s5006_s6 + $0x2] ss:$4 sm:$0x3] }
 0x132   : > { %v797_v50 = vpop.permute.xlu1 %796  ;;  %v905_v51 = vrot.slane %v904_v49, 1  ;;  %v4414_v45 = vld [vmem:[%s5006_s6 + $0x2] ss:$4 sm:$0x3] }
 0x133   : > { %v798_v52 = vrot.slane %v797_v50, 1  ;;  %v786_v53 = vpop.permute.xlu0 %785 }
 0x134   : > { %v787_v54 = vrot.slane %v786_v53, 1  ;;  %v906_v55 = vsel %vm381_vm3, %v904_v49, %v905_v51 }
 0x135   : > { %v800_v56 = vsel %vm799_vm13, %v797_v50, %v798_v52  ;;  %909 = vst.msk [vmem:[#allocation2 + $0x72] ss:$8 sm:$0x3] %vm5088_vm1, %v906_v55  ;;  %v4418_v55 = vld [vmem:[%s5006_s6 + $0x2] ss:$4 sm:$0x3] }
 0x136   : > { %v789_v59 = vsel %vm788_vm15, %v786_v53, %v787_v54  ;;  %803 = vst.msk [vmem:[#allocation2 + $0x57] ss:$8 sm:$0x3] %vm5088_vm1, %v800_v56  ;;  %v4419_v54 = vld [vmem:[%s5006_s6 + $0x2] ss:$4 sm:$0x3] }
 0x137   : > { %792 = vst.msk [vmem:[#allocation2 + $0x56] ss:$8 sm:$0x3] %vm5088_vm1, %v789_v59  ;;  %1263 = vrot.lane.b32.xlu2 %v4403_v57, %s8095_s22  ;;  %s8100_s22 = smov 28  }
 0x138   : > { %1253 = vrot.lane.b32.xlu1 %v4402_v58, %s8096_s3  ;;  %s8099_s3 = smov 27   ;;  %v4417_v57 = vld [vmem:[%s5006_s6 + $0x2] ss:$4 sm:$0x3] }
 0x139   : > { %1243 = vrot.lane.b32.xlu0 %v4401_v60, %s8097_s2  ;;  %v934_v61 = vpop.permute.xlu2 %933  ;;  %s8098_s2 = smov 26  }
 0x13a   : > { %v834_v62 = vpop.permute.xlu1 %833  ;;  %v935_v63 = vrot.slane %v934_v61, 1 }
 0x13b   : > { %v835_v0 = vrot.slane %v834_v62, 1  ;;  %v824_v1 = vpop.permute.xlu0 %823 }
 0x13c   : > { %v825_v2 = vrot.slane %v824_v1, 1  ;;  %v936_v3 = vsel %vm414_vm4, %v934_v61, %v935_v63 }
 0x13d   : > { %v836_v4 = vsel %vm304_vm9, %v834_v62, %v835_v0  ;;  %939 = vst.msk [vmem:[#allocation2 + $0x75] ss:$8 sm:$0x3] %vm5088_vm1, %v936_v3  ;;  %v4421_v3 = vld [vmem:[%s5006_s6 + $0x2] ss:$4 sm:$0x3] }
 0x13e   : > { %v826_v7 = vsel %vm293_vm6, %v824_v1, %v825_v2  ;;  %839 = vst.msk [vmem:[#allocation2 + $0x63] ss:$8 sm:$0x3] %vm5088_vm1, %v836_v4  ;;  %v4422_v2 = vld [vmem:[%s5006_s6 + $0x2] ss:$4 sm:$0x3] }
 0x13f   : > { %829 = vst.msk [vmem:[#allocation2 + $0x62] ss:$8 sm:$0x3] %vm5088_vm1, %v826_v7  ;;  %1293 = vrot.lane.b32.xlu2 %v4406_v5, %s8098_s2  ;;  %s8103_s2 = smov 127  }
 0x140   : > { %1283 = vrot.lane.b32.xlu1 %v4405_v6, %s8099_s3  ;;  %s8102_s3 = smov 126   ;;  %v4420_v5 = vld [vmem:[%s5006_s6 + $0x2] ss:$4 sm:$0x3] }
 0x141   : > { %1273 = vrot.lane.b32.xlu0 %v4404_v8, %s8100_s22  ;;  %v964_v9 = vpop.permute.xlu2 %963  ;;  %s8101_s22 = smov 125  }
 0x142   : > { %v864_v10 = vpop.permute.xlu1 %863  ;;  %v965_v11 = vrot.slane %v964_v9, 1 }
 0x143   : > { %v865_v12 = vrot.slane %v864_v10, 1  ;;  %v854_v13 = vpop.permute.xlu0 %853 }
 0x144   : > { %v855_v14 = vrot.slane %v854_v13, 1  ;;  %v966_v15 = vsel %vm447_vm7, %v964_v9, %v965_v11 }
 0x145   : > { %v866_v16 = vsel %vm337_vm0, %v864_v10, %v865_v12  ;;  %969 = vst.msk [vmem:[#allocation2 + $0x80] ss:$8 sm:$0x3] %vm5088_vm1, %v966_v15  ;;  %v4424_v15 = vld [vmem:[%s5006_s6 + $0x2] ss:$4 sm:$0x3] }
 0x146   : > { %v856_v19 = vsel %vm326_vm8, %v854_v13, %v855_v14  ;;  %869 = vst.msk [vmem:[#allocation2 + $0x66] ss:$8 sm:$0x3] %vm5088_vm1, %v866_v16  ;;  %v4425_v14 = vld [vmem:[%s5006_s6 + $0x2] ss:$4 sm:$0x3] }
 0x147   : > { %859 = vst.msk [vmem:[#allocation2 + $0x65] ss:$8 sm:$0x3] %vm5088_vm1, %v856_v19  ;;  %1328 = vrot.lane.b32.xlu2 %v4410_v17, %s8101_s22  ;;  %s8106_s22 = smov 124  }
 0x148   : > { %1318 = vrot.lane.b32.xlu1 %v4409_v18, %s8102_s3  ;;  %s8105_s3 = smov 123   ;;  %v4423_v17 = vld [vmem:[%s5006_s6 + $0x2] ss:$4 sm:$0x3] }
 0x149   : > { %1308 = vrot.lane.b32.xlu0 %v4408_v20, %s8103_s2  ;;  %v994_v21 = vpop.permute.xlu2 %993  ;;  %s8104_s2 = smov 122  }
 0x14a   : > { %v894_v22 = vpop.permute.xlu1 %893  ;;  %v995_v23 = vrot.slane %v994_v21, 1 }
 0x14b   : > { %v895_v24 = vrot.slane %v894_v22, 1  ;;  %v884_v25 = vpop.permute.xlu0 %883 }
 0x14c   : > { %v885_v26 = vrot.slane %v884_v25, 1  ;;  %v996_v27 = vsel %vm8010_vm10, %v994_v21, %v995_v23  ;;  %vm8109_vm10 = vcmask 891904  }
 0x14d   : > { %v896_v28 = vsel %vm8009_vm11, %v894_v22, %v895_v24  ;;  %999 = vst.msk [vmem:[#allocation2 + $0x83] ss:$8 sm:$0x3] %vm5088_vm1, %v996_v27  ;;  %vm8108_vm11 = vcmask 883712  }
 0x14e   : > { %v886_v31 = vsel %vm8008_vm12, %v884_v25, %v885_v26  ;;  %899 = vst.msk [vmem:[#allocation2 + $0x71] ss:$8 sm:$0x3] %vm5088_vm1, %v896_v28  ;;  %vm8107_vm12 = vcmask 654336  }
 0x14f   : > { %889 = vst.msk [vmem:[#allocation2 + $0x70] ss:$8 sm:$0x3] %vm5088_vm1, %v886_v31  ;;  %1358 = vrot.lane.b32.xlu2 %v4413_v29, %s8104_s2  ;;  %v4428_v26 = vld [vmem:[%s5006_s6 + $0x2] ss:$4 sm:$0x3] }
 0x150   : > { %1348 = vrot.lane.b32.xlu1 %v4412_v30, %s8105_s3  ;;  %v4427_v27 = vld [vmem:[%s5006_s6 + $0x2] ss:$4 sm:$0x3] }
 0x151   : > { %1338 = vrot.lane.b32.xlu0 %v4411_v32, %s8106_s22  ;;  %v1024_v33 = vpop.permute.xlu2 %1023  ;;  %s8110_s22 = smov 110   ;;  %v4426_v29 = vld [vmem:[%s5006_s6 + $0x2] ss:$4 sm:$0x3] }
 0x152   : > { %v924_v34 = vpop.permute.xlu1 %923  ;;  %v1025_v35 = vrot.slane %v1024_v33, 1 }
 0x153   : > { %v925_v36 = vrot.slane %v924_v34, 1  ;;  %v914_v37 = vpop.permute.xlu0 %913 }
 0x154   : > { %v915_v39 = vrot.slane %v914_v37, 1  ;;  %v1026_v40 = vsel %vm8107_vm12, %v1024_v33, %v1025_v35  ;;  %vm8113_vm12 = vcmask 867328  }
 0x155   : > { %v926_v41 = vsel %vm8108_vm11, %v924_v34, %v925_v36  ;;  %1029 = vst.msk [vmem:[#allocation2 + $0x86] ss:$8 sm:$0x3] %vm5088_vm1, %v1026_v40  ;;  %vm8112_vm11 = vcmask 785408  }
 0x156   : > { %v916_v44 = vsel %vm8109_vm10, %v914_v37, %v915_v39  ;;  %929 = vst.msk [vmem:[#allocation2 + $0x74] ss:$8 sm:$0x3] %vm5088_vm1, %v926_v41  ;;  %vm8111_vm10 = vcmask 629760  }
 0x157   : > { %919 = vst.msk [vmem:[#allocation2 + $0x73] ss:$8 sm:$0x3] %vm5088_vm1, %v916_v44  ;;  %1388 = vrot.lane.b32.xlu2 %v4416_v42, %s8110_s22  ;;  %v4431_v39 = vld [vmem:[%s5006_s6 + $0x2] ss:$4 sm:$0x3] }
 0x158   : > { %1378 = vrot.lane.b32.xlu1 %v4415_v43, %s8060_s28  ;;  %v4430_v40 = vld [vmem:[%s5006_s6 + $0x2] ss:$4 sm:$0x3] }
 0x159   : > { %1368 = vrot.lane.b32.xlu0 %v4414_v45, %s8061_s29  ;;  %v1054_v46 = vpop.permute.xlu2 %1053  ;;  %v4429_v42 = vld [vmem:[%s5006_s6 + $0x2] ss:$4 sm:$0x3] }
 0x15a   : > { %v954_v47 = vpop.permute.xlu1 %953  ;;  %v1055_v48 = vrot.slane %v1054_v46, 1 }
 0x15b   : > { %v955_v49 = vrot.slane %v954_v47, 1  ;;  %v944_v50 = vpop.permute.xlu0 %943 }
 0x15c   : > { %v945_v51 = vrot.slane %v944_v50, 1  ;;  %v1056_v52 = vsel %vm8111_vm10, %v1054_v46, %v1055_v48  ;;  %vm8114_vm10 = vcmask 605184  }
 0x15d   : > { %v956_v53 = vsel %vm8112_vm11, %v954_v47, %v955_v49  ;;  %1059 = vst.msk [vmem:[#allocation2 + $0x91] ss:$8 sm:$0x3] %vm5088_vm1, %v1056_v52  ;;  %vm8115_vm11 = vcmask 760832  }
 0x15e   : > { %v946_v56 = vsel %vm8113_vm12, %v944_v50, %v945_v51  ;;  %959 = vst.msk [vmem:[#allocation2 + $0x77] ss:$8 sm:$0x3] %vm5088_vm1, %v956_v53  ;;  %vm8116_vm12 = vcmask 769024  }
 0x15f   : > { %949 = vst.msk [vmem:[#allocation2 + $0x76] ss:$8 sm:$0x3] %vm5088_vm1, %v946_v56  ;;  %1418 = vrot.lane.b32.xlu2 %v4419_v54, %s8062_s8  ;;  %v4434_v51 = vld [vmem:[%s5006_s6 + $0x2] ss:$4 sm:$0x3] }
 0x160   : > { %1408 = vrot.lane.b32.xlu1 %v4418_v55, %s8063_s27  ;;  %v4433_v52 = vld [vmem:[%s5006_s6 + $0x2] ss:$4 sm:$0x3] }
 0x161   : > { %1398 = vrot.lane.b32.xlu0 %v4417_v57, %s8064_s23  ;;  %v1084_v58 = vpop.permute.xlu2 %1083  ;;  %v4432_v54 = vld [vmem:[%s5006_s6 + $0x2] ss:$4 sm:$0x3] }
 0x162   : > { %v984_v59 = vpop.permute.xlu1 %983  ;;  %v1085_v60 = vrot.slane %v1084_v58, 1 }
 0x163   : > { %v985_v61 = vrot.slane %v984_v59, 1  ;;  %v974_v62 = vpop.permute.xlu0 %973 }
 0x164   : > { %v975_v63 = vrot.slane %v974_v62, 1  ;;  %v1086_v0 = vsel %vm8114_vm10, %v1084_v58, %v1085_v60  ;;  %vm8117_vm10 = vcmask 506880  }
 0x165   : > { %v986_v1 = vsel %vm8115_vm11, %v984_v59, %v985_v61  ;;  %1089 = vst.msk [vmem:[#allocation2 + $0x94] ss:$8 sm:$0x3] %vm5088_vm1, %v1086_v0  ;;  %vm8118_vm11 = vcmask 736256  }
 0x166   : > { %v976_v4 = vsel %vm8116_vm12, %v974_v62, %v975_v63  ;;  %989 = vst.msk [vmem:[#allocation2 + $0x82] ss:$8 sm:$0x3] %vm5088_vm1, %v986_v1  ;;  %vm8119_vm12 = vcmask 744448  }
 0x167   : > { %979 = vst.msk [vmem:[#allocation2 + $0x81] ss:$8 sm:$0x3] %vm5088_vm1, %v976_v4  ;;  %1448 = vrot.lane.b32.xlu2 %v4422_v2, %s8065_s30  ;;  %v4437_v63 = vld [vmem:[%s5006_s6 + $0x2] ss:$4 sm:$0x3] }
 0x168   : > { %1438 = vrot.lane.b32.xlu1 %v4421_v3, %s8066_s24  ;;  %v4436_v0 = vld [vmem:[%s5006_s6 + $0x2] ss:$4 sm:$0x3] }
 0x169   : > { %1428 = vrot.lane.b32.xlu0 %v4420_v5, %s8067_s13  ;;  %v1114_v6 = vpop.permute.xlu2 %1113  ;;  %v4435_v2 = vld [vmem:[%s5006_s6 + $0x2] ss:$4 sm:$0x3] }
 0x16a   : > { %v1014_v7 = vpop.permute.xlu1 %1013  ;;  %v1115_v8 = vrot.slane %v1114_v6, 1 }
 0x16b   : > { %v1015_v9 = vrot.slane %v1014_v7, 1  ;;  %v1004_v10 = vpop.permute.xlu0 %1003 }
 0x16c   : > { %v1005_v11 = vrot.slane %v1004_v10, 1  ;;  %v1116_v12 = vsel %vm8117_vm10, %v1114_v6, %v1115_v8  ;;  %vm8120_vm10 = vcmask 482304  }
 0x16d   : > { %v1016_v13 = vsel %vm8118_vm11, %v1014_v7, %v1015_v9  ;;  %1119 = vst.msk [vmem:[#allocation2 + $0x97] ss:$8 sm:$0x3] %vm5088_vm1, %v1116_v12  ;;  %vm8121_vm11 = vcmask 637952  }
 0x16e   : > { %v1006_v16 = vsel %vm8119_vm12, %v1004_v10, %v1005_v11  ;;  %1019 = vst.msk [vmem:[#allocation2 + $0x85] ss:$8 sm:$0x3] %vm5088_vm1, %v1016_v13  ;;  %vm8122_vm12 = vcmask 646144  }
 0x16f   : > { %1009 = vst.msk [vmem:[#allocation2 + $0x84] ss:$8 sm:$0x3] %vm5088_vm1, %v1006_v16  ;;  %1478 = vrot.lane.b32.xlu2 %v4425_v14, %s8068_s15  ;;  %v4440_v11 = vld [vmem:[%s5006_s6 + $0x2] ss:$4 sm:$0x3] }
 0x170   : > { %1468 = vrot.lane.b32.xlu1 %v4424_v15, %s8069_s16  ;;  %v4439_v12 = vld [vmem:[%s5006_s6 + $0x2] ss:$4 sm:$0x3] }
 0x171   : > { %1458 = vrot.lane.b32.xlu0 %v4423_v17, %s8070_s9  ;;  %v1144_v18 = vpop.permute.xlu2 %1143  ;;  %v4438_v14 = vld [vmem:[%s5006_s6 + $0x2] ss:$4 sm:$0x3] }
 0x172   : > { %v1044_v19 = vpop.permute.xlu1 %1043  ;;  %v1145_v20 = vrot.slane %v1144_v18, 1 }
 0x173   : > { %v1045_v21 = vrot.slane %v1044_v19, 1  ;;  %v1034_v22 = vpop.permute.xlu0 %1033 }
 0x174   : > { %v1035_v23 = vrot.slane %v1034_v22, 1  ;;  %v1146_v24 = vsel %vm8120_vm10, %v1144_v18, %v1145_v20  ;;  %vm8123_vm10 = vcmask 384000  }
 0x175   : > { %v1046_v25 = vsel %vm8121_vm11, %v1044_v19, %v1045_v21  ;;  %1149 = vst.msk [vmem:[#allocation2 + $0xa2] ss:$8 sm:$0x3] %vm5088_vm1, %v1146_v24  ;;  %vm8124_vm11 = vcmask 613376  }
 0x176   : > { %v1036_v28 = vsel %vm8122_vm12, %v1034_v22, %v1035_v23  ;;  %1049 = vst.msk [vmem:[#allocation2 + $0x90] ss:$8 sm:$0x3] %vm5088_vm1, %v1046_v25  ;;  %vm8125_vm12 = vcmask 621568  }
 0x177   : > { %1039 = vst.msk [vmem:[#allocation2 + $0x87] ss:$8 sm:$0x3] %vm5088_vm1, %v1036_v28  ;;  %1508 = vrot.lane.b32.xlu2 %v4428_v26, %s8071_s26  ;;  %v4443_v23 = vld [vmem:[%s5006_s6 + $0x2] ss:$4 sm:$0x3] }
 0x178   : > { %1498 = vrot.lane.b32.xlu1 %v4427_v27, %s8072_s14  ;;  %v4442_v24 = vld [vmem:[%s5006_s6 + $0x2] ss:$4 sm:$0x3] }
 0x179   : > { %1488 = vrot.lane.b32.xlu0 %v4426_v29, %s8073_s0  ;;  %v1174_v30 = vpop.permute.xlu2 %1173  ;;  %v4441_v26 = vld [vmem:[%s5006_s6 + $0x2] ss:$4 sm:$0x3] }
 0x17a   : > { %v1074_v31 = vpop.permute.xlu1 %1073  ;;  %v1175_v32 = vrot.slane %v1174_v30, 1 }
 0x17b   : > { %v1075_v33 = vrot.slane %v1074_v31, 1  ;;  %v1064_v34 = vpop.permute.xlu0 %1063 }
 0x17c   : > { %v1065_v35 = vrot.slane %v1064_v34, 1  ;;  %v1176_v36 = vsel %vm8123_vm10, %v1174_v30, %v1175_v32  ;;  %vm8126_vm10 = vcmask 359424  }
 0x17d   : > { %v1076_v37 = vsel %vm8124_vm11, %v1074_v31, %v1075_v33  ;;  %1179 = vst.msk [vmem:[#allocation2 + $0xa5] ss:$8 sm:$0x3] %vm5088_vm1, %v1176_v36  ;;  %vm8127_vm11 = vcmask 515072  }
 0x17e   : > { %v1066_v41 = vsel %vm8125_vm12, %v1064_v34, %v1065_v35  ;;  %1079 = vst.msk [vmem:[#allocation2 + $0x93] ss:$8 sm:$0x3] %vm5088_vm1, %v1076_v37  ;;  %vm8128_vm12 = vcmask 523264  }
 0x17f   : > { %1069 = vst.msk [vmem:[#allocation2 + $0x92] ss:$8 sm:$0x3] %vm5088_vm1, %v1066_v41  ;;  %1538 = vrot.lane.b32.xlu2 %v4431_v39, %s8074_s1  ;;  %v4446_v35 = vld [vmem:[%s5006_s6 + $0x2] ss:$4 sm:$0x3] }
 0x180   : > { %1528 = vrot.lane.b32.xlu1 %v4430_v40, %s8075_s10  ;;  %v4445_v36 = vld [vmem:[%s5006_s6 + $0x2] ss:$4 sm:$0x3] }
 0x181   : > { %1518 = vrot.lane.b32.xlu0 %v4429_v42, %s8076_s20  ;;  %v1204_v43 = vpop.permute.xlu2 %1203  ;;  %v4444_v39 = vld [vmem:[%s5006_s6 + $0x2] ss:$4 sm:$0x3] }
 0x182   : > { %v1104_v44 = vpop.permute.xlu1 %1103  ;;  %v1205_v45 = vrot.slane %v1204_v43, 1  ;;  %v4407_v42 = vld [vmem:[%s5006_s6 + $0x2] ss:$4 sm:$0x3] }
 0x183   : > { %v1105_v46 = vrot.slane %v1104_v44, 1  ;;  %v1094_v47 = vpop.permute.xlu0 %1093  ;;  %1304 = vst.msk [vmem:[#allocation2 + $0xc2] ss:$8 sm:$0x3] %vm5088_vm1, %v4407_v42 }
 0x184   : > { %v1095_v48 = vrot.slane %v1094_v47, 1  ;;  %v1206_v49 = vsel %vm8126_vm10, %v1204_v43, %v1205_v45  ;;  %vm8129_vm10 = vcmask 261120  }
 0x185   : > { %v1106_v50 = vsel %vm8127_vm11, %v1104_v44, %v1105_v46  ;;  %1209 = vst.msk [vmem:[#allocation2 + $0xb0] ss:$8 sm:$0x3] %vm5088_vm1, %v1206_v49  ;;  %vm8130_vm11 = vcmask 490496  }
 0x186   : > { %v1096_v53 = vsel %vm8128_vm12, %v1094_v47, %v1095_v48  ;;  %1109 = vst.msk [vmem:[#allocation2 + $0x96] ss:$8 sm:$0x3] %vm5088_vm1, %v1106_v50  ;;  %vm8131_vm12 = vcmask 498688  }
 0x187   : > { %1099 = vst.msk [vmem:[#allocation2 + $0x95] ss:$8 sm:$0x3] %vm5088_vm1, %v1096_v53  ;;  %1568 = vrot.lane.b32.xlu2 %v4434_v51, %s8077_s19  ;;  %v4449_v49 = vld [vmem:[%s5006_s6 + $0x2] ss:$4 sm:$0x3] }
 0x188   : > { %1558 = vrot.lane.b32.xlu1 %v4433_v52, %s8078_s7  ;;  %v4448_v50 = vld [vmem:[%s5006_s6 + $0x2] ss:$4 sm:$0x3] }
 0x189   : > { %1548 = vrot.lane.b32.xlu0 %v4432_v54, %s8079_s21  ;;  %v1234_v55 = vpop.permute.xlu2 %1233  ;;  %v4447_v52 = vld [vmem:[%s5006_s6 + $0x2] ss:$4 sm:$0x3] }
 0x18a   : > { %v1134_v56 = vpop.permute.xlu1 %1133  ;;  %v1235_v57 = vrot.slane %v1234_v55, 1 }
 0x18b   : > { %v1135_v58 = vrot.slane %v1134_v56, 1  ;;  %v1124_v59 = vpop.permute.xlu0 %1123 }
 0x18c   : > { %v1125_v60 = vrot.slane %v1124_v59, 1  ;;  %v1236_v61 = vsel %vm8129_vm10, %v1234_v55, %v1235_v57  ;;  %vm8132_vm10 = vcmask 236544  }
 0x18d   : > { %v1136_v62 = vsel %vm8130_vm11, %v1134_v56, %v1135_v58  ;;  %1239 = vst.msk [vmem:[#allocation2 + $0xb3] ss:$8 sm:$0x3] %vm5088_vm1, %v1236_v61  ;;  %vm8133_vm11 = vcmask 392192  }
 0x18e   : > { %v1126_v1 = vsel %vm8131_vm12, %v1124_v59, %v1125_v60  ;;  %1139 = vst.msk [vmem:[#allocation2 + $0xa1] ss:$8 sm:$0x3] %vm5088_vm1, %v1136_v62  ;;  %vm8134_vm12 = vcmask 474112  }
 0x18f   : > { %1129 = vst.msk [vmem:[#allocation2 + $0xa0] ss:$8 sm:$0x3] %vm5088_vm1, %v1126_v1  ;;  %1598 = vrot.lane.b32.xlu2 %v4437_v63, %s8080_s25  ;;  %v4452_v61 = vld [vmem:[%s5006_s6 + $0x2] ss:$4 sm:$0x3] }
 0x190   : > { %1588 = vrot.lane.b32.xlu1 %v4436_v0, %s8081_s18  ;;  %v4451_v62 = vld [vmem:[%s5006_s6 + $0x2] ss:$4 sm:$0x3] }
 0x191   : > { %1578 = vrot.lane.b32.xlu0 %v4435_v2, %s8082_s11  ;;  %v1264_v3 = vpop.permute.xlu2 %1263  ;;  %v4450_v0 = vld [vmem:[%s5006_s6 + $0x2] ss:$4 sm:$0x3] }
 0x192   : > { %v1164_v4 = vpop.permute.xlu1 %1163  ;;  %v1265_v5 = vrot.slane %v1264_v3, 1 }
 0x193   : > { %v1165_v6 = vrot.slane %v1164_v4, 1  ;;  %v1154_v7 = vpop.permute.xlu0 %1153 }
 0x194   : > { %v1155_v8 = vrot.slane %v1154_v7, 1  ;;  %v1266_v9 = vsel %vm8132_vm10, %v1264_v3, %v1265_v5  ;;  %vm8135_vm10 = vcmask 367616  }
 0x195   : > { %v1166_v10 = vsel %vm8133_vm11, %v1164_v4, %v1165_v6  ;;  %1269 = vst.msk [vmem:[#allocation2 + $0xb6] ss:$8 sm:$0x3] %vm5088_vm1, %v1266_v9  ;;  %vm8136_vm11 = vcmask 375808  }
 0x196   : > { %v1156_v13 = vsel %vm8134_vm12, %v1154_v7, %v1155_v8  ;;  %1169 = vst.msk [vmem:[#allocation2 + $0xa4] ss:$8 sm:$0x3] %vm5088_vm1, %v1166_v10  ;;  %vm8139_vm12 = vcmask 343040  }
 0x197   : > { %1159 = vst.msk [vmem:[#allocation2 + $0xa3] ss:$8 sm:$0x3] %vm5088_vm1, %v1156_v13  ;;  %1628 = vrot.lane.b32.xlu2 %v4440_v11, %s8083_s5  ;;  %v4455_v9 = vld [vmem:[%s5006_s6 + $0x2] ss:$4 sm:$0x3] }
 0x198   : > { %1618 = vrot.lane.b32.xlu1 %v4439_v12, %s8084_s12  ;;  %s8138_s12 = smov 58   ;;  %v4454_v10 = vld [vmem:[%s5006_s6 + $0x2] ss:$4 sm:$0x3] }
 0x199   : > { %1608 = vrot.lane.b32.xlu0 %v4438_v14, %s8085_s4  ;;  %v1294_v15 = vpop.permute.xlu2 %1293  ;;  %s8137_s4 = smov 48   ;;  %v4453_v12 = vld [vmem:[%s5006_s6 + $0x2] ss:$4 sm:$0x3] }
 0x19a   : > { %v1194_v16 = vpop.permute.xlu1 %1193  ;;  %v1295_v17 = vrot.slane %v1294_v15, 1 }
 0x19b   : > { %v1195_v18 = vrot.slane %v1194_v16, 1  ;;  %v1184_v19 = vpop.permute.xlu0 %1183 }
 0x19c   : > { %v1185_v20 = vrot.slane %v1184_v19, 1  ;;  %v1296_v21 = vsel %vm810_vm14, %v1294_v15, %v1295_v17 }
 0x19d   : > { %v1196_v22 = vsel %vm8135_vm10, %v1194_v16, %v1195_v18  ;;  %1299 = vst.msk [vmem:[#allocation2 + $0xc1] ss:$8 sm:$0x3] %vm5088_vm1, %v1296_v21  ;;  %vm8140_vm10 = vcmask 351232  }
 0x19e   : > { %v1186_v25 = vsel %vm8136_vm11, %v1184_v19, %v1185_v20  ;;  %1199 = vst.msk [vmem:[#allocation2 + $0xa7] ss:$8 sm:$0x3] %vm5088_vm1, %v1196_v22  ;;  %vm8144_vm11 = vcmask 244736  }
 0x19f   : > { %1189 = vst.msk [vmem:[#allocation2 + $0xa6] ss:$8 sm:$0x3] %vm5088_vm1, %v1186_v25  ;;  %1658 = vrot.lane.b32.xlu2 %v4443_v23, %s8086_s17  ;;  %s8143_s17 = smov 46  }
 0x1a0   : > { %1648 = vrot.lane.b32.xlu1 %v4442_v24, %s8137_s4  ;;  %s8142_s4 = smov 45   ;;  %v4459_v21 = vld [vmem:[%s5006_s6 + $0x3] ss:$4 sm:$0x3] }
 0x1a1   : > { %1638 = vrot.lane.b32.xlu0 %v4441_v26, %s8138_s12  ;;  %v1329_v27 = vpop.permute.xlu2 %1328  ;;  %s8141_s12 = smov 44   ;;  %v4458_v22 = vld [vmem:[%s5006_s6 + $0x3] ss:$4 sm:$0x3] }
 0x1a2   : > { %v1224_v28 = vpop.permute.xlu1 %1223  ;;  %v1330_v29 = vrot.slane %v1329_v27, 1  ;;  %v4457_v24 = vld [vmem:[%s5006_s6 + $0x3] ss:$4 sm:$0x3] }
 0x1a3   : > { %v1225_v30 = vrot.slane %v1224_v28, 1  ;;  %v1214_v31 = vpop.permute.xlu0 %1213 }
 0x1a4   : > { %v1215_v32 = vrot.slane %v1214_v31, 1  ;;  %v1331_v33 = vsel %vm315_vm5, %v1329_v27, %v1330_v29 }
 0x1a5   : > { %v1226_v34 = vsel %vm8139_vm12, %v1224_v28, %v1225_v30  ;;  %1334 = vst.msk [vmem:[#allocation2 + $0xc5] ss:$8 sm:$0x3] %vm5088_vm1, %v1331_v33  ;;  %vm8145_vm12 = vcmask 252928  }
 0x1a6   : > { %v1216_v37 = vsel %vm8140_vm10, %v1214_v31, %v1215_v32  ;;  %1229 = vst.msk [vmem:[#allocation2 + $0xb2] ss:$8 sm:$0x3] %vm5088_vm1, %v1226_v34  ;;  %vm8158_vm10 = vcmask 752640  }
 0x1a7   : > { %1219 = vst.msk [vmem:[#allocation2 + $0xb1] ss:$8 sm:$0x3] %vm5088_vm1, %v1216_v37  ;;  %1688 = vrot.lane.b32.xlu2 %v4446_v35, %s8141_s12  ;;  %s8148_s12 = smov 43  }
 0x1a8   : > { %1678 = vrot.lane.b32.xlu1 %v4445_v36, %s8142_s4  ;;  %s8147_s4 = smov 42   ;;  %v4462_v33 = vld [vmem:[%s5006_s6 + $0x3] ss:$4 sm:$0x3] }
 0x1a9   : > { %1668 = vrot.lane.b32.xlu0 %v4444_v39, %s8143_s17  ;;  %v1359_v40 = vpop.permute.xlu2 %1358  ;;  %s8146_s17 = smov 32   ;;  %v4461_v34 = vld [vmem:[%s5006_s6 + $0x3] ss:$4 sm:$0x3] }
 0x1aa   : > { %v1254_v41 = vpop.permute.xlu1 %1253  ;;  %v1360_v43 = vrot.slane %v1359_v40, 1  ;;  %v4460_v36 = vld [vmem:[%s5006_s6 + $0x3] ss:$4 sm:$0x3] }
 0x1ab   : > { %v1255_v44 = vrot.slane %v1254_v41, 1  ;;  %v1244_v45 = vpop.permute.xlu0 %1243 }
 0x1ac   : > { %v1245_v46 = vrot.slane %v1244_v45, 1  ;;  %v1361_v47 = vsel %vm348_vm2, %v1359_v40, %v1360_v43 }
 0x1ad   : > { %v1256_v48 = vsel %vm8144_vm11, %v1254_v41, %v1255_v44  ;;  %1364 = vst.msk [vmem:[#allocation2 + $0xd0] ss:$8 sm:$0x3] %vm5088_vm1, %v1361_v47  ;;  %vm8159_vm11 = vcmask 908288  }
 0x1ae   : > { %v1246_v51 = vsel %vm8145_vm12, %v1244_v45, %v1245_v46  ;;  %1259 = vst.msk [vmem:[#allocation2 + $0xb5] ss:$8 sm:$0x3] %vm5088_vm1, %v1256_v48  ;;  %vm8160_vm12 = vcmask 916480  }
 0x1af   : > { %1249 = vst.msk [vmem:[#allocation2 + $0xb4] ss:$8 sm:$0x3] %vm5088_vm1, %v1246_v51  ;;  %1718 = vrot.lane.b32.xlu2 %v4449_v49, %s8146_s17  ;;  %s8151_s17 = smov 31  }
 0x1b0   : > { %1708 = vrot.lane.b32.xlu1 %v4448_v50, %s8147_s4  ;;  %s8150_s4 = smov 30   ;;  %v4465_v46 = vld [vmem:[%s5006_s6 + $0x3] ss:$4 sm:$0x3] }
 0x1b1   : > { %1698 = vrot.lane.b32.xlu0 %v4447_v52, %s8148_s12  ;;  %v1389_v53 = vpop.permute.xlu2 %1388  ;;  %s8149_s12 = smov 29   ;;  %v4464_v47 = vld [vmem:[%s5006_s6 + $0x3] ss:$4 sm:$0x3] }
 0x1b2   : > { %v1284_v54 = vpop.permute.xlu1 %1283  ;;  %v1390_v55 = vrot.slane %v1389_v53, 1  ;;  %v4463_v49 = vld [vmem:[%s5006_s6 + $0x3] ss:$4 sm:$0x3] }
 0x1b3   : > { %v1285_v56 = vrot.slane %v1284_v54, 1  ;;  %v1274_v57 = vpop.permute.xlu0 %1273 }
 0x1b4   : > { %v1275_v58 = vrot.slane %v1274_v57, 1  ;;  %v1391_v59 = vsel %vm381_vm3, %v1389_v53, %v1390_v55 }
 0x1b5   : > { %v1286_v60 = vsel %vm799_vm13, %v1284_v54, %v1285_v56  ;;  %1394 = vst.msk [vmem:[#allocation2 + $0xd3] ss:$8 sm:$0x3] %vm5088_vm1, %v1391_v59  ;;  %v4467_v59 = vld [vmem:[%s5006_s6 + $0x3] ss:$4 sm:$0x3] }
 0x1b6   : > { %v1276_v63 = vsel %vm788_vm15, %v1274_v57, %v1275_v58  ;;  %1289 = vst.msk [vmem:[#allocation2 + $0xc0] ss:$8 sm:$0x3] %vm5088_vm1, %v1286_v60  ;;  %v4468_v58 = vld [vmem:[%s5006_s6 + $0x3] ss:$4 sm:$0x3] }
 0x1b7   : > { %1279 = vst.msk [vmem:[#allocation2 + $0xb7] ss:$8 sm:$0x3] %vm5088_vm1, %v1276_v63  ;;  %1748 = vrot.lane.b32.xlu2 %v4452_v61, %s8149_s12  ;;  %s8154_s12 = smov 28  }
 0x1b8   : > { %1738 = vrot.lane.b32.xlu1 %v4451_v62, %s8150_s4  ;;  %s8153_s4 = smov 27   ;;  %v4466_v61 = vld [vmem:[%s5006_s6 + $0x3] ss:$4 sm:$0x3] }
 0x1b9   : > { %1728 = vrot.lane.b32.xlu0 %v4450_v0, %s8151_s17  ;;  %v1419_v1 = vpop.permute.xlu2 %1418  ;;  %s8152_s17 = smov 26  }
 0x1ba   : > { %v1319_v2 = vpop.permute.xlu1 %1318  ;;  %v1420_v3 = vrot.slane %v1419_v1, 1 }
 0x1bb   : > { %v1320_v4 = vrot.slane %v1319_v2, 1  ;;  %v1309_v5 = vpop.permute.xlu0 %1308 }
 0x1bc   : > { %v1310_v6 = vrot.slane %v1309_v5, 1  ;;  %v1421_v7 = vsel %vm414_vm4, %v1419_v1, %v1420_v3 }
 0x1bd   : > { %v1321_v8 = vsel %vm304_vm9, %v1319_v2, %v1320_v4  ;;  %1424 = vst.msk [vmem:[#allocation2 + $0xd6] ss:$8 sm:$0x3] %vm5088_vm1, %v1421_v7  ;;  %v4470_v7 = vld [vmem:[%s5006_s6 + $0x3] ss:$4 sm:$0x3] }
 0x1be   : > { %v1311_v11 = vsel %vm293_vm6, %v1309_v5, %v1310_v6  ;;  %1324 = vst.msk [vmem:[#allocation2 + $0xc4] ss:$8 sm:$0x3] %vm5088_vm1, %v1321_v8  ;;  %v4471_v6 = vld [vmem:[%s5006_s6 + $0x3] ss:$4 sm:$0x3] }
 0x1bf   : > { %1314 = vst.msk [vmem:[#allocation2 + $0xc3] ss:$8 sm:$0x3] %vm5088_vm1, %v1311_v11  ;;  %1778 = vrot.lane.b32.xlu2 %v4455_v9, %s8152_s17  ;;  %s8157_s17 = smov 127  }
 0x1c0   : > { %1768 = vrot.lane.b32.xlu1 %v4454_v10, %s8153_s4  ;;  %s8156_s4 = smov 126   ;;  %v4469_v9 = vld [vmem:[%s5006_s6 + $0x3] ss:$4 sm:$0x3] }
 0x1c1   : > { %1758 = vrot.lane.b32.xlu0 %v4453_v12, %s8154_s12  ;;  %v1449_v13 = vpop.permute.xlu2 %1448  ;;  %s8155_s12 = smov 125  }
 0x1c2   : > { %v1349_v14 = vpop.permute.xlu1 %1348  ;;  %v1450_v15 = vrot.slane %v1449_v13, 1 }
 0x1c3   : > { %v1350_v16 = vrot.slane %v1349_v14, 1  ;;  %v1339_v17 = vpop.permute.xlu0 %1338 }
 0x1c4   : > { %v1340_v18 = vrot.slane %v1339_v17, 1  ;;  %v1451_v19 = vsel %vm447_vm7, %v1449_v13, %v1450_v15 }
 0x1c5   : > { %v1351_v20 = vsel %vm337_vm0, %v1349_v14, %v1350_v16  ;;  %1454 = vst.msk [vmem:[#allocation2 + $0xe1] ss:$8 sm:$0x3] %vm5088_vm1, %v1451_v19  ;;  %v4473_v19 = vld [vmem:[%s5006_s6 + $0x3] ss:$4 sm:$0x3] }
 0x1c6   : > { %v1341_v23 = vsel %vm326_vm8, %v1339_v17, %v1340_v18  ;;  %1354 = vst.msk [vmem:[#allocation2 + $0xc7] ss:$8 sm:$0x3] %vm5088_vm1, %v1351_v20  ;;  %v4474_v18 = vld [vmem:[%s5006_s6 + $0x3] ss:$4 sm:$0x3] }
 0x1c7   : > { %1344 = vst.msk [vmem:[#allocation2 + $0xc6] ss:$8 sm:$0x3] %vm5088_vm1, %v1341_v23  ;;  %1813 = vrot.lane.b32.xlu2 %v4459_v21, %s8155_s12  ;;  %v4472_v21 = vld [vmem:[%s5006_s6 + $0x3] ss:$4 sm:$0x3] }
 0x1c8   : > { %1803 = vrot.lane.b32.xlu1 %v4458_v22, %s8156_s4  ;;  %s8161_s4 = smov 124   ;;  %s8206_s12 = smov 29  }
 0x1c9   : > { %1793 = vrot.lane.b32.xlu0 %v4457_v24, %s8157_s17  ;;  %v1479_v25 = vpop.permute.xlu2 %1478  ;;  %s8207_s17 = smov 30  }
 0x1ca   : > { %v1379_v26 = vpop.permute.xlu1 %1378  ;;  %v1480_v27 = vrot.slane %v1479_v25, 1 }
 0x1cb   : > { %v1380_v28 = vrot.slane %v1379_v26, 1  ;;  %v1369_v29 = vpop.permute.xlu0 %1368 }
 0x1cc   : > { %v1370_v30 = vrot.slane %v1369_v29, 1  ;;  %v1481_v31 = vsel %vm8158_vm10, %v1479_v25, %v1480_v27  ;;  %vm8162_vm10 = vcmask 654336  }
 0x1cd   : > { %v1381_v32 = vsel %vm8159_vm11, %v1379_v26, %v1380_v28  ;;  %1484 = vst.msk [vmem:[#allocation2 + $0xe4] ss:$8 sm:$0x3] %vm5088_vm1, %v1481_v31  ;;  %vm8163_vm11 = vcmask 883712  }
 0x1ce   : > { %v1371_v35 = vsel %vm8160_vm12, %v1369_v29, %v1370_v30  ;;  %1384 = vst.msk [vmem:[#allocation2 + $0xd2] ss:$8 sm:$0x3] %vm5088_vm1, %v1381_v32  ;;  %vm8164_vm12 = vcmask 891904  }
 0x1cf   : > { %1374 = vst.msk [vmem:[#allocation2 + $0xd1] ss:$8 sm:$0x3] %vm5088_vm1, %v1371_v35  ;;  %1843 = vrot.lane.b32.xlu2 %v4462_v33, %s8104_s2  ;;  %v4477_v30 = vld [vmem:[%s5006_s6 + $0x3] ss:$4 sm:$0x3] }
 0x1d0   : > { %1833 = vrot.lane.b32.xlu1 %v4461_v34, %s8105_s3  ;;  %v4476_v31 = vld [vmem:[%s5006_s6 + $0x3] ss:$4 sm:$0x3]  ;;  %s8193_s3 = smov 47  }
 0x1d1   : > { %1823 = vrot.lane.b32.xlu0 %v4460_v36, %s8161_s4  ;;  %v1509_v37 = vpop.permute.xlu2 %1508  ;;  %v4475_v33 = vld [vmem:[%s5006_s6 + $0x3] ss:$4 sm:$0x3]  ;;  %s8461_s4 = sld [smem:[#allocation76_spill]] }
 0x1d2   : > { %v1409_v39 = vpop.permute.xlu1 %1408  ;;  %v1510_v40 = vrot.slane %v1509_v37, 1 }
 0x1d3   : > { %v1410_v41 = vrot.slane %v1409_v39, 1  ;;  %v1399_v42 = vpop.permute.xlu0 %1398 }
 0x1d4   : > { %v1400_v43 = vrot.slane %v1399_v42, 1  ;;  %v1511_v44 = vsel %vm8162_vm10, %v1509_v37, %v1510_v40  ;;  %vm8165_vm10 = vcmask 629760  }
 0x1d5   : > { %v1411_v45 = vsel %vm8163_vm11, %v1409_v39, %v1410_v41  ;;  %1514 = vst.msk [vmem:[#allocation2 + $0xe7] ss:$8 sm:$0x3] %vm5088_vm1, %v1511_v44  ;;  %vm8166_vm11 = vcmask 785408  }
 0x1d6   : > { %v1401_v48 = vsel %vm8164_vm12, %v1399_v42, %v1400_v43  ;;  %1414 = vst.msk [vmem:[#allocation2 + $0xd5] ss:$8 sm:$0x3] %vm5088_vm1, %v1411_v45  ;;  %vm8167_vm12 = vcmask 867328  }
 0x1d7   : > { %1404 = vst.msk [vmem:[#allocation2 + $0xd4] ss:$8 sm:$0x3] %vm5088_vm1, %v1401_v48  ;;  %1873 = vrot.lane.b32.xlu2 %v4465_v46, %s8110_s22  ;;  %v4480_v43 = vld [vmem:[%s5006_s6 + $0x3] ss:$4 sm:$0x3] }
 0x1d8   : > { %1863 = vrot.lane.b32.xlu1 %v4464_v47, %s8060_s28  ;;  %v4479_v44 = vld [vmem:[%s5006_s6 + $0x3] ss:$4 sm:$0x3]  ;;  %s4872_s28 = smov 98  }
 0x1d9   : > { %1853 = vrot.lane.b32.xlu0 %v4463_v49, %s8061_s29  ;;  %v1539_v50 = vpop.permute.xlu2 %1538  ;;  %v4478_v46 = vld [vmem:[%s5006_s6 + $0x3] ss:$4 sm:$0x3]  ;;  %s8208_s29 = smov 31  }
 0x1da   : > { %v1439_v51 = vpop.permute.xlu1 %1438  ;;  %v1540_v52 = vrot.slane %v1539_v50, 1 }
 0x1db   : > { %v1440_v53 = vrot.slane %v1439_v51, 1  ;;  %v1429_v54 = vpop.permute.xlu0 %1428 }
 0x1dc   : > { %v1430_v55 = vrot.slane %v1429_v54, 1  ;;  %v1541_v56 = vsel %vm8165_vm10, %v1539_v50, %v1540_v52  ;;  %vm8168_vm10 = vcmask 605184  }
 0x1dd   : > { %v1441_v57 = vsel %vm8166_vm11, %v1439_v51, %v1440_v53  ;;  %1544 = vst.msk [vmem:[#allocation2 + $0xf2] ss:$8 sm:$0x3] %vm5088_vm1, %v1541_v56  ;;  %vm8169_vm11 = vcmask 760832  }
 0x1de   : > { %v1431_v60 = vsel %vm8167_vm12, %v1429_v54, %v1430_v55  ;;  %1444 = vst.msk [vmem:[#allocation2 + $0xe0] ss:$8 sm:$0x3] %vm5088_vm1, %v1441_v57  ;;  %vm8170_vm12 = vcmask 769024  }
 0x1df   : > { %1434 = vst.msk [vmem:[#allocation2 + $0xd7] ss:$8 sm:$0x3] %vm5088_vm1, %v1431_v60  ;;  %1903 = vrot.lane.b32.xlu2 %v4468_v58, %s8062_s8  ;;  %v4483_v55 = vld [vmem:[%s5006_s6 + $0x3] ss:$4 sm:$0x3] }
 0x1e0   : > { %1893 = vrot.lane.b32.xlu1 %v4467_v59, %s8063_s27  ;;  %v4482_v56 = vld [vmem:[%s5006_s6 + $0x3] ss:$4 sm:$0x3]  ;;  %s8211_s27 = smov 28  }
 0x1e1   : > { %1883 = vrot.lane.b32.xlu0 %v4466_v61, %s8064_s23  ;;  %v1569_v62 = vpop.permute.xlu2 %1568  ;;  %v4481_v58 = vld [vmem:[%s5006_s6 + $0x3] ss:$4 sm:$0x3]  ;;  %s8210_s23 = smov 27  }
 0x1e2   : > { %v1469_v63 = vpop.permute.xlu1 %1468  ;;  %v1570_v0 = vrot.slane %v1569_v62, 1 }
 0x1e3   : > { %v1470_v1 = vrot.slane %v1469_v63, 1  ;;  %v1459_v2 = vpop.permute.xlu0 %1458 }
 0x1e4   : > { %v1460_v3 = vrot.slane %v1459_v2, 1  ;;  %v1571_v4 = vsel %vm8168_vm10, %v1569_v62, %v1570_v0  ;;  %vm8171_vm10 = vcmask 506880  }
 0x1e5   : > { %v1471_v5 = vsel %vm8169_vm11, %v1469_v63, %v1470_v1  ;;  %1574 = vst.msk [vmem:[#allocation2 + $0xf5] ss:$8 sm:$0x3] %vm5088_vm1, %v1571_v4  ;;  %vm8172_vm11 = vcmask 736256  }
 0x1e6   : > { %v1461_v8 = vsel %vm8170_vm12, %v1459_v2, %v1460_v3  ;;  %1474 = vst.msk [vmem:[#allocation2 + $0xe3] ss:$8 sm:$0x3] %vm5088_vm1, %v1471_v5  ;;  %vm8173_vm12 = vcmask 744448  }
 0x1e7   : > { %1464 = vst.msk [vmem:[#allocation2 + $0xe2] ss:$8 sm:$0x3] %vm5088_vm1, %v1461_v8  ;;  %1933 = vrot.lane.b32.xlu2 %v4471_v6, %s8065_s30  ;;  %v4486_v3 = vld [vmem:[%s5006_s6 + $0x3] ss:$4 sm:$0x3] }
 0x1e8   : > { %1923 = vrot.lane.b32.xlu1 %v4470_v7, %s8066_s24  ;;  %v4485_v4 = vld [vmem:[%s5006_s6 + $0x3] ss:$4 sm:$0x3]  ;;  %s8209_s24 = smov 26  }
 0x1e9   : > { %1913 = vrot.lane.b32.xlu0 %v4469_v9, %s8067_s13  ;;  %v1599_v10 = vpop.permute.xlu2 %1598  ;;  %v4484_v6 = vld [vmem:[%s5006_s6 + $0x3] ss:$4 sm:$0x3] }
 0x1ea   : > { %v1499_v11 = vpop.permute.xlu1 %1498  ;;  %v1600_v12 = vrot.slane %v1599_v10, 1 }
 0x1eb   : > { %v1500_v13 = vrot.slane %v1499_v11, 1  ;;  %v1489_v14 = vpop.permute.xlu0 %1488 }
 0x1ec   : > { %v1490_v15 = vrot.slane %v1489_v14, 1  ;;  %v1601_v16 = vsel %vm8171_vm10, %v1599_v10, %v1600_v12  ;;  %vm8174_vm10 = vcmask 482304  }
 0x1ed   : > { %v1501_v17 = vsel %vm8172_vm11, %v1499_v11, %v1500_v13  ;;  %1604 = vst.msk [vmem:[#allocation2 + $0x100] ss:$8 sm:$0x3] %vm5088_vm1, %v1601_v16  ;;  %vm8175_vm11 = vcmask 637952  }
 0x1ee   : > { %v1491_v20 = vsel %vm8173_vm12, %v1489_v14, %v1490_v15  ;;  %1504 = vst.msk [vmem:[#allocation2 + $0xe6] ss:$8 sm:$0x3] %vm5088_vm1, %v1501_v17  ;;  %vm8176_vm12 = vcmask 646144  }
 0x1ef   : > { %1494 = vst.msk [vmem:[#allocation2 + $0xe5] ss:$8 sm:$0x3] %vm5088_vm1, %v1491_v20  ;;  %1963 = vrot.lane.b32.xlu2 %v4474_v18, %s8068_s15  ;;  %v4489_v15 = vld [vmem:[%s5006_s6 + $0x3] ss:$4 sm:$0x3] }
 0x1f0   : > { %1953 = vrot.lane.b32.xlu1 %v4473_v19, %s8069_s16  ;;  %v4488_v16 = vld [vmem:[%s5006_s6 + $0x3] ss:$4 sm:$0x3] }
 0x1f1   : > { %1943 = vrot.lane.b32.xlu0 %v4472_v21, %s8070_s9  ;;  %v1629_v22 = vpop.permute.xlu2 %1628  ;;  %v4487_v18 = vld [vmem:[%s5006_s6 + $0x3] ss:$4 sm:$0x3] }
 0x1f2   : > { %v1529_v23 = vpop.permute.xlu1 %1528  ;;  %v1630_v24 = vrot.slane %v1629_v22, 1 }
 0x1f3   : > { %v1530_v25 = vrot.slane %v1529_v23, 1  ;;  %v1519_v26 = vpop.permute.xlu0 %1518 }
 0x1f4   : > { %v1520_v27 = vrot.slane %v1519_v26, 1  ;;  %v1631_v28 = vsel %vm8174_vm10, %v1629_v22, %v1630_v24  ;;  %vm8177_vm10 = vcmask 384000  }
 0x1f5   : > { %v1531_v29 = vsel %vm8175_vm11, %v1529_v23, %v1530_v25  ;;  %1634 = vst.msk [vmem:[#allocation2 + $0x103] ss:$8 sm:$0x3] %vm5088_vm1, %v1631_v28  ;;  %vm8178_vm11 = vcmask 613376  }
 0x1f6   : > { %v1521_v32 = vsel %vm8176_vm12, %v1519_v26, %v1520_v27  ;;  %1534 = vst.msk [vmem:[#allocation2 + $0xf1] ss:$8 sm:$0x3] %vm5088_vm1, %v1531_v29  ;;  %vm8179_vm12 = vcmask 621568  }
 0x1f7   : > { %1524 = vst.msk [vmem:[#allocation2 + $0xf0] ss:$8 sm:$0x3] %vm5088_vm1, %v1521_v32  ;;  %1993 = vrot.lane.b32.xlu2 %v4477_v30, %s8071_s26  ;;  %v4492_v27 = vld [vmem:[%s5006_s6 + $0x3] ss:$4 sm:$0x3] }
 0x1f8   : > { %1983 = vrot.lane.b32.xlu1 %v4476_v31, %s8072_s14  ;;  %v4491_v28 = vld [vmem:[%s5006_s6 + $0x3] ss:$4 sm:$0x3]  ;;  %s8440_s14 = sld [smem:[#allocation77_spill]] }
 0x1f9   : > { %1973 = vrot.lane.b32.xlu0 %v4475_v33, %s8073_s0  ;;  %v1659_v34 = vpop.permute.xlu2 %1658  ;;  %s8189_s0 = smov 60   ;;  %v4490_v30 = vld [vmem:[%s5006_s6 + $0x3] ss:$4 sm:$0x3] }
 0x1fa   : > { %v1559_v35 = vpop.permute.xlu1 %1558  ;;  %v1660_v36 = vrot.slane %v1659_v34, 1 }
 0x1fb   : > { %v1560_v37 = vrot.slane %v1559_v35, 1  ;;  %v1549_v39 = vpop.permute.xlu0 %1548 }
 0x1fc   : > { %v1550_v40 = vrot.slane %v1549_v39, 1  ;;  %v1661_v41 = vsel %vm8177_vm10, %v1659_v34, %v1660_v36  ;;  %vm8180_vm10 = vcmask 359424  }
 0x1fd   : > { %v1561_v42 = vsel %vm8178_vm11, %v1559_v35, %v1560_v37  ;;  %1664 = vst.msk [vmem:[#allocation2 + $0x106] ss:$8 sm:$0x3] %vm5088_vm1, %v1661_v41  ;;  %vm8181_vm11 = vcmask 515072  }
 0x1fe   : > { %v1551_v45 = vsel %vm8179_vm12, %v1549_v39, %v1550_v40  ;;  %1564 = vst.msk [vmem:[#allocation2 + $0xf4] ss:$8 sm:$0x3] %vm5088_vm1, %v1561_v42  ;;  %vm8182_vm12 = vcmask 523264  }
 0x1ff   : > { %1554 = vst.msk [vmem:[#allocation2 + $0xf3] ss:$8 sm:$0x3] %vm5088_vm1, %v1551_v45  ;;  %2023 = vrot.lane.b32.xlu2 %v4480_v43, %s8074_s1  ;;  %s8190_s1 = smov 61  }
 0x200   : > { %2013 = vrot.lane.b32.xlu1 %v4479_v44, %s8075_s10  ;;  %v4495_v40 = vld [vmem:[%s5006_s6 + $0x3] ss:$4 sm:$0x3]  ;;  %s8204_s10 = smov 42  }
 0x201   : > { %2003 = vrot.lane.b32.xlu0 %v4478_v46, %s8076_s20  ;;  %v1689_v47 = vpop.permute.xlu2 %1688  ;;  %v4494_v41 = vld [vmem:[%s5006_s6 + $0x3] ss:$4 sm:$0x3]  ;;  %s8198_s20 = smov 44  }
 0x202   : > { %v1589_v48 = vpop.permute.xlu1 %1588  ;;  %v1690_v49 = vrot.slane %v1689_v47, 1  ;;  %v4493_v43 = vld [vmem:[%s5006_s6 + $0x3] ss:$4 sm:$0x3] }
 0x203   : > { %v1590_v50 = vrot.slane %v1589_v48, 1  ;;  %v1579_v51 = vpop.permute.xlu0 %1578  ;;  %v4456_v44 = vld [vmem:[%s5006_s6 + $0x3] ss:$4 sm:$0x3] }
 0x204   : > { %v1580_v52 = vrot.slane %v1579_v51, 1  ;;  %v1691_v53 = vsel %vm8180_vm10, %v1689_v47, %v1690_v49  ;;  %vm8183_vm10 = vcmask 261120   ;;  %1789 = vst.msk [vmem:[#allocation2 + $0x123] ss:$8 sm:$0x3] %vm5088_vm1, %v4456_v44 }
 0x205   : > { %v1591_v54 = vsel %vm8181_vm11, %v1589_v48, %v1590_v50  ;;  %1694 = vst.msk [vmem:[#allocation2 + $0x111] ss:$8 sm:$0x3] %vm5088_vm1, %v1691_v53  ;;  %vm8184_vm11 = vcmask 490496  }
 0x206   : > { %v1581_v57 = vsel %vm8182_vm12, %v1579_v51, %v1580_v52  ;;  %1594 = vst.msk [vmem:[#allocation2 + $0xf7] ss:$8 sm:$0x3] %vm5088_vm1, %v1591_v54  ;;  %vm8185_vm12 = vcmask 498688  }
 0x207   : > { %1584 = vst.msk [vmem:[#allocation2 + $0xf6] ss:$8 sm:$0x3] %vm5088_vm1, %v1581_v57  ;;  %2053 = vrot.lane.b32.xlu2 %v4483_v55, %s8077_s19  ;;  %v4498_v53 = vld [vmem:[%s5006_s6 + $0x3] ss:$4 sm:$0x3] }
 0x208   : > { %2043 = vrot.lane.b32.xlu1 %v4482_v56, %s8078_s7  ;;  %v4497_v54 = vld [vmem:[%s5006_s6 + $0x3] ss:$4 sm:$0x3]  ;;  %s8203_s7 = smov 32  }
 0x209   : > { %2033 = vrot.lane.b32.xlu0 %v4481_v58, %s8079_s21  ;;  %v1719_v59 = vpop.permute.xlu2 %1718  ;;  %s8199_s21 = smov 45   ;;  %v4496_v56 = vld [vmem:[%s5006_s6 + $0x3] ss:$4 sm:$0x3] }
 0x20a   : > { %v1619_v60 = vpop.permute.xlu1 %1618  ;;  %v1720_v61 = vrot.slane %v1719_v59, 1 }
 0x20b   : > { %v1620_v62 = vrot.slane %v1619_v60, 1  ;;  %v1609_v63 = vpop.permute.xlu0 %1608 }
 0x20c   : > { %v1610_v0 = vrot.slane %v1609_v63, 1  ;;  %v1721_v1 = vsel %vm8183_vm10, %v1719_v59, %v1720_v61  ;;  %vm8186_vm10 = vcmask 236544  }
 0x20d   : > { %v1621_v2 = vsel %vm8184_vm11, %v1619_v60, %v1620_v62  ;;  %1724 = vst.msk [vmem:[#allocation2 + $0x114] ss:$8 sm:$0x3] %vm5088_vm1, %v1721_v1  ;;  %vm8187_vm11 = vcmask 392192  }
 0x20e   : > { %v1611_v5 = vsel %vm8185_vm12, %v1609_v63, %v1610_v0  ;;  %1624 = vst.msk [vmem:[#allocation2 + $0x102] ss:$8 sm:$0x3] %vm5088_vm1, %v1621_v2  ;;  %vm8188_vm12 = vcmask 474112  }
 0x20f   : > { %1614 = vst.msk [vmem:[#allocation2 + $0x101] ss:$8 sm:$0x3] %vm5088_vm1, %v1611_v5  ;;  %2083 = vrot.lane.b32.xlu2 %v4486_v3, %s8080_s25  ;;  %s8200_s25 = smov 46  }
 0x210   : > { %2073 = vrot.lane.b32.xlu1 %v4485_v4, %s8081_s18  ;;  %s8195_s18 = smov 58   ;;  %v4501_v1 = vld [vmem:[%s5006_s6 + $0x3] ss:$4 sm:$0x3] }
 0x211   : > { %2063 = vrot.lane.b32.xlu0 %v4484_v6, %s8082_s11  ;;  %v1749_v7 = vpop.permute.xlu2 %1748  ;;  %s8205_s11 = smov 43   ;;  %v4500_v2 = vld [vmem:[%s5006_s6 + $0x3] ss:$4 sm:$0x3] }
 0x212   : > { %v1649_v8 = vpop.permute.xlu1 %1648  ;;  %v1750_v9 = vrot.slane %v1749_v7, 1  ;;  %v4499_v4 = vld [vmem:[%s5006_s6 + $0x3] ss:$4 sm:$0x3] }
 0x213   : > { %v1650_v10 = vrot.slane %v1649_v8, 1  ;;  %v1639_v11 = vpop.permute.xlu0 %1638 }
 0x214   : > { %v1640_v12 = vrot.slane %v1639_v11, 1  ;;  %v1751_v13 = vsel %vm8186_vm10, %v1749_v7, %v1750_v9  ;;  %vm8191_vm10 = vcmask 367616  }
 0x215   : > { %v1651_v14 = vsel %vm8187_vm11, %v1649_v8, %v1650_v10  ;;  %1754 = vst.msk [vmem:[#allocation2 + $0x117] ss:$8 sm:$0x3] %vm5088_vm1, %v1751_v13  ;;  %vm8192_vm11 = vcmask 375808  }
 0x216   : > { %v1641_v17 = vsel %vm8188_vm12, %v1639_v11, %v1640_v12  ;;  %1654 = vst.msk [vmem:[#allocation2 + $0x105] ss:$8 sm:$0x3] %vm5088_vm1, %v1651_v14  ;;  %vm8196_vm12 = vcmask 343040  }
 0x217   : > { %1644 = vst.msk [vmem:[#allocation2 + $0x104] ss:$8 sm:$0x3] %vm5088_vm1, %v1641_v17  ;;  %2113 = vrot.lane.b32.xlu2 %v4489_v15, %s8083_s5  ;;  %s8194_s5 = smov 48  }
 0x218   : > { %2103 = vrot.lane.b32.xlu1 %v4488_v16, %s8189_s0  ;;  %v4504_v13 = vld [vmem:[%s5006_s6 + $0x3] ss:$4 sm:$0x3]  ;;  %s8465_s0 = sld [smem:[#allocation25_spill]] }
 0x219   : > { %2093 = vrot.lane.b32.xlu0 %v4487_v18, %s8190_s1  ;;  %v1779_v19 = vpop.permute.xlu2 %1778  ;;  %v4503_v14 = vld [vmem:[%s5006_s6 + $0x3] ss:$4 sm:$0x3] }
 0x21a   : > { %v1679_v20 = vpop.permute.xlu1 %1678  ;;  %v1780_v21 = vrot.slane %v1779_v19, 1  ;;  %v4502_v16 = vld [vmem:[%s5006_s6 + $0x3] ss:$4 sm:$0x3]  ;;  %s4869_s6 = smov 116  }
 0x21b   : > { %v1680_v22 = vrot.slane %v1679_v20, 1  ;;  %v1669_v23 = vpop.permute.xlu0 %1668 }
 0x21c   : > { %v1670_v24 = vrot.slane %v1669_v23, 1  ;;  %v1781_v25 = vsel %vm810_vm14, %v1779_v19, %v1780_v21 }
 0x21d   : > { %v1681_v26 = vsel %vm8191_vm10, %v1679_v20, %v1680_v22  ;;  %1784 = vst.msk [vmem:[#allocation2 + $0x122] ss:$8 sm:$0x3] %vm5088_vm1, %v1781_v25  ;;  %vm8197_vm10 = vcmask 351232  }
 0x21e   : > { %v1671_v29 = vsel %vm8192_vm11, %v1669_v23, %v1670_v24  ;;  %1684 = vst.msk [vmem:[#allocation2 + $0x110] ss:$8 sm:$0x3] %vm5088_vm1, %v1681_v26  ;;  %vm8202_vm11 = vcmask 252928   ;;  %v5873_v26 = vld [vmem:[#allocation2 + $0x10] sm:$0xff] }
 0x21f   : > { %1674 = vst.msk [vmem:[#allocation2 + $0x107] ss:$8 sm:$0x3] %vm5088_vm1, %v1671_v29  ;;  %2143 = vrot.lane.b32.xlu2 %v4492_v27, %s8193_s3  ;;  %v5875_v27 = vld [vmem:[#allocation2 + $0x20] sm:$0xff] }
 0x220   : > { %2133 = vrot.lane.b32.xlu1 %v4491_v28, %s8194_s5  ;;  %v5883_v28 = vld [vmem:[#allocation2] sm:$0xff] }
 0x221   : > { %2123 = vrot.lane.b32.xlu0 %v4490_v30, %s8195_s18  ;;  %v1814_v31 = vpop.permute.xlu2 %1813  ;;  %s8466_s18 = sld [smem:[#allocation78_spill]] }
 0x222   : > { %v1709_v32 = vpop.permute.xlu1 %1708  ;;  %v1815_v33 = vrot.slane %v1814_v31, 1 }
 0x223   : > { %v1710_v34 = vrot.slane %v1709_v32, 1  ;;  %v1699_v35 = vpop.permute.xlu0 %1698 }
 0x224   : > { %v1700_v36 = vrot.slane %v1699_v35, 1  ;;  %v1816_v37 = vsel %vm315_vm5, %v1814_v31, %v1815_v33  ;;  %vm8201_vm5 = vcmask 244736  }
 0x225   : > { %v1711_v39 = vsel %vm8196_vm12, %v1709_v32, %v1710_v34  ;;  %1819 = vst.msk [vmem:[#allocation2 + $0x126] ss:$8 sm:$0x3] %vm5088_vm1, %v1816_v37  ;;  %vm8220_vm12 = vcmask 867328  }
 0x226   : > { %v1701_v42 = vsel %vm8197_vm10, %v1699_v35, %v1700_v36  ;;  %1714 = vst.msk [vmem:[#allocation2 + $0x113] ss:$8 sm:$0x3] %vm5088_vm1, %v1711_v39  ;;  %v5894_v39 = vld [vmem:[#allocation2 + $0x40] sm:$0xff]  ;;  %vm8221_vm10 = vcmask 605184  }
 0x227   : > { %1704 = vst.msk [vmem:[#allocation2 + $0x112] ss:$8 sm:$0x3] %vm5088_vm1, %v1701_v42  ;;  %2173 = vrot.lane.b32.xlu2 %v4495_v40, %s8198_s20  ;;  %v5896_v40 = vld [vmem:[#allocation2 + $0x50] sm:$0xff] }
 0x228   : > { %2163 = vrot.lane.b32.xlu1 %v4494_v41, %s8199_s21  ;;  %v5904_v41 = vld [vmem:[#allocation2 + $0x30] sm:$0xff]  ;;  %s8468_s21 = sld [smem:[#allocation24_spill]] }
 0x229   : > { %2153 = vrot.lane.b32.xlu0 %v4493_v43, %s8200_s25  ;;  %v1844_v45 = vpop.permute.xlu2 %1843  ;;  %s8467_s25 = smov %s8466_s18 }
 0x22a   : > { %v1739_v46 = vpop.permute.xlu1 %1738  ;;  %v1845_v47 = vrot.slane %v1844_v45, 1  ;;  %s4736_s9 = scalar_lea.hbm %s8467_s25, 16 }
 0x22b   : > { %v1740_v48 = vrot.slane %v1739_v46, 1  ;;  %v1729_v49 = vpop.permute.xlu0 %1728 }
 0x22c   : > { %v1730_v50 = vrot.slane %v1729_v49, 1  ;;  %v1846_v51 = vsel %vm348_vm2, %v1844_v45, %v1845_v47  ;;  %vm8213_vm2 = vcmask 908288  }
 0x22d   : > { %v1741_v52 = vsel %vm8201_vm5, %v1739_v46, %v1740_v48  ;;  %1849 = vst.msk [vmem:[#allocation2 + $0x131] ss:$8 sm:$0x3] %vm5088_vm1, %v1846_v51  ;;  %v5915_v51 = vld [vmem:[#allocation2 + $0x70] sm:$0xff]  ;;  %vm8222_vm5 = vcmask 760832  }
 0x22e   : > { %v1731_v55 = vsel %vm8202_vm11, %v1729_v49, %v1730_v50  ;;  %1744 = vst.msk [vmem:[#allocation2 + $0x116] ss:$8 sm:$0x3] %vm5088_vm1, %v1741_v52  ;;  %v5917_v52 = vld [vmem:[#allocation2 + $0x80] sm:$0xff]  ;;  %vm8223_vm11 = vcmask 769024  }
 0x22f   : > { %1734 = vst.msk [vmem:[#allocation2 + $0x115] ss:$8 sm:$0x3] %vm5088_vm1, %v1731_v55  ;;  %2203 = vrot.lane.b32.xlu2 %v4498_v53, %s8203_s7  ;;  %v5925_v53 = vld [vmem:[#allocation2 + $0x60] sm:$0xff]  ;;  %s268_s7 = scalar_lea.vmem [#allocation8], %s8465_s0 }
 0x230   : > { %2193 = vrot.lane.b32.xlu1 %v4497_v54, %s8204_s10  ;;  %s7804_s10 = sshll.u32 %s268_s7, 4  ;;  %s4191_s10 = int_to_ptr.vmem [resolvable:$true] %s7804_s10 }
 0x231   : > { %2183 = vrot.lane.b32.xlu0 %v4496_v56, %s8205_s11  ;;  %v1874_v57 = vpop.permute.xlu2 %1873 }
 0x232   : > { %v1769_v58 = vpop.permute.xlu1 %1768  ;;  %v1875_v59 = vrot.slane %v1874_v57, 1 }
 0x233   : > { %v1770_v60 = vrot.slane %v1769_v58, 1  ;;  %v1759_v61 = vpop.permute.xlu0 %1758 }
 0x234   : > { %v1760_v62 = vrot.slane %v1759_v61, 1  ;;  %v1876_v63 = vsel %vm381_vm3, %v1874_v57, %v1875_v59  ;;  %vm8214_vm3 = vcmask 916480  }
 0x235   : > { %v1771_v0 = vsel %vm799_vm13, %v1769_v58, %v1770_v60  ;;  %1879 = vst.msk [vmem:[#allocation2 + $0x134] ss:$8 sm:$0x3] %vm5088_vm1, %v1876_v63  ;;  %v5936_v63 = vld [vmem:[#allocation2 + $0xa0] sm:$0xff] }
 0x236   : > { %v1761_v3 = vsel %vm788_vm15, %v1759_v61, %v1760_v62  ;;  %1774 = vst.msk [vmem:[#allocation2 + $0x121] ss:$8 sm:$0x3] %vm5088_vm1, %v1771_v0  ;;  %v5938_v0 = vld [vmem:[#allocation2 + $0xb0] sm:$0xff] }
 0x237   : > { %1764 = vst.msk [vmem:[#allocation2 + $0x120] ss:$8 sm:$0x3] %vm5088_vm1, %v1761_v3  ;;  %2233 = vrot.lane.b32.xlu2 %v4501_v1, %s8206_s12  ;;  %v5946_v1 = vld [vmem:[#allocation2 + $0x90] sm:$0xff] }
 0x238   : > { %2223 = vrot.lane.b32.xlu1 %v4500_v2, %s8207_s17 }
 0x239   : > { %2213 = vrot.lane.b32.xlu0 %v4499_v4, %s8208_s29  ;;  %v1904_v5 = vpop.permute.xlu2 %1903  ;;  %s8469_s29 = sld [smem:[#allocation79_spill]] }
 0x23a   : > { %v1804_v6 = vpop.permute.xlu1 %1803  ;;  %v1905_v7 = vrot.slane %v1904_v5, 1 }
 0x23b   : > { %v1805_v8 = vrot.slane %v1804_v6, 1  ;;  %v1794_v9 = vpop.permute.xlu0 %1793 }
 0x23c   : > { %v1795_v10 = vrot.slane %v1794_v9, 1  ;;  %v1906_v11 = vsel %vm414_vm4, %v1904_v5, %v1905_v7  ;;  %vm8215_vm4 = vcmask 654336  }
 0x23d   : > { %v1806_v12 = vsel %vm304_vm9, %v1804_v6, %v1805_v8  ;;  %1909 = vst.msk [vmem:[#allocation2 + $0x137] ss:$8 sm:$0x3] %vm5088_vm1, %v1906_v11  ;;  %vm8219_vm9 = vcmask 785408   ;;  %v5957_v11 = vld [vmem:[#allocation2 + $0xd0] sm:$0xff] }
 0x23e   : > { %v1796_v15 = vsel %vm293_vm6, %v1794_v9, %v1795_v10  ;;  %1809 = vst.msk [vmem:[#allocation2 + $0x125] ss:$8 sm:$0x3] %vm5088_vm1, %v1806_v12  ;;  %vm8216_vm6 = vcmask 883712   ;;  %v5959_v12 = vld [vmem:[#allocation2 + $0xe0] sm:$0xff] }
 0x23f   : > { %1799 = vst.msk [vmem:[#allocation2 + $0x124] ss:$8 sm:$0x3] %vm5088_vm1, %v1796_v15  ;;  %2263 = vrot.lane.b32.xlu2 %v4504_v13, %s8209_s24  ;;  %v5967_v13 = vld [vmem:[#allocation2 + $0xc0] sm:$0xff] }
 0x240   : > { %2253 = vrot.lane.b32.xlu1 %v4503_v14, %s8210_s23 }
 0x241   : > { %2243 = vrot.lane.b32.xlu0 %v4502_v16, %s8211_s27  ;;  %v1934_v17 = vpop.permute.xlu2 %1933  ;;  %s275_s27 = scalar_lea.vmem [#allocation9], %s8465_s0 }
 0x242   : > { %v1834_v18 = vpop.permute.xlu1 %1833  ;;  %v1935_v19 = vrot.slane %v1934_v17, 1 }
 0x243   : > { %v1835_v20 = vrot.slane %v1834_v18, 1  ;;  %v1824_v21 = vpop.permute.xlu0 %1823 }
 0x244   : > { %v1825_v22 = vrot.slane %v1824_v21, 1  ;;  %v1936_v23 = vsel %vm447_vm7, %v1934_v17, %v1935_v19  ;;  %vm8217_vm7 = vcmask 891904  }
 0x245   : > { %v1836_v24 = vsel %vm337_vm0, %v1834_v18, %v1835_v20  ;;  %1939 = vst.msk [vmem:[#allocation2 + $0x142] ss:$8 sm:$0x3] %vm5088_vm1, %v1936_v23  ;;  %vm8212_vm0 = vcmask 752640   ;;  %v5978_v23 = vld [vmem:[#allocation2 + $0x100] sm:$0xff] }
 0x246   : > { %v1826_v25 = vsel %vm326_vm8, %v1824_v21, %v1825_v22  ;;  %1839 = vst.msk [vmem:[#allocation2 + $0x130] ss:$8 sm:$0x3] %vm5088_vm1, %v1836_v24  ;;  %vm8218_vm8 = vcmask 629760   ;;  %v5980_v24 = vld [vmem:[#allocation2 + $0x110] sm:$0xff] }
 0x247   : > { %1829 = vst.msk [vmem:[#allocation2 + $0x127] ss:$8 sm:$0x3] %vm5088_vm1, %v1826_v25  ;;  %2350 = vrot.lane.b32.xlu2 %v5875_v27, %s8104_s2  ;;  %v5988_v25 = vld [vmem:[#allocation2 + $0xf0] sm:$0xff] }
 0x248   : > { %2348 = vrot.lane.b32.xlu1 %v5873_v26, %s8104_s2 }
 0x249   : > { %2346 = vrot.lane.b32.xlu0 %v5883_v28, %s8104_s2  ;;  %v1964_v29 = vpop.permute.xlu2 %1963 }
 0x24a   : > { %v1864_v30 = vpop.permute.xlu1 %1863  ;;  %v1965_v31 = vrot.slane %v1964_v29, 1 }
 0x24b   : > { %v1865_v32 = vrot.slane %v1864_v30, 1  ;;  %v1854_v33 = vpop.permute.xlu0 %1853 }
 0x24c   : > { %v1855_v34 = vrot.slane %v1854_v33, 1  ;;  %v1966_v35 = vsel %vm8212_vm0, %v1964_v29, %v1965_v31  ;;  %vm8224_vm0 = vcmask 506880  }
 0x24d   : > { %v1866_v36 = vsel %vm8213_vm2, %v1864_v30, %v1865_v32  ;;  %1969 = vst.msk [vmem:[#allocation2 + $0x145] ss:$8 sm:$0x3] %vm5088_vm1, %v1966_v35  ;;  %vm8225_vm2 = vcmask 736256  }
 0x24e   : > { %v1856_v37 = vsel %vm8214_vm3, %v1854_v33, %v1855_v34  ;;  %1869 = vst.msk [vmem:[#allocation2 + $0x133] ss:$8 sm:$0x3] %vm5088_vm1, %v1866_v36  ;;  %vm8226_vm3 = vcmask 744448  }
 0x24f   : > { %1859 = vst.msk [vmem:[#allocation2 + $0x132] ss:$8 sm:$0x3] %vm5088_vm1, %v1856_v37  ;;  %2356 = vrot.lane.b32.xlu2 %v5896_v40, %s8104_s2 }
 0x250   : > { %2354 = vrot.lane.b32.xlu1 %v5894_v39, %s8104_s2 }
 0x251   : > { %2352 = vrot.lane.b32.xlu0 %v5904_v41, %s8104_s2  ;;  %v1994_v42 = vpop.permute.xlu2 %1993 }
 0x252   : > { %v1894_v43 = vpop.permute.xlu1 %1893  ;;  %v1995_v44 = vrot.slane %v1994_v42, 1 }
 0x253   : > { %v1895_v45 = vrot.slane %v1894_v43, 1  ;;  %v1884_v46 = vpop.permute.xlu0 %1883 }
 0x254   : > { %v1885_v47 = vrot.slane %v1884_v46, 1  ;;  %v1996_v48 = vsel %vm8215_vm4, %v1994_v42, %v1995_v44  ;;  %vm8227_vm4 = vcmask 482304   ;;  %v6009_v44 = vld [vmem:[#allocation2 + $0x120] sm:$0xff] }
 0x255   : > { %v1896_v49 = vsel %vm8216_vm6, %v1894_v43, %v1895_v45  ;;  %1999 = vst.msk [vmem:[#allocation2 + $0x150] ss:$8 sm:$0x3] %vm5088_vm1, %v1996_v48  ;;  %vm8228_vm6 = vcmask 637952  }
 0x256   : > { %v1886_v50 = vsel %vm8217_vm7, %v1884_v46, %v1885_v47  ;;  %1899 = vst.msk [vmem:[#allocation2 + $0x136] ss:$8 sm:$0x3] %vm5088_vm1, %v1896_v49  ;;  %vm8229_vm7 = vcmask 646144  }
 0x257   : > { %1889 = vst.msk [vmem:[#allocation2 + $0x135] ss:$8 sm:$0x3] %vm5088_vm1, %v1886_v50  ;;  %2362 = vrot.lane.b32.xlu2 %v5917_v52, %s8104_s2 }
 0x258   : > { %2360 = vrot.lane.b32.xlu1 %v5915_v51, %s8104_s2 }
 0x259   : > { %2358 = vrot.lane.b32.xlu0 %v5925_v53, %s8104_s2  ;;  %v2024_v54 = vpop.permute.xlu2 %2023 }
 0x25a   : > { %v1924_v55 = vpop.permute.xlu1 %1923  ;;  %v2025_v56 = vrot.slane %v2024_v54, 1 }
 0x25b   : > { %v1925_v57 = vrot.slane %v1924_v55, 1  ;;  %v1914_v58 = vpop.permute.xlu0 %1913 }
 0x25c   : > { %v1915_v59 = vrot.slane %v1914_v58, 1  ;;  %v2026_v60 = vsel %vm8218_vm8, %v2024_v54, %v2025_v56  ;;  %vm8230_vm8 = vcmask 384000  }
 0x25d   : > { %v1926_v61 = vsel %vm8219_vm9, %v1924_v55, %v1925_v57  ;;  %2029 = vst.msk [vmem:[#allocation2 + $0x153] ss:$8 sm:$0x3] %vm5088_vm1, %v2026_v60  ;;  %vm8231_vm9 = vcmask 613376  }
 0x25e   : > { %v1916_v62 = vsel %vm8220_vm12, %v1914_v58, %v1915_v59  ;;  %1929 = vst.msk [vmem:[#allocation2 + $0x141] ss:$8 sm:$0x3] %vm5088_vm1, %v1926_v61  ;;  %v5999_v42 = vld [vmem:[#allocation2 + $0x130] sm:$0xff]  ;;  %vm8232_vm12 = vcmask 621568  }
 0x25f   : > { %1919 = vst.msk [vmem:[#allocation2 + $0x140] ss:$8 sm:$0x3] %vm5088_vm1, %v1916_v62  ;;  %2368 = vrot.lane.b32.xlu2 %v5938_v0, %s8104_s2 }
 0x260   : > { %2366 = vrot.lane.b32.xlu1 %v5936_v63, %s8104_s2 }
 0x261   : > { %2364 = vrot.lane.b32.xlu0 %v5946_v1, %s8104_s2  ;;  %v2054_v2 = vpop.permute.xlu2 %2053 }
 0x262   : > { %v1954_v3 = vpop.permute.xlu1 %1953  ;;  %v2055_v4 = vrot.slane %v2054_v2, 1 }
 0x263   : > { %v1955_v5 = vrot.slane %v1954_v3, 1  ;;  %v1944_v6 = vpop.permute.xlu0 %1943 }
 0x264   : > { %v1945_v7 = vrot.slane %v1944_v6, 1  ;;  %v2056_v8 = vsel %vm8221_vm10, %v2054_v2, %v2055_v4  ;;  %vm8233_vm10 = vcmask 359424  }
 0x265   : > { %v1956_v9 = vsel %vm8222_vm5, %v1954_v3, %v1955_v5  ;;  %2059 = vst.msk [vmem:[#allocation2 + $0x156] ss:$8 sm:$0x3] %vm5088_vm1, %v2056_v8  ;;  %vm8234_vm5 = vcmask 515072  }
 0x266   : > { %v1946_v10 = vsel %vm8223_vm11, %v1944_v6, %v1945_v7  ;;  %1959 = vst.msk [vmem:[#allocation2 + $0x144] ss:$8 sm:$0x3] %vm5088_vm1, %v1956_v9  ;;  %vm8235_vm11 = vcmask 523264  }
 0x267   : > { %1949 = vst.msk [vmem:[#allocation2 + $0x143] ss:$8 sm:$0x3] %vm5088_vm1, %v1946_v10  ;;  %2374 = vrot.lane.b32.xlu2 %v5959_v12, %s8104_s2 }
 0x268   : > { %2372 = vrot.lane.b32.xlu1 %v5957_v11, %s8104_s2 }
 0x269   : > { %2370 = vrot.lane.b32.xlu0 %v5967_v13, %s8104_s2  ;;  %v2084_v14 = vpop.permute.xlu2 %2083 }
 0x26a   : > { %v1984_v15 = vpop.permute.xlu1 %1983  ;;  %v2085_v16 = vrot.slane %v2084_v14, 1 }
 0x26b   : > { %v1985_v17 = vrot.slane %v1984_v15, 1  ;;  %v1974_v18 = vpop.permute.xlu0 %1973 }
 0x26c   : > { %v1975_v19 = vrot.slane %v1974_v18, 1  ;;  %v2086_v20 = vsel %vm8224_vm0, %v2084_v14, %v2085_v16  ;;  %vm8236_vm0 = vcmask 261120  }
 0x26d   : > { %v1986_v21 = vsel %vm8225_vm2, %v1984_v15, %v1985_v17  ;;  %2089 = vst.msk [vmem:[#allocation2 + $0x161] ss:$8 sm:$0x3] %vm5088_vm1, %v2086_v20  ;;  %vm8237_vm2 = vcmask 490496  }
 0x26e   : > { %v1976_v22 = vsel %vm8226_vm3, %v1974_v18, %v1975_v19  ;;  %1989 = vst.msk [vmem:[#allocation2 + $0x147] ss:$8 sm:$0x3] %vm5088_vm1, %v1986_v21  ;;  %vm8238_vm3 = vcmask 498688  }
 0x26f   : > { %1979 = vst.msk [vmem:[#allocation2 + $0x146] ss:$8 sm:$0x3] %vm5088_vm1, %v1976_v22  ;;  %2380 = vrot.lane.b32.xlu2 %v5980_v24, %s8104_s2 }
 0x270   : > { %2378 = vrot.lane.b32.xlu1 %v5978_v23, %s8104_s2 }
 0x271   : > { %2376 = vrot.lane.b32.xlu0 %v5988_v25, %s8104_s2  ;;  %v2114_v29 = vpop.permute.xlu2 %2113 }
 0x272   : > { %v2014_v30 = vpop.permute.xlu1 %2013  ;;  %v2115_v31 = vrot.slane %v2114_v29, 1 }
 0x273   : > { %v2015_v32 = vrot.slane %v2014_v30, 1  ;;  %v2004_v33 = vpop.permute.xlu0 %2003 }
 0x274   : > { %v2005_v34 = vrot.slane %v2004_v33, 1  ;;  %v2116_v35 = vsel %vm8227_vm4, %v2114_v29, %v2115_v31  ;;  %vm8239_vm4 = vcmask 236544  }
 0x275   : > { %v2016_v36 = vsel %vm8228_vm6, %v2014_v30, %v2015_v32  ;;  %2119 = vst.msk [vmem:[#allocation2 + $0x164] ss:$8 sm:$0x3] %vm5088_vm1, %v2116_v35  ;;  %vm8240_vm6 = vcmask 392192  }
 0x276   : > { %v2006_v37 = vsel %vm8229_vm7, %v2004_v33, %v2005_v34  ;;  %2019 = vst.msk [vmem:[#allocation2 + $0x152] ss:$8 sm:$0x3] %vm5088_vm1, %v2016_v36  ;;  %v6001_v43 = vld [vmem:[#allocation2 + $0x140] sm:$0xff]  ;;  %vm8241_vm7 = vcmask 474112  }
 0x277   : > { %2009 = vst.msk [vmem:[#allocation2 + $0x151] ss:$8 sm:$0x3] %vm5088_vm1, %v2006_v37  ;;  %2386 = vrot.lane.b32.xlu2 %v6001_v43, %s8104_s2 }
 0x278   : > { %2384 = vrot.lane.b32.xlu1 %v5999_v42, %s8104_s2 }
 0x279   : > { %2382 = vrot.lane.b32.xlu0 %v6009_v44, %s8104_s2  ;;  %v2144_v45 = vpop.permute.xlu2 %2143 }
 0x27a   : > { %v2044_v46 = vpop.permute.xlu1 %2043  ;;  %v2145_v47 = vrot.slane %v2144_v45, 1 }
 0x27b   : > { %v2045_v48 = vrot.slane %v2044_v46, 1  ;;  %v2034_v49 = vpop.permute.xlu0 %2033 }
 0x27c   : > { %v2035_v50 = vrot.slane %v2034_v49, 1  ;;  %v2146_v54 = vsel %vm8230_vm8, %v2144_v45, %v2145_v47  ;;  %vm8242_vm8 = vcmask 367616  }
 0x27d   : > { %v2046_v55 = vsel %vm8231_vm9, %v2044_v46, %v2045_v48  ;;  %2149 = vst.msk [vmem:[#allocation2 + $0x167] ss:$8 sm:$0x3] %vm5088_vm1, %v2146_v54  ;;  %vm8243_vm9 = vcmask 375808  }
 0x27e   : > { %v2036_v56 = vsel %vm8232_vm12, %v2034_v49, %v2035_v50  ;;  %2049 = vst.msk [vmem:[#allocation2 + $0x155] ss:$8 sm:$0x3] %vm5088_vm1, %v2046_v55  ;;  %vm8245_vm12 = vcmask 351232  }
 0x27f   : > { %2039 = vst.msk [vmem:[#allocation2 + $0x154] ss:$8 sm:$0x3] %vm5088_vm1, %v2036_v56 }
 0x281   : > { %v2174_v57 = vpop.permute.xlu2 %2173 }
 0x282   : > { %v2074_v58 = vpop.permute.xlu1 %2073  ;;  %v2175_v59 = vrot.slane %v2174_v57, 1 }
 0x283   : > { %v2075_v60 = vrot.slane %v2074_v58, 1  ;;  %v2064_v61 = vpop.permute.xlu0 %2063 }
 0x284   : > { %v2065_v62 = vrot.slane %v2064_v61, 1  ;;  %v2176_v2 = vsel %vm8233_vm10, %v2174_v57, %v2175_v59  ;;  %vm8246_vm10 = vcmask 244736  }
 0x285   : > { %v2076_v3 = vsel %vm8234_vm5, %v2074_v58, %v2075_v60  ;;  %2179 = vst.msk [vmem:[#allocation2 + $0x172] ss:$8 sm:$0x3] %vm5088_vm1, %v2176_v2  ;;  %vm8247_vm5 = vcmask 252928  }
 0x286   : > { %v2066_v4 = vsel %vm8235_vm11, %v2064_v61, %v2065_v62  ;;  %2079 = vst.msk [vmem:[#allocation2 + $0x160] ss:$8 sm:$0x3] %vm5088_vm1, %v2076_v3  ;;  %vm8295_vm11 = vmmov %vm8246_vm10 }
 0x287   : > { %2069 = vst.msk [vmem:[#allocation2 + $0x157] ss:$8 sm:$0x3] %vm5088_vm1, %v2066_v4 }
 0x289   : > { %v2204_v5 = vpop.permute.xlu2 %2203 }
 0x28a   : > { %v2104_v6 = vpop.permute.xlu1 %2103  ;;  %v2205_v7 = vrot.slane %v2204_v5, 1 }
 0x28b   : > { %v2105_v8 = vrot.slane %v2104_v6, 1  ;;  %v2094_v9 = vpop.permute.xlu0 %2093 }
 0x28c   : > { %v2095_v10 = vrot.slane %v2094_v9, 1  ;;  %v2206_v14 = vsel %vm8236_vm0, %v2204_v5, %v2205_v7  ;;  %vm3123_vm0 = vcmask 326656  }
 0x28d   : > { %v2106_v15 = vsel %vm8237_vm2, %v2104_v6, %v2105_v8  ;;  %2209 = vst.msk [vmem:[#allocation2 + $0x175] ss:$8 sm:$0x3] %vm5088_vm1, %v2206_v14 }
 0x28e   : > { %v2096_v16 = vsel %vm8238_vm3, %v2094_v9, %v2095_v10  ;;  %2109 = vst.msk [vmem:[#allocation2 + $0x163] ss:$8 sm:$0x3] %vm5088_vm1, %v2106_v15  ;;  %v6038_v17 = vld [vmem:[#allocation2 + $0x150] sm:$0xff]  ;;  %vm3200_vm3 = vcmask 572416  }
 0x28f   : > { %2099 = vst.msk [vmem:[#allocation2 + $0x162] ss:$8 sm:$0x3] %vm5088_vm1, %v2096_v16  ;;  %2388 = vrot.lane.b32.xlu0 %v6038_v17, %s8104_s2 }
 0x291   : > { %v2234_v18 = vpop.permute.xlu2 %2233 }
 0x292   : > { %v2134_v19 = vpop.permute.xlu1 %2133  ;;  %v2235_v20 = vrot.slane %v2234_v18, 1 }
 0x293   : > { %v2135_v21 = vrot.slane %v2134_v19, 1  ;;  %v2124_v22 = vpop.permute.xlu0 %2123 }
 0x294   : > { %v2125_v29 = vrot.slane %v2124_v22, 1  ;;  %v2236_v30 = vsel %vm8239_vm4, %v2234_v18, %v2235_v20  ;;  %vm8297_vm4 = vcmask 654336  }
 0x295   : > { %v2136_v31 = vsel %vm8240_vm6, %v2134_v19, %v2135_v21  ;;  %2239 = vst.msk [vmem:[#allocation2 + $0x180] ss:$8 sm:$0x3] %vm5088_vm1, %v2236_v30  ;;  %vm8298_vm6 = vmmov %vm8246_vm10 }
 0x296   : > { %v2126_v32 = vsel %vm8241_vm7, %v2124_v22, %v2125_v29  ;;  %2139 = vst.msk [vmem:[#allocation2 + $0x166] ss:$8 sm:$0x3] %vm5088_vm1, %v2136_v31  ;;  %vm8299_vm7 = vcmask 736256  }
 0x297   : > { %2129 = vst.msk [vmem:[#allocation2 + $0x165] ss:$8 sm:$0x3] %vm5088_vm1, %v2126_v32 }
 0x299   : > { %v2264_v33 = vpop.permute.xlu2 %2263 }
 0x29a   : > { %v2164_v34 = vpop.permute.xlu1 %2163  ;;  %v2265_v35 = vrot.slane %v2264_v33, 1 }
 0x29b   : > { %v2165_v36 = vrot.slane %v2164_v34, 1  ;;  %v2154_v37 = vpop.permute.xlu0 %2153 }
 0x29c   : > { %v2155_v45 = vrot.slane %v2154_v37, 1  ;;  %v2266_v46 = vsel %vm810_vm14, %v2264_v33, %v2265_v35  ;;  %vm8244_vm14 = vcmask 343040  }
 0x29d   : > { %v2166_v47 = vsel %vm8242_vm8, %v2164_v34, %v2165_v36  ;;  %2269 = vst.msk [vmem:[#allocation2 + $0x183] ss:$8 sm:$0x3] %vm5088_vm1, %v2266_v46  ;;  %vm8300_vm8 = vmmov %vm8237_vm2 }
 0x29e   : > { %v2156_v48 = vsel %vm8243_vm9, %v2154_v37, %v2155_v45  ;;  %2169 = vst.msk [vmem:[#allocation2 + $0x171] ss:$8 sm:$0x3] %vm5088_vm1, %v2166_v47  ;;  %v6060_v49 = vld [vmem:[#allocation2 + $0x160] sm:$0xff]  ;;  %vm8301_vm9 = vmmov %vm8297_vm4 }
 0x29f   : > { %2159 = vst.msk [vmem:[#allocation2 + $0x170] ss:$8 sm:$0x3] %vm5088_vm1, %v2156_v48  ;;  %2390 = vrot.lane.b32.xlu1 %v6060_v49, %s8104_s2 }
 0x2a1   : > { %v6108_v38 = vpop.permute.xlu2 %2350 }
 0x2a2   : > { %v2194_v50 = vpop.permute.xlu1 %2193 }
 0x2a3   : > { %v2195_v54 = vrot.slane %v2194_v50, 1  ;;  %v2184_v55 = vpop.permute.xlu0 %2183 }
 0x2a4   : > { %v2185_v56 = vrot.slane %v2184_v55, 1 }
 0x2a5   : > { %v2196_v57 = vsel %vm8244_vm14, %v2194_v50, %v2195_v54  ;;  %vm8302_vm14 = vmmov %vm8298_vm6 }
 0x2a6   : > { %2199 = vst.msk [vmem:[#allocation2 + $0x174] ss:$8 sm:$0x3] %vm5088_vm1, %v2196_v57  ;;  %v2186_v58 = vsel %vm8245_vm12, %v2184_v55, %v2185_v56  ;;  %vm8303_vm12 = vmmov %vm8237_vm2 }
 0x2a7   : > { %2189 = vst.msk [vmem:[#allocation2 + $0x173] ss:$8 sm:$0x3] %vm5088_vm1, %v2186_v58  ;;  %2421 = vrot.lane.b32.xlu1 %v5883_v28, %s4869_s6 }
 0x2a9   : > { %v6118_v16 = vpop.permute.xlu2 %2356 }
 0x2aa   : > { %v2224_v59 = vpop.permute.xlu1 %2223 }
 0x2ab   : > { %v2225_v60 = vrot.slane %v2224_v59, 1  ;;  %v2214_v61 = vpop.permute.xlu0 %2213 }
 0x2ac   : > { %v2215_v62 = vrot.slane %v2214_v61, 1 }
 0x2ad   : > { %v2226_v2 = vsel %vm8246_vm10, %v2224_v59, %v2225_v60  ;;  %vm8304_vm10 = vmmov %vm8297_vm4 }
 0x2ae   : > { %2229 = vst.msk [vmem:[#allocation2 + $0x177] ss:$8 sm:$0x3] %vm5088_vm1, %v2226_v2  ;;  %v2216_v3 = vsel %vm8247_vm5, %v2214_v61, %v2215_v62  ;;  %vm8305_vm5 = vmmov %vm8299_vm7 }
 0x2af   : > { %2219 = vst.msk [vmem:[#allocation2 + $0x176] ss:$8 sm:$0x3] %vm5088_vm1, %v2216_v3  ;;  %2427 = vrot.lane.b32.xlu1 %v5904_v41, %s4869_s6 }
 0x2b1   : > { %v6134_v19 = vpop.permute.xlu2 %2362 }
 0x2b2   : > { %v2254_v4 = vpop.permute.xlu1 %2253 }
 0x2b3   : > { %v2255_v5 = vrot.slane %v2254_v4, 1  ;;  %v2244_v6 = vpop.permute.xlu0 %2243 }
 0x2b4   : > { %v2245_v7 = vrot.slane %v2244_v6, 1 }
 0x2b5   : > { %v2256_v8 = vsel %vm799_vm13, %v2254_v4, %v2255_v5  ;;  %vm3046_vm13 = vcmask 80896  }
 0x2b6   : > { %2259 = vst.msk [vmem:[#allocation2 + $0x182] ss:$8 sm:$0x3] %vm5088_vm1, %v2256_v8  ;;  %v2246_v9 = vsel %vm788_vm15, %v2244_v6, %v2245_v7  ;;  %v6086_v10 = vld [vmem:[#allocation2 + $0x170] sm:$0xff]  ;;  %vm3149_vm15 = vcmask 408576  }
 0x2b7   : > { %2249 = vst.msk [vmem:[#allocation2 + $0x181] ss:$8 sm:$0x3] %vm5088_vm1, %v2246_v9  ;;  %2392 = vrot.lane.b32.xlu2 %v6086_v10, %s8104_s2  ;;  %2433 = vrot.lane.b32.xlu1 %v5925_v53, %s4869_s6  ;;  %vm3072_vm1 = vcmask 162816  }
 0x2b9   : > { %v6146_v22 = vpop.permute.xlu2 %2368 }
 0x2ba   : > { %v6110_v15 = vpop.permute.xlu1 %2348 }
 0x2bb   : > { %v6138_v21 = vpop.permute.xlu0 %2346 }
 0x2be   : > { %v6094_v14 = vld [vmem:[#allocation2 + $0x180] sm:$0xf] }
 0x2bf   : > { %2423 = vrot.lane.b32.xlu2 %v5873_v26, %s4869_s6  ;;  %2394 = vrot.lane.b32.xlu0 %v6094_v14, %s8104_s2  ;;  %s4870_s2 = smov 104  }
 0x2c0   : > { %2439 = vrot.lane.b32.xlu1 %v5946_v1, %s4869_s6 }
 0x2c1   : > { %v6158_v31 = vpop.permute.xlu2 %2374 }
 0x2c2   : > { %v6124_v18 = vpop.permute.xlu1 %2354  ;;  %8249 = vst [vmem:[#allocation27_spill] sm:$0xff] %v6158_v31 }
 0x2c3   : > { %v6150_v30 = vpop.permute.xlu0 %2352 }
 0x2c7   : > { %2429 = vrot.lane.b32.xlu2 %v5894_v39, %s4869_s6  ;;  %2425 = vrot.lane.b32.xlu0 %v5875_v27, %s4869_s6 }
 0x2c8   : > { %2445 = vrot.lane.b32.xlu1 %v5967_v13, %s4869_s6 }
 0x2c9   : > { %v6170_v34 = vpop.permute.xlu2 %2380 }
 0x2ca   : > { %v6136_v20 = vpop.permute.xlu1 %2360  ;;  %8251 = vst [vmem:[#allocation29_spill] sm:$0xff] %v6170_v34  ;;  %v2274_v34 = vld [vmem:[#allocation2 + $0x18] sm:$0xff] }
 0x2cb   : > { %v6168_v33 = vpop.permute.xlu0 %2358 }
 0x2cf   : > { %2435 = vrot.lane.b32.xlu2 %v5915_v51, %s4869_s6  ;;  %2431 = vrot.lane.b32.xlu0 %v5896_v40, %s4869_s6 }
 0x2d0   : > { %2451 = vrot.lane.b32.xlu1 %v5988_v25, %s4869_s6 }
 0x2d1   : > { %v6188_v37 = vpop.permute.xlu2 %2386 }
 0x2d2   : > { %v6148_v29 = vpop.permute.xlu1 %2366  ;;  %8253 = vst [vmem:[#allocation31_spill] sm:$0xff] %v6188_v37 }
 0x2d3   : > { %8248 = vst [vmem:[#allocation26_spill] sm:$0xff] %v6148_v29  ;;  %v6180_v36 = vpop.permute.xlu0 %2364 }
 0x2d7   : > { %2441 = vrot.lane.b32.xlu2 %v5936_v63, %s4869_s6  ;;  %2437 = vrot.lane.b32.xlu0 %v5917_v52, %s4869_s6 }
 0x2d8   : > { %2457 = vrot.lane.b32.xlu1 %v6009_v44, %s4869_s6 }
 0x2da   : > { %v6160_v32 = vpop.permute.xlu1 %2372 }
 0x2db   : > { %8250 = vst [vmem:[#allocation28_spill] sm:$0xff] %v6160_v32  ;;  %v6192_v46 = vpop.permute.xlu0 %2370 }
 0x2dc   : > { %8255 = vst [vmem:[#allocation33_spill] sm:$0xff] %v6192_v46 }
 0x2df   : > { %2447 = vrot.lane.b32.xlu2 %v5957_v11, %s4869_s6  ;;  %2443 = vrot.lane.b32.xlu0 %v5938_v0, %s4869_s6 }
 0x2e0   : > { %2463 = vrot.lane.b32.xlu1 %v6038_v17, %s4869_s6 }
 0x2e2   : > { %v6176_v35 = vpop.permute.xlu1 %2378 }
 0x2e3   : > { %8252 = vst [vmem:[#allocation30_spill] sm:$0xff] %v6176_v35  ;;  %v6204_v50 = vpop.permute.xlu0 %2376 }
 0x2e4   : > { %8258 = vst [vmem:[#allocation36_spill] sm:$0xff] %v6204_v50 }
 0x2e7   : > { %2453 = vrot.lane.b32.xlu2 %v5978_v23, %s4869_s6  ;;  %2449 = vrot.lane.b32.xlu0 %v5959_v12, %s4869_s6 }
 0x2e8   : > { %2469 = vrot.lane.b32.xlu1 %v6094_v14, %s4869_s6 }
 0x2ea   : > { %v6190_v45 = vpop.permute.xlu1 %2384 }
 0x2eb   : > { %8254 = vst [vmem:[#allocation32_spill] sm:$0xff] %v6190_v45  ;;  %v6222_v56 = vpop.permute.xlu0 %2382 }
 0x2ec   : > { %8259 = vst [vmem:[#allocation37_spill] sm:$0xff] %v6222_v56 }
 0x2ef   : > { %2459 = vrot.lane.b32.xlu2 %v5999_v42, %s4869_s6  ;;  %2455 = vrot.lane.b32.xlu0 %v5980_v24, %s4869_s6 }
 0x2f0   : > { %2500 = vrot.lane.b32.xlu1 %v5875_v27, %s8110_s22 }
 0x2f7   : > { %2465 = vrot.lane.b32.xlu2 %v6060_v49, %s4869_s6  ;;  %2461 = vrot.lane.b32.xlu0 %v6001_v43, %s4869_s6 }
 0x2f8   : > { %2506 = vrot.lane.b32.xlu1 %v5896_v40, %s8110_s22 }
 0x2ff   : > { %2496 = vrot.lane.b32.xlu2 %v5883_v28, %s8110_s22  ;;  %2467 = vrot.lane.b32.xlu0 %v6086_v10, %s4869_s6  ;;  %s7811_s6 = sshll.u32 %s275_s27, 4  ;;  %s4205_s6 = int_to_ptr.vmem [resolvable:$true] %s7811_s6 }
 0x300   : > { %2512 = vrot.lane.b32.xlu1 %v5917_v52, %s8110_s22 }
 0x307   : > { %2502 = vrot.lane.b32.xlu2 %v5904_v41, %s8110_s22  ;;  %2498 = vrot.lane.b32.xlu0 %v5873_v26, %s8110_s22 }
 0x308   : > { %2518 = vrot.lane.b32.xlu1 %v5938_v0, %s8110_s22 }
 0x30f   : > { %2508 = vrot.lane.b32.xlu2 %v5925_v53, %s8110_s22  ;;  %2504 = vrot.lane.b32.xlu0 %v5894_v39, %s8110_s22 }
 0x310   : > { %2524 = vrot.lane.b32.xlu1 %v5959_v12, %s8110_s22 }
 0x311   : > { %v6200_v47 = vpop.permute.xlu2 %2392  ;;  %v6202_v48 = vpop.permute.xlu1 %2390 }
 0x312   : > { %8256 = vst [vmem:[#allocation34_spill] sm:$0xff] %v6200_v47 }
 0x313   : > { %8257 = vst [vmem:[#allocation35_spill] sm:$0xff] %v6202_v48 }
 0x317   : > { %2514 = vrot.lane.b32.xlu2 %v5946_v1, %s8110_s22  ;;  %2510 = vrot.lane.b32.xlu0 %v5915_v51, %s8110_s22 }
 0x318   : > { %2530 = vrot.lane.b32.xlu1 %v5980_v24, %s8110_s22  ;;  %v6234_v24 = vpop.permute.xlu0 %2388 }
 0x319   : > { %v6212_v54 = vpop.permute.xlu2 %2423  ;;  %v6214_v55 = vpop.permute.xlu1 %2421  ;;  %8260 = vst [vmem:[#allocation38_spill] sm:$0xff] %v6234_v24 }
 0x31f   : > { %2520 = vrot.lane.b32.xlu2 %v5967_v13, %s8110_s22  ;;  %2516 = vrot.lane.b32.xlu0 %v5936_v63, %s8110_s22 }
 0x320   : > { %2536 = vrot.lane.b32.xlu1 %v6001_v43, %s8110_s22 }
 0x321   : > { %v6224_v57 = vpop.permute.xlu2 %2429  ;;  %v6226_v58 = vpop.permute.xlu1 %2427 }
 0x327   : > { %2526 = vrot.lane.b32.xlu2 %v5988_v25, %s8110_s22  ;;  %2522 = vrot.lane.b32.xlu0 %v5957_v11, %s8110_s22 }
 0x328   : > { %2542 = vrot.lane.b32.xlu1 %v6086_v10, %s8110_s22 }
 0x329   : > { %v6236_v59 = vpop.permute.xlu2 %2435  ;;  %v6238_v43 = vpop.permute.xlu1 %2433 }
 0x32f   : > { %2532 = vrot.lane.b32.xlu2 %v6009_v44, %s8110_s22  ;;  %2528 = vrot.lane.b32.xlu0 %v5978_v23, %s8110_s22 }
 0x330   : > { %2573 = vrot.lane.b32.xlu1 %v5873_v26, %s4870_s2 }
 0x331   : > { %v6246_v60 = vpop.permute.xlu2 %2441  ;;  %v6248_v61 = vpop.permute.xlu0 %2394 }
 0x332   : > { %8261 = vst [vmem:[#allocation39_spill] sm:$0xff] %v6246_v60  ;;  %v6250_v62 = vpop.permute.xlu1 %2439 }
 0x333   : > { %8262 = vst [vmem:[#allocation40_spill] sm:$0xff] %v6248_v61 }
 0x337   : > { %2538 = vrot.lane.b32.xlu2 %v6038_v17, %s8110_s22  ;;  %2534 = vrot.lane.b32.xlu0 %v5999_v42, %s8110_s22 }
 0x338   : > { %2579 = vrot.lane.b32.xlu1 %v5894_v39, %s4870_s2 }
 0x339   : > { %v6258_v44 = vpop.permute.xlu2 %2447  ;;  %v6260_v2 = vpop.permute.xlu0 %2425 }
 0x33a   : > { %8263 = vst [vmem:[#allocation41_spill] sm:$0xff] %v6258_v44  ;;  %v6262_v3 = vpop.permute.xlu1 %2445  ;;  %v2276_v44 = vld [vmem:[#allocation2 + $0x28] sm:$0xff] }
 0x33b   : > { %8264 = vst [vmem:[#allocation42_spill] sm:$0xff] %v6262_v3  ;;  %v2282_v3 = vld [vmem:[#allocation2 + $0x58] sm:$0xff] }
 0x33f   : > { %2544 = vrot.lane.b32.xlu2 %v6094_v14, %s8110_s22  ;;  %2540 = vrot.lane.b32.xlu0 %v6060_v49, %s8110_s22  ;;  %s4871_s22 = smov 86  }
 0x340   : > { %2585 = vrot.lane.b32.xlu1 %v5915_v51, %s4870_s2 }
 0x341   : > { %v6270_v17 = vpop.permute.xlu2 %2453  ;;  %v6272_v42 = vpop.permute.xlu0 %2431 }
 0x342   : > { %8265 = vst [vmem:[#allocation43_spill] sm:$0xff] %v6270_v17  ;;  %v6274_v4 = vpop.permute.xlu1 %2451 }
 0x343   : > { %8266 = vst [vmem:[#allocation44_spill] sm:$0xff] %v6274_v4  ;;  %v2278_v4 = vld [vmem:[#allocation2 + $0x38] sm:$0xff] }
 0x347   : > { %2575 = vrot.lane.b32.xlu2 %v5875_v27, %s4870_s2  ;;  %2571 = vrot.lane.b32.xlu0 %v5883_v28, %s4870_s2 }
 0x348   : > { %2591 = vrot.lane.b32.xlu1 %v5936_v63, %s4870_s2 }
 0x349   : > { %v6282_v5 = vpop.permute.xlu2 %2459  ;;  %v6284_v49 = vpop.permute.xlu0 %2437 }
 0x34a   : > { %8267 = vst [vmem:[#allocation45_spill] sm:$0xff] %v6282_v5  ;;  %v6286_v6 = vpop.permute.xlu1 %2457 }
 0x34b   : > { %8268 = vst [vmem:[#allocation46_spill] sm:$0xff] %v6286_v6 }
 0x34f   : > { %2581 = vrot.lane.b32.xlu2 %v5896_v40, %s4870_s2  ;;  %2577 = vrot.lane.b32.xlu0 %v5904_v41, %s4870_s2 }
 0x350   : > { %2597 = vrot.lane.b32.xlu1 %v5957_v11, %s4870_s2 }
 0x351   : > { %v6294_v7 = vpop.permute.xlu2 %2465  ;;  %v6296_v8 = vpop.permute.xlu0 %2443 }
 0x352   : > { %8269 = vst [vmem:[#allocation47_spill] sm:$0xff] %v6294_v7  ;;  %v6298_v9 = vpop.permute.xlu1 %2463 }
 0x353   : > { %8270 = vst [vmem:[#allocation48_spill] sm:$0xff] %v6296_v8 }
 0x354   : > { %8271 = vst [vmem:[#allocation49_spill] sm:$0xff] %v6298_v9 }
 0x357   : > { %2587 = vrot.lane.b32.xlu2 %v5917_v52, %s4870_s2  ;;  %2583 = vrot.lane.b32.xlu0 %v5925_v53, %s4870_s2 }
 0x358   : > { %2721 = vrot.lane.b32.xlu1 %v5883_v28, %s8068_s15 }
 0x359   : > { %v6306_v10 = vpop.permute.xlu2 %2496  ;;  %v6308_v14 = vpop.permute.xlu0 %2449 }
 0x35a   : > { %8272 = vst [vmem:[#allocation50_spill] sm:$0xff] %v6308_v14  ;;  %v6310_v61 = vpop.permute.xlu1 %2469 }
 0x35b   : > { %8273 = vst [vmem:[#allocation51_spill] sm:$0xff] %v6310_v61  ;;  %v2272_v61 = vld [vmem:[#allocation2 + $0x8] sm:$0xff] }
 0x35f   : > { %2593 = vrot.lane.b32.xlu2 %v5938_v0, %s4870_s2  ;;  %2589 = vrot.lane.b32.xlu0 %v5946_v1, %s4870_s2 }
 0x360   : > { %2796 = vrot.lane.b32.xlu1 %v5883_v28, %s4871_s22 }
 0x361   : > { %v6318_v47 = vpop.permute.xlu2 %2502  ;;  %v6320_v7 = vpop.permute.xlu0 %2455 }
 0x362   : > { %8274 = vst [vmem:[#allocation52_spill] sm:$0xff] %v6320_v7  ;;  %v6322_v48 = vpop.permute.xlu1 %2500 }
 0x367   : > { %2646 = vrot.lane.b32.xlu2 %v5883_v28, %s4872_s28  ;;  %2595 = vrot.lane.b32.xlu0 %v5967_v13, %s4870_s2 }
 0x368   : > { %2896 = vrot.lane.b32.xlu1 %v2272_v61, %s8071_s26 }
 0x369   : > { %v6329_v9 = vpop.permute.xlu2 %2508  ;;  %v6331_v24 = vpop.permute.xlu0 %2461 }
 0x36a   : > { %8275 = vst [vmem:[#allocation53_spill] sm:$0xff] %v6331_v24  ;;  %v6333_v37 = vpop.permute.xlu1 %2506 }
 0x36f   : > { %2723 = vrot.lane.b32.xlu2 %v5873_v26, %s8068_s15  ;;  %2648 = vrot.lane.b32.xlu0 %v5873_v26, %s4872_s28 }
 0x370   : > { %2800 = vrot.lane.b32.xlu1 %v5875_v27, %s4871_s22 }
 0x371   : > { %v6341_v5 = vpop.permute.xlu2 %2514  ;;  %v6343_v45 = vpop.permute.xlu0 %2467 }
 0x372   : > { %8276 = vst [vmem:[#allocation54_spill] sm:$0xff] %v6343_v45  ;;  %v6345_v6 = vpop.permute.xlu1 %2512 }
 0x377   : > { %2798 = vrot.lane.b32.xlu2 %v5873_v26, %s4871_s22  ;;  %2650 = vrot.lane.b32.xlu0 %v5875_v27, %s4872_s28 }
 0x378   : > { %2727 = vrot.lane.b32.xlu1 %v5904_v41, %s8068_s15 }
 0x379   : > { %v6353_v24 = vpop.permute.xlu2 %2520  ;;  %v6355_v56 = vpop.permute.xlu0 %2498 }
 0x37a   : > { %8277 = vst [vmem:[#allocation55_spill] sm:$0xff] %v6353_v24  ;;  %v6357_v7 = vpop.permute.xlu1 %2518 }
 0x37b   : > { %8278 = vst [vmem:[#allocation56_spill] sm:$0xff] %v6357_v7 }
 0x37f   : > { %2898 = vrot.lane.b32.xlu2 %v2274_v34, %s8071_s26  ;;  %2725 = vrot.lane.b32.xlu0 %v5875_v27, %s8068_s15 }
 0x380   : > { %2802 = vrot.lane.b32.xlu1 %v5904_v41, %s4871_s22 }
 0x381   : > { %v6364_v45 = vpop.permute.xlu2 %2526  ;;  %v6366_v17 = vpop.permute.xlu0 %2504 }
 0x382   : > { %8279 = vst [vmem:[#allocation57_spill] sm:$0xff] %v6364_v45  ;;  %v6368_v35 = vpop.permute.xlu1 %2524 }
 0x383   : > { %8280 = vst [vmem:[#allocation58_spill] sm:$0xff] %v6368_v35 }
 0x387   : > { %2971 = vrot.lane.b32.xlu2 %v2272_v61, %s8077_s19  ;;  %2652 = vrot.lane.b32.xlu0 %v5904_v41, %s4872_s28 }
 0x388   : > { %2902 = vrot.lane.b32.xlu1 %v2278_v4, %s8071_s26 }
 0x389   : > { %v6374_v50 = vpop.permute.xlu2 %2532  ;;  %v6376_v14 = vpop.permute.xlu0 %2510 }
 0x38a   : > { %8281 = vst [vmem:[#allocation59_spill] sm:$0xff] %v6374_v50  ;;  %v6378_v31 = vpop.permute.xlu1 %2530 }
 0x38b   : > { %8282 = vst [vmem:[#allocation60_spill] sm:$0xff] %v6378_v31 }
 0x38f   : > { %2900 = vrot.lane.b32.xlu2 %v2276_v44, %s8071_s26  ;;  %2973 = vrot.lane.b32.xlu0 %v2274_v34, %s8077_s19 }
 0x390   : > { %2977 = vrot.lane.b32.xlu1 %v2278_v4, %s8077_s19 }
 0x391   : > { %v6383_v61 = vpop.permute.xlu2 %2538  ;;  %v6385_v45 = vpop.permute.xlu0 %2516 }
 0x392   : > { %8283 = vst [vmem:[#allocation61_spill] sm:$0xff] %v6383_v61  ;;  %v6387_v35 = vpop.permute.xlu1 %2536 }
 0x393   : > { %8284 = vst [vmem:[#allocation62_spill] sm:$0xff] %v6385_v45 }
 0x394   : > { %8285 = vst [vmem:[#allocation63_spill] sm:$0xff] %v6387_v35 }
 0x397   : > { %2975 = vrot.lane.b32.xlu2 %v2276_v44, %s8077_s19  ;;  %2654 = vrot.lane.b32.xlu0 %v5894_v39, %s4872_s28 }
 0x398   : > { %2658 = vrot.lane.b32.xlu1 %v5925_v53, %s4872_s28 }
 0x399   : > { %v6394_v50 = vpop.permute.xlu2 %2544  ;;  %v6396_v31 = vpop.permute.xlu0 %2522 }
 0x39a   : > { %8286 = vst [vmem:[#allocation64_spill] sm:$0xff] %v6394_v50  ;;  %v6398_v34 = vpop.permute.xlu1 %2542 }
 0x39b   : > { %8287 = vst [vmem:[#allocation65_spill] sm:$0xff] %v6396_v31  ;;  %v2280_v31 = vld [vmem:[#allocation2 + $0x48] sm:$0xff] }
 0x39c   : > { %8288 = vst [vmem:[#allocation66_spill] sm:$0xff] %v6398_v34 }
 0x39f   : > { %2656 = vrot.lane.b32.xlu2 %v5896_v40, %s4872_s28  ;;  %2729 = vrot.lane.b32.xlu0 %v5894_v39, %s8068_s15 }
 0x3a0   : > { %2733 = vrot.lane.b32.xlu1 %v5925_v53, %s8068_s15 }
 0x3a1   : > { %v6406_v44 = vpop.permute.xlu2 %2575  ;;  %v6408_v4 = vpop.permute.xlu0 %2528 }
 0x3a2   : > { %8289 = vst [vmem:[#allocation67_spill] sm:$0xff] %v6408_v4  ;;  %v6410_v61 = vpop.permute.xlu1 %2573  ;;  %v2284_v4 = vld [vmem:[#allocation2 + $0x68] sm:$0xff] }
 0x3a7   : > { %2731 = vrot.lane.b32.xlu2 %v5896_v40, %s8068_s15  ;;  %2804 = vrot.lane.b32.xlu0 %v5894_v39, %s4871_s22 }
 0x3a8   : > { %2808 = vrot.lane.b32.xlu1 %v5925_v53, %s4871_s22 }
 0x3a9   : > { %v6418_v50 = vpop.permute.xlu2 %2581  ;;  %v6420_v34 = vpop.permute.xlu0 %2534 }
 0x3aa   : > { %8290 = vst [vmem:[#allocation68_spill] sm:$0xff] %v6420_v34  ;;  %v6422_v35 = vpop.permute.xlu1 %2579 }
 0x3af   : > { %2806 = vrot.lane.b32.xlu2 %v5896_v40, %s4871_s22  ;;  %2904 = vrot.lane.b32.xlu0 %v2280_v31, %s8071_s26 }
 0x3b0   : > { %2908 = vrot.lane.b32.xlu1 %v2284_v4, %s8071_s26 }
 0x3b1   : > { %v6428_v32 = vpop.permute.xlu2 %2587  ;;  %v6430_v24 = vpop.permute.xlu0 %2540 }
 0x3b2   : > { %8291 = vst [vmem:[#allocation69_spill] sm:$0xff] %v6430_v24  ;;  %v6432_v45 = vpop.permute.xlu1 %2585 }
 0x3b7   : > { %2906 = vrot.lane.b32.xlu2 %v2282_v3, %s8071_s26  ;;  %2979 = vrot.lane.b32.xlu0 %v2280_v31, %s8077_s19  ;;  %v3047_v31 = vsel %vm3046_vm13, %v5883_v28, %v6138_v21 }
 0x3b8   : > { %2983 = vrot.lane.b32.xlu1 %v2284_v4, %s8077_s19 }
 0x3b9   : > { %v6437_v34 = vpop.permute.xlu2 %2593  ;;  %v2572_v60 = vpop.permute.xlu0 %2571 }
 0x3ba   : > { %8292 = vst [vmem:[#allocation70_spill] sm:$0xff] %v6437_v34  ;;  %v6439_v46 = vpop.permute.xlu1 %2591  ;;  %v3048_v34 = vsel %vm3046_vm13, %v5873_v26, %v6110_v15 }
 0x3bb   : > { %8293 = vst [vmem:[#allocation71_spill] sm:$0xff] %v6439_v46 }
 0x3bf   : > { %2981 = vrot.lane.b32.xlu2 %v2282_v3, %s8077_s19  ;;  %2660 = vrot.lane.b32.xlu0 %v5915_v51, %s4872_s28  ;;  %v3073_v3 = vsel %vm3072_vm1, %v3047_v31, %v6214_v55 }
 0x3c0   : > { %2664 = vrot.lane.b32.xlu1 %v5946_v1, %s4872_s28  ;;  %v3098_v4 = vsel %vm8295_vm11, %v3073_v3, %v6306_v10  ;;  %vm8306_vm11 = vmmov %vm8298_vm6 }
 0x3c1   : > { %v2647_v24 = vpop.permute.xlu2 %2646  ;;  %v6446_v29 = vpop.permute.xlu0 %2577 }
 0x3c2   : > { %v6448_v7 = vpop.permute.xlu1 %2597 }
 0x3c3   : > { %8294 = vst [vmem:[#allocation72_spill] sm:$0xff] %v6448_v7  ;;  %v3124_v7 = vsel %vm3123_vm0, %v3098_v4, %v2572_v60 }
 0x3c4   : > { %v3150_v55 = vsel %vm3149_vm15, %v3124_v7, %v2647_v24  ;;  %v2286_v24 = vld [vmem:[#allocation2 + $0x78] sm:$0xff] }
 0x3c5   : > { %v2290_v7 = vld [vmem:[#allocation2 + $0x98] sm:$0xff] }
 0x3c7   : > { %2662 = vrot.lane.b32.xlu2 %v5917_v52, %s4872_s28  ;;  %2735 = vrot.lane.b32.xlu0 %v5915_v51, %s8068_s15 }
 0x3c8   : > { %2739 = vrot.lane.b32.xlu1 %v5946_v1, %s8068_s15 }
 0x3c9   : > { %v2724_v28 = vpop.permute.xlu2 %2723  ;;  %v6464_v21 = vpop.permute.xlu0 %2583 }
 0x3ca   : > { %v2722_v31 = vpop.permute.xlu1 %2721 }
 0x3cb   : > { %v3175_v46 = vsel %vm8237_vm2, %v3150_v55, %v2722_v31  ;;  %vm8307_vm2 = vmmov %vm8298_vm6 }
 0x3cf   : > { %2737 = vrot.lane.b32.xlu2 %v5917_v52, %s8068_s15  ;;  %2810 = vrot.lane.b32.xlu0 %v5915_v51, %s4871_s22 }
 0x3d0   : > { %2814 = vrot.lane.b32.xlu1 %v5946_v1, %s4871_s22 }
 0x3d1   : > { %v2799_v10 = vpop.permute.xlu2 %2798  ;;  %v6474_v60 = vpop.permute.xlu0 %2589 }
 0x3d2   : > { %v2797_v3 = vpop.permute.xlu1 %2796 }
 0x3d3   : > { %v3201_v4 = vsel %vm3200_vm3, %v3175_v46, %v2797_v3  ;;  %v2288_v46 = vld [vmem:[#allocation2 + $0x88] sm:$0xff]  ;;  %v3074_v3 = vsel %vm3072_vm1, %v3048_v34, %v6212_v54 }
 0x3d7   : > { %2812 = vrot.lane.b32.xlu2 %v5917_v52, %s4871_s22  ;;  %2910 = vrot.lane.b32.xlu0 %v2286_v24, %s8071_s26  ;;  %v3099_v52 = vsel %vm8298_vm6, %v3074_v3, %v6355_v56  ;;  %vm8309_vm6 = vmmov %vm8301_vm9 }
 0x3d8   : > { %2914 = vrot.lane.b32.xlu1 %v2290_v7, %s8071_s26 }
 0x3d9   : > { %v2899_v51 = vpop.permute.xlu2 %2898  ;;  %v6481_v55 = vpop.permute.xlu0 %2595 }
 0x3da   : > { %8296 = vst [vmem:[#allocation73_spill] sm:$0xff] %v6481_v55  ;;  %v2897_v1 = vpop.permute.xlu1 %2896 }
 0x3db   : > { %v3226_v31 = vsel %vm8297_vm4, %v3201_v4, %v2897_v1  ;;  %v3125_v4 = vsel %vm3123_vm0, %v3099_v52, %v6410_v61  ;;  %vm8308_vm4 = vmmov %vm8300_vm8 }
 0x3df   : > { %2912 = vrot.lane.b32.xlu2 %v2288_v46, %s8071_s26  ;;  %2985 = vrot.lane.b32.xlu0 %v2286_v24, %s8077_s19 }
 0x3e0   : > { %2989 = vrot.lane.b32.xlu1 %v2290_v7, %s8077_s19 }
 0x3e1   : > { %v2972_v1 = vpop.permute.xlu2 %2971  ;;  %v2649_v55 = vpop.permute.xlu0 %2648 }
 0x3e2   : > { %v6497_v26 = vsel %vm8299_vm7, %v3226_v31, %v2972_v1  ;;  %v2801_v15 = vpop.permute.xlu1 %2800  ;;  %v3151_v54 = vsel %vm3149_vm15, %v3125_v4, %v2649_v55  ;;  %v3049_v55 = vsel %vm3046_vm13, %v5875_v27, %v6108_v38  ;;  %v3050_v4 = vsel %vm3046_vm13, %v5904_v41, %v6150_v30 }
 0x3e3   : > { %v3176_v34 = vsel %vm8300_vm8, %v3151_v54, %v2724_v28  ;;  %v3075_v28 = vsel %vm3072_vm1, %v3049_v55, %v6260_v2  ;;  %v3076_v1 = vsel %vm3072_vm1, %v3050_v4, %v6226_v58  ;;  %vm3276_vm7 = vcmask 818176   ;;  %vm8310_vm8 = vmmov %vm8308_vm4 }
 0x3e4   : > { %v3202_v24 = vsel %vm3200_vm3, %v3176_v34, %v2799_v10  ;;  %v3100_v10 = vsel %vm8302_vm14, %v3075_v28, %v6322_v48  ;;  %v3277_v55 = vsel %vm3276_vm7, %v6497_v26, 0.0  ;;  %vm8312_vm14 = vmmov %vm8305_vm5 }
 0x3e5   : > { %v3227_v8 = vsel %vm8301_vm9, %v3202_v24, %v2899_v51  ;;  %v3126_v51 = vsel %vm3123_vm0, %v3100_v10, %v6406_v44  ;;  %v3052_v44 = vsel %vm3046_vm13, %v5896_v40, %v6118_v16  ;;  %vm8311_vm9 = vmmov %vm8305_vm5 }
 0x3e6   : > { %v3078_v54 = vsel %vm3072_vm1, %v3052_v44, %v6272_v42 }
 0x3e7   : > { %2987 = vrot.lane.b32.xlu2 %v2288_v46, %s8077_s19  ;;  %2666 = vrot.lane.b32.xlu0 %v5936_v63, %s4872_s28  ;;  %v3103_v40 = vsel %vm8307_vm2, %v3078_v54, %v6333_v37 }
 0x3e8   : > { %2670 = vrot.lane.b32.xlu1 %v5967_v13, %s4872_s28  ;;  %v3129_v41 = vsel %vm3123_vm0, %v3103_v40, %v6418_v50 }
 0x3e9   : > { %v2901_v56 = vpop.permute.xlu2 %2900  ;;  %v2651_v61 = vpop.permute.xlu0 %2650 }
 0x3ea   : > { %v2728_v7 = vpop.permute.xlu1 %2727  ;;  %v3152_v27 = vsel %vm3149_vm15, %v3126_v51, %v2651_v61 }
 0x3ef   : > { %2668 = vrot.lane.b32.xlu2 %v5938_v0, %s4872_s28  ;;  %2741 = vrot.lane.b32.xlu0 %v5936_v63, %s8068_s15 }
 0x3f0   : > { %2745 = vrot.lane.b32.xlu1 %v5967_v13, %s8068_s15 }
 0x3f1   : > { %v2976_v38 = vpop.permute.xlu2 %2975  ;;  %v2726_v31 = vpop.permute.xlu0 %2725 }
 0x3f2   : > { %v2803_v2 = vpop.permute.xlu1 %2802  ;;  %v3177_v46 = vsel %vm8303_vm12, %v3152_v27, %v2726_v31  ;;  %v3051_v27 = vsel %vm3046_vm13, %v5894_v39, %v6124_v18  ;;  %v3053_v31 = vsel %vm3046_vm13, %v5925_v53, %v6168_v33  ;;  %vm8313_vm12 = vmmov %vm8307_vm2 }
 0x3f3   : > { %v3203_v48 = vsel %vm3200_vm3, %v3177_v46, %v2801_v15  ;;  %v3101_v15 = vsel %vm8306_vm11, %v3076_v1, %v6318_v47  ;;  %vm8316_vm11 = vmmov %vm8308_vm4 }
 0x3f4   : > { %v3228_v3 = vsel %vm8304_vm10, %v3203_v48, %v2901_v56  ;;  %v3127_v16 = vsel %vm3123_vm0, %v3101_v15, %v6446_v29  ;;  %v3079_v48 = vsel %vm3072_vm1, %v3053_v31, %v6238_v43  ;;  %vm8314_vm10 = vmmov %vm8307_vm2  ;;  %v4639_v31 = vld [vmem:[#allocation2 + $0x70] sm:$0xff] }
 0x3f5   : > { %v6528_v52 = vsel %vm8305_vm5, %v3228_v3, %v2976_v38  ;;  %v3104_v18 = vsel %vm8314_vm10, %v3079_v48, %v6329_v9  ;;  %vm8315_vm5 = vmmov %vm8309_vm6  ;;  %v4640_v48 = vld [vmem:[#allocation2 + $0x90] sm:$0xff] }
 0x3f6   : > { %v3280_v51 = vsel %vm3276_vm7, %v6528_v52, 0.0  ;;  %v3130_v44 = vsel %vm3123_vm0, %v3104_v18, %v6464_v21  ;;  %vm8317_vm2 = vmmov %vm8308_vm4 }
 0x3f7   : > { %2743 = vrot.lane.b32.xlu2 %v5938_v0, %s8068_s15  ;;  %2816 = vrot.lane.b32.xlu0 %v5936_v63, %s4871_s22 }
 0x3f8   : > { %2820 = vrot.lane.b32.xlu1 %v5967_v13, %s4871_s22  ;;  %v2292_v13 = vld [vmem:[#allocation2 + $0xa8] sm:$0xff] }
 0x3f9   : > { %v2657_v30 = vpop.permute.xlu2 %2656  ;;  %v2653_v58 = vpop.permute.xlu0 %2652 }
 0x3fa   : > { %v3155_v42 = vsel %vm3149_vm15, %v3129_v41, %v2657_v30  ;;  %v2903_v63 = vpop.permute.xlu1 %2902  ;;  %v3153_v34 = vsel %vm3149_vm15, %v3127_v16, %v2653_v58  ;;  %v2296_v41 = vld [vmem:[#allocation2 + $0xc8] sm:$0xff] }
 0x3fb   : > { %v3178_v47 = vsel %vm8308_vm4, %v3153_v34, %v2728_v7  ;;  %vm8318_vm4 = vmmov %vm8311_vm9  ;;  %v4638_v34 = vld [vmem:[#allocation2 + $0x80] sm:$0xff] }
 0x3fc   : > { %v3204_v37 = vsel %vm3200_vm3, %v3178_v47, %v2803_v2  ;;  %v3077_v2 = vsel %vm3072_vm1, %v3051_v27, %v6224_v57  ;;  %v3055_v47 = vsel %vm3046_vm13, %v4638_v34, %v6134_v19  ;;  %v8331_v34 = vld [vmem:[#allocation48_spill] sm:$0xff] }
 0x3fd   : > { %v3229_v24 = vsel %vm8309_vm6, %v3204_v37, %v2903_v63  ;;  %v3102_v39 = vsel %vm8313_vm12, %v3077_v2, %v6366_v17  ;;  %v3081_v37 = vsel %vm3072_vm1, %v3055_v47, %v6284_v49  ;;  %vm8319_vm6 = vmmov %vm8314_vm10  ;;  %v3054_v2 = vsel %vm3046_vm13, %v4639_v31, %v6136_v20 }
 0x3fe   : > { %v3128_v33 = vsel %vm3123_vm0, %v3102_v39, %v6422_v35  ;;  %vm8323_vm12 = vmmov %vm8318_vm4  ;;  %v3056_v39 = vsel %vm3046_vm13, %v4640_v48, %v6180_v36  ;;  %v3080_v18 = vsel %vm3072_vm1, %v3054_v2, %v6236_v59  ;;  %v8340_v48 = vld [vmem:[#allocation26_spill] sm:$0xff] }
 0x3ff   : > { %2818 = vrot.lane.b32.xlu2 %v5938_v0, %s4871_s22  ;;  %2916 = vrot.lane.b32.xlu0 %v2292_v13, %s8071_s26  ;;  %vm8324_vm10 = vmmov %vm8318_vm4 }
 0x400   : > { %2747 = vrot.lane.b32.xlu1 %v5957_v11, %s8068_s15 }
 0x401   : > { %v2732_v29 = vpop.permute.xlu2 %2731  ;;  %v2974_v50 = vpop.permute.xlu0 %2973 }
 0x402   : > { %v3180_v56 = vsel %vm8310_vm8, %v3155_v42, %v2732_v29  ;;  %v2978_v61 = vpop.permute.xlu1 %2977  ;;  %v6566_v7 = vsel %vm8311_vm9, %v3227_v8, %v2974_v50  ;;  %v2294_v8 = vld [vmem:[#allocation2 + $0xb8] sm:$0xff]  ;;  %vm8320_vm8 = vmmov %vm8315_vm5 }
 0x403   : > { %v6571_v28 = vsel %vm8312_vm14, %v3229_v24, %v2978_v61  ;;  %v3278_v0 = vsel %vm3276_vm7, %v6566_v7, 0.0  ;;  %v3106_v24 = vsel %vm8319_vm6, %v3081_v37, %v6345_v6  ;;  %vm8321_vm9 = vmmov %vm8315_vm5  ;;  %v8332_v37 = vld [vmem:[#allocation56_spill] sm:$0xff] }
 0x404   : > { %v3279_v10 = vadd.f32 %v3278_v0, %v3277_v55  ;;  %v3282_v46 = vsel %vm3276_vm7, %v6571_v28, 0.0  ;;  %v2298_v55 = vld [vmem:[#allocation2 + $0xd8] sm:$0xff]  ;;  %vm8322_vm14 = vmmov %vm8317_vm2 }
 0x406   : > { %v3281_v38 = vadd.f32 %v3280_v51, %v3279_v10 }
 0x407   : > { %2918 = vrot.lane.b32.xlu2 %v2294_v8, %s8071_s26  ;;  %2991 = vrot.lane.b32.xlu0 %v2292_v13, %s8077_s19  ;;  %v3132_v13 = vsel %vm3123_vm0, %v3106_v24, %v6428_v32 }
 0x408   : > { %2822 = vrot.lane.b32.xlu1 %v5957_v11, %s4871_s22  ;;  %v3283_v53 = vadd.f32 %v3282_v46, %v3281_v38 }
 0x409   : > { %v2807_v57 = vpop.permute.xlu2 %2806  ;;  %v2655_v3 = vpop.permute.xlu0 %2654 }
 0x40a   : > { %v3206_v43 = vsel %vm3200_vm3, %v3180_v56, %v2807_v57  ;;  %v2659_v4 = vpop.permute.xlu1 %2658  ;;  %v3154_v17 = vsel %vm3149_vm15, %v3128_v33, %v2655_v3 }
 0x40b   : > { %v3156_v1 = vsel %vm3149_vm15, %v3130_v44, %v2659_v4 }
 0x40f   : > { %2993 = vrot.lane.b32.xlu2 %v2294_v8, %s8077_s19  ;;  %2672 = vrot.lane.b32.xlu0 %v5957_v11, %s4872_s28 }
 0x410   : > { %2749 = vrot.lane.b32.xlu1 %v5959_v12, %s8068_s15 }
 0x411   : > { %v2907_v35 = vpop.permute.xlu2 %2906  ;;  %v2730_v9 = vpop.permute.xlu0 %2729 }
 0x412   : > { %v3231_v54 = vsel %vm8315_vm5, %v3206_v43, %v2907_v35  ;;  %v2734_v21 = vpop.permute.xlu1 %2733  ;;  %v3179_v15 = vsel %vm8316_vm11, %v3154_v17, %v2730_v9  ;;  %vm8325_vm5 = vmmov %vm8319_vm6  ;;  %v2300_v17 = vld [vmem:[#allocation2 + $0xe8] sm:$0xff] }
 0x413   : > { %v3181_v40 = vsel %vm8317_vm2, %v3156_v1, %v2734_v21  ;;  %v3105_v20 = vsel %vm8325_vm5, %v3080_v18, %v6376_v14  ;;  %vm8326_vm11 = vmmov %vm8325_vm5  ;;  %v6693_v21 = vld [vmem:[#allocation2 + $0x110] sm:$0xff] }
 0x414   : > { %v3131_v57 = vsel %vm3123_vm0, %v3105_v20, %v6432_v45  ;;  %vm8327_vm2 = vmmov %vm8320_vm8  ;;  %v8341_v20 = vld [vmem:[#allocation33_spill] sm:$0xff] }
 0x417   : > { %2920 = vrot.lane.b32.xlu2 %v2296_v41, %s8071_s26  ;;  %2599 = vrot.lane.b32.xlu0 %v5959_v12, %s4870_s2 }
 0x418   : > { %2824 = vrot.lane.b32.xlu1 %v5959_v12, %s4871_s22 }
 0x419   : > { %v2982_v11 = vpop.permute.xlu2 %2981  ;;  %v2805_v16 = vpop.permute.xlu0 %2804 }
 0x41a   : > { %v6618_v30 = vsel %vm8318_vm4, %v3231_v54, %v2982_v11  ;;  %v2809_v58 = vpop.permute.xlu1 %2808  ;;  %v3205_v42 = vsel %vm3200_vm3, %v3179_v15, %v2805_v16  ;;  %vm8328_vm4 = vmmov %vm8322_vm14  ;;  %v6689_v54 = vld [vmem:[#allocation2 + $0x100] sm:$0xff] }
 0x41b   : > { %v3207_v63 = vsel %vm3200_vm3, %v3181_v40, %v2809_v58  ;;  %v3286_v8 = vsel %vm3276_vm7, %v6618_v30, 0.0  ;;  %vm8329_vm6 = vmmov %vm8328_vm4  ;;  %v4643_v58 = vld [vmem:[#allocation2 + $0xb0] sm:$0xff] }
 0x41f   : > { %2995 = vrot.lane.b32.xlu2 %v2296_v41, %s8077_s19  ;;  %2674 = vrot.lane.b32.xlu0 %v5959_v12, %s4872_s28 }
 0x420   : > { %2751 = vrot.lane.b32.xlu1 %v5988_v25, %s8068_s15 }
 0x421   : > { %v2663_v29 = vpop.permute.xlu2 %2662  ;;  %v2905_v50 = vpop.permute.xlu0 %2904 }
 0x422   : > { %v3158_v19 = vsel %vm3149_vm15, %v3132_v13, %v2663_v29  ;;  %v2909_v56 = vpop.permute.xlu1 %2908  ;;  %v3230_v49 = vsel %vm8320_vm8, %v3205_v42, %v2905_v50  ;;  %vm8330_vm8 = vmmov %vm8324_vm10  ;;  %v3058_v42 = vsel %vm3046_vm13, %v4643_v58, %v6146_v22  ;;  %v8334_v13 = vld [vmem:[#allocation70_spill] sm:$0xff] }
 0x423   : > { %v3232_v61 = vsel %vm8321_vm9, %v3207_v63, %v2909_v56  ;;  %v2302_v63 = vld [vmem:[#allocation2 + $0xf8] sm:$0xff]  ;;  %v3084_v47 = vsel %vm3072_vm1, %v3058_v42, %v8331_v34  ;;  %vm8333_vm9 = vmmov %vm8325_vm5 }
 0x424   : > { %v3109_v24 = vsel %vm8333_vm9, %v3084_v47, %v8332_v37  ;;  %vm8338_vm5 = vmmov %vm8330_vm8 }
 0x425   : > { %v3135_v29 = vsel %vm3123_vm0, %v3109_v24, %v8334_v13  ;;  %v2306_v24 = vld [vmem:[#allocation2 + $0x118] sm:$0xff] }
 0x427   : > { %2922 = vrot.lane.b32.xlu2 %v2298_v55, %s8071_s26  ;;  %2601 = vrot.lane.b32.xlu0 %v5988_v25, %s4870_s2 }
 0x428   : > { %2826 = vrot.lane.b32.xlu1 %v5988_v25, %s4871_s22 }
 0x429   : > { %v2738_v12 = vpop.permute.xlu2 %2737  ;;  %v2980_v32 = vpop.permute.xlu0 %2979 }
 0x42a   : > { %v3183_v6 = vsel %vm8322_vm14, %v3158_v19, %v2738_v12  ;;  %v2984_v0 = vpop.permute.xlu1 %2983  ;;  %v6645_v10 = vsel %vm8323_vm12, %v3230_v49, %v2980_v32  ;;  %vm8335_vm14 = vmmov %vm8327_vm2 }
 0x42b   : > { %v6648_v51 = vsel %vm8324_vm10, %v3232_v61, %v2984_v0  ;;  %v3284_v27 = vsel %vm3276_vm7, %v6645_v10, 0.0  ;;  %vm8336_vm12 = vmmov %vm8327_vm2 }
 0x42c   : > { %v3285_v38 = vadd.f32 %v3284_v27, %v3283_v53  ;;  %v3288_v33 = vsel %vm3276_vm7, %v6648_v51, 0.0  ;;  %v3082_v53 = vsel %vm3072_vm1, %v3056_v39, %v6250_v62  ;;  %vm8337_vm10 = vmmov %vm8328_vm4 }
 0x42d   : > { %v3107_v59 = vsel %vm8326_vm11, %v3082_v53, %v6341_v5  ;;  %vm8339_vm11 = vmmov %vm8338_vm5  ;;  %v4646_v53 = vld [vmem:[#allocation2 + $0xc0] sm:$0xff] }
 0x42e   : > { %v3287_v46 = vadd.f32 %v3286_v8, %v3285_v38 }
 0x42f   : > { %2997 = vrot.lane.b32.xlu2 %v2298_v55, %s8077_s19  ;;  %2676 = vrot.lane.b32.xlu0 %v5988_v25, %s4872_s28  ;;  %v3133_v25 = vsel %vm3123_vm0, %v3107_v59, %v6474_v60  ;;  %v6721_v55 = vld [vmem:[#allocation2 + $0x120] sm:$0xff]  ;;  %v3059_v59 = vsel %vm3046_vm13, %v4646_v53, %v8341_v20  ;;  %v4649_v20 = vld [vmem:[#allocation2 + $0xd0] sm:$0xff] }
 0x430   : > { %2753 = vrot.lane.b32.xlu1 %v5978_v23, %s8068_s15  ;;  %v3289_v36 = vadd.f32 %v3288_v33, %v3287_v46  ;;  %v4645_v46 = vld [vmem:[#allocation2 + $0xa0] sm:$0xff]  ;;  %v2304_v33 = vld [vmem:[#allocation2 + $0x108] sm:$0xff] }
 0x431   : > { %v2813_v3 = vpop.permute.xlu2 %2812  ;;  %v2661_v44 = vpop.permute.xlu0 %2660  ;;  %v3057_v39 = vsel %vm3046_vm13, %v4645_v46, %v8340_v48 }
 0x432   : > { %v3209_v62 = vsel %vm3200_vm3, %v3183_v6, %v2813_v3  ;;  %v2665_v43 = vpop.permute.xlu1 %2664  ;;  %v3157_v14 = vsel %vm3149_vm15, %v3131_v57, %v2661_v44  ;;  %v8342_v57 = vld [vmem:[#allocation39_spill] sm:$0xff] }
 0x433   : > { %v3159_v4 = vsel %vm3149_vm15, %v3133_v25, %v2665_v43  ;;  %v3083_v3 = vsel %vm3072_vm1, %v3057_v39, %v8342_v57 }
 0x437   : > { %2924 = vrot.lane.b32.xlu2 %v2300_v17, %s8071_s26  ;;  %2603 = vrot.lane.b32.xlu0 %v5978_v23, %s4870_s2 }
 0x438   : > { %2828 = vrot.lane.b32.xlu1 %v5978_v23, %s4871_s22 }
 0x439   : > { %v2913_v45 = vpop.permute.xlu2 %2912  ;;  %v2736_v5 = vpop.permute.xlu0 %2735 }
 0x43a   : > { %v3234_v60 = vsel %vm8327_vm2, %v3209_v62, %v2913_v45  ;;  %v2740_v1 = vpop.permute.xlu1 %2739  ;;  %v3182_v35 = vsel %vm8328_vm4, %v3157_v14, %v2736_v5  ;;  %v8344_v62 = vld [vmem:[#allocation62_spill] sm:$0xff]  ;;  %vm8345_vm2 = vmmov %vm8333_vm9  ;;  %v8348_v45 = vld [vmem:[#allocation71_spill] sm:$0xff] }
 0x43b   : > { %v3184_v9 = vsel %vm8329_vm6, %v3159_v4, %v2740_v1  ;;  %v3108_v43 = vsel %vm8345_vm2, %v3083_v3, %v8344_v62  ;;  %v8346_v4 = vld [vmem:[#allocation55_spill] sm:$0xff]  ;;  %vm8347_vm4 = vmmov %vm8345_vm2  ;;  %v8359_v62 = vld [vmem:[#allocation65_spill] sm:$0xff] }
 0x43c   : > { %v3134_v5 = vsel %vm3123_vm0, %v3108_v43, %v8348_v45  ;;  %vm8350_vm6 = vmmov %vm8336_vm12 }
 0x43f   : > { %2999 = vrot.lane.b32.xlu2 %v2300_v17, %s8077_s19  ;;  %2678 = vrot.lane.b32.xlu0 %v6689_v54, %s4872_s28 }
 0x440   : > { %2755 = vrot.lane.b32.xlu1 %v6693_v21, %s8068_s15 }
 0x441   : > { %v2988_v23 = vpop.permute.xlu2 %2987  ;;  %v2811_v15 = vpop.permute.xlu0 %2810 }
 0x442   : > { %v6698_v40 = vsel %vm8330_vm8, %v3234_v60, %v2988_v23  ;;  %v2815_v41 = vpop.permute.xlu1 %2814  ;;  %v3208_v11 = vsel %vm3200_vm3, %v3182_v35, %v2811_v15  ;;  %v8349_v35 = vld [vmem:[#allocation73_spill] sm:$0xff]  ;;  %vm8351_vm8 = vmmov %vm8337_vm10 }
 0x443   : > { %v3210_v16 = vsel %vm3200_vm3, %v3184_v9, %v2815_v41  ;;  %v3292_v2 = vsel %vm3276_vm7, %v6698_v40, 0.0  ;;  %vm8352_vm9 = vmmov %vm8351_vm8 }
 0x447   : > { %2926 = vrot.lane.b32.xlu2 %v2302_v63, %s8071_s26  ;;  %2605 = vrot.lane.b32.xlu0 %v6693_v21, %s4870_s2 }
 0x448   : > { %2830 = vrot.lane.b32.xlu1 %v6693_v21, %s4871_s22 }
 0x449   : > { %v2669_v50 = vpop.permute.xlu2 %2668  ;;  %v2911_v22 = vpop.permute.xlu0 %2910 }
 0x44a   : > { %v3161_v19 = vsel %vm3149_vm15, %v3135_v29, %v2669_v50  ;;  %v2915_v56 = vpop.permute.xlu1 %2914  ;;  %v3233_v49 = vsel %vm8335_vm14, %v3208_v11, %v2911_v22  ;;  %vm8353_vm14 = vmmov %vm8338_vm5 }
 0x44b   : > { %v3235_v61 = vsel %vm8336_vm12, %v3210_v16, %v2915_v56  ;;  %v6765_v16 = vld [vmem:[#allocation2 + $0x130] sm:$0xff]  ;;  %vm8354_vm12 = vmmov %vm8350_vm6 }
 0x44f   : > { %3001 = vrot.lane.b32.xlu2 %v2302_v63, %s8077_s19  ;;  %2680 = vrot.lane.b32.xlu0 %v6693_v21, %s4872_s28 }
 0x450   : > { %2757 = vrot.lane.b32.xlu1 %v6721_v55, %s8068_s15 }
 0x451   : > { %v2744_v12 = vpop.permute.xlu2 %2743  ;;  %v2986_v32 = vpop.permute.xlu0 %2985 }
 0x452   : > { %v3186_v6 = vsel %vm8337_vm10, %v3161_v19, %v2744_v12  ;;  %v2990_v0 = vpop.permute.xlu1 %2989  ;;  %v6727_v27 = vsel %vm8338_vm5, %v3233_v49, %v2986_v32  ;;  %v6785_v49 = vld [vmem:[#allocation2 + $0x140] sm:$0xff]  ;;  %vm8355_vm10 = vmmov %vm8350_vm6 }
 0x453   : > { %v6730_v38 = vsel %vm8339_vm11, %v3235_v61, %v2990_v0  ;;  %v3290_v8 = vsel %vm3276_vm7, %v6727_v27, 0.0  ;;  %vm8356_vm11 = vmmov %vm8338_vm5 }
 0x454   : > { %v3291_v31 = vadd.f32 %v3290_v8, %v3289_v36  ;;  %v3294_v44 = vsel %vm3276_vm7, %v6730_v38, 0.0  ;;  %v8343_v36 = vld [vmem:[#allocation42_spill] sm:$0xff]  ;;  %v2308_v8 = vld [vmem:[#allocation2 + $0x128] sm:$0xff] }
 0x455   : > { %v3085_v25 = vsel %vm3072_vm1, %v3059_v59, %v8343_v36  ;;  %v8357_v59 = vld [vmem:[#allocation28_spill] sm:$0xff] }
 0x456   : > { %v3293_v18 = vadd.f32 %v3292_v2, %v3291_v31  ;;  %v3110_v17 = vsel %vm8347_vm4, %v3085_v25, %v8346_v4  ;;  %v3060_v57 = vsel %vm3046_vm13, %v4649_v20, %v8357_v59  ;;  %vm8361_vm4 = vmmov %vm8351_vm8 }
 0x457   : > { %2928 = vrot.lane.b32.xlu2 %v2304_v33, %s8071_s26  ;;  %2607 = vrot.lane.b32.xlu0 %v6721_v55, %s4870_s2  ;;  %v3136_v9 = vsel %vm3123_vm0, %v3110_v17, %v8349_v35  ;;  %v8360_v17 = vld [vmem:[#allocation72_spill] sm:$0xff] }
 0x458   : > { %2832 = vrot.lane.b32.xlu1 %v6721_v55, %s4871_s22  ;;  %v3295_v14 = vadd.f32 %v3294_v44, %v3293_v18  ;;  %v8358_v44 = vld [vmem:[#allocation41_spill] sm:$0xff] }
 0x459   : > { %v2819_v60 = vpop.permute.xlu2 %2818  ;;  %v2667_v1 = vpop.permute.xlu0 %2666  ;;  %v3086_v36 = vsel %vm3072_vm1, %v3060_v57, %v8358_v44  ;;  %v4653_v44 = vld [vmem:[#allocation2 + $0xf0] sm:$0xff] }
 0x45a   : > { %v3212_v23 = vsel %vm3200_vm3, %v3186_v6, %v2819_v60  ;;  %v2671_v15 = vpop.permute.xlu1 %2670  ;;  %v3160_v41 = vsel %vm3149_vm15, %v3134_v5, %v2667_v1  ;;  %v3111_v43 = vsel %vm8345_vm2, %v3086_v36, %v8359_v62  ;;  %v8370_v36 = vld [vmem:[#allocation36_spill] sm:$0xff] }
 0x45b   : > { %v3162_v11 = vsel %vm3149_vm15, %v3136_v9, %v2671_v15  ;;  %v3137_v45 = vsel %vm3123_vm0, %v3111_v43, %v8360_v17  ;;  %v8371_v62 = vld [vmem:[#allocation44_spill] sm:$0xff] }
 0x45f   : > { %3003 = vrot.lane.b32.xlu2 %v2304_v33, %s8077_s19  ;;  %2682 = vrot.lane.b32.xlu0 %v6721_v55, %s4872_s28 }
 0x460   : > { %2759 = vrot.lane.b32.xlu1 %v6765_v16, %s8068_s15 }
 0x461   : > { %v2919_v58 = vpop.permute.xlu2 %2918  ;;  %v2742_v42 = vpop.permute.xlu0 %2741 }
 0x462   : > { %v3237_v63 = vsel %vm8350_vm6, %v3212_v23, %v2919_v58  ;;  %v2746_v34 = vpop.permute.xlu1 %2745  ;;  %v3185_v47 = vsel %vm8351_vm8, %v3160_v41, %v2742_v42  ;;  %v2310_v41 = vld [vmem:[#allocation2 + $0x138] sm:$0xff]  ;;  %vm8362_vm8 = vmmov %vm8338_vm5 }
 0x463   : > { %v3187_v37 = vsel %vm8352_vm9, %v3162_v11, %v2746_v34  ;;  %vm8366_vm9 = vmmov %vm8345_vm2 }
 0x467   : > { %2930 = vrot.lane.b32.xlu2 %v2306_v24, %s8071_s26  ;;  %2609 = vrot.lane.b32.xlu0 %v6765_v16, %s4870_s2 }
 0x468   : > { %2834 = vrot.lane.b32.xlu1 %v6765_v16, %s4871_s22 }
 0x469   : > { %v2994_v13 = vpop.permute.xlu2 %2993  ;;  %v2817_v29 = vpop.permute.xlu0 %2816 }
 0x46a   : > { %v6778_v50 = vsel %vm8353_vm14, %v3237_v63, %v2994_v13  ;;  %v2821_v22 = vpop.permute.xlu1 %2820  ;;  %v3211_v19 = vsel %vm3200_vm3, %v3185_v47, %v2817_v29  ;;  %v8364_v29 = vld [vmem:[#allocation50_spill] sm:$0xff]  ;;  %vm8367_vm14 = vmmov %vm8361_vm4 }
 0x46b   : > { %v3213_v56 = vsel %vm3200_vm3, %v3187_v37, %v2821_v22  ;;  %v3298_v53 = vsel %vm3276_vm7, %v6778_v50, 0.0  ;;  %v4651_v37 = vld [vmem:[#allocation2 + $0xe0] sm:$0xff] }
 0x46f   : > { %3005 = vrot.lane.b32.xlu2 %v2306_v24, %s8077_s19  ;;  %2684 = vrot.lane.b32.xlu0 %v6765_v16, %s4872_s28  ;;  %v8363_v24 = vld [vmem:[#allocation27_spill] sm:$0xff] }
 0x470   : > { %2761 = vrot.lane.b32.xlu1 %v6785_v49, %s8068_s15  ;;  %v3061_v13 = vsel %vm3046_vm13, %v4651_v37, %v8363_v24 }
 0x471   : > { %v2921_v61 = vpop.permute.xlu2 %2920  ;;  %v2917_v12 = vpop.permute.xlu0 %2916  ;;  %v3087_v22 = vsel %vm3072_vm1, %v3061_v13, %v8364_v29  ;;  %v8377_v13 = vld [vmem:[#allocation30_spill] sm:$0xff] }
 0x472   : > { %v3238_v32 = vsel %vm8354_vm12, %v3213_v56, %v2921_v61  ;;  %v2748_v6 = vpop.permute.xlu1 %2747  ;;  %v3236_v0 = vsel %vm8355_vm10, %v3211_v19, %v2917_v12  ;;  %v8365_v19 = vld [vmem:[#allocation58_spill] sm:$0xff]  ;;  %v6846_v61 = vld [vmem:[#allocation2 + $0x160] sm:$0xff]  ;;  %vm8368_vm12 = vmmov %vm8350_vm6  ;;  %v3063_v29 = vsel %vm3046_vm13, %v6689_v54, %v8377_v13 }
 0x473   : > { %v3112_v56 = vsel %vm8366_vm9, %v3087_v22, %v8365_v19  ;;  %vm8369_vm10 = vmmov %vm8338_vm5  ;;  %v8378_v22 = vld [vmem:[#allocation43_spill] sm:$0xff] }
 0x474   : > { %v3089_v19 = vsel %vm3072_vm1, %v3063_v29, %v8378_v22  ;;  %v8391_v22 = vld [vmem:[#allocation37_spill] sm:$0xff] }
 0x477   : > { %2932 = vrot.lane.b32.xlu2 %v2308_v8, %s8071_s26  ;;  %2611 = vrot.lane.b32.xlu0 %v6785_v49, %s4870_s2 }
 0x478   : > { %2836 = vrot.lane.b32.xlu1 %v6785_v49, %s4871_s22 }
 0x479   : > { %v2996_v31 = vpop.permute.xlu2 %2995  ;;  %v2992_v2 = vpop.permute.xlu0 %2991 }
 0x47a   : > { %v6797_v46 = vsel %vm8338_vm5, %v3238_v32, %v2996_v31  ;;  %v2823_v48 = vpop.permute.xlu1 %2822  ;;  %v6800_v39 = vsel %vm8356_vm11, %v3236_v0, %v2992_v2  ;;  %vm8373_vm5 = vmmov %vm8345_vm2 }
 0x47b   : > { %v3296_v18 = vsel %vm3276_vm7, %v6800_v39, 0.0  ;;  %v3300_v25 = vsel %vm3276_vm7, %v6797_v46, 0.0  ;;  %vm8374_vm11 = vmmov %vm8361_vm4 }
 0x47c   : > { %v3297_v33 = vadd.f32 %v3296_v18, %v3295_v14  ;;  %v6817_v14 = vld [vmem:[#allocation2 + $0x150] sm:$0xff]  ;;  %v2312_v18 = vld [vmem:[#allocation2 + $0x148] sm:$0xff]  ;;  %vm8375_vm2 = vmmov %vm8350_vm6 }
 0x47d   : > { %vm8382_vm9 = vmmov %vm8375_vm2 }
 0x47e   : > { %v3299_v3 = vadd.f32 %v3298_v53, %v3297_v33 }
 0x47f   : > { %3007 = vrot.lane.b32.xlu2 %v2308_v8, %s8077_s19  ;;  %2686 = vrot.lane.b32.xlu0 %v6785_v49, %s4872_s28 }
 0x480   : > { %2763 = vrot.lane.b32.xlu1 %v6817_v14, %s8068_s15  ;;  %v3301_v4 = vadd.f32 %v3300_v25, %v3299_v3  ;;  %v3062_v25 = vsel %vm3046_vm13, %v4653_v44, %v8370_v36 }
 0x481   : > { %v2923_v5 = vpop.permute.xlu2 %2922  ;;  %v2673_v60 = vpop.permute.xlu0 %2672  ;;  %v3088_v43 = vsel %vm3072_vm1, %v3062_v25, %v8371_v62 }
 0x482   : > { %v2750_v1 = vpop.permute.xlu1 %2749  ;;  %v3163_v35 = vsel %vm3149_vm15, %v3137_v45, %v2673_v60  ;;  %v6874_v45 = vld [vmem:[#allocation2 + $0x170] sm:$0xff] }
 0x483   : > { %v3188_v9 = vsel %vm8361_vm4, %v3163_v35, %v2748_v6  ;;  %vm8376_vm4 = vmmov %vm8362_vm8 }
 0x484   : > { %v3214_v23 = vsel %vm3200_vm3, %v3188_v9, %v2823_v48 }
 0x485   : > { %v3239_v15 = vsel %vm8350_vm6, %v3214_v23, %v2923_v5  ;;  %vm8380_vm6 = vmmov %vm8373_vm5 }
 0x487   : > { %2934 = vrot.lane.b32.xlu2 %v2310_v41, %s8071_s26  ;;  %2613 = vrot.lane.b32.xlu0 %v6817_v14, %s4870_s2 }
 0x488   : > { %2838 = vrot.lane.b32.xlu1 %v6817_v14, %s4871_s22 }
 0x489   : > { %v2998_v11 = vpop.permute.xlu2 %2997  ;;  %v2600_v58 = vpop.permute.xlu0 %2599 }
 0x48a   : > { %v6833_v42 = vsel %vm8362_vm8, %v3239_v15, %v2998_v11  ;;  %v2825_v63 = vpop.permute.xlu1 %2824  ;;  %v3138_v12 = vsel %vm3123_vm0, %v3112_v56, %v2600_v58  ;;  %v2314_v11 = vld [vmem:[#allocation2 + $0x158] sm:$0xff]  ;;  %vm8381_vm8 = vmmov %vm8374_vm11 }
 0x48b   : > { %v3302_v34 = vsel %vm3276_vm7, %v6833_v42, 0.0  ;;  %v2318_v56 = vld [vmem:[#allocation2 + $0x178] sm:$0xff] }
 0x48c   : > { %v3303_v47 = vadd.f32 %v3302_v34, %v3301_v4  ;;  %v8372_v4 = vld [vmem:[#allocation57_spill] sm:$0xff] }
 0x48d   : > { %v3113_v17 = vsel %vm8373_vm5, %v3088_v43, %v8372_v4  ;;  %v8384_v43 = vld [vmem:[#allocation29_spill] sm:$0xff] }
 0x48e   : > { %v3064_v4 = vsel %vm3046_vm13, %v6693_v21, %v8384_v43 }
 0x48f   : > { %3009 = vrot.lane.b32.xlu2 %v2310_v41, %s8077_s19  ;;  %2688 = vrot.lane.b32.xlu0 %v6817_v14, %s4872_s28 }
 0x490   : > { %2765 = vrot.lane.b32.xlu1 %v6846_v61, %s8068_s15 }
 0x491   : > { %v2925_v32 = vpop.permute.xlu2 %2924  ;;  %v2675_v6 = vpop.permute.xlu0 %2674 }
 0x492   : > { %v2752_v0 = vpop.permute.xlu1 %2751  ;;  %v3164_v8 = vsel %vm3149_vm15, %v3138_v12, %v2675_v6  ;;  %v8379_v12 = vld [vmem:[#allocation67_spill] sm:$0xff] }
 0x493   : > { %v3189_v31 = vsel %vm8367_vm14, %v3164_v8, %v2750_v1  ;;  %vm8383_vm14 = vmmov %vm8376_vm4 }
 0x494   : > { %v3215_v2 = vsel %vm3200_vm3, %v3189_v31, %v2825_v63 }
 0x495   : > { %v3240_v48 = vsel %vm8368_vm12, %v3215_v2, %v2925_v32  ;;  %v3114_v32 = vsel %vm8380_vm6, %v3089_v19, %v8379_v12  ;;  %vm8387_vm12 = vmmov %vm8373_vm5  ;;  %v3065_v19 = vsel %vm3046_vm13, %v6721_v55, %v8391_v22  ;;  %v8392_v12 = vld [vmem:[#allocation46_spill] sm:$0xff] }
 0x496   : > { %vm8389_vm5 = vmmov %vm8375_vm2 }
 0x497   : > { %2936 = vrot.lane.b32.xlu2 %v2312_v18, %s8071_s26  ;;  %2615 = vrot.lane.b32.xlu0 %v6846_v61, %s4870_s2 }
 0x498   : > { %2840 = vrot.lane.b32.xlu1 %v6846_v61, %s4871_s22 }
 0x499   : > { %v3000_v33 = vpop.permute.xlu2 %2999  ;;  %v2602_v53 = vpop.permute.xlu0 %2601 }
 0x49a   : > { %v6861_v20 = vsel %vm8369_vm10, %v3240_v48, %v3000_v33  ;;  %v2827_v59 = vpop.permute.xlu1 %2826  ;;  %v3139_v5 = vsel %vm3123_vm0, %v3113_v17, %v2602_v53  ;;  %v2316_v33 = vld [vmem:[#allocation2 + $0x168] sm:$0xff]  ;;  %v8385_v17 = vld [vmem:[#allocation52_spill] sm:$0xff]  ;;  %vm8388_vm10 = vmmov %vm8381_vm8 }
 0x49b   : > { %v3304_v57 = vsel %vm3276_vm7, %v6861_v20, 0.0  ;;  %v2320_v53 = vld [vmem:[#allocation2 + $0x188] sm:$0xf] }
 0x49c   : > { %v3305_v3 = vadd.f32 %v3304_v57, %v3303_v47 }
 0x49f   : > { %3011 = vrot.lane.b32.xlu2 %v2312_v18, %s8077_s19  ;;  %2690 = vrot.lane.b32.xlu0 %v6846_v61, %s4872_s28 }
 0x4a0   : > { %2767 = vrot.lane.b32.xlu1 %v6874_v45, %s8068_s15 }
 0x4a1   : > { %v2927_v60 = vpop.permute.xlu2 %2926  ;;  %v2677_v1 = vpop.permute.xlu0 %2676 }
 0x4a2   : > { %v2754_v35 = vpop.permute.xlu1 %2753  ;;  %v3165_v9 = vsel %vm3149_vm15, %v3139_v5, %v2677_v1  ;;  %v3090_v5 = vsel %vm3072_vm1, %v3064_v4, %v8385_v17  ;;  %v8399_v4 = vld [vmem:[#allocation45_spill] sm:$0xff] }
 0x4a3   : > { %v3190_v23 = vsel %vm8374_vm11, %v3165_v9, %v2752_v0  ;;  %vm8390_vm11 = vmmov %vm8376_vm4 }
 0x4a4   : > { %v3216_v15 = vsel %vm3200_vm3, %v3190_v23, %v2827_v59  ;;  %v6910_v59 = vld [vmem:[#allocation2 + $0x180] sm:$0xf] }
 0x4a5   : > { %v3241_v41 = vsel %vm8375_vm2, %v3216_v15, %v2927_v60  ;;  %v8386_v60 = vld [vmem:[#allocation60_spill] sm:$0xff]  ;;  %vm8394_vm2 = vmmov %vm8380_vm6 }
 0x4a6   : > { %v3115_v1 = vsel %vm8387_vm12, %v3090_v5, %v8386_v60  ;;  %vm8396_vm6 = vmmov %vm8389_vm5  ;;  %v8400_v5 = vld [vmem:[#allocation68_spill] sm:$0xff] }
 0x4a7   : > { %2938 = vrot.lane.b32.xlu2 %v2314_v11, %s8071_s26  ;;  %2617 = vrot.lane.b32.xlu0 %v6874_v45, %s4870_s2  ;;  %vm8403_vm12 = vmmov %vm8389_vm5 }
 0x4a8   : > { %2842 = vrot.lane.b32.xlu1 %v6874_v45, %s4871_s22 }
 0x4a9   : > { %v3002_v58 = vpop.permute.xlu2 %3001  ;;  %v2604_v63 = vpop.permute.xlu0 %2603 }
 0x4aa   : > { %v6889_v34 = vsel %vm8376_vm4, %v3241_v41, %v3002_v58  ;;  %v2829_v47 = vpop.permute.xlu1 %2828  ;;  %v3140_v6 = vsel %vm3123_vm0, %v3114_v32, %v2604_v63  ;;  %v3091_v32 = vsel %vm3072_vm1, %v3065_v19, %v8392_v12  ;;  %vm8395_vm4 = vmmov %vm8381_vm8  ;;  %v8406_v19 = vld [vmem:[#allocation53_spill] sm:$0xff] }
 0x4ab   : > { %v3306_v37 = vsel %vm3276_vm7, %v6889_v34, 0.0 }
 0x4ac   : > { %v3307_v24 = vadd.f32 %v3306_v37, %v3305_v3 }
 0x4af   : > { %3013 = vrot.lane.b32.xlu2 %v2314_v11, %s8077_s19  ;;  %2692 = vrot.lane.b32.xlu0 %v6874_v45, %s4872_s28 }
 0x4b0   : > { %2942 = vrot.lane.b32.xlu1 %v2318_v56, %s8071_s26 }
 0x4b1   : > { %v2929_v0 = vpop.permute.xlu2 %2928  ;;  %v2679_v8 = vpop.permute.xlu0 %2678 }
 0x4b2   : > { %v2756_v31 = vpop.permute.xlu1 %2755  ;;  %v3166_v54 = vsel %vm3149_vm15, %v3140_v6, %v2679_v8  ;;  %v8393_v6 = vld [vmem:[#allocation59_spill] sm:$0xff] }
 0x4b3   : > { %v3191_v2 = vsel %vm8381_vm8, %v3166_v54, %v2754_v35  ;;  %vm8397_vm8 = vmmov %vm8390_vm11 }
 0x4b4   : > { %v3217_v48 = vsel %vm3200_vm3, %v3191_v2, %v2829_v47 }
 0x4b5   : > { %v3242_v18 = vsel %vm8382_vm9, %v3217_v48, %v2929_v0  ;;  %v3116_v0 = vsel %vm8394_vm2, %v3091_v32, %v8393_v6  ;;  %vm8401_vm9 = vmmov %vm8394_vm2  ;;  %v8407_v32 = vld [vmem:[#allocation63_spill] sm:$0xff] }
 0x4b7   : > { %2940 = vrot.lane.b32.xlu2 %v2316_v33, %s8071_s26  ;;  %2619 = vrot.lane.b32.xlu0 %v6910_v59, %s4870_s2 }
 0x4b8   : > { %2944 = vrot.lane.b32.xlu1 %v2320_v53, %s8071_s26 }
 0x4b9   : > { %v3004_v57 = vpop.permute.xlu2 %3003  ;;  %v2606_v3 = vpop.permute.xlu0 %2605 }
 0x4ba   : > { %v6916_v44 = vsel %vm8383_vm14, %v3242_v18, %v3004_v57  ;;  %v2831_v36 = vpop.permute.xlu1 %2830  ;;  %v3141_v35 = vsel %vm3123_vm0, %v3115_v1, %v2606_v3  ;;  %vm8402_vm14 = vmmov %vm8395_vm4 }
 0x4bb   : > { %v3308_v25 = vsel %vm3276_vm7, %v6916_v44, 0.0 }
 0x4bc   : > { %v3309_v62 = vadd.f32 %v3308_v25, %v3307_v24 }
 0x4bf   : > { %3015 = vrot.lane.b32.xlu2 %v2316_v33, %s8077_s19  ;;  %2694 = vrot.lane.b32.xlu0 %v6910_v59, %s4872_s28 }
 0x4c1   : > { %v2931_v9 = vpop.permute.xlu2 %2930  ;;  %v2681_v23 = vpop.permute.xlu0 %2680 }
 0x4c2   : > { %v2758_v15 = vpop.permute.xlu1 %2757  ;;  %v3167_v41 = vsel %vm3149_vm15, %v3141_v35, %v2681_v23 }
 0x4c3   : > { %v3192_v21 = vsel %vm8388_vm10, %v3167_v41, %v2756_v31  ;;  %vm8404_vm10 = vmmov %vm8397_vm8 }
 0x4c4   : > { %v3218_v11 = vsel %vm3200_vm3, %v3192_v21, %v2831_v36 }
 0x4c5   : > { %v3243_v58 = vsel %vm8389_vm5, %v3218_v11, %v2931_v9  ;;  %vm8408_vm5 = vmmov %vm8394_vm2 }
 0x4c6   : > { %vm8410_vm2 = vmmov %vm8396_vm6 }
 0x4c7   : > { %2844 = vrot.lane.b32.xlu2 %v6910_v59, %s4871_s22  ;;  %2769 = vrot.lane.b32.xlu0 %v6910_v59, %s8068_s15  ;;  %s4170_s22 = scalar_lea.sflag [#allocation5], %s8468_s21 }
 0x4c9   : > { %v3006_v63 = vpop.permute.xlu2 %3005  ;;  %v2608_v47 = vpop.permute.xlu0 %2607 }
 0x4ca   : > { %v6940_v37 = vsel %vm8390_vm11, %v3243_v58, %v3006_v63  ;;  %v2833_v24 = vpop.permute.xlu1 %2832  ;;  %v3142_v8 = vsel %vm3123_vm0, %v3116_v0, %v2608_v47  ;;  %vm8409_vm11 = vmmov %vm8395_vm4 }
 0x4cb   : > { %v3310_v13 = vsel %vm3276_vm7, %v6940_v37, 0.0 }
 0x4cc   : > { %v3311_v29 = vadd.f32 %v3310_v13, %v3309_v62  ;;  %v8398_v62 = vld [vmem:[#allocation32_spill] sm:$0xff]  ;;  %v8405_v13 = vld [vmem:[#allocation31_spill] sm:$0xff] }
 0x4cd   : > { %v3066_v43 = vsel %vm3046_vm13, %v6765_v16, %v8398_v62 }
 0x4ce   : > { %v3092_v17 = vsel %vm3072_vm1, %v3066_v43, %v8399_v4 }
 0x4cf   : > { %3019 = vrot.lane.b32.xlu2 %v2320_v53, %s8077_s19  ;;  %3017 = vrot.lane.b32.xlu0 %v2318_v56, %s8077_s19  ;;  %v3117_v60 = vsel %vm8401_vm9, %v3092_v17, %v8400_v5  ;;  %vm8420_vm9 = vmmov %vm8409_vm11  ;;  %s8439_s19 = sld [smem:[#allocation19_spill]] }
 0x4d1   : > { %v2933_v31 = vpop.permute.xlu2 %2932  ;;  %v2683_v54 = vpop.permute.xlu0 %2682 }
 0x4d2   : > { %v2760_v2 = vpop.permute.xlu1 %2759  ;;  %v3168_v48 = vsel %vm3149_vm15, %v3142_v8, %v2683_v54 }
 0x4d3   : > { %v3193_v18 = vsel %vm8395_vm4, %v3168_v48, %v2758_v15  ;;  %vm8411_vm4 = vmmov %vm8397_vm8 }
 0x4d4   : > { %v3219_v55 = vsel %vm3200_vm3, %v3193_v18, %v2833_v24 }
 0x4d5   : > { %v3244_v33 = vsel %vm8396_vm6, %v3219_v55, %v2933_v31  ;;  %vm8416_vm6 = vmmov %vm8408_vm5  ;;  %p276_p1 = scmp.lt.s32.totalorder %s8439_s19, 1  ;;  %s4508_s1 = sshll.u32 %s8439_s19, 3 }
 0x4d6   : > { %s4188_s20 = scalar_lea.hbm %s8466_s18, %s4508_s1  ;;  %s4202_s24 = scalar_lea.hbm %s8469_s29, %s4508_s1 }
 0x4d7   : > { %s277_s30 = scalar_select %p276_p1, %s8439_s19, 1 }
 0x4d8   : > { %s4192_s11 = sshll.u32 %s4188_s20, 4  ;;  %s4206_s2 = sshll.u32 %s4202_s24, 4  ;;  %s4193_s11 = int_to_ptr.hbm [resolvable:$true] %s4192_s11  ;;  %s4207_s2 = int_to_ptr.hbm [resolvable:$true] %s4206_s2 }
 0x4d9   : > { %v3008_v57 = vpop.permute.xlu2 %3007  ;;  %v2610_v53 = vpop.permute.xlu0 %2609  ;;  %s4513_s8 = smul.u32 200, %s277_s30  ;;  %s4730_s28 = sshra.s32 %s4193_s11, 4  ;;  %s4731_s28 = int_to_ptr.hbm [resolvable:$true] %s4730_s28 }
 0x4da   : > { %v6959_v56 = vsel %vm8397_vm8, %v3244_v33, %v3008_v57  ;;  %v2835_v3 = vpop.permute.xlu1 %2834  ;;  %v3143_v1 = vsel %vm3123_vm0, %v3117_v60, %v2610_v53  ;;  %vm8419_vm8 = vmmov %vm8408_vm5  ;;  %s4732_s19 = scalar_lea.hbm %s4731_s28, 8  ;;  %p4737_p10 = scmp.lt.s32.totalorder %s4731_s28, %s8467_s25 }
 0x4db   : > { %v3312_v36 = vsel %vm3276_vm7, %v6959_v56, 0.0  ;;  %s7261_s15 = scalar_lea.vmem %s8440_s14, %s4513_s8  ;;  %p4733_p4 = scmp.ne.s32.totalorder %s4731_s28, %s4732_s19 }
 0x4dc   : > { %v3313_v25 = vadd.f32 %v3312_v36, %v3311_v29  ;;  %v3067_v29 = vsel %vm3046_vm13, %v6785_v49, %v8405_v13  ;;  %p4738_p2 = scmp.lt.s32.totalorder %s4736_s9, %s4732_s19 }
 0x4dd   : > { %v3093_v12 = vsel %vm3072_vm1, %v3067_v29, %v8406_v19  ;;  %v8415_v29 = vld [vmem:[#allocation61_spill] sm:$0xff]  ;;  %v8417_v19 = vld [vmem:[#allocation47_spill] sm:$0xff]  ;;  %p4734_p8 = pnand %p4733_p4, %p4972_p3 }
 0x4de   : > { %v3118_v6 = vsel %vm8408_vm5, %v3093_v12, %v8407_v32  ;;  %p4739_p11 = por %p4738_p2, %p4737_p10 }
 0x4df   : > { %p4735_p9 = pneg %p4734_p8 }
 0x4e1   : > { %v2935_v35 = vpop.permute.xlu2 %2934  ;;  %v2685_v9 = vpop.permute.xlu0 %2684  ;;  %p4740_p12 = pnand %p4739_p11, %p4735_p9 }
 0x4e2   : > { %v3169_v23 = vsel %vm3149_vm15, %v3143_v1, %v2685_v9  ;;  %v2762_v41 = vpop.permute.xlu1 %2761 }
 0x4e3   : > { %v3194_v15 = vsel %vm8402_vm14, %v3169_v23, %v2760_v2  ;;  %vm8424_vm14 = vmmov %vm8420_vm9 }
 0x4e4   : > { %v3220_v21 = vsel %vm3200_vm3, %v3194_v15, %v2835_v3 }
 0x4e5   : > { %v3245_v16 = vsel %vm8403_vm12, %v3220_v21, %v2935_v35  ;;  %v8412_v21 = vld [vmem:[#allocation38_spill] sm:$0xff]  ;;  %vm8427_vm12 = vmmov %vm8408_vm5 }
 0x4e9   : > { %v3010_v11 = vpop.permute.xlu2 %3009  ;;  %v2612_v58 = vpop.permute.xlu0 %2611 }
 0x4ea   : > { %v6976_v63 = vsel %vm8404_vm10, %v3245_v16, %v3010_v11  ;;  %v2837_v22 = vpop.permute.xlu1 %2836  ;;  %v3144_v0 = vsel %vm3123_vm0, %v3118_v6, %v2612_v58  ;;  %v3068_v11 = vsel %vm3046_vm13, %v6817_v14, %v8412_v21  ;;  %v8413_v16 = vld [vmem:[#allocation49_spill] sm:$0xff]  ;;  %vm8429_vm10 = vmmov %vm8408_vm5 }
 0x4eb   : > { %v3314_v47 = vsel %vm3276_vm7, %v6976_v63, 0.0  ;;  %v3094_v58 = vsel %vm3072_vm1, %v3068_v11, %v8413_v16  ;;  %v8418_v6 = vld [vmem:[#allocation69_spill] sm:$0xff]  ;;  %vm8432_vm5 = vmmov %vm8420_vm9 }
 0x4ec   : > { %v3315_v24 = vadd.f32 %v3314_v47, %v3313_v25 }
 0x4f1   : > { %v2937_v8 = vpop.permute.xlu2 %2936  ;;  %v2687_v31 = vpop.permute.xlu0 %2686 }
 0x4f2   : > { %v3170_v54 = vsel %vm3149_vm15, %v3144_v0, %v2687_v31  ;;  %v2764_v18 = vpop.permute.xlu1 %2763 }
 0x4f3   : > { %v3195_v2 = vsel %vm8409_vm11, %v3170_v54, %v2762_v41 }
 0x4f4   : > { %v3221_v48 = vsel %vm3200_vm3, %v3195_v2, %v2837_v22  ;;  %v3119_v22 = vsel %vm8416_vm6, %v3094_v58, %v8415_v29  ;;  %v8421_v2 = vld [vmem:[#allocation34_spill] sm:$0xff]  ;;  %v8428_v58 = vld [vmem:[#allocation64_spill] sm:$0xff]  ;;  %vm8437_vm6 = vmmov %vm8411_vm4 }
 0x4f5   : > { %v3246_v49 = vsel %vm8410_vm2, %v3221_v48, %v2937_v8  ;;  %v3070_v48 = vsel %vm3046_vm13, %v6874_v45, %v8421_v2 }
 0x4f9   : > { %v3012_v55 = vpop.permute.xlu2 %3011  ;;  %v2614_v33 = vpop.permute.xlu0 %2613 }
 0x4fa   : > { %v6993_v57 = vsel %vm8411_vm4, %v3246_v49, %v3012_v55  ;;  %v2839_v25 = vpop.permute.xlu1 %2838  ;;  %v3145_v32 = vsel %vm3123_vm0, %v3119_v22, %v2614_v33  ;;  %v8422_v49 = vld [vmem:[#allocation40_spill] sm:$0xff]  ;;  %v4873_v22 = vmov 196.0  }
 0x4fb   : > { %v3316_v53 = vsel %vm3276_vm7, %v6993_v57, 0.0  ;;  %v3071_v33 = vsel %vm3046_vm13, %v6910_v59, %v8422_v49  ;;  %4632 = vrcp.f32 %v4873_v22 }
 0x4fc   : > { %v3317_v3 = vadd.f32 %v3316_v53, %v3315_v24  ;;  %v8414_v24 = vld [vmem:[#allocation35_spill] sm:$0xff]  ;;  %v8423_v53 = vld [vmem:[#allocation54_spill] sm:$0xff] }
 0x4fd   : > { %v3069_v13 = vsel %vm3046_vm13, %v6846_v61, %v8414_v24  ;;  %v3096_v21 = vsel %vm3072_vm1, %v3070_v48, %v8423_v53  ;;  %vm8431_vm13 = vmmov %vm8411_vm4 }
 0x4fe   : > { %v3095_v12 = vsel %vm3072_vm1, %v3069_v13, %v8417_v19 }
 0x4ff   : > { %v3120_v0 = vsel %vm8419_vm8, %v3095_v12, %v8418_v6  ;;  %vm3324_vm8 = vcmask 814080  }
 0x501   : > { %v2689_v36 = vpop.permute.xlu0 %2688  ;;  %v2939_v4 = vpop.permute.xlu2 %2938 }
 0x502   : > { %v2766_v43 = vpop.permute.xlu1 %2765  ;;  %v3171_v14 = vsel %vm3149_vm15, %v3145_v32, %v2689_v36 }
 0x503   : > { %v3196_v61 = vsel %vm8420_vm9, %v3171_v14, %v2764_v18  ;;  %vm8438_vm9 = vmmov %vm8411_vm4 }
 0x504   : > { %v3222_v16 = vsel %vm3200_vm3, %v3196_v61, %v2839_v25 }
 0x509   : > { %v2616_v62 = vpop.permute.xlu0 %2615  ;;  %v3014_v60 = vpop.permute.xlu2 %3013 }
 0x50a   : > { %v2841_v5 = vpop.permute.xlu1 %2840  ;;  %v3146_v8 = vsel %vm3123_vm0, %v3120_v0, %v2616_v62  ;;  %v8425_v62 = vld [vmem:[#allocation51_spill] sm:$0xff]  ;;  %v4633_v0 = vpop.eup %4632 }
 0x50b   : > { %v3097_v11 = vsel %vm3072_vm1, %v3071_v33, %v8425_v62  ;;  %vm8430_vm1 = vmmov %vm8410_vm2 }
 0x50c   : > { %v3122_v45 = vsel %vm8429_vm10, %v3097_v11, %v8428_v58  ;;  %v3247_v19 = vsel %vm8430_vm1, %v3222_v16, %v2939_v4  ;;  %vm8433_vm11 = vmmov %vm8430_vm1 }
 0x50d   : > { %v7039_v25 = vsel %vm8431_vm13, %v3247_v19, %v3014_v60  ;;  %vm8434_vm2 = vmmov %vm8432_vm5 }
 0x50e   : > { %v3318_v4 = vsel %vm3276_vm7, %v7039_v25, 0.0 }
 0x511   : > { %v2691_v17 = vpop.permute.xlu0 %2690  ;;  %v2941_v23 = vpop.permute.xlu2 %2940 }
 0x512   : > { %v2768_v35 = vpop.permute.xlu1 %2767  ;;  %v3172_v54 = vsel %vm3149_vm15, %v3146_v8, %v2691_v17  ;;  %v8426_v17 = vld [vmem:[#allocation66_spill] sm:$0xff] }
 0x513   : > { %v3197_v36 = vsel %vm8424_vm14, %v3172_v54, %v2766_v43  ;;  %v3121_v18 = vsel %vm8427_vm12, %v3096_v21, %v8426_v17 }
 0x514   : > { %v3223_v59 = vsel %vm3200_vm3, %v3197_v36, %v2841_v5 }
 0x519   : > { %v2618_v1 = vpop.permute.xlu0 %2617  ;;  %v3016_v47 = vpop.permute.xlu2 %3015 }
 0x51a   : > { %v2843_v41 = vpop.permute.xlu1 %2842  ;;  %v3147_v24 = vsel %vm3123_vm0, %v3121_v18, %v2618_v1  ;;  %v3248_v1 = vsel %vm8433_vm11, %v3223_v59, %v2941_v23  ;;  %v3319_v23 = vadd.f32 %v3318_v4, %v3317_v3 }
 0x521   : > { %v2693_v9 = vpop.permute.xlu0 %2692  ;;  %v2845_v13 = vpop.permute.xlu2 %2844 }
 0x522   : > { %v2943_v55 = vpop.permute.xlu1 %2942  ;;  %v3173_v29 = vsel %vm3149_vm15, %v3147_v24, %v2693_v9  ;;  %v7045_v9 = vsel %vm8411_vm4, %v3248_v1, %v3016_v47  ;;  %v3334_v47 = vmul.f32 196.0, %v4633_v0  ;;  %vm3555_vm4 = vcmask 556032  }
 0x523   : > { %v3198_v5 = vsel %vm8434_vm2, %v3173_v29, %v2768_v35  ;;  %v3320_v60 = vsel %vm3276_vm7, %v7045_v9, 0.0  ;;  %vm3559_vm2 = vcmask 1043456  }
 0x524   : > { %v3224_v8 = vsel %vm3200_vm3, %v3198_v5, %v2843_v41  ;;  %v3321_v2 = vadd.f32 %v3320_v60, %v3319_v23  ;;  %v3335_v53 = vsub.f32 1.0, %v3334_v47 }
 0x526   : > { %v3336_v36 = vmul.f32 %v4633_v0, %v3335_v53 }
 0x528   : > { %v3337_v17 = vadd.f32 %v4633_v0, %v3336_v36 }
 0x529   : > { %v2620_v15 = vpop.permute.xlu0 %2619  ;;  %v3020_v54 = vpop.permute.xlu2 %3019 }
 0x52a   : > { %v3148_v43 = vsel %vm3123_vm0, %v3122_v45, %v2620_v15  ;;  %v2945_v14 = vpop.permute.xlu1 %2944  ;;  %vm8436_vm0 = vmmov %vm8430_vm1 }
 0x52b   : > { %v3249_v35 = vsel %vm8436_vm0, %v3224_v8, %v2943_v55 }
 0x531   : > { %v2695_v31 = vpop.permute.xlu0 %2694 }
 0x532   : > { %v3174_v12 = vsel %vm3149_vm15, %v3148_v43, %v2695_v31  ;;  %vm8435_vm15 = vmmov %vm8430_vm1 }
 0x539   : > { %v2770_v32 = vpop.permute.xlu0 %2769 }
 0x53a   : > { %v3199_v6 = vsel %vm8432_vm5, %v3174_v12, %v2770_v32 }
 0x53b   : > { %v3225_v15 = vsel %vm3200_vm3, %v3199_v6, %v2845_v13  ;;  %vm3338_vm3 = vweird.f32 %v4633_v0 }
 0x53c   : > { %v3250_v31 = vsel %vm8435_vm15, %v3225_v15, %v2945_v14  ;;  %v3339_v58 = vsel %vm3338_vm3, %v4633_v0, %v3337_v17 }
 0x53d   : > { %v7056_v48 = vsel %vm8437_vm6, %v3250_v31, %v3020_v54 }
 0x53e   : > { %v3325_v3 = vsel %vm3324_vm8, %v7056_v48, 0.0 }
 0x541   : > { %v3018_v61 = vpop.permute.xlu0 %3017 }
 0x542   : > { %v7059_v49 = vsel %vm8438_vm9, %v3249_v35, %v3018_v61 }
 0x543   : > { %v3322_v41 = vsel %vm3276_vm7, %v7059_v49, 0.0 }
 0x544   : > { %v3323_v33 = vadd.f32 %v3322_v41, %v3321_v2 }
 0x546   : > { %v3326_v21 = vadd.f32 %v3325_v3, %v3323_v33 }
 0x548   : > { %v3327_v55 = vrot.slane %v3326_v21, 4 }
 0x54a   : > { %v3328_v62 = vadd.f32 %v3327_v55, %v3326_v21 }
 0x54c   : > { %v3329_v11 = vrot.slane %v3328_v62, 2 }
 0x54e   : > { %v3330_v18 = vadd.f32 %v3329_v11, %v3328_v62 }
 0x550   : > { %v3331_v16 = vrot.slane %v3330_v18, 1 }
 0x552   : > { %v3332_v45 = vadd.f32 %v3331_v16, %v3330_v18 }
 0x554   : > { %v7065_v24 = vmul.f32 %v3339_v58, %v3332_v45 }
 0x556   : > { %v7069_v13 = vsub.f32 %v6497_v26, %v7065_v24  ;;  %v7073_v59 = vsub.f32 %v6566_v7, %v7065_v24  ;;  %v7077_v29 = vsub.f32 %v6528_v52, %v7065_v24  ;;  %v7081_v43 = vsub.f32 %v6571_v28, %v7065_v24 }
 0x557   : > { %v7085_v22 = vsub.f32 %v6645_v10, %v7065_v24  ;;  %v7089_v26 = vsub.f32 %v6618_v30, %v7065_v24  ;;  %v7093_v7 = vsub.f32 %v6648_v51, %v7065_v24  ;;  %v7097_v52 = vsub.f32 %v6727_v27, %v7065_v24 }
 0x558   : > { %v7101_v28 = vsub.f32 %v6698_v40, %v7065_v24  ;;  %v7105_v10 = vsub.f32 %v6730_v38, %v7065_v24  ;;  %v7109_v30 = vsub.f32 %v6800_v39, %v7065_v24  ;;  %v7113_v51 = vsub.f32 %v6778_v50, %v7065_v24 }
 0x559   : > { %v7117_v27 = vsub.f32 %v6797_v46, %v7065_v24  ;;  %v7121_v40 = vsub.f32 %v6833_v42, %v7065_v24  ;;  %v7125_v38 = vsub.f32 %v6861_v20, %v7065_v24  ;;  %v7129_v39 = vsub.f32 %v6889_v34, %v7065_v24 }
 0x55a   : > { %v7133_v50 = vsub.f32 %v6916_v44, %v7065_v24  ;;  %v7137_v46 = vsub.f32 %v6940_v37, %v7065_v24  ;;  %v7141_v42 = vsub.f32 %v6959_v56, %v7065_v24  ;;  %v7145_v20 = vsub.f32 %v6976_v63, %v7065_v24 }
 0x55b   : > { %v7149_v34 = vsub.f32 %v6993_v57, %v7065_v24  ;;  %v3366_v44 = vmul.f32 %v7069_v13, %v7069_v13  ;;  %v3367_v19 = vmul.f32 %v7073_v59, %v7073_v59  ;;  %v3368_v37 = vmul.f32 %v7077_v29, %v7077_v29 }
 0x55c   : > { %v3369_v56 = vmul.f32 %v7081_v43, %v7081_v43  ;;  %v3370_v57 = vmul.f32 %v7085_v22, %v7085_v22  ;;  %v3371_v5 = vmul.f32 %v7089_v26, %v7089_v26  ;;  %v3372_v0 = vmul.f32 %v7093_v7, %v7093_v7 }
 0x55d   : > { %v3391_v12 = vsel %vm3276_vm7, %v3366_v44, 0.0  ;;  %v3392_v63 = vsel %vm3276_vm7, %v3367_v19, 0.0  ;;  %v3394_v6 = vsel %vm3276_vm7, %v3368_v37, 0.0  ;;  %v3373_v60 = vmul.f32 %v7097_v52, %v7097_v52 }
 0x55e   : > { %v3393_v32 = vadd.f32 %v3392_v63, %v3391_v12  ;;  %v3396_v15 = vsel %vm3276_vm7, %v3369_v56, 0.0  ;;  %v3398_v14 = vsel %vm3276_vm7, %v3370_v57, 0.0  ;;  %v3400_v31 = vsel %vm3276_vm7, %v3371_v5, 0.0 }
 0x55f   : > { %v3374_v54 = vmul.f32 %v7101_v28, %v7101_v28  ;;  %v3402_v35 = vsel %vm3276_vm7, %v3372_v0, 0.0  ;;  %v3375_v61 = vmul.f32 %v7105_v10, %v7105_v10  ;;  %v3404_v2 = vsel %vm3276_vm7, %v3373_v60, 0.0 }
 0x560   : > { %v3395_v1 = vadd.f32 %v3394_v6, %v3393_v32  ;;  %v3376_v33 = vmul.f32 %v7109_v30, %v7109_v30  ;;  %v3377_v21 = vmul.f32 %v7113_v51, %v7113_v51  ;;  %v3378_v62 = vmul.f32 %v7117_v27, %v7117_v27 }
 0x561   : > { %v3406_v3 = vsel %vm3276_vm7, %v3374_v54, 0.0  ;;  %v3408_v55 = vsel %vm3276_vm7, %v3375_v61, 0.0  ;;  %v3379_v18 = vmul.f32 %v7121_v40, %v7121_v40  ;;  %v3380_v45 = vmul.f32 %v7125_v38, %v7125_v38 }
 0x562   : > { %v3397_v4 = vadd.f32 %v3396_v15, %v3395_v1  ;;  %v3410_v11 = vsel %vm3276_vm7, %v3376_v33, 0.0  ;;  %v3412_v16 = vsel %vm3276_vm7, %v3377_v21, 0.0  ;;  %v3414_v44 = vsel %vm3276_vm7, %v3378_v62, 0.0 }
 0x563   : > { %v3381_v37 = vmul.f32 %v7129_v39, %v7129_v39  ;;  %v3416_v56 = vsel %vm3276_vm7, %v3379_v18, 0.0  ;;  %v3382_v63 = vmul.f32 %v7133_v50, %v7133_v50  ;;  %v3418_v32 = vsel %vm3276_vm7, %v3380_v45, 0.0 }
 0x564   : > { %v3399_v8 = vadd.f32 %v3398_v14, %v3397_v4  ;;  %v3383_v6 = vmul.f32 %v7137_v46, %v7137_v46  ;;  %v3384_v15 = vmul.f32 %v7141_v42, %v7141_v42  ;;  %v7208_v14 = vsub.f32 %v7039_v25, %v7065_v24 }
 0x565   : > { %v3420_v1 = vsel %vm3276_vm7, %v3381_v37, 0.0  ;;  %v3422_v4 = vsel %vm3276_vm7, %v3382_v63, 0.0  ;;  %v3386_v54 = vmul.f32 %v7149_v34, %v7149_v34  ;;  %v3364_v25 = vsub.f32 %v7059_v49, %v7065_v24 }
 0x566   : > { %v3401_v23 = vadd.f32 %v3400_v31, %v3399_v8  ;;  %v3385_v8 = vmul.f32 %v7145_v20, %v7145_v20  ;;  %v3424_v60 = vsel %vm3276_vm7, %v3383_v6, 0.0  ;;  %v3387_v61 = vmul.f32 %v7208_v14, %v7208_v14 }
 0x567   : > { %v3365_v33 = vsub.f32 %v7056_v48, %v7065_v24  ;;  %v3389_v21 = vmul.f32 %v3364_v25, %v3364_v25 }
 0x568   : > { %v3403_v47 = vadd.f32 %v3402_v35, %v3401_v23  ;;  %v7215_v23 = vsub.f32 %v7045_v9, %v7065_v24  ;;  %v3426_v35 = vsel %vm3276_vm7, %v3384_v15, 0.0 }
 0x569   : > { %v3390_v49 = vmul.f32 %v3365_v33, %v3365_v33 }
 0x56a   : > { %v3405_v41 = vadd.f32 %v3404_v2, %v3403_v47  ;;  %v3428_v2 = vsel %vm3276_vm7, %v3385_v8, 0.0  ;;  %v3388_v9 = vmul.f32 %v7215_v23, %v7215_v23 }
 0x56c   : > { %v3407_v53 = vadd.f32 %v3406_v3, %v3405_v41  ;;  %v3430_v3 = vsel %vm3276_vm7, %v3386_v54, 0.0  ;;  %v3434_v62 = vsel %vm3276_vm7, %v3388_v9, 0.0 }
 0x56e   : > { %v3409_v36 = vadd.f32 %v3408_v55, %v3407_v53  ;;  %v3432_v55 = vsel %vm3276_vm7, %v3387_v61, 0.0 }
 0x570   : > { %v3411_v17 = vadd.f32 %v3410_v11, %v3409_v36 }
 0x572   : > { %v3413_v58 = vadd.f32 %v3412_v16, %v3411_v17  ;;  %v3436_v17 = vsel %vm3276_vm7, %v3389_v21, 0.0  ;;  %v3438_v16 = vsel %vm3324_vm8, %v3390_v49, 0.0 }
 0x574   : > { %v3415_v19 = vadd.f32 %v3414_v44, %v3413_v58 }
 0x576   : > { %v3417_v12 = vadd.f32 %v3416_v56, %v3415_v19 }
 0x578   : > { %v3419_v57 = vadd.f32 %v3418_v32, %v3417_v12 }
 0x57a   : > { %v3421_v5 = vadd.f32 %v3420_v1, %v3419_v57 }
 0x57c   : > { %v3423_v0 = vadd.f32 %v3422_v4, %v3421_v5 }
 0x57e   : > { %v3425_v31 = vadd.f32 %v3424_v60, %v3423_v0  ;;  %v4874_v0 = vmov 0.0  }
 0x580   : > { %v3427_v47 = vadd.f32 %v3426_v35, %v3425_v31 }
 0x582   : > { %v3429_v41 = vadd.f32 %v3428_v2, %v3427_v47 }
 0x584   : > { %v3431_v53 = vadd.f32 %v3430_v3, %v3429_v41 }
 0x586   : > { %v3433_v36 = vadd.f32 %v3432_v55, %v3431_v53 }
 0x588   : > { %v3435_v11 = vadd.f32 %v3434_v62, %v3433_v36 }
 0x58a   : > { %v3437_v18 = vadd.f32 %v3436_v17, %v3435_v11 }
 0x58c   : > { %v3439_v48 = vadd.f32 %v3438_v16, %v3437_v18 }
 0x58e   : > { %v3440_v24 = vrot.slane %v3439_v48, 4 }
 0x590   : > { %v3441_v58 = vadd.f32 %v3440_v24, %v3439_v48 }
 0x592   : > { %v3442_v45 = vrot.slane %v3441_v58, 2 }
 0x594   : > { %v3443_v44 = vadd.f32 %v3442_v45, %v3441_v58 }
 0x596   : > { %v3444_v19 = vrot.slane %v3443_v44, 1 }
 0x598   : > { %v3445_v37 = vadd.f32 %v3444_v19, %v3443_v44 }
 0x59a   : > { %4634 = vrsqrt.f32 %v3445_v37  ;;  %vm3453_vm14 = vcmp.eq.f32.partialorder %v3445_v37, inf  ;;  %v3456_v5 = vand.u32 2147483648, %v3445_v37  ;;  %vm3455_vm12 = vcmp.eq.f32.partialorder %v3445_v37, 0.0 }
 0x5a0   : > { %v4635_v56 = vpop.eup %4634 }
 0x5a1   : > { %v3447_v12 = vmul.f32 %v4635_v56, %v3445_v37 }
 0x5a3   : > { %v3448_v63 = vmul.f32 %v4635_v56, %v3447_v12 }
 0x5a5   : > { %v3449_v32 = vmul.f32 0.5, %v3448_v63 }
 0x5a7   : > { %v3450_v57 = vsub.f32 1.5, %v3449_v32 }
 0x5a9   : > { %v3451_v6 = vmul.f32 %v4635_v56, %v3450_v57 }
 0x5ab   : > { %v3452_v1 = vmul.f32 %v3451_v6, %v3445_v37 }
 0x5ad   : > { %v3454_v15 = vsel %vm3453_vm14, %v3445_v37, %v3452_v1 }
 0x5ae   : > { %v3457_v4 = vsel %vm3455_vm12, %v3456_v5, %v3454_v15 }
 0x5af   : > { %vm3458_vm10 = vcmp.le.f32.partialorder %v3457_v4, 0.0001 }
 0x5b0   : > { %v4505_v8 = vsel %vm3458_vm10, 1.0, %v4874_v0 }
 0x5b1   : > { %v3461_v60 = vadd.f32 %v4505_v8, %v3457_v4  ;;  %v7236_v35 = vmul.f32 0.1, %v4505_v8 }
 0x5b3   : > { %4636 = vrcp.f32 %v3461_v60  ;;  %v3471_v61 = vand.u32 2147483647, %v3461_v60  ;;  %v3473_v2 = vand.u32 2147483648, %v3461_v60  ;;  %vm3467_vm13 = vweird.f32 %v3461_v60 }
 0x5b4   : > { %v3501_v9 = vadd.f32 %v7236_v35, %v3364_v25  ;;  %v7240_v3 = vadd.f32 %v7236_v35, %v3365_v33  ;;  %v3493_v21 = vadd.f32 %v7236_v35, %v7129_v39  ;;  %v3492_v55 = vadd.f32 %v7236_v35, %v7125_v38 }
 0x5b5   : > { %vm3472_vm5 = vcmp.eq.f32.partialorder %v3471_v61, 8.507059e+37  ;;  %v3474_v36 = vor.u32 1.1754944e-38, %v3473_v2  ;;  %v3491_v49 = vadd.f32 %v7236_v35, %v7121_v40  ;;  %v3490_v62 = vadd.f32 %v7236_v35, %v7117_v27 }
 0x5b6   : > { %v3489_v25 = vadd.f32 %v7236_v35, %v7113_v51  ;;  %v3488_v11 = vadd.f32 %v7236_v35, %v7109_v30  ;;  %v3487_v39 = vadd.f32 %v7236_v35, %v7105_v10  ;;  %v3486_v38 = vadd.f32 %v7236_v35, %v7101_v28 }
 0x5b7   : > { %v3485_v51 = vadd.f32 %v7236_v35, %v7097_v52  ;;  %v3484_v30 = vadd.f32 %v7236_v35, %v7093_v7  ;;  %v7271_v10 = vadd.f32 %v7236_v35, %v7089_v26  ;;  %v3482_v45 = vadd.f32 %v7236_v35, %v7085_v22 }
 0x5b8   : > { %v3481_v56 = vadd.f32 %v7236_v35, %v7081_v43  ;;  %v7327_v6 = vadd.f32 %v7236_v35, %v7077_v29 }
 0x5b9   : > { %v4637_v31 = vpop.eup %4636 }
 0x5ba   : > { %v3463_v54 = vmul.f32 %v4637_v31, %v3461_v60  ;;  %vm3468_vm1 = vweird.f32 %v4637_v31  ;;  %v7348_v60 = vadd.f32 %v7236_v35, %v7073_v59 }
 0x5bb   : > { %vm3469_vm11 = vmor %vm3467_vm13, %vm3468_vm1 }
 0x5bc   : > { %v3464_v47 = vsub.f32 1.0, %v3463_v54 }
 0x5be   : > { %v3465_v41 = vmul.f32 %v4637_v31, %v3464_v47 }
 0x5c0   : > { %v3466_v53 = vadd.f32 %v4637_v31, %v3465_v41  ;;  %v3478_v41 = vadd.f32 %v7236_v35, %v7069_v13 }
 0x5c2   : > { %v3470_v33 = vsel %vm3469_vm11, %v4637_v31, %v3466_v53 }
 0x5c3   : > { %v7263_v27 = vsel %vm3472_vm5, %v3474_v36, %v3470_v33 }
 0x5c4   : > { %v7274_v28 = vmul.f32 %v3501_v9, %v7263_v27  ;;  %v3518_v40 = vmul.f32 %v3493_v21, %v7263_v27  ;;  %v3517_v17 = vmul.f32 %v3492_v55, %v7263_v27  ;;  %v3516_v18 = vmul.f32 %v3491_v49, %v7263_v27 }
 0x5c5   : > { %v3515_v16 = vmul.f32 %v3490_v62, %v7263_v27  ;;  %v3514_v52 = vmul.f32 %v3489_v25, %v7263_v27  ;;  %v3513_v7 = vmul.f32 %v3488_v11, %v7263_v27  ;;  %v3512_v48 = vmul.f32 %v3487_v39, %v7263_v27 }
 0x5c6   : > { %3551 = vst.msk [vmem:[%s7261_s15 + $0xb8] sm:$0xff] %vm3276_vm7, %v7274_v28  ;;  %v7286_v26 = vand.u32 4294901760, %v3518_v40  ;;  %v7288_v24 = vand.u32 4294901760, %v3517_v17  ;;  %v7290_v58 = vand.u32 4294901760, %v3516_v18  ;;  %v3511_v57 = vmul.f32 %v3486_v38, %v7263_v27 }
 0x5c7   : > { %3543 = vst.msk [vmem:[%s7261_s15 + $0x78] sm:$0xff] %vm3276_vm7, %v3518_v40  ;;  %v7296_v44 = vand.u32 4294901760, %v3515_v16  ;;  %v7298_v19 = vand.u32 4294901760, %v3514_v52  ;;  %v7300_v37 = vand.u32 4294901760, %v3513_v7  ;;  %v7322_v32 = vand.u32 4294901760, %v3512_v48 }
 0x5c8   : > { %3564 = vmatpush.msra.mxu0 %v7286_v26  ;;  %3760 = vmatpush.msra.mxu3 %v7286_v26  ;;  %3542 = vst.msk [vmem:[%s7261_s15 + $0x70] sm:$0xff] %vm3276_vm7, %v3517_v17  ;;  %v7309_v22 = vsub.f32 %v3518_v40, %v7286_v26  ;;  %v7312_v12 = vsub.f32 %v3517_v17, %v7288_v24  ;;  %v7342_v29 = vand.u32 4294901760, %v3511_v57 }
 0x5c9   : > { %v7315_v63 = vsub.f32 %v3516_v18, %v7290_v58  ;;  %3541 = vst.msk [vmem:[%s7261_s15 + $0x68] sm:$0xff] %vm3276_vm7, %v3516_v18  ;;  %v7320_v43 = vsub.f32 %v3515_v16, %v7296_v44  ;;  %v7336_v15 = vsub.f32 %v3514_v52, %v7298_v19  ;;  %v3510_v8 = vmul.f32 %v3485_v51, %v7263_v27 }
 0x5ca   : > { %3566 = vmatpush.msra.mxu0 %v7288_v24  ;;  %3707 = vmatpush.msra.mxu2 %v7309_v22  ;;  %3540 = vst.msk [vmem:[%s7261_s15 + $0x60] sm:$0xff] %vm3276_vm7, %v3515_v16  ;;  %v3606_v1 = vand.u32 4294901760, %v7309_v22  ;;  %v8027_v5 = vand.u32 4294901760, %v7312_v12  ;;  %v7361_v47 = vsub.f32 %v3513_v7, %v7300_v37  ;;  %v7370_v61 = vsub.f32 %v3512_v48, %v7322_v32 }
 0x5cb   : > { %v8025_v4 = vand.u32 4294901760, %v7315_v63  ;;  %3762 = vmatpush.msra.mxu3 %v7288_v24  ;;  %3539 = vst.msk [vmem:[%s7261_s15 + $0x58] sm:$0xff] %vm3276_vm7, %v3514_v52  ;;  %v8024_v0 = vand.u32 4294901760, %v7320_v43  ;;  %v7372_v2 = vand.u32 4294901760, %v3510_v8  ;;  %v8023_v53 = vand.u32 4294901760, %v7336_v15 }
 0x5cc   : > { %3568 = vmatpush.msra.mxu0 %v7290_v58  ;;  %3710 = vmatpush.msra.mxu2 %v7312_v12  ;;  %v3607_v31 = vsub.f32 %v7309_v22, %v3606_v1  ;;  %3538 = vst.msk [vmem:[%s7261_s15 + $0x50] sm:$0xff] %vm3276_vm7, %v3513_v7  ;;  %v3613_v54 = vsub.f32 %v7312_v12, %v8027_v5  ;;  %v8020_v33 = vand.u32 4294901760, %v7361_v47  ;;  %v8019_v39 = vand.u32 4294901760, %v7370_v61 }
 0x5cd   : > { %3764 = vmatpush.msra.mxu3 %v7290_v58  ;;  %3537 = vst.msk [vmem:[%s7261_s15 + $0x48] sm:$0xff] %vm3276_vm7, %v3512_v48  ;;  %v3619_v59 = vsub.f32 %v7315_v63, %v8025_v4  ;;  %v7382_v21 = vsub.f32 %v3511_v57, %v7342_v29  ;;  %v3509_v55 = vmul.f32 %v3484_v30, %v7263_v27  ;;  %v8442_v22 = vand.u32 4294901760, %v7312_v12 }
 0x5ce   : > { %3570 = vmatpush.msra.mxu0 %v7296_v44  ;;  %3713 = vmatpush.msra.mxu2 %v7315_v63  ;;  %v3608_v9 = vand.u32 4294901760, %v3607_v31  ;;  %3536 = vst.msk [vmem:[%s7261_s15 + $0x40] sm:$0xff] %vm3276_vm7, %v3511_v57  ;;  %v3614_v36 = vand.u32 4294901760, %v3613_v54  ;;  %v3625_v13 = vsub.f32 %v7320_v43, %v8024_v0  ;;  %v7393_v49 = vadd.f32 %v7236_v35, %v7215_v23 }
 0x5cf   : > { %3766 = vmatpush.msra.mxu3 %v7296_v44  ;;  %3535 = vst.msk [vmem:[%s7261_s15 + $0x38] sm:$0xff] %vm3276_vm7, %v3510_v8  ;;  %v7397_v62 = vadd.f32 %v7236_v35, %v7208_v14  ;;  %v7402_v25 = vand.u32 4294901760, %v3509_v55  ;;  %v3508_v11 = vmul.f32 %v7271_v10, %v7263_v27  ;;  %v3507_v23 = vmul.f32 %v3482_v45, %v7263_v27 }
 0x5d0   : > { %3572 = vmatpush.msra.mxu0 %v7298_v19  ;;  %3609 = vmatpush.msra.mxu1 %v3608_v9  ;;  %3534 = vst.msk [vmem:[%s7261_s15 + $0x30] sm:$0xff] %vm3276_vm7, %v3509_v55  ;;  %v7411_v14 = vsub.f32 %v3510_v8, %v7372_v2  ;;  %v3506_v38 = vmul.f32 %v3481_v56, %v7263_v27  ;;  %v3620_v30 = vand.u32 4294901760, %v3619_v59  ;;  %v8017_v17 = vand.u32 4294901760, %v7382_v21 }
 0x5d1   : > { %3716 = vmatpush.msra.mxu2 %v7320_v43  ;;  %3768 = vmatpush.msra.mxu3 %v7298_v19  ;;  %v7417_v51 = vadd.f32 %v7236_v35, %v7149_v34  ;;  %v3631_v10 = vsub.f32 %v7336_v15, %v8023_v53  ;;  %3533 = vst.msk [vmem:[%s7261_s15 + $0x28] sm:$0xff] %vm3276_vm7, %v3508_v11  ;;  %v7425_v40 = vand.u32 4294901760, %v3508_v11  ;;  %v7435_v18 = vand.u32 4294901760, %v3507_v23 }
 0x5d2   : > { %3574 = vmatpush.msra.mxu0 %v7300_v37  ;;  %3615 = vmatpush.msra.mxu1 %v3614_v36  ;;  %v7431_v34 = vsub.f32 %v3509_v55, %v7402_v25  ;;  %3532 = vst.msk [vmem:[%s7261_s15 + $0x20] sm:$0xff] %vm3276_vm7, %v3507_v23  ;;  %v7439_v16 = vadd.f32 %v7236_v35, %v7145_v20  ;;  %v3626_v52 = vand.u32 4294901760, %v3625_v13  ;;  %v7455_v45 = vand.u32 4294901760, %v3506_v38 }
 0x5d3   : > { %3719 = vmatpush.msra.mxu2 %v7336_v15  ;;  %3770 = vmatpush.msra.mxu3 %v7300_v37  ;;  %v3637_v7 = vsub.f32 %v7361_v47, %v8020_v33  ;;  %v7446_v48 = vsub.f32 %v3508_v11, %v7425_v40  ;;  %3531 = vst.msk [vmem:[%s7261_s15 + $0x18] sm:$0xff] %vm3276_vm7, %v3506_v38  ;;  %v8016_v56 = vand.u32 4294901760, %v7411_v14  ;;  %v3632_v8 = vand.u32 4294901760, %v3631_v10 }
 0x5d4   : > { %3576 = vmatpush.msra.mxu0 %v7322_v32  ;;  %3621 = vmatpush.msra.mxu1 %v3620_v30  ;;  %v3643_v20 = vsub.f32 %v7370_v61, %v8019_v39  ;;  %v3505_v57 = vmul.f32 %v7327_v6, %v7263_v27  ;;  %v3649_v31 = vsub.f32 %v7382_v21, %v8017_v17  ;;  %v8015_v9 = vand.u32 4294901760, %v7431_v34 }
 0x5d5   : > { %3722 = vmatpush.msra.mxu2 %v7361_v47  ;;  %3772 = vmatpush.msra.mxu3 %v7322_v32  ;;  %v3504_v54 = vmul.f32 %v7348_v60, %v7263_v27  ;;  %v7467_v59 = vmul.f32 %v3478_v41, %v7263_v27  ;;  %v7472_v6 = vsub.f32 %v3507_v23, %v7435_v18  ;;  %v8014_v55 = vand.u32 4294901760, %v7446_v48 }
 0x5d6   : > { %3578 = vmatpush.msra.mxu0 %v7342_v29  ;;  %3627 = vmatpush.msra.mxu1 %v3626_v52  ;;  %3530 = vst.msk [vmem:[%s7261_s15 + $0x10] sm:$0xff] %vm3276_vm7, %v3505_v57  ;;  %v3527_v60 = vmul.f32 %v7240_v3, %v7263_v27  ;;  %v3638_v41 = vand.u32 4294901760, %v3637_v7  ;;  %v7481_v36 = vand.u32 4294901760, %v3505_v57  ;;  %v7487_v13 = vadd.f32 %v7236_v35, %v7141_v42 }
 0x5d7   : > { %3725 = vmatpush.msra.mxu2 %v7370_v61  ;;  %3774 = vmatpush.msra.mxu3 %v7342_v29  ;;  %3529 = vst.msk [vmem:[%s7261_s15 + $0x8] sm:$0xff] %vm3276_vm7, %v3504_v54  ;;  %v7491_v11 = vadd.f32 %v7236_v35, %v7137_v46  ;;  %v7494_v23 = vand.u32 4294901760, %v7274_v28  ;;  %v3655_v3 = vsub.f32 %v7411_v14, %v8016_v56  ;;  %v3644_v42 = vand.u32 4294901760, %v3643_v20 }
 0x5d8   : > { %3580 = vmatpush.msra.mxu0 %v7372_v2  ;;  %3633 = vmatpush.msra.mxu1 %v3632_v8  ;;  %v7502_v30 = vsub.f32 %v3506_v38, %v7455_v45  ;;  %3528 = vst.msk [vmem:[%s7261_s15] sm:$0xff] %vm3276_vm7, %v7467_v59  ;;  %v3561_v46 = vsel %vm3559_vm2, %v3527_v60, 0  ;;  %v7509_v10 = vand.u32 4294901760, %v3504_v54  ;;  %v3494_v7 = vadd.f32 %v7236_v35, %v7133_v50 }
 0x5d9   : > { %3728 = vmatpush.msra.mxu2 %v7382_v21  ;;  %3776 = vmatpush.msra.mxu3 %v7372_v2  ;;  %3552 = vst.msk [vmem:[%s7261_s15 + $0xc0] sm:$0xf] %vm3324_vm8, %v3527_v60  ;;  %v7513_v52 = vand.u32 4294901760, %v3561_v46  ;;  %v3650_v38 = vand.u32 4294901760, %v3649_v31  ;;  %v3661_v8 = vsub.f32 %v7431_v34, %v8015_v9  ;;  %v3667_v20 = vsub.f32 %v7446_v48, %v8014_v55 }
 0x5da   : > { %3582 = vmatpush.msra.mxu0 %v7402_v25  ;;  %3639 = vmatpush.msra.mxu1 %v3638_v41  ;;  %v8018_v60 = vand.u32 4294901760, %v7472_v6  ;;  %v7528_v50 = vsub.f32 %v3505_v57, %v7481_v36  ;;  %v7531_v35 = vand.u32 4294901760, %v7467_v59  ;;  %v3525_v41 = vmul.f32 %v7393_v49, %v7263_v27 }
 0x5db   : > { %3731 = vmatpush.msra.mxu2 %v7411_v14  ;;  %3778 = vmatpush.msra.mxu3 %v7402_v25  ;;  %v7534_v31 = vsub.f32 %v3561_v46, %v7513_v52  ;;  %v3656_v55 = vand.u32 4294901760, %v3655_v3  ;;  %v7543_v57 = vsub.f32 %v7274_v28, %v7494_v23  ;;  %v3524_v9 = vmul.f32 %v7397_v62, %v7263_v27 }
 0x5dc   : > { %3584 = vmatpush.msra.mxu0 %v7425_v40  ;;  %3645 = vmatpush.msra.mxu1 %v3644_v42  ;;  %8441 = vst [vmem:[#allocation48_spill] sm:$0xff] %v7531_v35  ;;  %v8021_v42 = vand.u32 4294901760, %v7502_v30  ;;  %v7549_v49 = vsub.f32 %v3504_v54, %v7509_v10  ;;  %v7554_v3 = vand.u32 4294901760, %v3525_v41  ;;  %v3523_v28 = vmul.f32 %v7417_v51, %v7263_v27 }
 0x5dd   : > { %3734 = vmatpush.msra.mxu2 %v7431_v34  ;;  %3780 = vmatpush.msra.mxu3 %v7425_v40  ;;  %v8022_v46 = vand.u32 4294901760, %v7534_v31  ;;  %3550 = vst.msk [vmem:[%s7261_s15 + $0xb0] sm:$0xff] %vm3276_vm7, %v3525_v41  ;;  %v3662_v62 = vand.u32 4294901760, %v3661_v8  ;;  %v3668_v56 = vand.u32 4294901760, %v3667_v20  ;;  %v3673_v54 = vsub.f32 %v7472_v6, %v8018_v60 }
 0x5de   : > { %3586 = vmatpush.msra.mxu0 %v7435_v18  ;;  %3651 = vmatpush.msra.mxu1 %v3650_v38  ;;  %3549 = vst.msk [vmem:[%s7261_s15 + $0xa8] sm:$0xff] %vm3276_vm7, %v3524_v9  ;;  %v7565_v38 = vand.u32 4294901760, %v3524_v9  ;;  %v7570_v51 = vsub.f32 %v7467_v59, %v7531_v35  ;;  %v8026_v17 = vand.u32 4294901760, %v7528_v50  ;;  %v7574_v8 = vsub.f32 %v3525_v41, %v7554_v3 }
 0x5df   : > { %3737 = vmatpush.msra.mxu2 %v7446_v48  ;;  %3782 = vmatpush.msra.mxu3 %v7435_v18  ;;  %3548 = vst.msk [vmem:[%s7261_s15 + $0xa0] sm:$0xff] %vm3276_vm7, %v3523_v28  ;;  %v7578_v20 = vand.u32 4294901760, %v3523_v28  ;;  %v8028_v59 = vand.u32 4294901760, %v7543_v57  ;;  %v3522_v41 = vmul.f32 %v7439_v16, %v7263_v27  ;;  %v3948_v39 = vsub.f32 %v7534_v31, %v8022_v46 }
 0x5e0   : > { %3588 = vmatpush.msra.mxu0 %v7455_v45  ;;  %3657 = vmatpush.msra.mxu1 %v3656_v55  ;;  %v3679_v55 = vsub.f32 %v7502_v30, %v8021_v42  ;;  %v7587_v60 = vsub.f32 %v3524_v9, %v7565_v38  ;;  %v8029_v33 = vand.u32 4294901760, %v7549_v49  ;;  %v3521_v9 = vmul.f32 %v7487_v13, %v7263_v27 }
 0x5e1   : > { %3740 = vmatpush.msra.mxu2 %v7472_v6  ;;  %3784 = vmatpush.msra.mxu3 %v7455_v45  ;;  %v7597_v42 = vsub.f32 %v3523_v28, %v7578_v20  ;;  %v8030_v16 = vand.u32 4294901760, %v7574_v8  ;;  %3547 = vst.msk [vmem:[%s7261_s15 + $0x98] sm:$0xff] %vm3276_vm7, %v3522_v41  ;;  %v3520_v46 = vmul.f32 %v7491_v11, %v7263_v27  ;;  %v3674_v13 = vand.u32 4294901760, %v3673_v54 }
 0x5e2   : > { %3590 = vmatpush.msra.mxu0 %v7481_v36  ;;  %3663 = vmatpush.msra.mxu1 %v3662_v62  ;;  %v7606_v62 = vand.u32 4294901760, %v3522_v41  ;;  %v3519_v28 = vmul.f32 %v3494_v7, %v7263_v27  ;;  %v3685_v53 = vsub.f32 %v7528_v50, %v8026_v17  ;;  %v8033_v0 = vand.u32 4294901760, %v7570_v51  ;;  %3546 = vst.msk [vmem:[%s7261_s15 + $0x90] sm:$0xff] %vm3276_vm7, %v3521_v9 }
 0x5e3   : > { %3743 = vmatpush.msra.mxu2 %v7502_v30  ;;  %3786 = vmatpush.msra.mxu3 %v7481_v36  ;;  %v7618_v4 = vand.u32 4294901760, %v3521_v9  ;;  %v3954_v27 = vsub.f32 %v7543_v57, %v8028_v59  ;;  %3545 = vst.msk [vmem:[%s7261_s15 + $0x88] sm:$0xff] %vm3276_vm7, %v3520_v46  ;;  %v7631_v7 = vand.u32 4294901760, %v3520_v46  ;;  %v3949_v54 = vand.u32 4294901760, %v3948_v39 }
 0x5e4   : > { %3592 = vmatpush.msra.mxu0 %v7509_v10  ;;  %3669 = vmatpush.msra.mxu1 %v3668_v56  ;;  %v8032_v56 = vand.u32 4294901760, %v7587_v60  ;;  %v7627_v11 = vsub.f32 %v3522_v41, %v7606_v62  ;;  %v3680_v17 = vand.u32 4294901760, %v3679_v55  ;;  %v3691_v5 = vsub.f32 %v7549_v49, %v8029_v33  ;;  %3544 = vst.msk [vmem:[%s7261_s15 + $0x80] sm:$0xff] %vm3276_vm7, %v3519_v28 }
 0x5e5   : > { %3746 = vmatpush.msra.mxu2 %v7528_v50  ;;  %3788 = vmatpush.msra.mxu3 %v7509_v10  ;;  %v3960_v41 = vsub.f32 %v7574_v8, %v8030_v16  ;;  %v7648_v39 = vand.u32 4294901760, %v3519_v28  ;;  %v3686_v55 = vand.u32 4294901760, %v3685_v53  ;;  %v3697_v33 = vsub.f32 %v7570_v51, %v8033_v0 }
 0x5e6   : > { %3594 = vmatpush.msra.mxu0 %v7531_v35  ;;  %3675 = vmatpush.msra.mxu1 %v3674_v13  ;;  %v7646_v13 = vsub.f32 %v3521_v9, %v7618_v4  ;;  %v3955_v16 = vand.u32 4294901760, %v3954_v27  ;;  %v3966_v9 = vsub.f32 %v7587_v60, %v8032_v56  ;;  %v3977_v59 = vand.u32 4294901760, %v7627_v11 }
 0x5e7   : > { %3749 = vmatpush.msra.mxu2 %v7549_v49  ;;  %3790 = vmatpush.msra.mxu3 %v7531_v35  ;;  %v7661_v35 = vsub.f32 %v3520_v46, %v7631_v7  ;;  %v3961_v53 = vand.u32 4294901760, %v3960_v41  ;;  %v7671_v56 = vsub.f32 %v3519_v28, %v7648_v39  ;;  %v3553_v46 = vld [vmem:[#allocation6] sm:$0xff]  ;;  %v8444_v0 = vand.u32 4294901760, %v7315_v63 }
 0x5e8   : > { %3801 = vmatpush.msrb.mxu0 %v3606_v1  ;;  %3681 = vmatpush.msra.mxu1 %v3680_v17  ;;  %v3692_v1 = vand.u32 4294901760, %v3691_v5  ;;  %v8443_v17 = vand.u32 4294901760, %v7597_v42  ;;  %v3967_v12 = vand.u32 4294901760, %v3966_v9  ;;  %v3698_v5 = vand.u32 4294901760, %v3697_v33  ;;  %v3554_v9 = vld [vmem:[#allocation6 + $0x8] sm:$0xff] }
 0x5e9   : > { %3950 = vmatpush.msrb.mxu3 %v3949_v54  ;;  %3752 = vmatpush.msra.mxu2 %v7570_v51  ;;  %v3983_v54 = vand.u32 4294901760, %v7646_v13  ;;  %v3989_v41 = vand.u32 4294901760, %v7661_v35  ;;  %v7683_v28 = vand.u32 4294901760, %v3553_v46  ;;  %v3995_v33 = vand.u32 4294901760, %v7671_v56 }
 0x5ea   : > { %3805 = vmatpush.msrb.mxu0 %v8442_v22  ;;  %3687 = vmatpush.msra.mxu1 %v3686_v55  ;;  %v3972_v27 = vsub.f32 %v7597_v42, %v8443_v17  ;;  %v8445_v55 = vand.u32 4294901760, %v7320_v43  ;;  %v8446_v22 = vand.u32 4294901760, %v7336_v15 }
 0x5eb   : > { %3912 = vmatpush.msrb.mxu2 %v7513_v52  ;;  %3956 = vmatpush.msrb.mxu3 %v3955_v16  ;;  %v3978_v16 = vsub.f32 %v7627_v11, %v3977_v59  ;;  %v3596_v17 = vsub.f32 %v3553_v46, %v7683_v28  ;;  %v3996_v15 = vsub.f32 %v7671_v56, %v3995_v33  ;;  %v8449_v46 = vand.u32 4294901760, %v7382_v21 }
 0x5ec   : > { %3809 = vmatpush.msrb.mxu0 %v8444_v0  ;;  %3693 = vmatpush.msra.mxu1 %v3692_v1  ;;  %v3973_v63 = vand.u32 4294901760, %v3972_v27  ;;  %v3984_v0 = vsub.f32 %v7646_v13, %v3983_v54  ;;  %v3990_v1 = vsub.f32 %v7661_v35, %v3989_v41  ;;  %v3557_v27 = vsel %vm3555_vm4, %v3554_v9, 0 }
 0x5ed   : > { %3914 = vmatpush.msrb.mxu2 %v7494_v23  ;;  %3962 = vmatpush.msrb.mxu3 %v3961_v53  ;;  %v3979_v43 = vand.u32 4294901760, %v3978_v16  ;;  %v8447_v53 = vand.u32 4294901760, %v7361_v47  ;;  %v7708_v47 = vand.u32 4294901760, %v3557_v27  ;;  %v3997_v16 = vand.u32 4294901760, %v3996_v15 }
 0x5ee   : > { %3813 = vmatpush.msrb.mxu0 %v8445_v55  ;;  %3699 = vmatpush.msra.mxu1 %v3698_v5  ;;  %v3597_v5 = vand.u32 4294901760, %v3596_v17  ;;  %v8451_v21 = vand.u32 4294901760, %v7431_v34 }
 0x5ef   : > { %3916 = vmatpush.msrb.mxu2 %v7554_v3  ;;  %3968 = vmatpush.msrb.mxu3 %v3967_v12  ;;  %v8448_v12 = vand.u32 4294901760, %v7370_v61  ;;  %v8450_v61 = vand.u32 4294901760, %v7411_v14  ;;  %v8453_v14 = vand.u32 4294901760, %v7472_v6 }
 0x5f0   : > { %3817 = vmatpush.msrb.mxu0 %v8446_v22  ;;  %3868 = vmatpush.msrb.mxu1 %v7286_v26  ;;  %v3985_v26 = vand.u32 4294901760, %v3984_v0  ;;  %v3598_v34 = vsub.f32 %v3596_v17, %v3597_v5 }
 0x5f1   : > { %3918 = vmatpush.msrb.mxu2 %v7565_v38  ;;  %3974 = vmatpush.msrb.mxu3 %v3973_v63 }
 0x5f2   : > { %3821 = vmatpush.msrb.mxu0 %v8447_v53  ;;  %3870 = vmatpush.msrb.mxu1 %v7288_v24  ;;  %v3991_v24 = vand.u32 4294901760, %v3990_v1  ;;  %v3599_v6 = vand.u32 4294901760, %v3598_v34 }
 0x5f3   : > { %3920 = vmatpush.msrb.mxu2 %v7578_v20  ;;  %3980 = vmatpush.msrb.mxu3 %v3979_v43 }
 0x5f4   : > { %3825 = vmatpush.msrb.mxu0 %v8448_v12  ;;  %3872 = vmatpush.msrb.mxu1 %v7290_v58  ;;  %v3930_v58 = vsub.f32 %v3557_v27, %v7708_v47 }
 0x5f5   : > { %3922 = vmatpush.msrb.mxu2 %v7606_v62  ;;  %3986 = vmatpush.msrb.mxu3 %v3985_v26 }
 0x5f6   : > { %3829 = vmatpush.msrb.mxu0 %v8449_v46  ;;  %3874 = vmatpush.msrb.mxu1 %v7296_v44  ;;  %v8452_v44 = vand.u32 4294901760, %v7446_v48 }
 0x5f7   : > { %3924 = vmatpush.msrb.mxu2 %v7618_v4  ;;  %3992 = vmatpush.msrb.mxu3 %v3991_v24 }
 0x5f8   : > { %3833 = vmatpush.msrb.mxu0 %v8450_v61  ;;  %3876 = vmatpush.msrb.mxu1 %v7298_v19  ;;  %v3931_v19 = vand.u32 4294901760, %v3930_v58 }
 0x5f9   : > { %3926 = vmatpush.msrb.mxu2 %v7631_v7  ;;  %3998 = vmatpush.msrb.mxu3 %v3997_v16 }
 0x5fa   : > { %3794 = vmatmul.f32.vlgmr.msra.gmra.mxu3 %v3597_v5  ;;  %3837 = vmatpush.msrb.mxu0 %v8451_v21  ;;  %v3932_v48 = vsub.f32 %v3930_v58, %v3931_v19 }
 0x5fb   : > { %4052 = vmatpush.msra.mxu3 %v7513_v52  ;;  %3878 = vmatpush.msrb.mxu1 %v7300_v37  ;;  %v8454_v37 = vand.u32 4294901760, %v7502_v30 }
 0x5fc   : > { %3928 = vmatpush.msrb.mxu2 %v7648_v39  ;;  %3841 = vmatpush.msrb.mxu0 %v8452_v44  ;;  %v3933_v30 = vand.u32 4294901760, %v3932_v48 }
 0x5fd   : > { %3755 = vmatmul.f32.vlgmr.msra.gmra.mxu2 %v3596_v17  ;;  %4054 = vmatpush.msra.mxu3 %v7494_v23 }
 0x5fe   : > { %4013 = vmatpush.msra.mxu2 %v7534_v31  ;;  %3880 = vmatpush.msrb.mxu1 %v7322_v32  ;;  %v8455_v32 = vand.u32 4294901760, %v7528_v50  ;;  %v4875_v50 = vmov 0  }
 0x5ff   : > { %4056 = vmatpush.msra.mxu3 %v7554_v3  ;;  %3845 = vmatpush.msrb.mxu0 %v8453_v14 }
 0x600   : > { %4016 = vmatpush.msra.mxu2 %v7543_v57  ;;  %3882 = vmatpush.msrb.mxu1 %v7342_v29  ;;  %v8456_v29 = vand.u32 4294901760, %v7549_v49 }
 0x601   : > { %4058 = vmatpush.msra.mxu3 %v7565_v38  ;;  %3849 = vmatpush.msrb.mxu0 %v8454_v37 }
 0x602   : > { %4019 = vmatpush.msra.mxu2 %v7574_v8  ;;  %3884 = vmatpush.msrb.mxu1 %v7372_v2  ;;  %v8457_v2 = vand.u32 4294901760, %v7570_v51 }
 0x603   : > { %4060 = vmatpush.msra.mxu3 %v7578_v20  ;;  %3853 = vmatpush.msrb.mxu0 %v8455_v32 }
 0x604   : > { %4022 = vmatpush.msra.mxu2 %v7587_v60  ;;  %3886 = vmatpush.msrb.mxu1 %v7402_v25  ;;  %v8458_v25 = vand.u32 4294901760, %v7534_v31  ;;  %v8462_v31 = vand.u32 4294901760, %v7587_v60 }
 0x605   : > { %4062 = vmatpush.msra.mxu3 %v7606_v62  ;;  %3857 = vmatpush.msrb.mxu0 %v8456_v29 }
 0x606   : > { %4025 = vmatpush.msra.mxu2 %v7597_v42  ;;  %3888 = vmatpush.msrb.mxu1 %v7425_v40  ;;  %v8459_v40 = vand.u32 4294901760, %v7543_v57  ;;  %v8464_v57 = vand.u32 4294901760, %v7597_v42 }
 0x607   : > { %3600 = vmatmul.f32.vlgmr.msra.gmra.mxu0 %v3599_v6  ;;  %4064 = vmatpush.msra.mxu3 %v7618_v4 }
 0x608   : > { %4028 = vmatpush.msra.mxu2 %v7627_v11  ;;  %3861 = vmatpush.msrb.mxu0 %v8457_v2 }
 0x609   : > { %3890 = vmatpush.msrb.mxu1 %v7435_v18  ;;  %3934 = vmatmul.f32.vlgmr.msrb.gmra.mxu2 %v3933_v30  ;;  %v8460_v18 = vand.u32 4294901760, %v7574_v8 }
 0x60a   : > { %3701 = vmatmul.f32.vlgmr.msra.gmra.mxu1 %v7683_v28  ;;  %4031 = vmatpush.msra.mxu2 %v7646_v13 }
 0x60b   : > { %4066 = vmatpush.msra.mxu3 %v7631_v7  ;;  %4086 = vmatpush.msra.mxu0 %v8458_v25 }
 0x60c   : > { %3892 = vmatpush.msrb.mxu1 %v7455_v45  ;;  %4000 = vmatmul.f32.vlgmr.msrb.gmra.mxu3 %v7708_v47  ;;  %v4155_v45 = vld [vmem:[%s8461_s4] sm:$0xff] }
 0x60d   : > { %4034 = vmatpush.msra.mxu2 %v7661_v35  ;;  %4068 = vmatpush.msra.mxu3 %v7648_v39 }
 0x60e   : > { %4090 = vmatpush.msra.mxu0 %v8459_v40  ;;  %3894 = vmatpush.msrb.mxu1 %v7481_v36  ;;  %v8463_v36 = vld [vmem:[#allocation48_spill] sm:$0xff] }
 0x60f   : > { %4037 = vmatpush.msra.mxu2 %v7671_v56  ;;  %3863 = vmatmul.f32.vlgmr.msrb.gmra.mxu0 %v7683_v28 }
 0x610   : > { %4094 = vmatpush.msra.mxu0 %v8460_v18  ;;  %3896 = vmatpush.msrb.mxu1 %v7509_v10 }
 0x611   : > { %4040 = vmatmul.f32.vlgmr.msra.gmra.mxu2 %v3930_v58  ;;  %4631 = vset.pattern.permute.xlu0 %v4875_v50 }
 0x612   : > { %4098 = vmatpush.msra.mxu0 %v8462_v31  ;;  %3898 = vmatpush.msrb.mxu1 %v8463_v36 }
 0x613   : > { %3900 = vmatmul.f32.vlgmr.msrb.gmra.mxu1 %v7683_v28  ;;  %4158 = vperm.xlu0 %4631, %v4155_v45  }
 0x614   : > { %4102 = vmatpush.msra.mxu0 %v8464_v57  ;;  %4132 = vmatpush.msra.mxu1 %v7513_v52 }
 0x615   : > { %4072 = vmatmul.f32.vlgmr.msra.gmra.mxu3 %v3931_v19 }
 0x616   : > { %4106 = vmatpush.msra.mxu0 %v3977_v59  ;;  %4134 = vmatpush.msra.mxu1 %v7494_v23 }
 0x618   : > { %4110 = vmatpush.msra.mxu0 %v3983_v54  ;;  %4136 = vmatpush.msra.mxu1 %v7554_v3 }
 0x61a   : > { %4114 = vmatpush.msra.mxu0 %v3989_v41  ;;  %4138 = vmatpush.msra.mxu1 %v7565_v38 }
 0x61c   : > { %4118 = vmatpush.msra.mxu0 %v3995_v33  ;;  %4140 = vmatpush.msra.mxu1 %v7578_v20 }
 0x61d   : > { %4120 = vmatmul.f32.vlgmr.msra.gmra.mxu0 %v7708_v47 }
 0x61e   : > { %4142 = vmatpush.msra.mxu1 %v7606_v62 }
 0x620   : > { %4144 = vmatpush.msra.mxu1 %v7618_v4 }
 0x622   : > { %4146 = vmatpush.msra.mxu1 %v7631_v7 }
 0x624   : > { %4148 = vmatpush.msra.mxu1 %v7648_v39 }
 0x625   : > { %4150 = vmatmul.f32.vlgmr.msra.gmra.mxu1 %v7708_v47 }
 0x67d   : > { %v3795_v52 = vpop.f32.mrf.mxu3 }
 0x680   : > { %v3756_v23 = vpop.f32.mrf.mxu2 }
 0x684   : > { %v3601_v10 = vpop.f32.mrf.mxu0 }
 0x685   : > { %v4159_v55 = vpop.permute.xlu0 %4158 }
 0x687   : > { %v3702_v60 = vpop.f32.mrf.mxu1 }
 0x688   : > { %v3703_v35 = vadd.f32 %v3702_v60, %v3601_v10 }
 0x68a   : > { %v3757_v42 = vadd.f32 %v3756_v23, %v3703_v35 }
 0x68c   : > { %v3796_v49 = vadd.f32 %v3795_v52, %v3757_v42  ;;  %v3864_v3 = vpop.f32.mrf.mxu0  ;;  %v3935_v38 = vpop.f32.mrf.mxu2 }
 0x68e   : > { %v3865_v51 = vadd.f32 %v3864_v3, %v3796_v49 }
 0x68f   : > { %v4001_v4 = vpop.f32.mrf.mxu3 }
 0x690   : > { %v3901_v8 = vpop.f32.mrf.mxu1 }
 0x691   : > { %v3902_v20 = vadd.f32 %v3901_v8, %v3865_v51 }
 0x693   : > { %v3936_v59 = vadd.f32 %v3935_v38, %v3902_v20 }
 0x694   : > { %v4041_v56 = vpop.f32.mrf.mxu2 }
 0x695   : > { %v4002_v62 = vadd.f32 %v4001_v4, %v3936_v59 }
 0x697   : > { %v4042_v11 = vadd.f32 %v4041_v56, %v4002_v62 }
 0x698   : > { %v4073_v7 = vpop.f32.mrf.mxu3 }
 0x699   : > { %v4074_v13 = vadd.f32 %v4073_v7, %v4042_v11 }
 0x69a   : > { %v4121_v39 = vpop.f32.mrf.mxu0 }
 0x69b   : > { %v4122_v54 = vadd.f32 %v4121_v39, %v4074_v13 }
 0x6a2   : > { %v4151_v41 = vpop.f32.mrf.mxu1 }
 0x6a3   : > { %v4152_v28 = vadd.f32 %v4151_v41, %v4122_v54 }
 0x6a5   : > { %v4161_v63 = vsub.f32 %v4152_v28, %v4159_v55  ;;  %4154 = vst.msk [vmem:[%s268_s7] sm:$0xff] %vm3276_vm7, %v4152_v28 }
 0x6a6   : > { %4743 = shalt.err (!%p4740_p12)
}
 0x6a7   : > { %4520 = dma.vmem_to_hbm [thread:$0]  (%p4972_p3), %s4191_s10, 128, %s4193_s11, %s4170_s22   ;;  %v4162_v0 = vmax.f32 %v4161_v63, 0.0 }
 0x6a8   : > { %s4175_s15 = scalar_lea.sflag [#allocation10], %s8468_s21  ;;  %s4758_s16 = sshra.s32 %s4207_s2, 4  ;;  %s4759_s16 = int_to_ptr.hbm [resolvable:$true] %s4758_s16 }
 0x6a9   : > { %4163 = vst.msk [vmem:[%s275_s27] sm:$0xff] %vm3276_vm7, %v4162_v0  ;;  %s4760_s26 = scalar_lea.hbm %s4759_s16, 8  ;;  %s4764_s1 = scalar_lea.hbm %s8469_s29, 16 }
 0x6aa   : > { %p4761_p13 = scmp.ne.s32.totalorder %s4759_s16, %s4760_s26  ;;  %p4765_p7 = scmp.lt.s32.totalorder %s4759_s16, %s8469_s29 }
 0x6ab   : > { %p4766_p1 = scmp.lt.s32.totalorder %s4764_s1, %s4760_s26 }
 0x6ac   : > { %p4762_p0 = pnand %p4761_p13, %p4972_p3 }
 0x6ad   : > { %p4767_p4 = por %p4766_p1, %p4765_p7 }
 0x6ae   : > { %p4763_p5 = pneg %p4762_p0 }
 0x6b0   : > { %p4768_p8 = pnand %p4767_p4, %p4763_p5 }
 0x6b2   : > { %4771 = shalt.err (!%p4768_p8)
}
 0x6b3   : > { %4521 = dma.vmem_to_hbm [thread:$0]  (%p4972_p3), %s4205_s6, 128, %s4207_s2, %s4175_s15  }
 0x6b4 PF: > { %s8471_s18 = sld [smem:[#allocation15_spill]] }
 0x6b5   : > { %s8473_s21 = sld [smem:[#allocation18_spill]] }
 0x6ba   : > { %s4226_s7 = sand.u32 1, %s8471_s18  }
 0x6bb   : > { %p8474_p9 = scmp.ge.s32.totalorder %s8473_s21, 2  ;;  %s4227_s10 = scalar_lea.sflag [#allocation5], %s4226_s7 }
 0x6bd   : > { %p4533_p10 = pnand %p8474_p9, %p4941_p6 }
 0x6bf   : > { %p4534_p2 = pneg %p4533_p10 }
 0x6c1   : > { %4797 = dma.done.wait (%p4534_p2), %s4227_s10, 128  }
 0x6c2   : > { %4799 = vsyncadd (%p4534_p2), %s4227_s10, 4294967168  ;;  %s4237_s11 = scalar_lea.sflag [#allocation10], %s4226_s7 }
 0x6c3   : > { %4801 = dma.done.wait (%p4534_p2), %s4237_s11, 128  }
 0x6c4   : > { %4803 = vsyncadd (%p4534_p2), %s4237_s11, 4294967168  ;;  %s8475_s21 = sld [smem:[#allocation21_spill]] }
 0x6c5   : > { %s8476_s18 = sld [smem:[#allocation16_spill]] }
 0x6c6   : > { %s8477_s19 = sld [smem:[#allocation17_spill]] }
 0x6c7   : > { %s8478_s20 = sld [smem:[#allocation22_spill]] }
 0x6ca   : > { %p23_p3 = scmp.ge.s32.totalorder %s8475_s21, 4  }
 0x6cc   :  { %25 = sbr.rel (!%p23_p3) target bundleno = 15 (0xf), region = 308 }
 0x6d1   :  { %4243 = vsyncpa [#allocation4], 1 }
 0x6d2   :  { %4245 = vsyncpa [#allocation4 + $0x1], 1 }
 0x6d3   :  { %4246 = vsyncpa [#allocation7], 1 }
 0x6d4   :  { %4247 = vsyncpa [#allocation5], 1 }
 0x6d5   :  { %4249 = vsyncpa [#allocation5 + $0x1], 1 }
 0x6d6   :  { %4250 = vsyncpa [#allocation10], 1 }
 0x6d7   :  { %4252 = vsyncpa [#allocation10 + $0x1], 1 }

</bundles_post_ra>
